<compile_context>
chip_gen: v5e
topology: v5e:2x2
jax: 0.10.0
libtpu: 0.0.40
codegen_flags: <defaults>
</compile_context>

<pallas_src>
import jax
import jax.numpy as jnp
from jax import lax
from jax.experimental import pallas as pl
from jax.experimental.pallas import tpu as pltpu


def _round_up(n, m):
    return ((n + m - 1) // m) * m


# ----------------------------- Pallas kernel -------------------------------


def make_fused_lstm_kernel(num_layers, seq_len, hp):
    """Fused multi-layer LSTM + linear-head kernel.

    Ref order (all whole-array VMEM-resident):
      inputs:  x (T, V),
               [w_ih_t (D_l, 4*HP), w_hh_t (HP, 4*HP), b (1, 4*HP)] * L,
               h0 (L, HP), c0 (L, HP), lin_w_t (HP, VP), lin_b (1, VP)
      outputs: out (T, VP), hT (L, HP), cT (L, HP)

    Gate column order is [i, f, o, g]; each gate block is HP lanes wide.
    """
    L, T, HP = num_layers, seq_len, hp

    def kernel(*refs):
        x_ref = refs[0]
        layer_refs = refs[1:1 + 3 * L]
        h0_ref, c0_ref, lin_w_t_ref, lin_b_ref = refs[1 + 3 * L:5 + 3 * L]
        out_ref, hT_ref, cT_ref = refs[5 + 3 * L:]

        w_ih = [layer_refs[3 * l][...] for l in range(L)]
        w_hh = [layer_refs[3 * l + 1][...] for l in range(L)]
        bias = [layer_refs[3 * l + 2][...] for l in range(L)]

        # Layer 0: hoisted full-sequence input projection (+bias) — one
        # (T, V) x (V, 4HP) MXU matmul off the recurrent critical path.
        xw0 = jnp.dot(x_ref[...], w_ih[0],
                      preferred_element_type=jnp.float32) + bias[0]  # (T,4HP)

        h_state = [h0_ref[l:l + 1, :] for l in range(L)]   # each (1, HP)
        c_state = [c0_ref[l:l + 1, :] for l in range(L)]
        h_rows = [[None] * T for _ in range(L)]

        # Fully unrolled recurrence (T static & small).  Layer l step t
        # depends only on (l, t-1) and (l-1, t): wavefront-schedulable DAG.
        # TODO(synk): for T >~ 64 switch to lax.fori_loop(..., unroll=4..8)
        # carrying (h, c) to bound instruction footprint / vreg live ranges.
        # TODO(synk): hold W_hh in MXU staging registers across the time loop
        # (pltpu.matmul_push_rhs / matmul_acc_lhs / matmul_pop) to drop the
        # per-step RHS push from the serial chain.
        for t in range(T):
            for l in range(L):
                h, c = h_state[l], c_state[l]
                if l == 0:
                    gates = xw0[t:t + 1, :] + jnp.dot(
                        h, w_hh[0], preferred_element_type=jnp.float32)
                else:
                    # Per-step input projection from the h_t value produced
                    # by layer l-1 (no full-sequence dependency).
                    gates = (jnp.dot(h_rows[l - 1][t], w_ih[l],
                                     preferred_element_type=jnp.float32)
                             + jnp.dot(h, w_hh[l],
                                       preferred_element_type=jnp.float32)
                             + bias[l])
                # Gate order [i, f, o, g]: sigmoid over 3*HP lanes only,
                # tanh over the last HP lanes only; 128-lane-aligned slices.
                sig = jax.nn.sigmoid(gates[:, :3 * HP])
                g_g = jnp.tanh(gates[:, 3 * HP:])
                i_g = sig[:, 0 * HP:1 * HP]
                f_g = sig[:, 1 * HP:2 * HP]
                o_g = sig[:, 2 * HP:3 * HP]
                c = f_g * c + i_g * g_g
                h = o_g * jnp.tanh(c)
                h_rows[l][t] = h
                h_state[l], c_state[l] = h, c

        # Batched writes (no per-step masked partial stores).
        hT_ref[...] = jnp.concatenate(h_state, axis=0)     # (L, HP)
        cT_ref[...] = jnp.concatenate(c_state, axis=0)     # (L, HP)
        seq_out = jnp.concatenate(h_rows[L - 1], axis=0)   # (T, HP)

        # Linear head: lane-dense (VP multiple of 128) output block.
        # TODO(synk): cast seq_out / lin_w_t / layer-0 w_ih_t to bf16 at real
        # model sizes (kept f32 here to match the f32 reference bit-closely).
        out_ref[...] = (jnp.dot(seq_out, lin_w_t_ref[...],
                                preferred_element_type=jnp.float32)
                        + lin_b_ref[...])

    return kernel


# ------------------------------ JAX wrapper --------------------------------

_VMEM_SPEC = pl.BlockSpec(memory_space=pltpu.MemorySpace.VMEM)


def _fused_forward(x_2d, layer_params, h0, c0, lin_w_t, lin_b):
    """One pallas_call for the whole stacked LSTM + head (padded shapes)."""
    num_layers = len(layer_params)
    T = x_2d.shape[0]
    HP = h0.shape[1]
    VP = lin_b.shape[1]

    flat_weights = []
    for (w_ih_t, w_hh_t, b) in layer_params:
        flat_weights += [w_ih_t, w_hh_t, b]

    n_in = 1 + 3 * num_layers + 4
    kernel = make_fused_lstm_kernel(num_layers, T, HP)

    out_shapes = (
        jax.ShapeDtypeStruct((T, VP), jnp.float32),           # out (padded V)
        jax.ShapeDtypeStruct((num_layers, HP), jnp.float32),  # h_T (stacked)
        jax.ShapeDtypeStruct((num_layers, HP), jnp.float32),  # c_T (stacked)
    )
    return pl.pallas_call(
        kernel,
        out_shape=out_shapes,
        in_specs=[_VMEM_SPEC] * n_in,
        out_specs=(_VMEM_SPEC, _VMEM_SPEC, _VMEM_SPEC),
        # TODO(synk): at real vocab sizes, stream lin_w_t / layer-0 w_ih_t
        # with a grid over 128-multiple vocab tiles marked "parallel" and set
        # pltpu.CompilerParams(vmem_limit_bytes=...) against v7x's 64 MiB.
    )(x_2d, *flat_weights, h0, c0, lin_w_t, lin_b)


@jax.jit
def my_lstm_forward(inputs, kparams, h_prev, c_prev):
    """Equivalent of MyLSTM.forward.

    inputs:  (T, 1, vocab_size) float32
    h_prev:  (num_layers, 1, hidden_size)
    c_prev:  (num_layers, 1, hidden_size)
    Returns (out (T, 1, vocab_size), h_prev_new, c_prev_new).
    """
    T, _, V = inputs.shape
    L, _, H = h_prev.shape
    HP = kparams["lstm"][0][1].shape[0]     # w_hh_t is (HP, 4*HP)

    x = inputs[:, 0, :]                                    # (T, V)
    h0 = jnp.pad(h_prev[:, 0, :], ((0, 0), (0, HP - H)))   # (L, HP)
    c0 = jnp.pad(c_prev[:, 0, :], ((0, 0), (0, HP - H)))
    out_p, hT, cT = _fused_forward(x, kparams["lstm"], h0, c0,
                                   kparams["lin_w_t"], kparams["lin_b"])
    return (out_p[:, :V][:, None, :],
            hT[:, :H][:, None, :],
            cT[:, :H][:, None, :])


# ----------------------- deterministic param init --------------------------


def init_params(key, vocab_size, hidden_size, num_layers):
    """Raw torch-style params: U(-1/sqrt(H), 1/sqrt(H)), gate order [i,f,g,o]."""
    bound = 1.0 / float(hidden_size) ** 0.5
    layers = []
    for l in range(num_layers):
        d_in = vocab_size if l == 0 else hidden_size
        key, k1, k2, k3, k4 = jax.random.split(key, 5)
        w_ih = jax.random.uniform(k1, (4 * hidden_size, d_in),
                                  jnp.float32, -bound, bound)
        w_hh = jax.random.uniform(k2, (4 * hidden_size, hidden_size),
                                  jnp.float32, -bound, bound)
        b_ih = jax.random.uniform(k3, (4 * hidden_size,),
                                  jnp.float32, -bound, bound)
        b_hh = jax.random.uniform(k4, (4 * hidden_size,),
                                  jnp.float32, -bound, bound)
        layers.append((w_ih, w_hh, b_ih, b_hh))
    key, k5, k6 = jax.random.split(key, 3)
    lin_w = jax.random.uniform(k5, (vocab_size, hidden_size),
                               jnp.float32, -bound, bound)
    lin_b = jax.random.uniform(k6, (vocab_size,), jnp.float32, -bound, bound)
    return {"lstm": layers, "lin_w": lin_w, "lin_b": lin_b}


def _reorder_pad_gates(w, h, hp):
    """(4H, ...) torch gate order [i,f,g,o] -> (4*HP, ...) in order [i,f,o,g],
    each gate block zero-padded from H to HP along the gate axis."""
    i, f, g, o = (w[k * h:(k + 1) * h] for k in range(4))
    z = jnp.zeros((hp - h,) + w.shape[1:], w.dtype)
    return jnp.concatenate([i, z, f, z, o, z, g, z], axis=0)


def prepare_kernel_params(raw, hidden_size, vocab_size, hp, vp):
    """Reorder gates to [i,f,o,g], lane-pad H->HP / V->VP, transpose, fuse b."""
    H, V, HP, VP = hidden_size, vocab_size, hp, vp
    layers = []
    for l, (w_ih, w_hh, b_ih, b_hh) in enumerate(raw["lstm"]):
        w_ih_r = _reorder_pad_gates(w_ih, H, HP)                 # (4HP, d_in)
        if l > 0:                                                # pad hidden input dim
            w_ih_r = jnp.pad(w_ih_r, ((0, 0), (0, HP - H)))
        w_hh_r = jnp.pad(_reorder_pad_gates(w_hh, H, HP),
                         ((0, 0), (0, HP - H)))                  # (4HP, HP)
        b_r = _reorder_pad_gates(b_ih + b_hh, H, HP)             # (4HP,)
        layers.append((w_ih_r.T, w_hh_r.T, b_r[None, :]))
    lin_w_t = jnp.zeros((HP, VP), jnp.float32).at[:H, :V].set(raw["lin_w"].T)
    lin_b = jnp.zeros((1, VP), jnp.float32).at[0, :V].set(raw["lin_b"])
    return {"lstm": layers, "lin_w_t": lin_w_t, "lin_b": lin_b}


# -------------------------- pure-JAX reference -----------------------------


def reference_forward(inputs, raw, h_prev, c_prev):
    seq = inputs[:, 0, :]
    L, _, H = h_prev.shape
    for l in range(L):
        w_ih, w_hh, b_ih, b_hh = raw["lstm"][l]
        b = (b_ih + b_hh)[None, :]

        def step(carry, x_t, w_ih=w_ih, w_hh=w_hh, b=b):
            h, c = carry
            gates = x_t[None, :] @ w_ih.T + h @ w_hh.T + b
            i = jax.nn.sigmoid(gates[:, 0 * H:1 * H])
            f = jax.nn.sigmoid(gates[:, 1 * H:2 * H])
            g = jnp.tanh(gates[:, 2 * H:3 * H])
            o = jax.nn.sigmoid(gates[:, 3 * H:4 * H])
            c_new = f * c + i * g
            h_new = o * jnp.tanh(c_new)
            return (h_new, c_new), h_new[0]

        (_, _), seq = lax.scan(step, (h_prev[l], c_prev[l]), seq)
    out = seq @ raw["lin_w"].T + raw["lin_b"][None, :]
    return out[:, None, :]


# --------------------------------- main -------------------------------------

if __name__ == "__main__":
    vocab_size = 32
    hidden_size = 32
    num_layers = 2
    seq_length = 8

    HP = _round_up(hidden_size, 128)   # lane-aligned hidden
    VP = _round_up(vocab_size, 128)    # lane-dense head output

    key = jax.random.PRNGKey(0)
    key, pkey, xkey = jax.random.split(key, 3)

    raw_params = init_params(pkey, vocab_size, hidden_size, num_layers)
    kparams = prepare_kernel_params(raw_params, hidden_size, vocab_size, HP, VP)

    # One-hot inputs of shape (seq_length, 1, vocab_size), like the module.
    idx = jax.random.randint(xkey, (seq_length,), 0, vocab_size)
    inputs = jax.nn.one_hot(idx, vocab_size, dtype=jnp.float32)[:, None, :]

    # reset_states(): zero initial h/c.
    h_prev = jnp.zeros((num_layers, 1, hidden_size), jnp.float32)
    c_prev = jnp.zeros((num_layers, 1, hidden_size), jnp.float32)

    out, h_new, c_new = my_lstm_forward(inputs, kparams, h_prev, c_prev)
    out = jax.block_until_ready(out)
    jax.block_until_ready(h_new)
    jax.block_until_ready(c_new)

    assert out.shape == (seq_length, 1, vocab_size)
    assert h_new.shape == (num_layers, 1, hidden_size)
    assert c_new.shape == (num_layers, 1, hidden_size)

    ref = reference_forward(inputs, raw_params, h_prev, c_prev)
    if not jnp.allclose(out, ref, atol=1e-5, rtol=1e-5):
        raise AssertionError("Pallas LSTM output mismatch vs JAX reference")

    print("KERNEL_OK")
</pallas_src>

<mosaic_0001>
module attributes {stable_mosaic.version = 11 : i64} {
  func.func @kernel(%arg0: memref<8x32xf32, #tpu.memory_space<vmem>>, %arg1: memref<32x512xf32, #tpu.memory_space<vmem>>, %arg2: memref<128x512xf32, #tpu.memory_space<vmem>>, %arg3: memref<1x512xf32, #tpu.memory_space<vmem>>, %arg4: memref<128x512xf32, #tpu.memory_space<vmem>>, %arg5: memref<128x512xf32, #tpu.memory_space<vmem>>, %arg6: memref<1x512xf32, #tpu.memory_space<vmem>>, %arg7: memref<2x128xf32, #tpu.memory_space<vmem>>, %arg8: memref<2x128xf32, #tpu.memory_space<vmem>>, %arg9: memref<128x128xf32, #tpu.memory_space<vmem>>, %arg10: memref<1x128xf32, #tpu.memory_space<vmem>>, %arg11: memref<8x128xf32, #tpu.memory_space<vmem>>, %arg12: memref<2x128xf32, #tpu.memory_space<vmem>>, %arg13: memref<2x128xf32, #tpu.memory_space<vmem>>) attributes {dimension_semantics = [], scalar_prefetch = 0 : i64, scratch_operands = 0 : i64, tpu.core_type = #tpu.core_type<tc>} {
    %c0 = arith.constant 0 : index
    %c0_0 = arith.constant 0 : index
    %0 = vector.load %arg1[%c0, %c0_0] : memref<32x512xf32, #tpu.memory_space<vmem>>, vector<32x512xf32>
    %c0_1 = arith.constant 0 : index
    %c0_2 = arith.constant 0 : index
    %1 = vector.load %arg4[%c0_1, %c0_2] : memref<128x512xf32, #tpu.memory_space<vmem>>, vector<128x512xf32>
    %c0_3 = arith.constant 0 : index
    %c0_4 = arith.constant 0 : index
    %2 = vector.load %arg2[%c0_3, %c0_4] : memref<128x512xf32, #tpu.memory_space<vmem>>, vector<128x512xf32>
    %c0_5 = arith.constant 0 : index
    %c0_6 = arith.constant 0 : index
    %3 = vector.load %arg5[%c0_5, %c0_6] : memref<128x512xf32, #tpu.memory_space<vmem>>, vector<128x512xf32>
    %c0_7 = arith.constant 0 : index
    %c0_8 = arith.constant 0 : index
    %4 = vector.load %arg3[%c0_7, %c0_8] : memref<1x512xf32, #tpu.memory_space<vmem>>, vector<1x512xf32>
    %c0_9 = arith.constant 0 : index
    %c0_10 = arith.constant 0 : index
    %5 = vector.load %arg6[%c0_9, %c0_10] : memref<1x512xf32, #tpu.memory_space<vmem>>, vector<1x512xf32>
    %c0_11 = arith.constant 0 : index
    %c0_12 = arith.constant 0 : index
    %6 = vector.load %arg0[%c0_11, %c0_12] : memref<8x32xf32, #tpu.memory_space<vmem>>, vector<8x32xf32>
    %cst = arith.constant dense<0.000000e+00> : vector<8x512xf32>
    %7 = tpu.matmul %6, %0, %cst {dimension_numbers = #tpu.dot_dimension_numbers<[1], [0], [0], [1], [0, 0, 1, 1], [], []>} : vector<8x32xf32>, vector<32x512xf32>, vector<8x512xf32> -> vector<8x512xf32>
    %8 = vector.broadcast %4 : vector<1x512xf32> to vector<8x512xf32>
    %9 = arith.addf %7, %8 : vector<8x512xf32>
    %c0_13 = arith.constant 0 : index
    %c0_14 = arith.constant 0 : index
    %10 = vector.load %arg7[%c0_13, %c0_14] : memref<2x128xf32, #tpu.memory_space<vmem>>, vector<1x128xf32>
    %c1 = arith.constant 1 : index
    %c0_15 = arith.constant 0 : index
    %11 = vector.load %arg7[%c1, %c0_15] : memref<2x128xf32, #tpu.memory_space<vmem>>, vector<1x128xf32>
    %c0_16 = arith.constant 0 : index
    %c0_17 = arith.constant 0 : index
    %12 = vector.load %arg8[%c0_16, %c0_17] : memref<2x128xf32, #tpu.memory_space<vmem>>, vector<1x128xf32>
    %c1_18 = arith.constant 1 : index
    %c0_19 = arith.constant 0 : index
    %13 = vector.load %arg8[%c1_18, %c0_19] : memref<2x128xf32, #tpu.memory_space<vmem>>, vector<1x128xf32>
    %14 = vector.extract_strided_slice %9 {offsets = [0, 0], sizes = [1, 512], strides = [1, 1]} : vector<8x512xf32> to vector<1x512xf32>
    %cst_20 = arith.constant dense<0.000000e+00> : vector<1x512xf32>
    %15 = tpu.matmul %10, %2, %cst_20 {dimension_numbers = #tpu.dot_dimension_numbers<[1], [0], [0], [1], [0, 0, 1, 1], [], []>} : vector<1x128xf32>, vector<128x512xf32>, vector<1x512xf32> -> vector<1x512xf32>
    %16 = arith.addf %14, %15 : vector<1x512xf32>
    %17 = vector.extract_strided_slice %16 {offsets = [0, 0], sizes = [1, 384], strides = [1, 1]} : vector<1x512xf32> to vector<1x384xf32>
    %18 = arith.negf %17 : vector<1x384xf32>
    %19 = math.exp %18 : vector<1x384xf32>
    %cst_21 = arith.constant 1.000000e+00 : f32
    %20 = vector.broadcast %cst_21 : f32 to vector<1x384xf32>
    %21 = arith.addf %20, %19 : vector<1x384xf32>
    %22 = arith.divf %20, %21 : vector<1x384xf32>
    %23 = vector.extract_strided_slice %16 {offsets = [0, 384], sizes = [1, 128], strides = [1, 1]} : vector<1x512xf32> to vector<1x128xf32>
    %24 = math.tanh %23 : vector<1x128xf32>
    %25 = vector.extract_strided_slice %22 {offsets = [0, 0], sizes = [1, 128], strides = [1, 1]} : vector<1x384xf32> to vector<1x128xf32>
    %26 = vector.extract_strided_slice %22 {offsets = [0, 128], sizes = [1, 128], strides = [1, 1]} : vector<1x384xf32> to vector<1x128xf32>
    %27 = vector.extract_strided_slice %22 {offsets = [0, 256], sizes = [1, 128], strides = [1, 1]} : vector<1x384xf32> to vector<1x128xf32>
    %28 = arith.mulf %26, %12 : vector<1x128xf32>
    %29 = arith.mulf %25, %24 : vector<1x128xf32>
    %30 = arith.addf %28, %29 : vector<1x128xf32>
    %31 = math.tanh %30 : vector<1x128xf32>
    %32 = arith.mulf %27, %31 : vector<1x128xf32>
    %cst_22 = arith.constant dense<0.000000e+00> : vector<1x512xf32>
    %33 = tpu.matmul %32, %1, %cst_22 {dimension_numbers = #tpu.dot_dimension_numbers<[1], [0], [0], [1], [0, 0, 1, 1], [], []>} : vector<1x128xf32>, vector<128x512xf32>, vector<1x512xf32> -> vector<1x512xf32>
    %cst_23 = arith.constant dense<0.000000e+00> : vector<1x512xf32>
    %34 = tpu.matmul %11, %3, %cst_23 {dimension_numbers = #tpu.dot_dimension_numbers<[1], [0], [0], [1], [0, 0, 1, 1], [], []>} : vector<1x128xf32>, vector<128x512xf32>, vector<1x512xf32> -> vector<1x512xf32>
    %35 = arith.addf %33, %34 : vector<1x512xf32>
    %36 = arith.addf %35, %5 : vector<1x512xf32>
    %37 = vector.extract_strided_slice %36 {offsets = [0, 0], sizes = [1, 384], strides = [1, 1]} : vector<1x512xf32> to vector<1x384xf32>
    %38 = arith.negf %37 : vector<1x384xf32>
    %39 = math.exp %38 : vector<1x384xf32>
    %cst_24 = arith.constant 1.000000e+00 : f32
    %40 = vector.broadcast %cst_24 : f32 to vector<1x384xf32>
    %41 = arith.addf %40, %39 : vector<1x384xf32>
    %42 = arith.divf %40, %41 : vector<1x384xf32>
    %43 = vector.extract_strided_slice %36 {offsets = [0, 384], sizes = [1, 128], strides = [1, 1]} : vector<1x512xf32> to vector<1x128xf32>
    %44 = math.tanh %43 : vector<1x128xf32>
    %45 = vector.extract_strided_slice %42 {offsets = [0, 0], sizes = [1, 128], strides = [1, 1]} : vector<1x384xf32> to vector<1x128xf32>
    %46 = vector.extract_strided_slice %42 {offsets = [0, 128], sizes = [1, 128], strides = [1, 1]} : vector<1x384xf32> to vector<1x128xf32>
    %47 = vector.extract_strided_slice %42 {offsets = [0, 256], sizes = [1, 128], strides = [1, 1]} : vector<1x384xf32> to vector<1x128xf32>
    %48 = arith.mulf %46, %13 : vector<1x128xf32>
    %49 = arith.mulf %45, %44 : vector<1x128xf32>
    %50 = arith.addf %48, %49 : vector<1x128xf32>
    %51 = math.tanh %50 : vector<1x128xf32>
    %52 = arith.mulf %47, %51 : vector<1x128xf32>
    %53 = vector.extract_strided_slice %9 {offsets = [1, 0], sizes = [1, 512], strides = [1, 1]} : vector<8x512xf32> to vector<1x512xf32>
    %cst_25 = arith.constant dense<0.000000e+00> : vector<1x512xf32>
    %54 = tpu.matmul %32, %2, %cst_25 {dimension_numbers = #tpu.dot_dimension_numbers<[1], [0], [0], [1], [0, 0, 1, 1], [], []>} : vector<1x128xf32>, vector<128x512xf32>, vector<1x512xf32> -> vector<1x512xf32>
    %55 = arith.addf %53, %54 : vector<1x512xf32>
    %56 = vector.extract_strided_slice %55 {offsets = [0, 0], sizes = [1, 384], strides = [1, 1]} : vector<1x512xf32> to vector<1x384xf32>
    %57 = arith.negf %56 : vector<1x384xf32>
    %58 = math.exp %57 : vector<1x384xf32>
    %cst_26 = arith.constant 1.000000e+00 : f32
    %59 = vector.broadcast %cst_26 : f32 to vector<1x384xf32>
    %60 = arith.addf %59, %58 : vector<1x384xf32>
    %61 = arith.divf %59, %60 : vector<1x384xf32>
    %62 = vector.extract_strided_slice %55 {offsets = [0, 384], sizes = [1, 128], strides = [1, 1]} : vector<1x512xf32> to vector<1x128xf32>
    %63 = math.tanh %62 : vector<1x128xf32>
    %64 = vector.extract_strided_slice %61 {offsets = [0, 0], sizes = [1, 128], strides = [1, 1]} : vector<1x384xf32> to vector<1x128xf32>
    %65 = vector.extract_strided_slice %61 {offsets = [0, 128], sizes = [1, 128], strides = [1, 1]} : vector<1x384xf32> to vector<1x128xf32>
    %66 = vector.extract_strided_slice %61 {offsets = [0, 256], sizes = [1, 128], strides = [1, 1]} : vector<1x384xf32> to vector<1x128xf32>
    %67 = arith.mulf %65, %30 : vector<1x128xf32>
    %68 = arith.mulf %64, %63 : vector<1x128xf32>
    %69 = arith.addf %67, %68 : vector<1x128xf32>
    %70 = math.tanh %69 : vector<1x128xf32>
    %71 = arith.mulf %66, %70 : vector<1x128xf32>
    %cst_27 = arith.constant dense<0.000000e+00> : vector<1x512xf32>
    %72 = tpu.matmul %71, %1, %cst_27 {dimension_numbers = #tpu.dot_dimension_numbers<[1], [0], [0], [1], [0, 0, 1, 1], [], []>} : vector<1x128xf32>, vector<128x512xf32>, vector<1x512xf32> -> vector<1x512xf32>
    %cst_28 = arith.constant dense<0.000000e+00> : vector<1x512xf32>
    %73 = tpu.matmul %52, %3, %cst_28 {dimension_numbers = #tpu.dot_dimension_numbers<[1], [0], [0], [1], [0, 0, 1, 1], [], []>} : vector<1x128xf32>, vector<128x512xf32>, vector<1x512xf32> -> vector<1x512xf32>
    %74 = arith.addf %72, %73 : vector<1x512xf32>
    %75 = arith.addf %74, %5 : vector<1x512xf32>
    %76 = vector.extract_strided_slice %75 {offsets = [0, 0], sizes = [1, 384], strides = [1, 1]} : vector<1x512xf32> to vector<1x384xf32>
    %77 = arith.negf %76 : vector<1x384xf32>
    %78 = math.exp %77 : vector<1x384xf32>
    %cst_29 = arith.constant 1.000000e+00 : f32
    %79 = vector.broadcast %cst_29 : f32 to vector<1x384xf32>
    %80 = arith.addf %79, %78 : vector<1x384xf32>
    %81 = arith.divf %79, %80 : vector<1x384xf32>
    %82 = vector.extract_strided_slice %75 {offsets = [0, 384], sizes = [1, 128], strides = [1, 1]} : vector<1x512xf32> to vector<1x128xf32>
    %83 = math.tanh %82 : vector<1x128xf32>
    %84 = vector.extract_strided_slice %81 {offsets = [0, 0], sizes = [1, 128], strides = [1, 1]} : vector<1x384xf32> to vector<1x128xf32>
    %85 = vector.extract_strided_slice %81 {offsets = [0, 128], sizes = [1, 128], strides = [1, 1]} : vector<1x384xf32> to vector<1x128xf32>
    %86 = vector.extract_strided_slice %81 {offsets = [0, 256], sizes = [1, 128], strides = [1, 1]} : vector<1x384xf32> to vector<1x128xf32>
    %87 = arith.mulf %85, %50 : vector<1x128xf32>
    %88 = arith.mulf %84, %83 : vector<1x128xf32>
    %89 = arith.addf %87, %88 : vector<1x128xf32>
    %90 = math.tanh %89 : vector<1x128xf32>
    %91 = arith.mulf %86, %90 : vector<1x128xf32>
    %92 = vector.extract_strided_slice %9 {offsets = [2, 0], sizes = [1, 512], strides = [1, 1]} : vector<8x512xf32> to vector<1x512xf32>
    %cst_30 = arith.constant dense<0.000000e+00> : vector<1x512xf32>
    %93 = tpu.matmul %71, %2, %cst_30 {dimension_numbers = #tpu.dot_dimension_numbers<[1], [0], [0], [1], [0, 0, 1, 1], [], []>} : vector<1x128xf32>, vector<128x512xf32>, vector<1x512xf32> -> vector<1x512xf32>
    %94 = arith.addf %92, %93 : vector<1x512xf32>
    %95 = vector.extract_strided_slice %94 {offsets = [0, 0], sizes = [1, 384], strides = [1, 1]} : vector<1x512xf32> to vector<1x384xf32>
    %96 = arith.negf %95 : vector<1x384xf32>
    %97 = math.exp %96 : vector<1x384xf32>
    %cst_31 = arith.constant 1.000000e+00 : f32
    %98 = vector.broadcast %cst_31 : f32 to vector<1x384xf32>
    %99 = arith.addf %98, %97 : vector<1x384xf32>
    %100 = arith.divf %98, %99 : vector<1x384xf32>
    %101 = vector.extract_strided_slice %94 {offsets = [0, 384], sizes = [1, 128], strides = [1, 1]} : vector<1x512xf32> to vector<1x128xf32>
    %102 = math.tanh %101 : vector<1x128xf32>
    %103 = vector.extract_strided_slice %100 {offsets = [0, 0], sizes = [1, 128], strides = [1, 1]} : vector<1x384xf32> to vector<1x128xf32>
    %104 = vector.extract_strided_slice %100 {offsets = [0, 128], sizes = [1, 128], strides = [1, 1]} : vector<1x384xf32> to vector<1x128xf32>
    %105 = vector.extract_strided_slice %100 {offsets = [0, 256], sizes = [1, 128], strides = [1, 1]} : vector<1x384xf32> to vector<1x128xf32>
    %106 = arith.mulf %104, %69 : vector<1x128xf32>
    %107 = arith.mulf %103, %102 : vector<1x128xf32>
    %108 = arith.addf %106, %107 : vector<1x128xf32>
    %109 = math.tanh %108 : vector<1x128xf32>
    %110 = arith.mulf %105, %109 : vector<1x128xf32>
    %cst_32 = arith.constant dense<0.000000e+00> : vector<1x512xf32>
    %111 = tpu.matmul %110, %1, %cst_32 {dimension_numbers = #tpu.dot_dimension_numbers<[1], [0], [0], [1], [0, 0, 1, 1], [], []>} : vector<1x128xf32>, vector<128x512xf32>, vector<1x512xf32> -> vector<1x512xf32>
    %cst_33 = arith.constant dense<0.000000e+00> : vector<1x512xf32>
    %112 = tpu.matmul %91, %3, %cst_33 {dimension_numbers = #tpu.dot_dimension_numbers<[1], [0], [0], [1], [0, 0, 1, 1], [], []>} : vector<1x128xf32>, vector<128x512xf32>, vector<1x512xf32> -> vector<1x512xf32>
    %113 = arith.addf %111, %112 : vector<1x512xf32>
    %114 = arith.addf %113, %5 : vector<1x512xf32>
    %115 = vector.extract_strided_slice %114 {offsets = [0, 0], sizes = [1, 384], strides = [1, 1]} : vector<1x512xf32> to vector<1x384xf32>
    %116 = arith.negf %115 : vector<1x384xf32>
    %117 = math.exp %116 : vector<1x384xf32>
    %cst_34 = arith.constant 1.000000e+00 : f32
    %118 = vector.broadcast %cst_34 : f32 to vector<1x384xf32>
    %119 = arith.addf %118, %117 : vector<1x384xf32>
    %120 = arith.divf %118, %119 : vector<1x384xf32>
    %121 = vector.extract_strided_slice %114 {offsets = [0, 384], sizes = [1, 128], strides = [1, 1]} : vector<1x512xf32> to vector<1x128xf32>
    %122 = math.tanh %121 : vector<1x128xf32>
    %123 = vector.extract_strided_slice %120 {offsets = [0, 0], sizes = [1, 128], strides = [1, 1]} : vector<1x384xf32> to vector<1x128xf32>
    %124 = vector.extract_strided_slice %120 {offsets = [0, 128], sizes = [1, 128], strides = [1, 1]} : vector<1x384xf32> to vector<1x128xf32>
    %125 = vector.extract_strided_slice %120 {offsets = [0, 256], sizes = [1, 128], strides = [1, 1]} : vector<1x384xf32> to vector<1x128xf32>
    %126 = arith.mulf %124, %89 : vector<1x128xf32>
    %127 = arith.mulf %123, %122 : vector<1x128xf32>
    %128 = arith.addf %126, %127 : vector<1x128xf32>
    %129 = math.tanh %128 : vector<1x128xf32>
    %130 = arith.mulf %125, %129 : vector<1x128xf32>
    %131 = vector.extract_strided_slice %9 {offsets = [3, 0], sizes = [1, 512], strides = [1, 1]} : vector<8x512xf32> to vector<1x512xf32>
    %cst_35 = arith.constant dense<0.000000e+00> : vector<1x512xf32>
    %132 = tpu.matmul %110, %2, %cst_35 {dimension_numbers = #tpu.dot_dimension_numbers<[1], [0], [0], [1], [0, 0, 1, 1], [], []>} : vector<1x128xf32>, vector<128x512xf32>, vector<1x512xf32> -> vector<1x512xf32>
    %133 = arith.addf %131, %132 : vector<1x512xf32>
    %134 = vector.extract_strided_slice %133 {offsets = [0, 0], sizes = [1, 384], strides = [1, 1]} : vector<1x512xf32> to vector<1x384xf32>
    %135 = arith.negf %134 : vector<1x384xf32>
    %136 = math.exp %135 : vector<1x384xf32>
    %cst_36 = arith.constant 1.000000e+00 : f32
    %137 = vector.broadcast %cst_36 : f32 to vector<1x384xf32>
    %138 = arith.addf %137, %136 : vector<1x384xf32>
    %139 = arith.divf %137, %138 : vector<1x384xf32>
    %140 = vector.extract_strided_slice %133 {offsets = [0, 384], sizes = [1, 128], strides = [1, 1]} : vector<1x512xf32> to vector<1x128xf32>
    %141 = math.tanh %140 : vector<1x128xf32>
    %142 = vector.extract_strided_slice %139 {offsets = [0, 0], sizes = [1, 128], strides = [1, 1]} : vector<1x384xf32> to vector<1x128xf32>
    %143 = vector.extract_strided_slice %139 {offsets = [0, 128], sizes = [1, 128], strides = [1, 1]} : vector<1x384xf32> to vector<1x128xf32>
    %144 = vector.extract_strided_slice %139 {offsets = [0, 256], sizes = [1, 128], strides = [1, 1]} : vector<1x384xf32> to vector<1x128xf32>
    %145 = arith.mulf %143, %108 : vector<1x128xf32>
    %146 = arith.mulf %142, %141 : vector<1x128xf32>
    %147 = arith.addf %145, %146 : vector<1x128xf32>
    %148 = math.tanh %147 : vector<1x128xf32>
    %149 = arith.mulf %144, %148 : vector<1x128xf32>
    %cst_37 = arith.constant dense<0.000000e+00> : vector<1x512xf32>
    %150 = tpu.matmul %149, %1, %cst_37 {dimension_numbers = #tpu.dot_dimension_numbers<[1], [0], [0], [1], [0, 0, 1, 1], [], []>} : vector<1x128xf32>, vector<128x512xf32>, vector<1x512xf32> -> vector<1x512xf32>
    %cst_38 = arith.constant dense<0.000000e+00> : vector<1x512xf32>
    %151 = tpu.matmul %130, %3, %cst_38 {dimension_numbers = #tpu.dot_dimension_numbers<[1], [0], [0], [1], [0, 0, 1, 1], [], []>} : vector<1x128xf32>, vector<128x512xf32>, vector<1x512xf32> -> vector<1x512xf32>
    %152 = arith.addf %150, %151 : vector<1x512xf32>
    %153 = arith.addf %152, %5 : vector<1x512xf32>
    %154 = vector.extract_strided_slice %153 {offsets = [0, 0], sizes = [1, 384], strides = [1, 1]} : vector<1x512xf32> to vector<1x384xf32>
    %155 = arith.negf %154 : vector<1x384xf32>
    %156 = math.exp %155 : vector<1x384xf32>
    %cst_39 = arith.constant 1.000000e+00 : f32
    %157 = vector.broadcast %cst_39 : f32 to vector<1x384xf32>
    %158 = arith.addf %157, %156 : vector<1x384xf32>
    %159 = arith.divf %157, %158 : vector<1x384xf32>
    %160 = vector.extract_strided_slice %153 {offsets = [0, 384], sizes = [1, 128], strides = [1, 1]} : vector<1x512xf32> to vector<1x128xf32>
    %161 = math.tanh %160 : vector<1x128xf32>
    %162 = vector.extract_strided_slice %159 {offsets = [0, 0], sizes = [1, 128], strides = [1, 1]} : vector<1x384xf32> to vector<1x128xf32>
    %163 = vector.extract_strided_slice %159 {offsets = [0, 128], sizes = [1, 128], strides = [1, 1]} : vector<1x384xf32> to vector<1x128xf32>
    %164 = vector.extract_strided_slice %159 {offsets = [0, 256], sizes = [1, 128], strides = [1, 1]} : vector<1x384xf32> to vector<1x128xf32>
    %165 = arith.mulf %163, %128 : vector<1x128xf32>
    %166 = arith.mulf %162, %161 : vector<1x128xf32>
    %167 = arith.addf %165, %166 : vector<1x128xf32>
    %168 = math.tanh %167 : vector<1x128xf32>
    %169 = arith.mulf %164, %168 : vector<1x128xf32>
    %170 = vector.extract_strided_slice %9 {offsets = [4, 0], sizes = [1, 512], strides = [1, 1]} : vector<8x512xf32> to vector<1x512xf32>
    %cst_40 = arith.constant dense<0.000000e+00> : vector<1x512xf32>
    %171 = tpu.matmul %149, %2, %cst_40 {dimension_numbers = #tpu.dot_dimension_numbers<[1], [0], [0], [1], [0, 0, 1, 1], [], []>} : vector<1x128xf32>, vector<128x512xf32>, vector<1x512xf32> -> vector<1x512xf32>
    %172 = arith.addf %170, %171 : vector<1x512xf32>
    %173 = vector.extract_strided_slice %172 {offsets = [0, 0], sizes = [1, 384], strides = [1, 1]} : vector<1x512xf32> to vector<1x384xf32>
    %174 = arith.negf %173 : vector<1x384xf32>
    %175 = math.exp %174 : vector<1x384xf32>
    %cst_41 = arith.constant 1.000000e+00 : f32
    %176 = vector.broadcast %cst_41 : f32 to vector<1x384xf32>
    %177 = arith.addf %176, %175 : vector<1x384xf32>
    %178 = arith.divf %176, %177 : vector<1x384xf32>
    %179 = vector.extract_strided_slice %172 {offsets = [0, 384], sizes = [1, 128], strides = [1, 1]} : vector<1x512xf32> to vector<1x128xf32>
    %180 = math.tanh %179 : vector<1x128xf32>
    %181 = vector.extract_strided_slice %178 {offsets = [0, 0], sizes = [1, 128], strides = [1, 1]} : vector<1x384xf32> to vector<1x128xf32>
    %182 = vector.extract_strided_slice %178 {offsets = [0, 128], sizes = [1, 128], strides = [1, 1]} : vector<1x384xf32> to vector<1x128xf32>
    %183 = vector.extract_strided_slice %178 {offsets = [0, 256], sizes = [1, 128], strides = [1, 1]} : vector<1x384xf32> to vector<1x128xf32>
    %184 = arith.mulf %182, %147 : vector<1x128xf32>
    %185 = arith.mulf %181, %180 : vector<1x128xf32>
    %186 = arith.addf %184, %185 : vector<1x128xf32>
    %187 = math.tanh %186 : vector<1x128xf32>
    %188 = arith.mulf %183, %187 : vector<1x128xf32>
    %cst_42 = arith.constant dense<0.000000e+00> : vector<1x512xf32>
    %189 = tpu.matmul %188, %1, %cst_42 {dimension_numbers = #tpu.dot_dimension_numbers<[1], [0], [0], [1], [0, 0, 1, 1], [], []>} : vector<1x128xf32>, vector<128x512xf32>, vector<1x512xf32> -> vector<1x512xf32>
    %cst_43 = arith.constant dense<0.000000e+00> : vector<1x512xf32>
    %190 = tpu.matmul %169, %3, %cst_43 {dimension_numbers = #tpu.dot_dimension_numbers<[1], [0], [0], [1], [0, 0, 1, 1], [], []>} : vector<1x128xf32>, vector<128x512xf32>, vector<1x512xf32> -> vector<1x512xf32>
    %191 = arith.addf %189, %190 : vector<1x512xf32>
    %192 = arith.addf %191, %5 : vector<1x512xf32>
    %193 = vector.extract_strided_slice %192 {offsets = [0, 0], sizes = [1, 384], strides = [1, 1]} : vector<1x512xf32> to vector<1x384xf32>
    %194 = arith.negf %193 : vector<1x384xf32>
    %195 = math.exp %194 : vector<1x384xf32>
    %cst_44 = arith.constant 1.000000e+00 : f32
    %196 = vector.broadcast %cst_44 : f32 to vector<1x384xf32>
    %197 = arith.addf %196, %195 : vector<1x384xf32>
    %198 = arith.divf %196, %197 : vector<1x384xf32>
    %199 = vector.extract_strided_slice %192 {offsets = [0, 384], sizes = [1, 128], strides = [1, 1]} : vector<1x512xf32> to vector<1x128xf32>
    %200 = math.tanh %199 : vector<1x128xf32>
    %201 = vector.extract_strided_slice %198 {offsets = [0, 0], sizes = [1, 128], strides = [1, 1]} : vector<1x384xf32> to vector<1x128xf32>
    %202 = vector.extract_strided_slice %198 {offsets = [0, 128], sizes = [1, 128], strides = [1, 1]} : vector<1x384xf32> to vector<1x128xf32>
    %203 = vector.extract_strided_slice %198 {offsets = [0, 256], sizes = [1, 128], strides = [1, 1]} : vector<1x384xf32> to vector<1x128xf32>
    %204 = arith.mulf %202, %167 : vector<1x128xf32>
    %205 = arith.mulf %201, %200 : vector<1x128xf32>
    %206 = arith.addf %204, %205 : vector<1x128xf32>
    %207 = math.tanh %206 : vector<1x128xf32>
    %208 = arith.mulf %203, %207 : vector<1x128xf32>
    %209 = vector.extract_strided_slice %9 {offsets = [5, 0], sizes = [1, 512], strides = [1, 1]} : vector<8x512xf32> to vector<1x512xf32>
    %cst_45 = arith.constant dense<0.000000e+00> : vector<1x512xf32>
    %210 = tpu.matmul %188, %2, %cst_45 {dimension_numbers = #tpu.dot_dimension_numbers<[1], [0], [0], [1], [0, 0, 1, 1], [], []>} : vector<1x128xf32>, vector<128x512xf32>, vector<1x512xf32> -> vector<1x512xf32>
    %211 = arith.addf %209, %210 : vector<1x512xf32>
    %212 = vector.extract_strided_slice %211 {offsets = [0, 0], sizes = [1, 384], strides = [1, 1]} : vector<1x512xf32> to vector<1x384xf32>
    %213 = arith.negf %212 : vector<1x384xf32>
    %214 = math.exp %213 : vector<1x384xf32>
    %cst_46 = arith.constant 1.000000e+00 : f32
    %215 = vector.broadcast %cst_46 : f32 to vector<1x384xf32>
    %216 = arith.addf %215, %214 : vector<1x384xf32>
    %217 = arith.divf %215, %216 : vector<1x384xf32>
    %218 = vector.extract_strided_slice %211 {offsets = [0, 384], sizes = [1, 128], strides = [1, 1]} : vector<1x512xf32> to vector<1x128xf32>
    %219 = math.tanh %218 : vector<1x128xf32>
    %220 = vector.extract_strided_slice %217 {offsets = [0, 0], sizes = [1, 128], strides = [1, 1]} : vector<1x384xf32> to vector<1x128xf32>
    %221 = vector.extract_strided_slice %217 {offsets = [0, 128], sizes = [1, 128], strides = [1, 1]} : vector<1x384xf32> to vector<1x128xf32>
    %222 = vector.extract_strided_slice %217 {offsets = [0, 256], sizes = [1, 128], strides = [1, 1]} : vector<1x384xf32> to vector<1x128xf32>
    %223 = arith.mulf %221, %186 : vector<1x128xf32>
    %224 = arith.mulf %220, %219 : vector<1x128xf32>
    %225 = arith.addf %223, %224 : vector<1x128xf32>
    %226 = math.tanh %225 : vector<1x128xf32>
    %227 = arith.mulf %222, %226 : vector<1x128xf32>
    %cst_47 = arith.constant dense<0.000000e+00> : vector<1x512xf32>
    %228 = tpu.matmul %227, %1, %cst_47 {dimension_numbers = #tpu.dot_dimension_numbers<[1], [0], [0], [1], [0, 0, 1, 1], [], []>} : vector<1x128xf32>, vector<128x512xf32>, vector<1x512xf32> -> vector<1x512xf32>
    %cst_48 = arith.constant dense<0.000000e+00> : vector<1x512xf32>
    %229 = tpu.matmul %208, %3, %cst_48 {dimension_numbers = #tpu.dot_dimension_numbers<[1], [0], [0], [1], [0, 0, 1, 1], [], []>} : vector<1x128xf32>, vector<128x512xf32>, vector<1x512xf32> -> vector<1x512xf32>
    %230 = arith.addf %228, %229 : vector<1x512xf32>
    %231 = arith.addf %230, %5 : vector<1x512xf32>
    %232 = vector.extract_strided_slice %231 {offsets = [0, 0], sizes = [1, 384], strides = [1, 1]} : vector<1x512xf32> to vector<1x384xf32>
    %233 = arith.negf %232 : vector<1x384xf32>
    %234 = math.exp %233 : vector<1x384xf32>
    %cst_49 = arith.constant 1.000000e+00 : f32
    %235 = vector.broadcast %cst_49 : f32 to vector<1x384xf32>
    %236 = arith.addf %235, %234 : vector<1x384xf32>
    %237 = arith.divf %235, %236 : vector<1x384xf32>
    %238 = vector.extract_strided_slice %231 {offsets = [0, 384], sizes = [1, 128], strides = [1, 1]} : vector<1x512xf32> to vector<1x128xf32>
    %239 = math.tanh %238 : vector<1x128xf32>
    %240 = vector.extract_strided_slice %237 {offsets = [0, 0], sizes = [1, 128], strides = [1, 1]} : vector<1x384xf32> to vector<1x128xf32>
    %241 = vector.extract_strided_slice %237 {offsets = [0, 128], sizes = [1, 128], strides = [1, 1]} : vector<1x384xf32> to vector<1x128xf32>
    %242 = vector.extract_strided_slice %237 {offsets = [0, 256], sizes = [1, 128], strides = [1, 1]} : vector<1x384xf32> to vector<1x128xf32>
    %243 = arith.mulf %241, %206 : vector<1x128xf32>
    %244 = arith.mulf %240, %239 : vector<1x128xf32>
    %245 = arith.addf %243, %244 : vector<1x128xf32>
    %246 = math.tanh %245 : vector<1x128xf32>
    %247 = arith.mulf %242, %246 : vector<1x128xf32>
    %248 = vector.extract_strided_slice %9 {offsets = [6, 0], sizes = [1, 512], strides = [1, 1]} : vector<8x512xf32> to vector<1x512xf32>
    %cst_50 = arith.constant dense<0.000000e+00> : vector<1x512xf32>
    %249 = tpu.matmul %227, %2, %cst_50 {dimension_numbers = #tpu.dot_dimension_numbers<[1], [0], [0], [1], [0, 0, 1, 1], [], []>} : vector<1x128xf32>, vector<128x512xf32>, vector<1x512xf32> -> vector<1x512xf32>
    %250 = arith.addf %248, %249 : vector<1x512xf32>
    %251 = vector.extract_strided_slice %250 {offsets = [0, 0], sizes = [1, 384], strides = [1, 1]} : vector<1x512xf32> to vector<1x384xf32>
    %252 = arith.negf %251 : vector<1x384xf32>
    %253 = math.exp %252 : vector<1x384xf32>
    %cst_51 = arith.constant 1.000000e+00 : f32
    %254 = vector.broadcast %cst_51 : f32 to vector<1x384xf32>
    %255 = arith.addf %254, %253 : vector<1x384xf32>
    %256 = arith.divf %254, %255 : vector<1x384xf32>
    %257 = vector.extract_strided_slice %250 {offsets = [0, 384], sizes = [1, 128], strides = [1, 1]} : vector<1x512xf32> to vector<1x128xf32>
    %258 = math.tanh %257 : vector<1x128xf32>
    %259 = vector.extract_strided_slice %256 {offsets = [0, 0], sizes = [1, 128], strides = [1, 1]} : vector<1x384xf32> to vector<1x128xf32>
    %260 = vector.extract_strided_slice %256 {offsets = [0, 128], sizes = [1, 128], strides = [1, 1]} : vector<1x384xf32> to vector<1x128xf32>
    %261 = vector.extract_strided_slice %256 {offsets = [0, 256], sizes = [1, 128], strides = [1, 1]} : vector<1x384xf32> to vector<1x128xf32>
    %262 = arith.mulf %260, %225 : vector<1x128xf32>
    %263 = arith.mulf %259, %258 : vector<1x128xf32>
    %264 = arith.addf %262, %263 : vector<1x128xf32>
    %265 = math.tanh %264 : vector<1x128xf32>
    %266 = arith.mulf %261, %265 : vector<1x128xf32>
    %cst_52 = arith.constant dense<0.000000e+00> : vector<1x512xf32>
    %267 = tpu.matmul %266, %1, %cst_52 {dimension_numbers = #tpu.dot_dimension_numbers<[1], [0], [0], [1], [0, 0, 1, 1], [], []>} : vector<1x128xf32>, vector<128x512xf32>, vector<1x512xf32> -> vector<1x512xf32>
    %cst_53 = arith.constant dense<0.000000e+00> : vector<1x512xf32>
    %268 = tpu.matmul %247, %3, %cst_53 {dimension_numbers = #tpu.dot_dimension_numbers<[1], [0], [0], [1], [0, 0, 1, 1], [], []>} : vector<1x128xf32>, vector<128x512xf32>, vector<1x512xf32> -> vector<1x512xf32>
    %269 = arith.addf %267, %268 : vector<1x512xf32>
    %270 = arith.addf %269, %5 : vector<1x512xf32>
    %271 = vector.extract_strided_slice %270 {offsets = [0, 0], sizes = [1, 384], strides = [1, 1]} : vector<1x512xf32> to vector<1x384xf32>
    %272 = arith.negf %271 : vector<1x384xf32>
    %273 = math.exp %272 : vector<1x384xf32>
    %cst_54 = arith.constant 1.000000e+00 : f32
    %274 = vector.broadcast %cst_54 : f32 to vector<1x384xf32>
    %275 = arith.addf %274, %273 : vector<1x384xf32>
    %276 = arith.divf %274, %275 : vector<1x384xf32>
    %277 = vector.extract_strided_slice %270 {offsets = [0, 384], sizes = [1, 128], strides = [1, 1]} : vector<1x512xf32> to vector<1x128xf32>
    %278 = math.tanh %277 : vector<1x128xf32>
    %279 = vector.extract_strided_slice %276 {offsets = [0, 0], sizes = [1, 128], strides = [1, 1]} : vector<1x384xf32> to vector<1x128xf32>
    %280 = vector.extract_strided_slice %276 {offsets = [0, 128], sizes = [1, 128], strides = [1, 1]} : vector<1x384xf32> to vector<1x128xf32>
    %281 = vector.extract_strided_slice %276 {offsets = [0, 256], sizes = [1, 128], strides = [1, 1]} : vector<1x384xf32> to vector<1x128xf32>
    %282 = arith.mulf %280, %245 : vector<1x128xf32>
    %283 = arith.mulf %279, %278 : vector<1x128xf32>
    %284 = arith.addf %282, %283 : vector<1x128xf32>
    %285 = math.tanh %284 : vector<1x128xf32>
    %286 = arith.mulf %281, %285 : vector<1x128xf32>
    %287 = vector.extract_strided_slice %9 {offsets = [7, 0], sizes = [1, 512], strides = [1, 1]} : vector<8x512xf32> to vector<1x512xf32>
    %cst_55 = arith.constant dense<0.000000e+00> : vector<1x512xf32>
    %288 = tpu.matmul %266, %2, %cst_55 {dimension_numbers = #tpu.dot_dimension_numbers<[1], [0], [0], [1], [0, 0, 1, 1], [], []>} : vector<1x128xf32>, vector<128x512xf32>, vector<1x512xf32> -> vector<1x512xf32>
    %289 = arith.addf %287, %288 : vector<1x512xf32>
    %290 = vector.extract_strided_slice %289 {offsets = [0, 0], sizes = [1, 384], strides = [1, 1]} : vector<1x512xf32> to vector<1x384xf32>
    %291 = arith.negf %290 : vector<1x384xf32>
    %292 = math.exp %291 : vector<1x384xf32>
    %cst_56 = arith.constant 1.000000e+00 : f32
    %293 = vector.broadcast %cst_56 : f32 to vector<1x384xf32>
    %294 = arith.addf %293, %292 : vector<1x384xf32>
    %295 = arith.divf %293, %294 : vector<1x384xf32>
    %296 = vector.extract_strided_slice %289 {offsets = [0, 384], sizes = [1, 128], strides = [1, 1]} : vector<1x512xf32> to vector<1x128xf32>
    %297 = math.tanh %296 : vector<1x128xf32>
    %298 = vector.extract_strided_slice %295 {offsets = [0, 0], sizes = [1, 128], strides = [1, 1]} : vector<1x384xf32> to vector<1x128xf32>
    %299 = vector.extract_strided_slice %295 {offsets = [0, 128], sizes = [1, 128], strides = [1, 1]} : vector<1x384xf32> to vector<1x128xf32>
    %300 = vector.extract_strided_slice %295 {offsets = [0, 256], sizes = [1, 128], strides = [1, 1]} : vector<1x384xf32> to vector<1x128xf32>
    %301 = arith.mulf %299, %264 : vector<1x128xf32>
    %302 = arith.mulf %298, %297 : vector<1x128xf32>
    %303 = arith.addf %301, %302 : vector<1x128xf32>
    %304 = math.tanh %303 : vector<1x128xf32>
    %305 = arith.mulf %300, %304 : vector<1x128xf32>
    %cst_57 = arith.constant dense<0.000000e+00> : vector<1x512xf32>
    %306 = tpu.matmul %305, %1, %cst_57 {dimension_numbers = #tpu.dot_dimension_numbers<[1], [0], [0], [1], [0, 0, 1, 1], [], []>} : vector<1x128xf32>, vector<128x512xf32>, vector<1x512xf32> -> vector<1x512xf32>
    %cst_58 = arith.constant dense<0.000000e+00> : vector<1x512xf32>
    %307 = tpu.matmul %286, %3, %cst_58 {dimension_numbers = #tpu.dot_dimension_numbers<[1], [0], [0], [1], [0, 0, 1, 1], [], []>} : vector<1x128xf32>, vector<128x512xf32>, vector<1x512xf32> -> vector<1x512xf32>
    %308 = arith.addf %306, %307 : vector<1x512xf32>
    %309 = arith.addf %308, %5 : vector<1x512xf32>
    %310 = vector.extract_strided_slice %309 {offsets = [0, 0], sizes = [1, 384], strides = [1, 1]} : vector<1x512xf32> to vector<1x384xf32>
    %311 = arith.negf %310 : vector<1x384xf32>
    %312 = math.exp %311 : vector<1x384xf32>
    %cst_59 = arith.constant 1.000000e+00 : f32
    %313 = vector.broadcast %cst_59 : f32 to vector<1x384xf32>
    %314 = arith.addf %313, %312 : vector<1x384xf32>
    %315 = arith.divf %313, %314 : vector<1x384xf32>
    %316 = vector.extract_strided_slice %309 {offsets = [0, 384], sizes = [1, 128], strides = [1, 1]} : vector<1x512xf32> to vector<1x128xf32>
    %317 = math.tanh %316 : vector<1x128xf32>
    %318 = vector.extract_strided_slice %315 {offsets = [0, 0], sizes = [1, 128], strides = [1, 1]} : vector<1x384xf32> to vector<1x128xf32>
    %319 = vector.extract_strided_slice %315 {offsets = [0, 128], sizes = [1, 128], strides = [1, 1]} : vector<1x384xf32> to vector<1x128xf32>
    %320 = vector.extract_strided_slice %315 {offsets = [0, 256], sizes = [1, 128], strides = [1, 1]} : vector<1x384xf32> to vector<1x128xf32>
    %321 = arith.mulf %319, %284 : vector<1x128xf32>
    %322 = arith.mulf %318, %317 : vector<1x128xf32>
    %323 = arith.addf %321, %322 : vector<1x128xf32>
    %324 = math.tanh %323 : vector<1x128xf32>
    %325 = arith.mulf %320, %324 : vector<1x128xf32>
    %326 = tpu.concatenate %305, %325 in 0 : vector<1x128xf32>, vector<1x128xf32> -> vector<2x128xf32>
    %c0_60 = arith.constant 0 : index
    %c0_61 = arith.constant 0 : index
    %327 = vector.load %arg12[%c0_60, %c0_61] : memref<2x128xf32, #tpu.memory_space<vmem>>, vector<2x128xf32>
    tpu.vector_store %arg12[%c0_60, %c0_61], %326 {strides = array<i32>} : memref<2x128xf32, #tpu.memory_space<vmem>>, vector<2x128xf32>,
    %328 = tpu.concatenate %303, %323 in 0 : vector<1x128xf32>, vector<1x128xf32> -> vector<2x128xf32>
    %c0_62 = arith.constant 0 : index
    %c0_63 = arith.constant 0 : index
    %329 = vector.load %arg13[%c0_62, %c0_63] : memref<2x128xf32, #tpu.memory_space<vmem>>, vector<2x128xf32>
    tpu.vector_store %arg13[%c0_62, %c0_63], %328 {strides = array<i32>} : memref<2x128xf32, #tpu.memory_space<vmem>>, vector<2x128xf32>,
    %330 = tpu.concatenate %52, %91, %130, %169, %208, %247, %286, %325 in 0 : vector<1x128xf32>, vector<1x128xf32>, vector<1x128xf32>, vector<1x128xf32>, vector<1x128xf32>, vector<1x128xf32>, vector<1x128xf32>, vector<1x128xf32> -> vector<8x128xf32>
    %c0_64 = arith.constant 0 : index
    %c0_65 = arith.constant 0 : index
    %331 = vector.load %arg9[%c0_64, %c0_65] : memref<128x128xf32, #tpu.memory_space<vmem>>, vector<128x128xf32>
    %cst_66 = arith.constant dense<0.000000e+00> : vector<8x128xf32>
    %332 = tpu.matmul %330, %331, %cst_66 {dimension_numbers = #tpu.dot_dimension_numbers<[1], [0], [0], [1], [0, 0, 1, 1], [], []>} : vector<8x128xf32>, vector<128x128xf32>, vector<8x128xf32> -> vector<8x128xf32>
    %c0_67 = arith.constant 0 : index
    %c0_68 = arith.constant 0 : index
    %333 = vector.load %arg10[%c0_67, %c0_68] : memref<1x128xf32, #tpu.memory_space<vmem>>, vector<1x128xf32>
    %334 = vector.broadcast %333 : vector<1x128xf32> to vector<8x128xf32>
    %335 = arith.addf %332, %334 : vector<8x128xf32>
    %c0_69 = arith.constant 0 : index
    %c0_70 = arith.constant 0 : index
    %336 = vector.load %arg11[%c0_69, %c0_70] : memref<8x128xf32, #tpu.memory_space<vmem>>, vector<8x128xf32>
    tpu.vector_store %arg11[%c0_69, %c0_70], %335 {strides = array<i32>} : memref<8x128xf32, #tpu.memory_space<vmem>>, vector<8x128xf32>,
    return
  }
}

</mosaic_0001>

<bundles_post_ra>
// kernel: my_lstm_forward.1
= control target key start
LH: loop header
LB: loop body
LE: loop exit
PB: predicated region body
PF: predicated region fallthrough
CT: control target
= control target key end

     0   :  { %19 = vsyncpa [#allocation3], 0  ;;  %s8642_s0 = inlined_call_operand.hbm [shape: f32[8,32], index: 0, kind: input, shape index: {}]   ;;  %s8643_s1 = inlined_call_operand.hbm [shape: f32[32,512], index: 1, kind: input, shape index: {}]   ;;  %s8644_s2 = inlined_call_operand.hbm [shape: f32[128,512], index: 2, kind: input, shape index: {}]   ;;  %s8645_s3 = inlined_call_operand.vmem [shape: f32[1,512], index: 3, kind: input, shape index: {}]   ;;  %s8646_s4 = inlined_call_operand.hbm [shape: f32[128,512], index: 4, kind: input, shape index: {}]   ;;  %s8647_s5 = inlined_call_operand.hbm [shape: f32[128,512], index: 5, kind: input, shape index: {}]   ;;  %s8648_s6 = inlined_call_operand.vmem [shape: f32[1,512], index: 6, kind: input, shape index: {}]   ;;  %s8649_s7 = inlined_call_operand.vmem [shape: f32[2,128], index: 7, kind: input, shape index: {}]   ;;  %s8650_s8 = inlined_call_operand.vmem [shape: f32[2,128], index: 8, kind: input, shape index: {}]   ;;  %s8651_s9 = inlined_call_operand.hbm [shape: f32[128,128], index: 9, kind: input, shape index: {}]   ;;  %s8652_s10 = inlined_call_operand.vmem [shape: f32[1,128], index: 10, kind: input, shape index: {}]   ;;  %s8653_s11 = inlined_call_operand.hbm [shape: f32[8,128], index: 11, kind: output, shape index: {0}]   ;;  %s8654_s12 = inlined_call_operand.hbm [shape: f32[2,128], index: 12, kind: output, shape index: {1}]   ;;  %s8655_s13 = inlined_call_operand.hbm [shape: f32[2,128], index: 13, kind: output, shape index: {2}]  }
   0x1   :  { %20 = vsyncpa [#allocation6], 0 }
   0x2   :  { %21 = vsyncpa [#allocation9], 0 }
   0x3   :  { %22 = vsyncpa [#allocation12], 0 }
   0x4   :  { %23 = vsyncpa [#allocation4], 0  ;;  %s40_s27 = sshll.u32 %s8643_s1, 4  ;;  %s41_s27 = int_to_ptr.hbm [resolvable:$true] %s40_s27 }
   0x5   :  { %24 = vsyncpa [#allocation15], 0  ;;  %s4835_s28 = smov [#allocation5]   ;;  %s68_s15 = sshll.u32 %s8646_s4, 4  ;;  %s69_s15 = int_to_ptr.hbm [resolvable:$true] %s68_s15 }
   0x6   :  { %s42_s29 = sshll.u32 %s4835_s28, 4  ;;  %s4836_s16 = smov 512   ;;  %s43_s29 = int_to_ptr.vmem [resolvable:$true] %s42_s29 }
   0x7   :  { %s4837_s17 = smov 32   ;;  %s4838_s18 = smov [#allocation8]  }
   0x8   :  { %48 = dma.hbm_to_vmem [thread:$0]  %s41_s27, 2048, %s43_s29, [#allocation6], %s4836_s16, %s4836_s16, %s4837_s17  }
   0x9   :  { %s70_s19 = sshll.u32 %s4838_s18, 4  ;;  %s30_s21 = sshll.u32 %s8642_s0, 4  ;;  %s71_s19 = int_to_ptr.vmem [resolvable:$true] %s70_s19  ;;  %s31_s21 = int_to_ptr.hbm [resolvable:$true] %s30_s21 }
   0xa   :  { %76 = dma.hbm_to_vmem [thread:$0]  %s69_s15, 8192, %s71_s19, [#allocation9], %s4836_s16, %s4836_s16, %s4837_s17  }
   0xb   :  { %s53_s23 = sshll.u32 %s8644_s2, 4  ;;  %s4839_s24 = smov [#allocation2]   ;;  %s54_s23 = int_to_ptr.hbm [resolvable:$true] %s53_s23 }
   0xc   :  { %s32_s25 = sshll.u32 %s4839_s24, 4  ;;  %s4840_s26 = smov [#allocation7]   ;;  %s33_s25 = int_to_ptr.vmem [resolvable:$true] %s32_s25 }
   0xd   :  { %35 = dma.hbm_to_vmem [thread:$0]  %s31_s21, 128, %s33_s25, [#allocation3]  }
   0xe   :  { %s55_s27 = sshll.u32 %s4840_s26, 4  ;;  %s81_s0 = sshll.u32 %s8647_s5, 4  ;;  %s56_s27 = int_to_ptr.vmem [resolvable:$true] %s55_s27  ;;  %s82_s0 = int_to_ptr.hbm [resolvable:$true] %s81_s0 }
   0xf   :  { %61 = dma.hbm_to_vmem [thread:$0]  %s54_s23, 8192, %s56_s27, [#allocation6], %s4836_s16, %s4836_s16, %s4837_s17  }
  0x10   :  { %s100_s2 = sshll.u32 %s8651_s9, 4  ;;  %s4841_s15 = smov [#allocation10]   ;;  %s101_s2 = int_to_ptr.hbm [resolvable:$true] %s100_s2 }
  0x11   :  { %s83_s18 = sshll.u32 %s4841_s15, 4  ;;  %s4842_s19 = smov [#allocation11]   ;;  %s84_s18 = int_to_ptr.vmem [resolvable:$true] %s83_s18 }
  0x12   :  { %89 = dma.hbm_to_vmem [thread:$0]  %s82_s0, 8192, %s84_s18, [#allocation9], %s4836_s16, %s4836_s16, %s4837_s17  }
  0x13   :  { %s102_s5 = sshll.u32 %s4842_s19, 4  ;;  %s4843_s20 = smov 128   ;;  %s103_s5 = int_to_ptr.vmem [resolvable:$true] %s102_s5 }
  0x14   :  { %s4844_s1 = smov 8  }
  0x15   :  { %108 = dma.hbm_to_vmem [thread:$0]  %s101_s2, 2048, %s103_s5, [#allocation12], %s4843_s20, %s4843_s20, %s4844_s1  }
  0x16   :  { %4823 = dma.done.wait [#allocation3], 128  }
  0x17   :  { %4824 = vsyncadd [#allocation3], 4294967168 }
  0x18   :  { %4825 = dma.done.wait [#allocation6], 10240  }
  0x19   :  { %4826 = vsyncadd [#allocation6], 4294957056 }
  0x1a   :  { %4827 = dma.done.wait [#allocation9], 16384  }
  0x1b   :  { %4828 = vsyncadd [#allocation9], 4294950912 }
  0x1c   :  { %4829 = dma.done.wait [#allocation12], 2048  }
  0x1d   :  { %4830 = vsyncadd [#allocation12], 4294965248  ;;  %v147_v0 = vld [vmem:[#allocation5 + $0x60] sm:$0xff]  ;;  %v149_v1 = vld [vmem:[#allocation5 + $0x70] sm:$0xff]  ;;  %vm355_vm0 = vcmask 261120   ;;  %s3676_s27 = sshll.u32 %s8654_s12, 4  ;;  %s3677_s27 = int_to_ptr.hbm [resolvable:$true] %s3676_s27 }
  0x1e   :  { %v4948_v2 = vld [vmem:[#allocation7 + $0x1e0] sm:$0xff]  ;;  %371 = vmatpush.msra.mxu1 %v147_v0  ;;  %411 = vmatpush.msra.mxu2 %v149_v1  ;;  %v145_v4 = vld [vmem:[#allocation5 + $0x50] sm:$0xff]  ;;  %v150_v11 = vld [vmem:[#allocation5 + $0x78] sm:$0xff]  ;;  %s4845_s28 = smov [#allocation14]   ;;  %s3687_s14 = sshll.u32 %s8655_s13, 4  ;;  %s3688_s14 = int_to_ptr.hbm [resolvable:$true] %s3687_s14 }
  0x1f   :  { %v143_v3 = vld [vmem:[#allocation5 + $0x40] sm:$0xff]  ;;  %443 = vmatpush.msra.mxu0 %v4948_v2  ;;  %v141_v7 = vld [vmem:[#allocation5 + $0x30] sm:$0xff]  ;;  %v148_v13 = vld [vmem:[#allocation5 + $0x68] sm:$0xff]  ;;  %431 = vmatpush.msra.mxu3 %v150_v11  ;;  %s3674_s29 = sshll.u32 %s4845_s28, 4  ;;  %s4846_s2 = smov [#allocation16]   ;;  %s3675_s29 = int_to_ptr.vmem [resolvable:$true] %s3674_s29 }
  0x20   :  { %v4950_v5 = vld [vmem:[#allocation7 + $0x1c0] sm:$0xff]  ;;  %372 = vmatpush.msra.mxu1 %v143_v3  ;;  %412 = vmatpush.msra.mxu2 %v145_v4  ;;  %v137_v10 = vld [vmem:[#allocation5 + $0x10] sm:$0xff]  ;;  %v146_v15 = vld [vmem:[#allocation5 + $0x58] sm:$0xff]  ;;  %s3685_s15 = sshll.u32 %s4846_s2, 4  ;;  %s4847_s5 = smov [#allocation13]   ;;  %s3686_s15 = int_to_ptr.vmem [resolvable:$true] %s3685_s15 }
  0x21   :  { %v139_v6 = vld [vmem:[#allocation5 + $0x20] sm:$0xff]  ;;  %444 = vmatpush.msra.mxu0 %v4950_v5  ;;  %v4959_v14 = vld [vmem:[#allocation7 + $0x1f0] sm:$0xff]  ;;  %v144_v17 = vld [vmem:[#allocation5 + $0x48] sm:$0xff]  ;;  %432 = vmatpush.msra.mxu3 %v146_v15  ;;  %s3663_s12 = sshll.u32 %s4847_s5, 4  ;;  %s3665_s9 = sshll.u32 %s8653_s11, 4  ;;  %s3664_s12 = int_to_ptr.vmem [resolvable:$true] %s3663_s12  ;;  %s3666_s9 = int_to_ptr.hbm [resolvable:$true] %s3665_s9 }
  0x22   :  { %v4953_v8 = vld [vmem:[#allocation7 + $0x1a0] sm:$0xff]  ;;  %373 = vmatpush.msra.mxu1 %v139_v6  ;;  %413 = vmatpush.msra.mxu2 %v141_v7  ;;  %v4964_v18 = vld [vmem:[#allocation7 + $0x1d0] sm:$0xff]  ;;  %v142_v19 = vld [vmem:[#allocation5 + $0x38] sm:$0xff] }
  0x23   :  { %v135_v9 = vld [vmem:[#allocation5] sm:$0xff]  ;;  %445 = vmatpush.msra.mxu0 %v4953_v8  ;;  %v140_v21 = vld [vmem:[#allocation5 + $0x28] sm:$0xff]  ;;  %v4970_v22 = vld [vmem:[#allocation7 + $0x1b0] sm:$0xff]  ;;  %433 = vmatpush.msra.mxu3 %v142_v19 }
  0x24   :  { %v4956_v12 = vld [vmem:[#allocation7 + $0x180] sm:$0xff]  ;;  %374 = vmatpush.msra.mxu1 %v135_v9  ;;  %414 = vmatpush.msra.mxu2 %v137_v10  ;;  %v4972_v23 = vld [vmem:[#allocation2] sm:$0xff]  ;;  %v136_v25 = vld [vmem:[#allocation5 + $0x8] sm:$0xff] }
  0x25   :  { %v4961_v16 = vld [vmem:[#allocation7 + $0x160] sm:$0xff]  ;;  %446 = vmatpush.msra.mxu0 %v4956_v12  ;;  %v4978_v26 = vld [vmem:[#allocation7 + $0x190] sm:$0xff]  ;;  %v138_v27 = vld [vmem:[#allocation5 + $0x18] sm:$0xff]  ;;  %3709 = vmatmul.msk.f32.vlgmr.msra.gmra.mxu1 %vm355_vm0, %v4972_v23 }
  0x26   :  { %391 = vmatpush.msrb.mxu1 %v148_v13  ;;  %483 = vmatpush.msrb.mxu2 %v4959_v14  ;;  %v4967_v20 = vld [vmem:[#allocation7 + $0x140] sm:$0xff]  ;;  %v4985_v29 = vld [vmem:[#allocation7 + $0x1e8] sm:$0xff]  ;;  %v4988_v30 = vld [vmem:[#allocation7 + $0x170] sm:$0xff] }
  0x27   :  { %447 = vmatpush.msra.mxu0 %v4961_v16  ;;  %v4975_v24 = vld [vmem:[#allocation7 + $0x120] sm:$0xff]  ;;  %v4990_v31 = vld [vmem:[#allocation7 + $0x1f8] sm:$0xff]  ;;  %434 = vmatpush.msra.mxu3 %v138_v27  ;;  %v4995_v33 = vld [vmem:[#allocation7 + $0x1c8] sm:$0xff] }
  0x28   :  { %392 = vmatpush.msrb.mxu1 %v144_v17  ;;  %484 = vmatpush.msrb.mxu2 %v4964_v18  ;;  %v4983_v28 = vld [vmem:[#allocation7 + $0x100] sm:$0xff]  ;;  %v4999_v34 = vld [vmem:[#allocation7 + $0x150] sm:$0xff]  ;;  %v5001_v35 = vld [vmem:[#allocation7 + $0x1d8] sm:$0xff] }
  0x29   :  { %448 = vmatpush.msra.mxu0 %v4967_v20  ;;  %v4993_v32 = vld [vmem:[#allocation7 + $0xe0] sm:$0xff]  ;;  %503 = vmatpush.msrb.mxu3 %v4990_v31  ;;  %v5007_v37 = vld [vmem:[#allocation7 + $0x1a8] sm:$0xff]  ;;  %v5011_v38 = vld [vmem:[#allocation7 + $0x130] sm:$0xff] }
  0x2a   :  { %393 = vmatpush.msrb.mxu1 %v140_v21  ;;  %485 = vmatpush.msrb.mxu2 %v4970_v22  ;;  %v5005_v36 = vld [vmem:[#allocation7 + $0xc0] sm:$0xff]  ;;  %v5013_v39 = vld [vmem:[#allocation7 + $0x1b8] sm:$0xff]  ;;  %v5019_v41 = vld [vmem:[#allocation7 + $0x188] sm:$0xff] }
  0x2b   :  { %449 = vmatpush.msra.mxu0 %v4975_v24  ;;  %504 = vmatpush.msrb.mxu3 %v5001_v35  ;;  %v5017_v40 = vld [vmem:[#allocation7 + $0xa0] sm:$0xff]  ;;  %v5023_v42 = vld [vmem:[#allocation7 + $0x110] sm:$0xff]  ;;  %v5025_v43 = vld [vmem:[#allocation7 + $0x198] sm:$0xff] }
  0x2c   :  { %394 = vmatpush.msrb.mxu1 %v136_v25  ;;  %486 = vmatpush.msrb.mxu2 %v4978_v26  ;;  %v5029_v44 = vld [vmem:[#allocation7 + $0x80] sm:$0xff]  ;;  %v5031_v45 = vld [vmem:[#allocation7 + $0x168] sm:$0xff]  ;;  %v5035_v46 = vld [vmem:[#allocation7 + $0xf0] sm:$0xff] }
  0x2d   :  { %450 = vmatpush.msra.mxu0 %v4983_v28  ;;  %505 = vmatpush.msrb.mxu3 %v5013_v39  ;;  %v5037_v47 = vld [vmem:[#allocation7 + $0x178] sm:$0xff]  ;;  %v5041_v48 = vld [vmem:[#allocation7 + $0x60] sm:$0xff]  ;;  %v5043_v49 = vld [vmem:[#allocation7 + $0x148] sm:$0xff] }
  0x2e   :  { %463 = vmatpush.msra.mxu1 %v4985_v29  ;;  %487 = vmatpush.msrb.mxu2 %v4988_v30  ;;  %v5047_v50 = vld [vmem:[#allocation7 + $0xd0] sm:$0xff]  ;;  %v5049_v51 = vld [vmem:[#allocation7 + $0x158] sm:$0xff]  ;;  %v5053_v52 = vld [vmem:[#allocation7 + $0x40] sm:$0xff] }
  0x2f   :  { %451 = vmatpush.msra.mxu0 %v4993_v32  ;;  %506 = vmatpush.msrb.mxu3 %v5025_v43  ;;  %9300 = vst [vmem:[#allocation23_spill] sm:$0xff] %v5053_v52  ;;  %v5055_v53 = vld [vmem:[#allocation7 + $0x128] sm:$0xff]  ;;  %v5059_v54 = vld [vmem:[#allocation7 + $0xb0] sm:$0xff]  ;;  %v5061_v55 = vld [vmem:[#allocation7 + $0x138] sm:$0xff] }
  0x30   :  { %464 = vmatpush.msra.mxu1 %v4995_v33  ;;  %488 = vmatpush.msrb.mxu2 %v4999_v34  ;;  %v5065_v56 = vld [vmem:[#allocation7 + $0x20] sm:$0xff]  ;;  %v5067_v57 = vld [vmem:[#allocation7 + $0x108] sm:$0xff]  ;;  %v5071_v58 = vld [vmem:[#allocation7 + $0x90] sm:$0xff] }
  0x31   :  { %452 = vmatpush.msra.mxu0 %v5005_v36  ;;  %507 = vmatpush.msrb.mxu3 %v5037_v47  ;;  %9301 = vst [vmem:[#allocation24_spill] sm:$0xff] %v5065_v56  ;;  %v5073_v59 = vld [vmem:[#allocation7 + $0x118] sm:$0xff]  ;;  %v5077_v60 = vld [vmem:[#allocation7] sm:$0xff]  ;;  %v5081_v61 = vld [vmem:[#allocation7 + $0xe8] sm:$0xff] }
  0x32   :  { %465 = vmatpush.msra.mxu1 %v5007_v37  ;;  %489 = vmatpush.msrb.mxu2 %v5011_v38  ;;  %9302 = vst [vmem:[#allocation25_spill] sm:$0xff] %v5077_v60  ;;  %v5086_v62 = vld [vmem:[%s8649_s7] sm:$0x1]  ;;  %v5090_v63 = vld [vmem:[#allocation7 + $0x70] sm:$0xff]  ;;  %v5097_v1 = vld [vmem:[#allocation7 + $0xc8] sm:$0xff] }
  0x33   :  { %453 = vmatpush.msra.mxu0 %v5017_v40  ;;  %508 = vmatpush.msrb.mxu3 %v5049_v51  ;;  %v5092_v0 = vld [vmem:[#allocation7 + $0xf8] sm:$0xff]  ;;  %v5101_v3 = vld [vmem:[#allocation7 + $0x50] sm:$0xff]  ;;  %v5107_v6 = vld [vmem:[#allocation7 + $0xa8] sm:$0xff] }
  0x34   :  { %466 = vmatpush.msra.mxu1 %v5019_v41  ;;  %490 = vmatpush.msrb.mxu2 %v5023_v42  ;;  %9303 = vst [vmem:[#allocation26_spill] sm:$0xff] %v5101_v3  ;;  %v5103_v4 = vld [vmem:[#allocation7 + $0xd8] sm:$0xff]  ;;  %v5109_v7 = vld [vmem:[#allocation10 + $0x1e0] sm:$0xff]  ;;  %v5112_v9 = vld [vmem:[#allocation7 + $0x30] sm:$0xff] }
  0x35   :  { %454 = vmatpush.msra.mxu0 %v5029_v44  ;;  %509 = vmatpush.msrb.mxu3 %v5061_v55  ;;  %9304 = vst [vmem:[#allocation27_spill] sm:$0xff] %v5109_v7  ;;  %v5114_v10 = vld [vmem:[#allocation7 + $0xb8] sm:$0xff]  ;;  %v5120_v11 = vld [vmem:[#allocation7 + $0x88] sm:$0xff]  ;;  %v5122_v13 = vld [vmem:[#allocation10 + $0x1c0] sm:$0xff] }
  0x36   :  { %467 = vmatpush.msra.mxu1 %v5031_v45  ;;  %491 = vmatpush.msrb.mxu2 %v5035_v46  ;;  %9305 = vst [vmem:[#allocation28_spill] sm:$0xff] %v5112_v9  ;;  %v5125_v15 = vld [vmem:[#allocation7 + $0x10] sm:$0xff]  ;;  %v5130_v17 = vld [vmem:[#allocation7 + $0x98] sm:$0xff]  ;;  %v5132_v19 = vld [vmem:[#allocation7 + $0x68] sm:$0xff] }
  0x37   :  { %455 = vmatpush.msra.mxu0 %v5041_v48  ;;  %510 = vmatpush.msrb.mxu3 %v5073_v59  ;;  %9306 = vst [vmem:[#allocation29_spill] sm:$0xff] %v5122_v13  ;;  %v5136_v21 = vld [vmem:[#allocation10 + $0x1a0] sm:$0xff]  ;;  %v5141_v25 = vld [vmem:[#allocation7 + $0x78] sm:$0xff]  ;;  %v5143_v27 = vld [vmem:[#allocation7 + $0x48] sm:$0xff] }
  0x38   :  { %468 = vmatpush.msra.mxu1 %v5043_v49  ;;  %492 = vmatpush.msrb.mxu2 %v5047_v50  ;;  %9307 = vst [vmem:[#allocation30_spill] sm:$0xff] %v5125_v15 }
  0x39   :  { %456 = vmatpush.msra.mxu0 %v5053_v52  ;;  %3711 = vmatmul.msk.f32.vlgmr.msra.gmra.mxu2 %vm355_vm0, %v4972_v23  ;;  %9308 = vst [vmem:[#allocation31_spill] sm:$0xff] %v5136_v21  ;;  %v5173_v52 = vld [vmem:[#allocation7 + $0x18] sm:$0xff] }
  0x3a   :  { %469 = vmatpush.msra.mxu1 %v5055_v53  ;;  %493 = vmatpush.msrb.mxu2 %v5059_v54  ;;  %9309 = vst [vmem:[#allocation32_spill] sm:$0xff] %v5143_v27 }
  0x3b   :  { %457 = vmatpush.msra.mxu0 %v5065_v56  ;;  %511 = vmatpush.msrb.mxu3 %v5092_v0  ;;  %v5163_v56 = vld [vmem:[#allocation7 + $0x38] sm:$0xff]  ;;  %9319 = vst [vmem:[#allocation42_spill] sm:$0xff] %v5173_v52 }
  0x3c   :  { %470 = vmatpush.msra.mxu1 %v5067_v57  ;;  %494 = vmatpush.msrb.mxu2 %v5071_v58  ;;  %9316 = vst [vmem:[#allocation39_spill] sm:$0xff] %v5163_v56 }
  0x3d   :  { %458 = vmatpush.msra.mxu0 %v5077_v60  ;;  %3712 = vmatmul.msk.f32.vlgmr.msra.gmra.mxu3 %vm355_vm0, %v4972_v23  ;;  %v5149_v60 = vld [vmem:[#allocation10 + $0x180] sm:$0xff] }
  0x3e   :  { %471 = vmatpush.msra.mxu1 %v5081_v61  ;;  %459 = vmatmul.f32.vlgmr.msra.gmra.mxu0 %v5086_v62  ;;  %9311 = vst [vmem:[#allocation34_spill] sm:$0xff] %v5149_v60 }
  0x3f   :  { %495 = vmatpush.msrb.mxu2 %v5090_v63  ;;  %512 = vmatpush.msrb.mxu3 %v5103_v4 }
  0x40   :  { %472 = vmatpush.msra.mxu1 %v5097_v1  ;;  %590 = vmatpush.msrb.mxu0 %v5109_v7  ;;  %v5147_v7 = vld [vmem:[#allocation10 + $0x1f0] sm:$0xff] }
  0x41   :  { %496 = vmatpush.msrb.mxu2 %v5101_v3  ;;  %513 = vmatpush.msrb.mxu3 %v5114_v10  ;;  %9310 = vst [vmem:[#allocation33_spill] sm:$0xff] %v5147_v7  ;;  %v5165_v3 = vld [vmem:[#allocation7 + $0x8] sm:$0xff] }
  0x42   :  { %473 = vmatpush.msra.mxu1 %v5107_v6  ;;  %591 = vmatpush.msrb.mxu0 %v5122_v13  ;;  %v5152_v13 = vld [vmem:[#allocation7 + $0x58] sm:$0xff]  ;;  %9317 = vst [vmem:[#allocation40_spill] sm:$0xff] %v5165_v3 }
  0x43   :  { %497 = vmatpush.msrb.mxu2 %v5112_v9  ;;  %3710 = vmatmul.msk.f32.vlgmr.msrb.gmra.mxu1 %vm355_vm0, %v4972_v23  ;;  %9312 = vst [vmem:[#allocation35_spill] sm:$0xff] %v5152_v13  ;;  %v5154_v9 = vld [vmem:[#allocation7 + $0x28] sm:$0xff]  ;;  %v5159_v23 = vld [vmem:[#allocation10 + $0x1d0] sm:$0xff] }
  0x44   :  { %474 = vmatpush.msra.mxu1 %v5120_v11  ;;  %514 = vmatpush.msrb.mxu3 %v5130_v17  ;;  %9313 = vst [vmem:[#allocation36_spill] sm:$0xff] %v5154_v9 }
  0x45   :  { %498 = vmatpush.msrb.mxu2 %v5125_v15  ;;  %592 = vmatpush.msrb.mxu0 %v5136_v21  ;;  %9314 = vst [vmem:[#allocation37_spill] sm:$0xff] %v5159_v23  ;;  %v5161_v15 = vld [vmem:[#allocation10 + $0x160] sm:$0xff]  ;;  %v5171_v21 = vld [vmem:[#allocation10 + $0x1b0] sm:$0xff] }
  0x46   :  { %475 = vmatpush.msra.mxu1 %v5132_v19  ;;  %499 = vmatmul.f32.vlgmr.msrb.gmra.mxu2 %v5086_v62  ;;  %9315 = vst [vmem:[#allocation38_spill] sm:$0xff] %v5161_v15 }
  0x47   :  { %515 = vmatpush.msrb.mxu3 %v5141_v25  ;;  %630 = vmatpush.msra.mxu2 %v5147_v7  ;;  %9318 = vst [vmem:[#allocation41_spill] sm:$0xff] %v5171_v21  ;;  %v5181_v7 = vld [vmem:[#allocation10 + $0x190] sm:$0xff] }
  0x48   :  { %476 = vmatpush.msra.mxu1 %v5143_v27  ;;  %593 = vmatpush.msrb.mxu0 %v5149_v60  ;;  %v5175_v27 = vld [vmem:[#allocation10 + $0x1e8] sm:$0xff]  ;;  %9321 = vst [vmem:[#allocation44_spill] sm:$0xff] %v5181_v7  ;;  %v5184_v60 = vld [vmem:[#allocation10 + $0x1f8] sm:$0xff] }
  0x49   :  { %516 = vmatpush.msrb.mxu3 %v5152_v13  ;;  %9320 = vst [vmem:[#allocation43_spill] sm:$0xff] %v5175_v27  ;;  %631 = vmatpush.msra.mxu2 %v5159_v23  ;;  %v5191_v23 = vld [vmem:[#allocation10 + $0x170] sm:$0xff] }
  0x4a   :  { %477 = vmatpush.msra.mxu1 %v5154_v9  ;;  %594 = vmatpush.msrb.mxu0 %v5161_v15  ;;  %9322 = vst [vmem:[#allocation45_spill] sm:$0xff] %v5184_v60  ;;  %v5186_v9 = vld [vmem:[#allocation10 + $0x1c8] sm:$0xff]  ;;  %v5194_v15 = vld [vmem:[#allocation10 + $0x1d8] sm:$0xff]  ;;  %v5519_v13 = vld [vmem:[#allocation8 + $0x50] sm:$0xff] }
  0x4b   :  { %517 = vmatpush.msrb.mxu3 %v5163_v56  ;;  %9323 = vst [vmem:[#allocation46_spill] sm:$0xff] %v5186_v9  ;;  %632 = vmatpush.msra.mxu2 %v5171_v21  ;;  %v5201_v56 = vld [vmem:[#allocation10 + $0x1b8] sm:$0xff]  ;;  %v5203_v21 = vld [vmem:[#allocation10 + $0x188] sm:$0xff] }
  0x4c   :  { %478 = vmatpush.msra.mxu1 %v5165_v3  ;;  %9324 = vst [vmem:[#allocation47_spill] sm:$0xff] %v5191_v23  ;;  %v5196_v3 = vld [vmem:[#allocation10 + $0x1a8] sm:$0xff] }
  0x4d   :  { %479 = vmatmul.f32.vlgmr.msra.gmra.mxu1 %v5086_v62  ;;  %518 = vmatpush.msrb.mxu3 %v5173_v52  ;;  %9325 = vst [vmem:[#allocation48_spill] sm:$0xff] %v5194_v15  ;;  %v5263_v52 = vld [vmem:[#allocation10 + $0xc0] sm:$0xff] }
  0x4e   :  { %610 = vmatpush.msrb.mxu1 %v5175_v27  ;;  %519 = vmatmul.f32.vlgmr.msrb.gmra.mxu3 %v5086_v62  ;;  %9326 = vst [vmem:[#allocation49_spill] sm:$0xff] %v5196_v3  ;;  %v5208_v62 = vld [vmem:[#allocation10 + $0x198] sm:$0xff]  ;;  %v5210_v27 = vld [vmem:[#allocation10 + $0x168] sm:$0xff] }
  0x4f   :  { %633 = vmatpush.msra.mxu2 %v5181_v7  ;;  %650 = vmatpush.msra.mxu3 %v5184_v60  ;;  %9327 = vst [vmem:[#allocation50_spill] sm:$0xff] %v5201_v56  ;;  %v5214_v7 = vld [vmem:[#allocation10 + $0x178] sm:$0xff] }
  0x50   :  { %611 = vmatpush.msrb.mxu1 %v5186_v9  ;;  %9328 = vst [vmem:[#allocation51_spill] sm:$0xff] %v5203_v21  ;;  %v5231_v9 = vld [vmem:[#allocation10 + $0x128] sm:$0xff]  ;;  %v5247_v60 = vld [vmem:[#allocation10 + $0x118] sm:$0xff] }
  0x51   :  { %634 = vmatpush.msra.mxu2 %v5191_v23  ;;  %651 = vmatpush.msra.mxu3 %v5194_v15  ;;  %9329 = vst [vmem:[#allocation52_spill] sm:$0xff] %v5208_v62  ;;  %v5219_v23 = vld [vmem:[#allocation10 + $0x140] sm:$0xff]  ;;  %v5221_v15 = vld [vmem:[#allocation10 + $0x148] sm:$0xff] }
  0x52   :  { %612 = vmatpush.msrb.mxu1 %v5196_v3  ;;  %9330 = vst [vmem:[#allocation53_spill] sm:$0xff] %v5210_v27  ;;  %v5223_v3 = vld [vmem:[#allocation10 + $0x150] sm:$0xff]  ;;  %595 = vmatpush.msrb.mxu0 %v5219_v23 }
  0x53   :  { %652 = vmatpush.msra.mxu3 %v5201_v56  ;;  %9331 = vst [vmem:[#allocation54_spill] sm:$0xff] %v5214_v7  ;;  %v5227_v56 = vld [vmem:[#allocation10 + $0x158] sm:$0xff]  ;;  %635 = vmatpush.msra.mxu2 %v5223_v3 }
  0x54   :  { %613 = vmatpush.msrb.mxu1 %v5203_v21  ;;  %9332 = vst [vmem:[#allocation55_spill] sm:$0xff] %v5219_v23  ;;  %v5229_v21 = vld [vmem:[#allocation10 + $0x120] sm:$0xff]  ;;  %v5245_v23 = vld [vmem:[#allocation10 + $0x110] sm:$0xff] }
  0x55   :  { %653 = vmatpush.msra.mxu3 %v5208_v62  ;;  %9333 = vst [vmem:[#allocation56_spill] sm:$0xff] %v5221_v15  ;;  %v5239_v62 = vld [vmem:[#allocation10 + $0x100] sm:$0xff]  ;;  %596 = vmatpush.msrb.mxu0 %v5229_v21 }
  0x56   :  { %614 = vmatpush.msrb.mxu1 %v5210_v27  ;;  %9334 = vst [vmem:[#allocation57_spill] sm:$0xff] %v5223_v3  ;;  %v5237_v27 = vld [vmem:[#allocation10 + $0x138] sm:$0xff]  ;;  %v5253_v3 = vld [vmem:[#allocation10 + $0xe8] sm:$0xff] }
  0x57   :  { %654 = vmatpush.msra.mxu3 %v5214_v7  ;;  %9335 = vst [vmem:[#allocation58_spill] sm:$0xff] %v5227_v56  ;;  %v5235_v7 = vld [vmem:[#allocation10 + $0x130] sm:$0xff]  ;;  %597 = vmatpush.msrb.mxu0 %v5239_v62 }
  0x58   :  { %615 = vmatpush.msrb.mxu1 %v5221_v15  ;;  %9336 = vst [vmem:[#allocation59_spill] sm:$0xff] %v5229_v21  ;;  %v5243_v15 = vld [vmem:[#allocation10 + $0x108] sm:$0xff]  ;;  %636 = vmatpush.msra.mxu2 %v5235_v7  ;;  %v5257_v21 = vld [vmem:[#allocation10 + $0xf0] sm:$0xff] }
  0x59   :  { %9337 = vst [vmem:[#allocation60_spill] sm:$0xff] %v5231_v9  ;;  %655 = vmatpush.msra.mxu3 %v5227_v56  ;;  %v5251_v56 = vld [vmem:[#allocation10 + $0xe0] sm:$0xff] }
  0x5a   :  { %9338 = vst [vmem:[#allocation61_spill] sm:$0xff] %v5235_v7  ;;  %616 = vmatpush.msrb.mxu1 %v5231_v9  ;;  %v5259_v9 = vld [vmem:[#allocation10 + $0xf8] sm:$0xff]  ;;  %637 = vmatpush.msra.mxu2 %v5245_v23  ;;  %v5265_v7 = vld [vmem:[#allocation10 + $0xc8] sm:$0xff] }
  0x5b   :  { %9339 = vst [vmem:[#allocation62_spill] sm:$0xff] %v5237_v27  ;;  %656 = vmatpush.msra.mxu3 %v5237_v27  ;;  %598 = vmatpush.msrb.mxu0 %v5251_v56  ;;  %v5269_v27 = vld [vmem:[#allocation10 + $0xd0] sm:$0xff] }
  0x5c   :  { %9340 = vst [vmem:[#allocation63_spill] sm:$0xff] %v5239_v62  ;;  %617 = vmatpush.msrb.mxu1 %v5243_v15  ;;  %v5271_v62 = vld [vmem:[#allocation10 + $0xd8] sm:$0xff]  ;;  %638 = vmatpush.msra.mxu2 %v5257_v21 }
  0x5d   :  { %9341 = vst [vmem:[#allocation64_spill] sm:$0xff] %v5243_v15  ;;  %657 = vmatpush.msra.mxu3 %v5247_v60  ;;  %v5275_v15 = vld [vmem:[#allocation10 + $0xa0] sm:$0xff]  ;;  %599 = vmatpush.msrb.mxu0 %v5263_v52 }
  0x5e   :  { %9342 = vst [vmem:[#allocation65_spill] sm:$0xff] %v5245_v23  ;;  %618 = vmatpush.msrb.mxu1 %v5253_v3  ;;  %v5277_v23 = vld [vmem:[#allocation10 + $0xa8] sm:$0xff]  ;;  %639 = vmatpush.msra.mxu2 %v5269_v27 }
  0x5f   :  { %9343 = vst [vmem:[#allocation66_spill] sm:$0xff] %v5247_v60  ;;  %658 = vmatpush.msra.mxu3 %v5259_v9  ;;  %v5281_v60 = vld [vmem:[#allocation10 + $0xb0] sm:$0xff]  ;;  %600 = vmatpush.msrb.mxu0 %v5275_v15 }
  0x60   :  { %9344 = vst [vmem:[#allocation67_spill] sm:$0xff] %v5251_v56  ;;  %619 = vmatpush.msrb.mxu1 %v5265_v7  ;;  %v5283_v56 = vld [vmem:[#allocation10 + $0xb8] sm:$0xff]  ;;  %640 = vmatpush.msra.mxu2 %v5281_v60 }
  0x61   :  { %9345 = vst [vmem:[#allocation68_spill] sm:$0xff] %v5253_v3  ;;  %659 = vmatpush.msra.mxu3 %v5271_v62  ;;  %v5287_v3 = vld [vmem:[#allocation10 + $0x80] sm:$0xff] }
  0x62   :  { %9346 = vst [vmem:[#allocation69_spill] sm:$0xff] %v5257_v21  ;;  %v5289_v21 = vld [vmem:[#allocation10 + $0x88] sm:$0xff]  ;;  %620 = vmatpush.msrb.mxu1 %v5277_v23  ;;  %601 = vmatpush.msrb.mxu0 %v5287_v3 }
  0x63   :  { %9347 = vst [vmem:[#allocation70_spill] sm:$0xff] %v5259_v9  ;;  %v5293_v9 = vld [vmem:[#allocation10 + $0x90] sm:$0xff]  ;;  %660 = vmatpush.msra.mxu3 %v5283_v56 }
  0x64   :  { %9348 = vst [vmem:[#allocation71_spill] sm:$0xff] %v5263_v52  ;;  %v5295_v52 = vld [vmem:[#allocation10 + $0x98] sm:$0xff]  ;;  %621 = vmatpush.msrb.mxu1 %v5289_v21  ;;  %641 = vmatpush.msra.mxu2 %v5293_v9 }
  0x65   :  { %9349 = vst [vmem:[#allocation72_spill] sm:$0xff] %v5265_v7  ;;  %v5299_v7 = vld [vmem:[#allocation10 + $0x60] sm:$0xff]  ;;  %661 = vmatpush.msra.mxu3 %v5295_v52 }
  0x66   :  { %9350 = vst [vmem:[#allocation73_spill] sm:$0xff] %v5269_v27  ;;  %v5301_v27 = vld [vmem:[#allocation10 + $0x68] sm:$0xff]  ;;  %602 = vmatpush.msrb.mxu0 %v5299_v7 }
  0x67   :  { %9351 = vst [vmem:[#allocation74_spill] sm:$0xff] %v5271_v62  ;;  %v5305_v62 = vld [vmem:[#allocation10 + $0x70] sm:$0xff]  ;;  %622 = vmatpush.msrb.mxu1 %v5301_v27 }
  0x68   :  { %9352 = vst [vmem:[#allocation75_spill] sm:$0xff] %v5275_v15  ;;  %v5307_v15 = vld [vmem:[#allocation10 + $0x78] sm:$0xff]  ;;  %642 = vmatpush.msra.mxu2 %v5305_v62 }
  0x69   :  { %9353 = vst [vmem:[#allocation76_spill] sm:$0xff] %v5277_v23  ;;  %v5311_v23 = vld [vmem:[#allocation10 + $0x40] sm:$0xff]  ;;  %662 = vmatpush.msra.mxu3 %v5307_v15 }
  0x6a   :  { %9354 = vst [vmem:[#allocation77_spill] sm:$0xff] %v5281_v60  ;;  %v5313_v60 = vld [vmem:[#allocation10 + $0x48] sm:$0xff]  ;;  %603 = vmatpush.msrb.mxu0 %v5311_v23 }
  0x6b   :  { %9355 = vst [vmem:[#allocation78_spill] sm:$0xff] %v5283_v56  ;;  %v5317_v56 = vld [vmem:[#allocation10 + $0x50] sm:$0xff]  ;;  %623 = vmatpush.msrb.mxu1 %v5313_v60 }
  0x6c   :  { %9356 = vst [vmem:[#allocation79_spill] sm:$0xff] %v5287_v3  ;;  %v5319_v3 = vld [vmem:[#allocation10 + $0x58] sm:$0xff]  ;;  %643 = vmatpush.msra.mxu2 %v5317_v56 }
  0x6d   :  { %9357 = vst [vmem:[#allocation80_spill] sm:$0xff] %v5289_v21  ;;  %663 = vmatpush.msra.mxu3 %v5319_v3 }
  0x6e   :  { %9358 = vst [vmem:[#allocation81_spill] sm:$0xff] %v5293_v9  ;;  %v5381_v9 = vld [vmem:[#allocation8 + $0x1b8] sm:$0xff] }
  0x6f   :  { %9359 = vst [vmem:[#allocation82_spill] sm:$0xff] %v5295_v52  ;;  %v5327_v52 = vld [vmem:[#allocation10 + $0x20] sm:$0xff] }
  0x70   :  { %9360 = vst [vmem:[#allocation83_spill] sm:$0xff] %v5299_v7  ;;  %v5329_v7 = vld [vmem:[#allocation10 + $0x28] sm:$0xff]  ;;  %604 = vmatpush.msrb.mxu0 %v5327_v52 }
  0x71   :  { %9361 = vst [vmem:[#allocation84_spill] sm:$0xff] %v5301_v27  ;;  %v5331_v27 = vld [vmem:[#allocation10 + $0x30] sm:$0xff]  ;;  %624 = vmatpush.msrb.mxu1 %v5329_v7 }
  0x72   :  { %9362 = vst [vmem:[#allocation85_spill] sm:$0xff] %v5305_v62  ;;  %v5335_v62 = vld [vmem:[#allocation10 + $0x38] sm:$0xff]  ;;  %644 = vmatpush.msra.mxu2 %v5331_v27 }
  0x73   :  { %9363 = vst [vmem:[#allocation86_spill] sm:$0xff] %v5307_v15  ;;  %664 = vmatpush.msra.mxu3 %v5335_v62  ;;  %v5365_v15 = vld [vmem:[#allocation8 + $0x1d0] sm:$0xff] }
  0x74   :  { %9364 = vst [vmem:[#allocation87_spill] sm:$0xff] %v5311_v23  ;;  %v5347_v23 = vld [vmem:[#allocation10 + $0x18] sm:$0xff] }
  0x75   :  { %9365 = vst [vmem:[#allocation88_spill] sm:$0xff] %v5313_v60  ;;  %v5339_v60 = vld [vmem:[#allocation10] sm:$0xff]  ;;  %665 = vmatpush.msra.mxu3 %v5347_v23 }
  0x76   :  { %9366 = vst [vmem:[#allocation89_spill] sm:$0xff] %v5317_v56  ;;  %v5341_v56 = vld [vmem:[#allocation10 + $0x8] sm:$0xff]  ;;  %605 = vmatpush.msrb.mxu0 %v5339_v60 }
  0x77   :  { %9367 = vst [vmem:[#allocation90_spill] sm:$0xff] %v5319_v3  ;;  %v5343_v3 = vld [vmem:[#allocation10 + $0x10] sm:$0xff]  ;;  %625 = vmatpush.msrb.mxu1 %v5341_v56 }
  0x78   :  { %9368 = vst [vmem:[#allocation91_spill] sm:$0xff] %v5327_v52  ;;  %v5349_v52 = vld [vmem:[#allocation8 + $0x1e0] sm:$0xff]  ;;  %645 = vmatpush.msra.mxu2 %v5343_v3 }
  0x79   :  { %9369 = vst [vmem:[#allocation92_spill] sm:$0xff] %v5329_v7  ;;  %v5351_v7 = vld [vmem:[#allocation8 + $0x1e8] sm:$0xff]  ;;  %670 = vmatpush.msra.mxu0 %v5349_v52 }
  0x7a   :  { %9370 = vst [vmem:[#allocation93_spill] sm:$0xff] %v5331_v27  ;;  %v5357_v27 = vld [vmem:[#allocation8 + $0x1f8] sm:$0xff]  ;;  %690 = vmatpush.msra.mxu1 %v5351_v7 }
  0x7b   :  { %9371 = vst [vmem:[#allocation94_spill] sm:$0xff] %v5335_v62  ;;  %v5355_v62 = vld [vmem:[#allocation8 + $0x1f0] sm:$0xff]  ;;  %730 = vmatpush.msrb.mxu3 %v5357_v27 }
  0x7c   :  { %9372 = vst [vmem:[#allocation95_spill] sm:$0xff] %v5339_v60  ;;  %v5361_v60 = vld [vmem:[#allocation8 + $0x1c0] sm:$0xff]  ;;  %710 = vmatpush.msrb.mxu2 %v5355_v62 }
  0x7d   :  { %9373 = vst [vmem:[#allocation96_spill] sm:$0xff] %v5341_v56  ;;  %v5363_v56 = vld [vmem:[#allocation8 + $0x1c8] sm:$0xff]  ;;  %671 = vmatpush.msra.mxu0 %v5361_v60 }
  0x7e   :  { %9374 = vst [vmem:[#allocation97_spill] sm:$0xff] %v5343_v3  ;;  %v5369_v3 = vld [vmem:[#allocation8 + $0x1d8] sm:$0xff]  ;;  %691 = vmatpush.msra.mxu1 %v5363_v56  ;;  %711 = vmatpush.msrb.mxu2 %v5365_v15 }
  0x7f   :  { %9375 = vst [vmem:[#allocation98_spill] sm:$0xff] %v5347_v23  ;;  %v5373_v23 = vld [vmem:[#allocation8 + $0x1a0] sm:$0xff]  ;;  %731 = vmatpush.msrb.mxu3 %v5369_v3 }
  0x80   :  { %9376 = vst [vmem:[#allocation99_spill] sm:$0xff] %v5349_v52  ;;  %v5375_v52 = vld [vmem:[#allocation8 + $0x1a8] sm:$0xff]  ;;  %672 = vmatpush.msra.mxu0 %v5373_v23 }
  0x81   :  { %9377 = vst [vmem:[#allocation100_spill] sm:$0xff] %v5351_v7  ;;  %v5377_v7 = vld [vmem:[#allocation8 + $0x1b0] sm:$0xff]  ;;  %692 = vmatpush.msra.mxu1 %v5375_v52  ;;  %732 = vmatpush.msrb.mxu3 %v5381_v9 }
  0x82   :  { %9378 = vst [vmem:[#allocation101_spill] sm:$0xff] %v5355_v62  ;;  %712 = vmatpush.msrb.mxu2 %v5377_v7  ;;  %v5393_v62 = vld [vmem:[#allocation8 + $0x198] sm:$0xff] }
  0x83   :  { %9379 = vst [vmem:[#allocation102_spill] sm:$0xff] %v5357_v27  ;;  %v5385_v27 = vld [vmem:[#allocation8 + $0x180] sm:$0xff]  ;;  %733 = vmatpush.msrb.mxu3 %v5393_v62 }
  0x84   :  { %9380 = vst [vmem:[#allocation103_spill] sm:$0xff] %v5361_v60  ;;  %v5387_v60 = vld [vmem:[#allocation8 + $0x188] sm:$0xff]  ;;  %673 = vmatpush.msra.mxu0 %v5385_v27 }
  0x85   :  { %9381 = vst [vmem:[#allocation104_spill] sm:$0xff] %v5363_v56  ;;  %v5389_v56 = vld [vmem:[#allocation8 + $0x190] sm:$0xff]  ;;  %693 = vmatpush.msra.mxu1 %v5387_v60 }
  0x86   :  { %9382 = vst [vmem:[#allocation105_spill] sm:$0xff] %v5365_v15  ;;  %713 = vmatpush.msrb.mxu2 %v5389_v56  ;;  %v5405_v15 = vld [vmem:[#allocation8 + $0x178] sm:$0xff] }
  0x87   :  { %9383 = vst [vmem:[#allocation106_spill] sm:$0xff] %v5369_v3  ;;  %v5397_v3 = vld [vmem:[#allocation8 + $0x160] sm:$0xff]  ;;  %734 = vmatpush.msrb.mxu3 %v5405_v15 }
  0x88   :  { %9384 = vst [vmem:[#allocation107_spill] sm:$0xff] %v5373_v23  ;;  %v5399_v23 = vld [vmem:[#allocation8 + $0x168] sm:$0xff]  ;;  %674 = vmatpush.msra.mxu0 %v5397_v3 }
  0x89   :  { %9385 = vst [vmem:[#allocation108_spill] sm:$0xff] %v5375_v52  ;;  %v5401_v52 = vld [vmem:[#allocation8 + $0x170] sm:$0xff]  ;;  %694 = vmatpush.msra.mxu1 %v5399_v23 }
  0x8a   :  { %9386 = vst [vmem:[#allocation109_spill] sm:$0xff] %v5377_v7  ;;  %714 = vmatpush.msrb.mxu2 %v5401_v52  ;;  %v5417_v7 = vld [vmem:[#allocation8 + $0x158] sm:$0xff] }
  0x8b   :  { %9387 = vst [vmem:[#allocation110_spill] sm:$0xff] %v5381_v9  ;;  %v5409_v9 = vld [vmem:[#allocation8 + $0x140] sm:$0xff]  ;;  %735 = vmatpush.msrb.mxu3 %v5417_v7 }
  0x8c   :  { %9388 = vst [vmem:[#allocation111_spill] sm:$0xff] %v5385_v27  ;;  %v5411_v27 = vld [vmem:[#allocation8 + $0x148] sm:$0xff]  ;;  %675 = vmatpush.msra.mxu0 %v5409_v9 }
  0x8d   :  { %9389 = vst [vmem:[#allocation112_spill] sm:$0xff] %v5387_v60  ;;  %v5413_v60 = vld [vmem:[#allocation8 + $0x150] sm:$0xff]  ;;  %695 = vmatpush.msra.mxu1 %v5411_v27 }
  0x8e   :  { %9390 = vst [vmem:[#allocation113_spill] sm:$0xff] %v5389_v56  ;;  %715 = vmatpush.msrb.mxu2 %v5413_v60  ;;  %v5429_v56 = vld [vmem:[#allocation8 + $0x138] sm:$0xff] }
  0x8f   :  { %9391 = vst [vmem:[#allocation114_spill] sm:$0xff] %v5393_v62  ;;  %v5421_v62 = vld [vmem:[#allocation8 + $0x120] sm:$0xff]  ;;  %736 = vmatpush.msrb.mxu3 %v5429_v56 }
  0x90   :  { %9392 = vst [vmem:[#allocation115_spill] sm:$0xff] %v5397_v3  ;;  %v5423_v3 = vld [vmem:[#allocation8 + $0x128] sm:$0xff]  ;;  %676 = vmatpush.msra.mxu0 %v5421_v62 }
  0x91   :  { %9393 = vst [vmem:[#allocation116_spill] sm:$0xff] %v5399_v23  ;;  %v5425_v23 = vld [vmem:[#allocation8 + $0x130] sm:$0xff]  ;;  %696 = vmatpush.msra.mxu1 %v5423_v3 }
  0x92   :  { %9394 = vst [vmem:[#allocation117_spill] sm:$0xff] %v5401_v52  ;;  %716 = vmatpush.msrb.mxu2 %v5425_v23  ;;  %v5441_v52 = vld [vmem:[#allocation8 + $0x118] sm:$0xff] }
  0x93   :  { %9395 = vst [vmem:[#allocation118_spill] sm:$0xff] %v5405_v15  ;;  %v5433_v15 = vld [vmem:[#allocation8 + $0x100] sm:$0xff]  ;;  %737 = vmatpush.msrb.mxu3 %v5441_v52 }
  0x94   :  { %9396 = vst [vmem:[#allocation119_spill] sm:$0xff] %v5409_v9  ;;  %v5435_v9 = vld [vmem:[#allocation8 + $0x108] sm:$0xff]  ;;  %677 = vmatpush.msra.mxu0 %v5433_v15 }
  0x95   :  { %9397 = vst [vmem:[#allocation120_spill] sm:$0xff] %v5411_v27  ;;  %v5437_v27 = vld [vmem:[#allocation8 + $0x110] sm:$0xff]  ;;  %697 = vmatpush.msra.mxu1 %v5435_v9 }
  0x96   :  { %9398 = vst [vmem:[#allocation121_spill] sm:$0xff] %v5413_v60  ;;  %717 = vmatpush.msrb.mxu2 %v5437_v27  ;;  %v5453_v60 = vld [vmem:[#allocation8 + $0xf8] sm:$0xff] }
  0x97   :  { %9399 = vst [vmem:[#allocation122_spill] sm:$0xff] %v5417_v7  ;;  %v5445_v7 = vld [vmem:[#allocation8 + $0xe0] sm:$0xff]  ;;  %738 = vmatpush.msrb.mxu3 %v5453_v60 }
  0x98   :  { %9400 = vst [vmem:[#allocation123_spill] sm:$0xff] %v5421_v62  ;;  %v5447_v62 = vld [vmem:[#allocation8 + $0xe8] sm:$0xff]  ;;  %678 = vmatpush.msra.mxu0 %v5445_v7 }
  0x99   :  { %9401 = vst [vmem:[#allocation124_spill] sm:$0xff] %v5423_v3  ;;  %v5449_v3 = vld [vmem:[#allocation8 + $0xf0] sm:$0xff]  ;;  %698 = vmatpush.msra.mxu1 %v5447_v62 }
  0x9a   :  { %9402 = vst [vmem:[#allocation125_spill] sm:$0xff] %v5425_v23  ;;  %718 = vmatpush.msrb.mxu2 %v5449_v3  ;;  %v5493_v23 = vld [vmem:[#allocation8 + $0x90] sm:$0xff] }
  0x9b   :  { %9403 = vst [vmem:[#allocation126_spill] sm:$0xff] %v5429_v56  ;;  %v5458_v56 = vld [vmem:[%s8645_s3] sm:$0xf] }
  0x9c   :  { %9404 = vst [vmem:[#allocation127_spill] sm:$0xff] %v5433_v15  ;;  %v5472_v15 = vld [vmem:[#allocation8 + $0xd8] sm:$0xff] }
  0x9d   :  { %9405 = vst [vmem:[#allocation128_spill] sm:$0xff] %v5435_v9  ;;  %v5464_v9 = vld [vmem:[#allocation8 + $0xc0] sm:$0xff]  ;;  %739 = vmatpush.msrb.mxu3 %v5472_v15 }
  0x9e   :  { %9406 = vst [vmem:[#allocation129_spill] sm:$0xff] %v5437_v27  ;;  %v5466_v27 = vld [vmem:[#allocation8 + $0xc8] sm:$0xff]  ;;  %679 = vmatpush.msra.mxu0 %v5464_v9 }
  0x9f   :  { %9407 = vst [vmem:[#allocation130_spill] sm:$0xff] %v5441_v52  ;;  %v5468_v52 = vld [vmem:[#allocation8 + $0xd0] sm:$0xff]  ;;  %699 = vmatpush.msra.mxu1 %v5466_v27 }
  0xa0   :  { %9408 = vst [vmem:[#allocation131_spill] sm:$0xff] %v5445_v7  ;;  %719 = vmatpush.msrb.mxu2 %v5468_v52  ;;  %v347_v7 = vperm.slane %v5458_v56, 0 }
  0xa1   :  { %9409 = vst [vmem:[#allocation132_spill] sm:$0xff] %v5447_v62  ;;  %v5476_v62 = vld [vmem:[#allocation8 + $0xa0] sm:$0xff] }
  0xa2   :  { %9410 = vst [vmem:[#allocation133_spill] sm:$0xff] %v5449_v3  ;;  %v5478_v3 = vld [vmem:[#allocation8 + $0xa8] sm:$0xff]  ;;  %680 = vmatpush.msra.mxu0 %v5476_v62 }
  0xa3   :  { %9411 = vst [vmem:[#allocation134_spill] sm:$0xff] %v5453_v60  ;;  %v5480_v60 = vld [vmem:[#allocation8 + $0xb0] sm:$0xff]  ;;  %700 = vmatpush.msra.mxu1 %v5478_v3 }
  0xa4   :  { %9412 = vst [vmem:[#allocation135_spill] sm:$0xff] %v5464_v9  ;;  %v5485_v9 = vld [vmem:[#allocation8 + $0xb8] sm:$0xff]  ;;  %720 = vmatpush.msrb.mxu2 %v5480_v60 }
  0xa5   :  { %9413 = vst [vmem:[#allocation136_spill] sm:$0xff] %v5466_v27  ;;  %v376_v27 = vpop.f32.mrf.mxu1  ;;  %740 = vmatpush.msrb.mxu3 %v5485_v9 }
  0xa6   :  { %9414 = vst [vmem:[#allocation137_spill] sm:$0xff] %v5468_v52  ;;  %v5491_v52 = vld [vmem:[#allocation8 + $0x88] sm:$0xff]  ;;  %721 = vmatpush.msrb.mxu2 %v5493_v23  ;;  %v5507_v21 = vadd.f32 %v376_v27, %v347_v7  ;;  %v5524_v27 = vld [vmem:[#allocation8 + $0x58] sm:$0xff] }
  0xa7   :  { %9415 = vst [vmem:[#allocation138_spill] sm:$0xff] %v5472_v15  ;;  %v5489_v15 = vld [vmem:[#allocation8 + $0x80] sm:$0xff]  ;;  %701 = vmatpush.msra.mxu1 %v5491_v52 }
  0xa8   :  { %9416 = vst [vmem:[#allocation139_spill] sm:$0xff] %v5476_v62  ;;  %681 = vmatpush.msra.mxu0 %v5489_v15  ;;  %v5497_v62 = vld [vmem:[#allocation8 + $0x98] sm:$0xff] }
  0xa9   :  { %9417 = vst [vmem:[#allocation140_spill] sm:$0xff] %v5478_v3  ;;  %741 = vmatpush.msrb.mxu3 %v5497_v62  ;;  %v5501_v3 = vld [vmem:[#allocation8 + $0x60] sm:$0xff] }
  0xaa   :  { %9418 = vst [vmem:[#allocation141_spill] sm:$0xff] %v5480_v60  ;;  %v5503_v60 = vld [vmem:[#allocation8 + $0x68] sm:$0xff]  ;;  %682 = vmatpush.msra.mxu0 %v5501_v3 }
  0xab   :  { %9419 = vst [vmem:[#allocation142_spill] sm:$0xff] %v5485_v9  ;;  %v5505_v9 = vld [vmem:[#allocation8 + $0x70] sm:$0xff]  ;;  %702 = vmatpush.msra.mxu1 %v5503_v60 }
  0xac   :  { %9420 = vst [vmem:[#allocation143_spill] sm:$0xff] %v5489_v15  ;;  %v5511_v15 = vld [vmem:[#allocation8 + $0x78] sm:$0xff]  ;;  %722 = vmatpush.msrb.mxu2 %v5505_v9 }
  0xad   :  { %9421 = vst [vmem:[#allocation144_spill] sm:$0xff] %v5491_v52  ;;  %742 = vmatpush.msrb.mxu3 %v5511_v15 }
  0xae   :  { %9422 = vst [vmem:[#allocation145_spill] sm:$0xff] %v5493_v23  ;;  %v5517_v23 = vld [vmem:[#allocation8 + $0x48] sm:$0xff]  ;;  %723 = vmatpush.msrb.mxu2 %v5519_v13 }
  0xaf   :  { %9423 = vst [vmem:[#allocation146_spill] sm:$0xff] %v5497_v62  ;;  %v5515_v62 = vld [vmem:[#allocation8 + $0x40] sm:$0xff]  ;;  %703 = vmatpush.msra.mxu1 %v5517_v23  ;;  %743 = vmatpush.msrb.mxu3 %v5524_v27 }
  0xb0   :  { %9424 = vst [vmem:[#allocation147_spill] sm:$0xff] %v5501_v3  ;;  %683 = vmatpush.msra.mxu0 %v5515_v62 }
  0xb1   :  { %9425 = vst [vmem:[#allocation148_spill] sm:$0xff] %v5503_v60  ;;  %v5532_v60 = vld [vmem:[#allocation8 + $0x30] sm:$0xff] }
  0xb2   :  { %9426 = vst [vmem:[#allocation149_spill] sm:$0xff] %v5505_v9  ;;  %v5528_v9 = vld [vmem:[#allocation8 + $0x20] sm:$0xff]  ;;  %724 = vmatpush.msrb.mxu2 %v5532_v60 }
  0xb3   :  { %9427 = vst [vmem:[#allocation150_spill] sm:$0xff] %v5507_v21  ;;  %684 = vmatpush.msra.mxu0 %v5528_v9 }
  0xb4   :  { %9428 = vst [vmem:[#allocation151_spill] sm:$0xff] %v5511_v15  ;;  %v5530_v15 = vld [vmem:[#allocation8 + $0x28] sm:$0xff] }
  0xb5   :  { %9429 = vst [vmem:[#allocation152_spill] sm:$0xff] %v5517_v23  ;;  %704 = vmatpush.msra.mxu1 %v5530_v15 }
  0xb6   :  { %9430 = vst [vmem:[#allocation153_spill] sm:$0xff] %v5519_v13  ;;  %v5544_v13 = vld [vmem:[#allocation8 + $0x10] sm:$0xff] }
  0xb7   :  { %9431 = vst [vmem:[#allocation154_spill] sm:$0xff] %v5524_v27  ;;  %v5542_v27 = vld [vmem:[#allocation8 + $0x8] sm:$0xff]  ;;  %725 = vmatpush.msrb.mxu2 %v5544_v13 }
  0xb8   :  { %9432 = vst [vmem:[#allocation155_spill] sm:$0xff] %v5532_v60  ;;  %705 = vmatpush.msra.mxu1 %v5542_v27  ;;  %v440_v60 = vld [vmem:[%s8649_s7 + $0x1] sm:$0x1] }
  0xb9   :  { %9435 = vst [vmem:[#allocation158_spill] sm:$0xff] %v5542_v27  ;;  %606 = vmatmul.f32.vlgmr.msrb.gmra.mxu0 %v440_v60  ;;  %626 = vmatmul.f32.vlgmr.msrb.gmra.mxu1 %v440_v60  ;;  %v348_v27 = vperm.slane %v5458_v56, 1 }
  0xba   :  { %9436 = vst [vmem:[#allocation159_spill] sm:$0xff] %v5544_v13  ;;  %646 = vmatmul.f32.vlgmr.msra.gmra.mxu2 %v440_v60  ;;  %666 = vmatmul.f32.vlgmr.msra.gmra.mxu3 %v440_v60 }
  0xbb   :  { %v460_v52 = vpop.f32.mrf.mxu0  ;;  %846 = vmatpush.msrb.mxu1 %v4985_v29  ;;  %866 = vmatpush.msra.mxu2 %v4959_v14 }
  0xbc   :  { %v523_v7 = vadd.f32 %v460_v52, %v5507_v21  ;;  %v5536_v52 = vld [vmem:[#allocation8 + $0x38] sm:$0xff]  ;;  %v5540_v21 = vld [vmem:[#allocation8] sm:$0xff]  ;;  %v416_v23 = vpop.f32.mrf.mxu2 }
  0xbd   :  { %9433 = vst [vmem:[#allocation156_spill] sm:$0xff] %v5536_v52  ;;  %744 = vmatpush.msrb.mxu3 %v5536_v52  ;;  %685 = vmatpush.msra.mxu0 %v5540_v21 }
  0xbe   :  { %v3713_v3 = vmul.f32 -1.442695, %v523_v7  ;;  %9434 = vst [vmem:[#allocation157_spill] sm:$0xff] %v5540_v21  ;;  %v5548_v7 = vld [vmem:[#allocation8 + $0x18] sm:$0xff]  ;;  %847 = vmatpush.msrb.mxu1 %v4995_v33  ;;  %867 = vmatpush.msra.mxu2 %v4964_v18 }
  0xbf   :  { %9437 = vst [vmem:[#allocation160_spill] sm:$0xff] %v5548_v7  ;;  %745 = vmatpush.msrb.mxu3 %v5548_v7  ;;  %826 = vmatpush.msrb.mxu0 %v4948_v2 }
  0xc0   :  { %3775 = vpow2.f32 %v3713_v3  ;;  %v396_v52 = vpop.f32.mrf.mxu1  ;;  %v349_v3 = vperm.slane %v5458_v56, 2  ;;  %848 = vmatpush.msrb.mxu1 %v5007_v37  ;;  %868 = vmatpush.msra.mxu2 %v4970_v22 }
  0xc1   :  { %886 = vmatpush.msra.mxu3 %v4990_v31  ;;  %827 = vmatpush.msrb.mxu0 %v4950_v5  ;;  %v5571_v2 = vadd.f32 %v396_v52, %v348_v27 }
  0xc2   :  { %v5565_v21 = vadd.f32 %v416_v23, %v349_v3  ;;  %849 = vmatpush.msrb.mxu1 %v5019_v41  ;;  %869 = vmatpush.msra.mxu2 %v4978_v26  ;;  %v350_v26 = vperm.slane %v5458_v56, 3  ;;  %v9441_v41 = vld [vmem:[#allocation26_spill] sm:$0xff] }
  0xc3   :  { %887 = vmatpush.msra.mxu3 %v5001_v35  ;;  %828 = vmatpush.msrb.mxu0 %v4953_v8  ;;  %9438 = vst [vmem:[#allocation161_spill] sm:$0xff] %v5571_v2 }
  0xc4   :  { %850 = vmatpush.msrb.mxu1 %v5031_v45  ;;  %870 = vmatpush.msra.mxu2 %v4988_v30  ;;  %v9443_v45 = vld [vmem:[#allocation24_spill] sm:$0xff] }
  0xc5   :  { %888 = vmatpush.msra.mxu3 %v5013_v39  ;;  %829 = vmatpush.msrb.mxu0 %v4956_v12  ;;  %v436_v12 = vpop.f32.mrf.mxu3  ;;  %v9440_v39 = vld [vmem:[#allocation32_spill] sm:$0xff] }
  0xc6   :  { %v3776_v13 = vpop.eup %3775  ;;  %851 = vmatpush.msrb.mxu1 %v5043_v49  ;;  %871 = vmatpush.msra.mxu2 %v4999_v34  ;;  %v5618_v33 = vadd.f32 %v436_v12, %v350_v26  ;;  %v9445_v49 = vld [vmem:[#allocation28_spill] sm:$0xff]  ;;  %v9453_v12 = vld [vmem:[#allocation27_spill] sm:$0xff]  ;;  %v9457_v26 = vld [vmem:[#allocation29_spill] sm:$0xff] }
  0xc7   :  { %v5563_v7 = vadd.f32 1.0, %v3776_v13  ;;  %889 = vmatpush.msra.mxu3 %v5025_v43  ;;  %830 = vmatpush.msrb.mxu0 %v4961_v16 }
  0xc8   :  { %852 = vmatpush.msrb.mxu1 %v5055_v53  ;;  %872 = vmatpush.msra.mxu2 %v5011_v38  ;;  %v9439_v38 = vld [vmem:[#allocation23_spill] sm:$0xff] }
  0xc9   :  { %v500_v5 = vpop.f32.mrf.mxu2  ;;  %3777 = vrcp.f32 %v5563_v7  ;;  %890 = vmatpush.msra.mxu3 %v5037_v47  ;;  %831 = vmatpush.msrb.mxu0 %v4967_v20  ;;  %vm544_vm2 = vweird.f32 %v5563_v7  ;;  %v548_v53 = vand.u32 2147483647, %v5563_v7 }
  0xca   :  { %v480_v14 = vpop.f32.mrf.mxu1  ;;  %v525_v18 = vadd.f32 %v500_v5, %v5565_v21  ;;  %853 = vmatpush.msrb.mxu1 %v5067_v57  ;;  %873 = vmatpush.msra.mxu2 %v5023_v42  ;;  %v9442_v42 = vld [vmem:[#allocation35_spill] sm:$0xff]  ;;  %v9484_v57 = vld [vmem:[#allocation66_spill] sm:$0xff] }
  0xcb   :  { %v524_v8 = vadd.f32 %v480_v14, %v5571_v2  ;;  %891 = vmatpush.msra.mxu3 %v5049_v51  ;;  %832 = vmatpush.msrb.mxu0 %v4975_v24  ;;  %vm549_vm6 = vcmp.eq.f32.partialorder %v548_v53, 8.507059e+37  ;;  %v9480_v53 = vld [vmem:[#allocation62_spill] sm:$0xff] }
  0xcc   :  { %v3715_v22 = vmul.f32 -1.442695, %v525_v18  ;;  %854 = vmatpush.msrb.mxu1 %v5081_v61  ;;  %874 = vmatpush.msra.mxu2 %v5035_v46  ;;  %v9444_v46 = vld [vmem:[#allocation36_spill] sm:$0xff] }
  0xcd   :  { %v3714_v29 = vmul.f32 -1.442695, %v524_v8  ;;  %892 = vmatpush.msra.mxu3 %v5061_v55  ;;  %833 = vmatpush.msrb.mxu0 %v4983_v28  ;;  %v9448_v55 = vld [vmem:[#allocation40_spill] sm:$0xff] }
  0xce   :  { %3779 = vpow2.f32 %v3715_v22  ;;  %855 = vmatpush.msrb.mxu1 %v5097_v1  ;;  %875 = vmatpush.msra.mxu2 %v5047_v50  ;;  %v9446_v50 = vld [vmem:[#allocation39_spill] sm:$0xff] }
  0xcf   :  { %3781 = vpow2.f32 %v3714_v29  ;;  %v5592_v16 = vpop.eup %3777  ;;  %893 = vmatpush.msra.mxu3 %v5073_v59  ;;  %834 = vmatpush.msrb.mxu0 %v4993_v32  ;;  %v9452_v59 = vld [vmem:[#allocation42_spill] sm:$0xff] }
  0xd0   :  { %v540_v20 = vmul.f32 %v5592_v16, %v5563_v7  ;;  %856 = vmatpush.msrb.mxu1 %v5107_v6  ;;  %876 = vmatpush.msra.mxu2 %v5059_v54  ;;  %vm545_vm1 = vweird.f32 %v5592_v16  ;;  %v9447_v54 = vld [vmem:[#allocation25_spill] sm:$0xff] }
  0xd1   :  { %894 = vmatpush.msra.mxu3 %v5092_v0  ;;  %835 = vmatpush.msrb.mxu0 %v5005_v36  ;;  %v520_v34 = vpop.f32.mrf.mxu3  ;;  %vm5651_vm3 = vmor %vm544_vm2, %vm545_vm1 }
  0xd2   :  { %v541_v32 = vsub.f32 1.0, %v540_v20  ;;  %857 = vmatpush.msrb.mxu1 %v5120_v11  ;;  %877 = vmatpush.msra.mxu2 %v5071_v58  ;;  %v526_v36 = vadd.f32 %v520_v34, %v5618_v33  ;;  %v9451_v58 = vld [vmem:[#allocation30_spill] sm:$0xff]  ;;  %v441_v11 = vld [vmem:[%s8650_s8] sm:$0x1]  ;;  %v9455_v20 = vld [vmem:[#allocation33_spill] sm:$0xff] }
  0xd3   :  { %895 = vmatpush.msra.mxu3 %v5103_v4  ;;  %836 = vmatpush.msrb.mxu0 %v5017_v40  ;;  %v9462_v34 = vld [vmem:[#allocation49_spill] sm:$0xff] }
  0xd4   :  { %v3780_v24 = vpop.eup %3779  ;;  %v542_v35 = vmul.f32 %v5592_v16, %v541_v32  ;;  %858 = vmatpush.msrb.mxu1 %v5132_v19  ;;  %878 = vmatpush.msra.mxu2 %v5090_v63  ;;  %v9461_v32 = vld [vmem:[#allocation31_spill] sm:$0xff] }
  0xd5   :  { %v3782_v28 = vpop.eup %3781  ;;  %v5607_v30 = vadd.f32 1.0, %v3780_v24  ;;  %896 = vmatpush.msra.mxu3 %v5114_v10  ;;  %837 = vmatpush.msrb.mxu0 %v5029_v44  ;;  %v9456_v24 = vld [vmem:[#allocation45_spill] sm:$0xff] }
  0xd6   :  { %v5611_v31 = vadd.f32 1.0, %v3782_v28  ;;  %859 = vmatpush.msrb.mxu1 %v9440_v39  ;;  %879 = vmatpush.msra.mxu2 %v9441_v41  ;;  %v543_v44 = vadd.f32 %v5592_v16, %v542_v35  ;;  %v9458_v28 = vld [vmem:[#allocation46_spill] sm:$0xff]  ;;  %v9463_v35 = vld [vmem:[#allocation41_spill] sm:$0xff]  ;;  %v9467_v39 = vld [vmem:[#allocation44_spill] sm:$0xff] }
  0xd7   :  { %3783 = vrcp.f32 %v5607_v30  ;;  %897 = vmatpush.msra.mxu3 %v5130_v17  ;;  %838 = vmatpush.msrb.mxu0 %v5041_v48  ;;  %v550_v48 = vand.u32 2147483648, %v5563_v7  ;;  %vm574_vm9 = vweird.f32 %v5607_v30  ;;  %v580_v3 = vand.u32 2147483648, %v5607_v30  ;;  %v9469_v41 = vld [vmem:[#allocation38_spill] sm:$0xff] }
  0xd8   :  { %3785 = vrcp.f32 %v5611_v31  ;;  %860 = vmatpush.msrb.mxu1 %v9444_v46  ;;  %880 = vmatpush.msra.mxu2 %v9445_v49  ;;  %v565_v56 = vand.u32 2147483648, %v5611_v31  ;;  %v547_v61 = vsel %vm5651_vm3, %v5592_v16, %v543_v44  ;;  %v563_v63 = vand.u32 2147483647, %v5611_v31  ;;  %v9454_v16 = vld [vmem:[#allocation43_spill] sm:$0xff]  ;;  %v9472_v44 = vld [vmem:[#allocation54_spill] sm:$0xff]  ;;  %v9474_v46 = vld [vmem:[#allocation56_spill] sm:$0xff] }
  0xd9   :  { %898 = vmatpush.msra.mxu3 %v5141_v25  ;;  %839 = vmatpush.msrb.mxu0 %v9439_v38  ;;  %3787 = vtanh.f32 %v526_v36  ;;  %v551_v1 = vor.u32 1.1754944e-38, %v550_v48  ;;  %vm559_vm5 = vweird.f32 %v5611_v31  ;;  %v578_v5 = vand.u32 2147483647, %v5607_v30  ;;  %v9464_v36 = vld [vmem:[#allocation50_spill] sm:$0xff]  ;;  %v9466_v38 = vld [vmem:[#allocation51_spill] sm:$0xff] }
  0xda   :  { %861 = vmatpush.msrb.mxu1 %v9448_v55  ;;  %881 = vmatpush.msra.mxu2 %v9451_v58  ;;  %v566_v10 = vor.u32 1.1754944e-38, %v565_v56  ;;  %vm564_vm8 = vcmp.eq.f32.partialorder %v563_v63, 8.507059e+37  ;;  %v581_v18 = vor.u32 1.1754944e-38, %v580_v3  ;;  %v9476_v48 = vld [vmem:[#allocation58_spill] sm:$0xff]  ;;  %v9477_v49 = vld [vmem:[#allocation59_spill] sm:$0xff]  ;;  %v9482_v55 = vld [vmem:[#allocation64_spill] sm:$0xff] }
  0xdb   :  { %899 = vmatpush.msra.mxu3 %v9442_v42  ;;  %840 = vmatpush.msrb.mxu0 %v9443_v45  ;;  %v552_v13 = vsel %vm549_vm6, %v551_v1, %v547_v61  ;;  %vm579_vm12 = vcmp.eq.f32.partialorder %v578_v5, 8.507059e+37  ;;  %v9470_v42 = vld [vmem:[#allocation53_spill] sm:$0xff]  ;;  %v9473_v45 = vld [vmem:[#allocation55_spill] sm:$0xff]  ;;  %v9488_v61 = vld [vmem:[#allocation70_spill] sm:$0xff] }
  0xdc   :  { %v9483_v56 = vld [vmem:[#allocation65_spill] sm:$0xff]  ;;  %v9485_v58 = vld [vmem:[#allocation67_spill] sm:$0xff]  ;;  %v9504_v5 = vld [vmem:[#allocation86_spill] sm:$0xff] }
  0xdd   :  { %v3784_v37 = vpop.eup %3783  ;;  %900 = vmatpush.msra.mxu3 %v9446_v50  ;;  %841 = vmatpush.msrb.mxu0 %v9447_v54  ;;  %v9478_v50 = vld [vmem:[#allocation60_spill] sm:$0xff]  ;;  %v9481_v54 = vld [vmem:[#allocation63_spill] sm:$0xff]  ;;  %v9491_v1 = vld [vmem:[#allocation73_spill] sm:$0xff] }
  0xde   :  { %v3786_v40 = vpop.eup %3785  ;;  %v570_v47 = vmul.f32 %v3784_v37, %v5607_v30  ;;  %vm575_vm10 = vweird.f32 %v3784_v37  ;;  %v9459_v30 = vld [vmem:[#allocation37_spill] sm:$0xff]  ;;  %v9489_v63 = vld [vmem:[#allocation71_spill] sm:$0xff] }
  0xdf   :  { %v555_v43 = vmul.f32 %v3786_v40, %v5611_v31  ;;  %901 = vmatpush.msra.mxu3 %v9452_v59  ;;  %vm560_vm4 = vweird.f32 %v3786_v40  ;;  %v3788_v6 = vpop.eup %3787  ;;  %vm576_vm11 = vmor %vm574_vm9, %vm575_vm10  ;;  %v9460_v31 = vld [vmem:[#allocation48_spill] sm:$0xff]  ;;  %v9503_v3 = vld [vmem:[#allocation85_spill] sm:$0xff] }
  0xe0   :  { %v571_v0 = vsub.f32 1.0, %v570_v47  ;;  %vm561_vm7 = vmor %vm559_vm5, %vm560_vm4  ;;  %v586_v27 = vmul.f32 %v3788_v6, %v552_v13  ;;  %v9475_v47 = vld [vmem:[#allocation57_spill] sm:$0xff]  ;;  %v9486_v59 = vld [vmem:[#allocation68_spill] sm:$0xff] }
  0xe1   :  { %v556_v51 = vsub.f32 1.0, %v555_v43  ;;  %v9471_v43 = vld [vmem:[#allocation47_spill] sm:$0xff]  ;;  %v9496_v13 = vld [vmem:[#allocation78_spill] sm:$0xff] }
  0xe2   :  { %v572_v19 = vmul.f32 %v3784_v37, %v571_v0  ;;  %v9490_v0 = vld [vmem:[#allocation72_spill] sm:$0xff]  ;;  %v9493_v6 = vld [vmem:[#allocation75_spill] sm:$0xff] }
  0xe3   :  { %v557_v60 = vmul.f32 %v3786_v40, %v556_v51  ;;  %v9479_v51 = vld [vmem:[#allocation61_spill] sm:$0xff] }
  0xe4   :  { %v573_v7 = vadd.f32 %v3784_v37, %v572_v19  ;;  %v9498_v19 = vld [vmem:[#allocation80_spill] sm:$0xff] }
  0xe5   :  { %v558_v4 = vadd.f32 %v3786_v40, %v557_v60  ;;  %v9487_v60 = vld [vmem:[#allocation69_spill] sm:$0xff] }
  0xe6   :  { %v577_v14 = vsel %vm576_vm11, %v3784_v37, %v573_v7  ;;  %v9465_v37 = vld [vmem:[#allocation34_spill] sm:$0xff]  ;;  %v9502_v7 = vld [vmem:[#allocation84_spill] sm:$0xff] }
  0xe7   :  { %v562_v17 = vsel %vm561_vm7, %v3786_v40, %v558_v4  ;;  %v582_v22 = vsel %vm579_vm12, %v581_v18, %v577_v14  ;;  %v9468_v40 = vld [vmem:[#allocation52_spill] sm:$0xff]  ;;  %v9492_v4 = vld [vmem:[#allocation74_spill] sm:$0xff]  ;;  %v9505_v14 = vld [vmem:[#allocation87_spill] sm:$0xff] }
  0xe8   :  { %v567_v25 = vsel %vm564_vm8, %v566_v10, %v562_v17  ;;  %v9494_v10 = vld [vmem:[#allocation76_spill] sm:$0xff]  ;;  %v9497_v17 = vld [vmem:[#allocation79_spill] sm:$0xff] }
  0xe9   :  { %v585_v23 = vmul.f32 %v567_v25, %v441_v11  ;;  %v9495_v11 = vld [vmem:[#allocation77_spill] sm:$0xff]  ;;  %v9506_v18 = vld [vmem:[#allocation88_spill] sm:$0xff] }
  0xea   :  { %v9499_v25 = vld [vmem:[#allocation81_spill] sm:$0xff] }
  0xeb   :  { %v5665_v52 = vadd.f32 %v586_v27, %v585_v23  ;;  %v9500_v23 = vld [vmem:[#allocation82_spill] sm:$0xff]  ;;  %v9501_v27 = vld [vmem:[#allocation83_spill] sm:$0xff] }
  0xed   :  { %3789 = vtanh.f32 %v5665_v52 }
  0xf3   :  { %v3790_v8 = vpop.eup %3789 }
  0xf4   :  { %v589_v29 = vmul.f32 %v3790_v8, %v582_v22  ;;  %v9507_v8 = vld [vmem:[#allocation89_spill] sm:$0xff]  ;;  %v9508_v22 = vld [vmem:[#allocation90_spill] sm:$0xff] }
  0xf6   :  { %686 = vmatmul.f32.vlgmr.msra.gmra.mxu0 %v589_v29  ;;  %706 = vmatmul.f32.vlgmr.msra.gmra.mxu1 %v589_v29 }
  0xf7   :  { %726 = vmatmul.f32.vlgmr.msrb.gmra.mxu2 %v589_v29  ;;  %746 = vmatmul.f32.vlgmr.msrb.gmra.mxu3 %v589_v29 }
  0xf8   :  { %988 = vmatpush.msra.mxu0 %v9453_v12  ;;  %1008 = vmatpush.msra.mxu1 %v9454_v16  ;;  %v9510_v12 = vld [vmem:[#allocation92_spill] sm:$0xff]  ;;  %v9511_v16 = vld [vmem:[#allocation93_spill] sm:$0xff] }
  0xf9   :  { %1028 = vmatpush.msrb.mxu2 %v9455_v20  ;;  %1048 = vmatpush.msrb.mxu3 %v9456_v24  ;;  %v9512_v20 = vld [vmem:[#allocation94_spill] sm:$0xff]  ;;  %v9513_v24 = vld [vmem:[#allocation95_spill] sm:$0xff] }
  0xfa   :  { %989 = vmatpush.msra.mxu0 %v9457_v26  ;;  %1009 = vmatpush.msra.mxu1 %v9458_v28  ;;  %v9514_v26 = vld [vmem:[#allocation96_spill] sm:$0xff]  ;;  %v9515_v28 = vld [vmem:[#allocation97_spill] sm:$0xff] }
  0xfb   :  { %1029 = vmatpush.msrb.mxu2 %v9459_v30  ;;  %1049 = vmatpush.msrb.mxu3 %v9460_v31  ;;  %v9516_v30 = vld [vmem:[#allocation98_spill] sm:$0xff]  ;;  %v9517_v31 = vld [vmem:[#allocation99_spill] sm:$0xff] }
  0xfc   :  { %990 = vmatpush.msra.mxu0 %v9461_v32  ;;  %1010 = vmatpush.msra.mxu1 %v9462_v34  ;;  %v9518_v32 = vld [vmem:[#allocation100_spill] sm:$0xff]  ;;  %v9519_v34 = vld [vmem:[#allocation101_spill] sm:$0xff] }
  0xfd   :  { %1030 = vmatpush.msrb.mxu2 %v9463_v35  ;;  %1050 = vmatpush.msrb.mxu3 %v9464_v36  ;;  %v9520_v35 = vld [vmem:[#allocation102_spill] sm:$0xff]  ;;  %v9521_v36 = vld [vmem:[#allocation103_spill] sm:$0xff] }
  0xfe   :  { %842 = vmatmul.f32.vlgmr.msrb.gmra.mxu0 %v589_v29  ;;  %862 = vmatmul.f32.vlgmr.msrb.gmra.mxu1 %v589_v29 }
  0xff   :  { %882 = vmatmul.f32.vlgmr.msra.gmra.mxu2 %v589_v29  ;;  %902 = vmatmul.f32.vlgmr.msra.gmra.mxu3 %v589_v29  ;;  %v9509_v29 = vld [vmem:[#allocation91_spill] sm:$0xff] }
 0x100   :  { %991 = vmatpush.msra.mxu0 %v9465_v37  ;;  %1011 = vmatpush.msra.mxu1 %v9466_v38  ;;  %v9522_v37 = vld [vmem:[#allocation104_spill] sm:$0xff]  ;;  %v9523_v38 = vld [vmem:[#allocation105_spill] sm:$0xff] }
 0x101   :  { %1031 = vmatpush.msrb.mxu2 %v9467_v39  ;;  %1051 = vmatpush.msrb.mxu3 %v9468_v40  ;;  %v9524_v39 = vld [vmem:[#allocation106_spill] sm:$0xff]  ;;  %v9525_v40 = vld [vmem:[#allocation107_spill] sm:$0xff] }
 0x102   :  { %992 = vmatpush.msra.mxu0 %v9469_v41  ;;  %1012 = vmatpush.msra.mxu1 %v9470_v42  ;;  %v9526_v41 = vld [vmem:[#allocation108_spill] sm:$0xff]  ;;  %v9527_v42 = vld [vmem:[#allocation109_spill] sm:$0xff] }
 0x103   :  { %1032 = vmatpush.msrb.mxu2 %v9471_v43  ;;  %1052 = vmatpush.msrb.mxu3 %v9472_v44  ;;  %v9528_v43 = vld [vmem:[#allocation110_spill] sm:$0xff]  ;;  %v9529_v44 = vld [vmem:[#allocation111_spill] sm:$0xff] }
 0x104   :  { %993 = vmatpush.msra.mxu0 %v9473_v45  ;;  %1013 = vmatpush.msra.mxu1 %v9474_v46  ;;  %v9530_v45 = vld [vmem:[#allocation112_spill] sm:$0xff]  ;;  %v9531_v46 = vld [vmem:[#allocation113_spill] sm:$0xff] }
 0x105   :  { %1033 = vmatpush.msrb.mxu2 %v9475_v47  ;;  %1053 = vmatpush.msrb.mxu3 %v9476_v48  ;;  %v9532_v47 = vld [vmem:[#allocation114_spill] sm:$0xff]  ;;  %v9533_v48 = vld [vmem:[#allocation115_spill] sm:$0xff] }
 0x106   :  { %994 = vmatpush.msra.mxu0 %v9477_v49  ;;  %1014 = vmatpush.msra.mxu1 %v9478_v50  ;;  %v9534_v49 = vld [vmem:[#allocation116_spill] sm:$0xff]  ;;  %v9535_v50 = vld [vmem:[#allocation117_spill] sm:$0xff] }
 0x107   :  { %1034 = vmatpush.msrb.mxu2 %v9479_v51  ;;  %1054 = vmatpush.msrb.mxu3 %v9480_v53  ;;  %v9536_v51 = vld [vmem:[#allocation118_spill] sm:$0xff]  ;;  %v9537_v53 = vld [vmem:[#allocation119_spill] sm:$0xff] }
 0x108   :  { %995 = vmatpush.msra.mxu0 %v9481_v54  ;;  %1015 = vmatpush.msra.mxu1 %v9482_v55  ;;  %v9538_v54 = vld [vmem:[#allocation120_spill] sm:$0xff]  ;;  %v9539_v55 = vld [vmem:[#allocation121_spill] sm:$0xff] }
 0x109   :  { %1035 = vmatpush.msrb.mxu2 %v9483_v56  ;;  %1055 = vmatpush.msrb.mxu3 %v9484_v57  ;;  %v9540_v56 = vld [vmem:[#allocation122_spill] sm:$0xff]  ;;  %v9541_v57 = vld [vmem:[#allocation123_spill] sm:$0xff] }
 0x10a   :  { %996 = vmatpush.msra.mxu0 %v9485_v58  ;;  %1016 = vmatpush.msra.mxu1 %v9486_v59  ;;  %v9542_v58 = vld [vmem:[#allocation124_spill] sm:$0xff]  ;;  %v9543_v59 = vld [vmem:[#allocation125_spill] sm:$0xff] }
 0x10b   :  { %1036 = vmatpush.msrb.mxu2 %v9487_v60  ;;  %1056 = vmatpush.msrb.mxu3 %v9488_v61  ;;  %v9544_v60 = vld [vmem:[#allocation126_spill] sm:$0xff]  ;;  %v9545_v61 = vld [vmem:[#allocation127_spill] sm:$0xff] }
 0x10c   :  { %997 = vmatpush.msra.mxu0 %v9489_v63  ;;  %1017 = vmatpush.msra.mxu1 %v9490_v0  ;;  %v9546_v63 = vld [vmem:[#allocation128_spill] sm:$0xff]  ;;  %v9547_v0 = vld [vmem:[#allocation129_spill] sm:$0xff] }
 0x10d   :  { %1037 = vmatpush.msrb.mxu2 %v9491_v1  ;;  %1057 = vmatpush.msrb.mxu3 %v9492_v4  ;;  %v9548_v1 = vld [vmem:[#allocation130_spill] sm:$0xff]  ;;  %v9549_v4 = vld [vmem:[#allocation131_spill] sm:$0xff] }
 0x10e   :  { %998 = vmatpush.msra.mxu0 %v9493_v6  ;;  %1018 = vmatpush.msra.mxu1 %v9494_v10  ;;  %v9550_v6 = vld [vmem:[#allocation132_spill] sm:$0xff]  ;;  %v9551_v10 = vld [vmem:[#allocation133_spill] sm:$0xff] }
 0x10f   :  { %1038 = vmatpush.msrb.mxu2 %v9495_v11  ;;  %1058 = vmatpush.msrb.mxu3 %v9496_v13  ;;  %v9552_v11 = vld [vmem:[#allocation134_spill] sm:$0xff]  ;;  %v9553_v13 = vld [vmem:[#allocation135_spill] sm:$0xff] }
 0x110   :  { %999 = vmatpush.msra.mxu0 %v9497_v17  ;;  %1019 = vmatpush.msra.mxu1 %v9498_v19  ;;  %v9554_v17 = vld [vmem:[#allocation136_spill] sm:$0xff]  ;;  %v9555_v19 = vld [vmem:[#allocation137_spill] sm:$0xff] }
 0x111   :  { %1039 = vmatpush.msrb.mxu2 %v9499_v25  ;;  %1059 = vmatpush.msrb.mxu3 %v9500_v23  ;;  %v9556_v25 = vld [vmem:[#allocation138_spill] sm:$0xff]  ;;  %v9557_v23 = vld [vmem:[#allocation139_spill] sm:$0xff] }
 0x112   :  { %1000 = vmatpush.msra.mxu0 %v9501_v27  ;;  %1020 = vmatpush.msra.mxu1 %v9502_v7  ;;  %v9558_v27 = vld [vmem:[#allocation140_spill] sm:$0xff]  ;;  %v9559_v7 = vld [vmem:[#allocation141_spill] sm:$0xff] }
 0x113   :  { %1040 = vmatpush.msrb.mxu2 %v9503_v3  ;;  %1060 = vmatpush.msrb.mxu3 %v9504_v5  ;;  %v9560_v3 = vld [vmem:[#allocation142_spill] sm:$0xff]  ;;  %v9561_v5 = vld [vmem:[#allocation143_spill] sm:$0xff] }
 0x114   :  { %1001 = vmatpush.msra.mxu0 %v9505_v14  ;;  %1021 = vmatpush.msra.mxu1 %v9506_v18  ;;  %v9562_v14 = vld [vmem:[#allocation144_spill] sm:$0xff]  ;;  %v9563_v18 = vld [vmem:[#allocation145_spill] sm:$0xff] }
 0x115   :  { %1041 = vmatpush.msrb.mxu2 %v9507_v8  ;;  %1061 = vmatpush.msrb.mxu3 %v9508_v22  ;;  %v9564_v8 = vld [vmem:[#allocation146_spill] sm:$0xff]  ;;  %v9565_v22 = vld [vmem:[#allocation147_spill] sm:$0xff] }
 0x116   :  { %1002 = vmatpush.msra.mxu0 %v9509_v29  ;;  %1022 = vmatpush.msra.mxu1 %v9510_v12  ;;  %v9566_v29 = vld [vmem:[#allocation148_spill] sm:$0xff]  ;;  %v9567_v12 = vld [vmem:[#allocation149_spill] sm:$0xff] }
 0x117   :  { %1042 = vmatpush.msrb.mxu2 %v9511_v16  ;;  %1062 = vmatpush.msrb.mxu3 %v9512_v20  ;;  %v9568_v16 = vld [vmem:[#allocation151_spill] sm:$0xff]  ;;  %v9569_v20 = vld [vmem:[#allocation152_spill] sm:$0xff] }
 0x118   :  { %1003 = vmatpush.msra.mxu0 %v9513_v24  ;;  %1023 = vmatpush.msra.mxu1 %v9514_v26  ;;  %v9570_v24 = vld [vmem:[#allocation153_spill] sm:$0xff]  ;;  %v9571_v26 = vld [vmem:[#allocation154_spill] sm:$0xff] }
 0x119   :  { %1043 = vmatpush.msrb.mxu2 %v9515_v28  ;;  %1063 = vmatpush.msrb.mxu3 %v9516_v30  ;;  %v9572_v28 = vld [vmem:[#allocation155_spill] sm:$0xff]  ;;  %v9573_v30 = vld [vmem:[#allocation156_spill] sm:$0xff] }
 0x11a   :  { %1071 = vmatpush.msrb.mxu0 %v9517_v31  ;;  %1091 = vmatpush.msrb.mxu1 %v9518_v32  ;;  %v9574_v31 = vld [vmem:[#allocation157_spill] sm:$0xff]  ;;  %v9575_v32 = vld [vmem:[#allocation158_spill] sm:$0xff] }
 0x11b   :  { %1111 = vmatpush.msra.mxu2 %v9519_v34  ;;  %1131 = vmatpush.msra.mxu3 %v9520_v35  ;;  %v9576_v34 = vld [vmem:[#allocation159_spill] sm:$0xff] }
 0x11c   :  { %1072 = vmatpush.msrb.mxu0 %v9521_v36  ;;  %1092 = vmatpush.msrb.mxu1 %v9522_v37 }
 0x11d   :  { %1112 = vmatpush.msra.mxu2 %v9523_v38  ;;  %1132 = vmatpush.msra.mxu3 %v9524_v39 }
 0x11e   :  { %1073 = vmatpush.msrb.mxu0 %v9525_v40  ;;  %1093 = vmatpush.msrb.mxu1 %v9526_v41 }
 0x11f   :  { %1113 = vmatpush.msra.mxu2 %v9527_v42  ;;  %1133 = vmatpush.msra.mxu3 %v9528_v43 }
 0x120   :  { %1074 = vmatpush.msrb.mxu0 %v9529_v44  ;;  %1094 = vmatpush.msrb.mxu1 %v9530_v45 }
 0x121   :  { %1114 = vmatpush.msra.mxu2 %v9531_v46  ;;  %1134 = vmatpush.msra.mxu3 %v9532_v47 }
 0x122   :  { %1075 = vmatpush.msrb.mxu0 %v9533_v48  ;;  %1095 = vmatpush.msrb.mxu1 %v9534_v49 }
 0x123   :  { %1115 = vmatpush.msra.mxu2 %v9535_v50  ;;  %1135 = vmatpush.msra.mxu3 %v9536_v51 }
 0x124   :  { %1076 = vmatpush.msrb.mxu0 %v9537_v53  ;;  %1096 = vmatpush.msrb.mxu1 %v9538_v54 }
 0x125   :  { %1116 = vmatpush.msra.mxu2 %v9539_v55  ;;  %1136 = vmatpush.msra.mxu3 %v9540_v56 }
 0x126   :  { %1077 = vmatpush.msrb.mxu0 %v9541_v57  ;;  %1097 = vmatpush.msrb.mxu1 %v9542_v58  ;;  %v9581_v58 = vld [vmem:[#allocation150_spill] sm:$0xff] }
 0x127   :  { %1117 = vmatpush.msra.mxu2 %v9543_v59  ;;  %1137 = vmatpush.msra.mxu3 %v9544_v60 }
 0x128   :  { %1078 = vmatpush.msrb.mxu0 %v9545_v61  ;;  %1098 = vmatpush.msrb.mxu1 %v9546_v63 }
 0x129   :  { %1118 = vmatpush.msra.mxu2 %v9547_v0  ;;  %1138 = vmatpush.msra.mxu3 %v9548_v1 }
 0x12a   :  { %1079 = vmatpush.msrb.mxu0 %v9549_v4  ;;  %1099 = vmatpush.msrb.mxu1 %v9550_v6 }
 0x12b   :  { %1119 = vmatpush.msra.mxu2 %v9551_v10  ;;  %1139 = vmatpush.msra.mxu3 %v9552_v11 }
 0x12c   :  { %1080 = vmatpush.msrb.mxu0 %v9553_v13  ;;  %1100 = vmatpush.msrb.mxu1 %v9554_v17 }
 0x12d   :  { %1120 = vmatpush.msra.mxu2 %v9555_v19  ;;  %1140 = vmatpush.msra.mxu3 %v9556_v25 }
 0x12e   :  { %1081 = vmatpush.msrb.mxu0 %v9557_v23  ;;  %1101 = vmatpush.msrb.mxu1 %v9558_v27 }
 0x12f   :  { %1121 = vmatpush.msra.mxu2 %v9559_v7  ;;  %1141 = vmatpush.msra.mxu3 %v9560_v3 }
 0x130   :  { %1082 = vmatpush.msrb.mxu0 %v9561_v5  ;;  %1102 = vmatpush.msrb.mxu1 %v9562_v14 }
 0x131   :  { %1122 = vmatpush.msra.mxu2 %v9563_v18  ;;  %1142 = vmatpush.msra.mxu3 %v9564_v8 }
 0x132   :  { %1083 = vmatpush.msrb.mxu0 %v9565_v22  ;;  %1103 = vmatpush.msrb.mxu1 %v9566_v29 }
 0x133   :  { %1123 = vmatpush.msra.mxu2 %v9567_v12  ;;  %1143 = vmatpush.msra.mxu3 %v9568_v16 }
 0x134   :  { %1084 = vmatpush.msrb.mxu0 %v5515_v62  ;;  %1104 = vmatpush.msrb.mxu1 %v9569_v20  ;;  %v9577_v62 = vld [vmem:[#allocation160_spill] sm:$0xff] }
 0x135   :  { %1124 = vmatpush.msra.mxu2 %v9570_v24  ;;  %1144 = vmatpush.msra.mxu3 %v9571_v26 }
 0x136   :  { %1085 = vmatpush.msrb.mxu0 %v5528_v9  ;;  %1105 = vmatpush.msrb.mxu1 %v5530_v15  ;;  %v607_v35 = vpop.f32.mrf.mxu0  ;;  %v627_v36 = vpop.f32.mrf.mxu1  ;;  %v344_v9 = vld [vmem:[%s8648_s6] sm:$0xf] }
 0x137   :  { %1125 = vmatpush.msra.mxu2 %v9572_v28  ;;  %1145 = vmatpush.msra.mxu3 %v9573_v30  ;;  %v5802_v15 = vperm.slane %v344_v9, 0  ;;  %v5804_v38 = vperm.slane %v344_v9, 1  ;;  %v5808_v48 = vperm.slane %v344_v9, 2  ;;  %v5813_v0 = vperm.slane %v344_v9, 3 }
 0x138   :  { %1086 = vmatpush.msrb.mxu0 %v9574_v31  ;;  %1106 = vmatpush.msrb.mxu1 %v9575_v32 }
 0x139   :  { %1126 = vmatpush.msra.mxu2 %v9576_v34  ;;  %1146 = vmatpush.msra.mxu3 %v9577_v62  ;;  %9578 = vst [vmem:[#allocation23_spill] sm:$0xff] %v5802_v15 }
 0x13a   :  { %9579 = vst [vmem:[#allocation32_spill] sm:$0xff] %v5804_v38 }
 0x13b   :  { %9580 = vst [vmem:[#allocation26_spill] sm:$0xff] %v5808_v48 }
 0x13c   :  { %9582 = vst [vmem:[#allocation35_spill] sm:$0xff] %v5813_v0 }
 0x13d   :  { %v647_v37 = vpop.f32.mrf.mxu2  ;;  %v667_v41 = vpop.f32.mrf.mxu3 }
 0x173   :  { %v687_v39 = vpop.f32.mrf.mxu0  ;;  %v707_v40 = vpop.f32.mrf.mxu1 }
 0x174   :  { %v688_v42 = vadd.f32 %v687_v39, %v607_v35  ;;  %v708_v43 = vadd.f32 %v707_v40, %v627_v36 }
 0x176   :  { %v759_v44 = vadd.f32 %v5802_v15, %v688_v42  ;;  %v760_v45 = vadd.f32 %v5804_v38, %v708_v43 }
 0x178   :  { %v3716_v46 = vmul.f32 -1.442695, %v759_v44  ;;  %v3717_v47 = vmul.f32 -1.442695, %v760_v45 }
 0x17a   :  { %3791 = vpow2.f32 %v3716_v46  ;;  %v727_v49 = vpop.f32.mrf.mxu2  ;;  %v747_v57 = vpop.f32.mrf.mxu3  ;;  %v442_v46 = vld [vmem:[%s8650_s8 + $0x1] sm:$0x1] }
 0x17b   :  { %3793 = vpow2.f32 %v3717_v47  ;;  %v728_v50 = vadd.f32 %v727_v49, %v647_v37  ;;  %v843_v51 = vpop.f32.mrf.mxu0  ;;  %v863_v53 = vpop.f32.mrf.mxu1  ;;  %v748_v10 = vadd.f32 %v747_v57, %v667_v41 }
 0x17c   :  { %v910_v54 = vrot.slane %v843_v51, 7  ;;  %v911_v55 = vrot.slane %v863_v53, 7 }
 0x17d   :  { %v761_v56 = vadd.f32 %v5808_v48, %v728_v50  ;;  %v762_v19 = vadd.f32 %v5813_v0, %v748_v10 }
 0x17e   :  { %v918_v59 = vadd.f32 %v910_v54, %v9581_v58  ;;  %v919_v60 = vadd.f32 %v911_v55, %v5571_v2 }
 0x17f   :  { %v3718_v61 = vmul.f32 -1.442695, %v761_v56 }
 0x180   :  { %v3792_v63 = vpop.eup %3791  ;;  %v3719_v1 = vmul.f32 -1.442695, %v918_v59  ;;  %v3720_v11 = vmul.f32 -1.442695, %v919_v60 }
 0x181   :  { %v3794_v4 = vpop.eup %3793  ;;  %v772_v6 = vadd.f32 1.0, %v3792_v63  ;;  %3795 = vpow2.f32 %v3718_v61 }
 0x182   :  { %v773_v13 = vadd.f32 1.0, %v3794_v4  ;;  %3797 = vpow2.f32 %v3719_v1  ;;  %v883_v17 = vpop.f32.mrf.mxu2  ;;  %v903_v29 = vpop.f32.mrf.mxu3 }
 0x183   :  { %3799 = vrcp.f32 %v772_v6  ;;  %v912_v25 = vrot.slane %v883_v17, 7  ;;  %v784_v24 = vand.u32 2147483647, %v772_v6  ;;  %v786_v31 = vand.u32 2147483648, %v772_v6 }
 0x184   :  { %3801 = vrcp.f32 %v773_v13  ;;  %v801_v30 = vand.u32 2147483648, %v773_v13  ;;  %v913_v32 = vrot.slane %v903_v29, 7  ;;  %v799_v62 = vand.u32 2147483647, %v773_v13 }
 0x185   :  { %3803 = vpow2.f32 %v3720_v11  ;;  %v920_v27 = vadd.f32 %v912_v25, %v5565_v21  ;;  %vm795_vm15 = vweird.f32 %v773_v13  ;;  %vm780_vm0 = vweird.f32 %v772_v6 }
 0x186   :  { %3805 = vtanh.f32 %v762_v19  ;;  %vm785_vm1 = vcmp.eq.f32.partialorder %v784_v24, 8.507059e+37  ;;  %v787_v41 = vor.u32 1.1754944e-38, %v786_v31  ;;  %v921_v43 = vadd.f32 %v913_v32, %v5618_v33 }
 0x187   :  { %v3796_v23 = vpop.eup %3795  ;;  %v3721_v18 = vmul.f32 -1.442695, %v920_v27  ;;  %v802_v45 = vor.u32 1.1754944e-38, %v801_v30  ;;  %vm800_vm4 = vcmp.eq.f32.partialorder %v799_v62, 8.507059e+37 }
 0x188   :  { %v3798_v7 = vpop.eup %3797  ;;  %v5817_v3 = vadd.f32 1.0, %v3796_v23 }
 0x189   :  { %v3800_v5 = vpop.eup %3799  ;;  %v5819_v14 = vadd.f32 1.0, %v3798_v7  ;;  %v981_v7 = vrot.slane %v5665_v52, 7 }
 0x18a   :  { %v3802_v8 = vpop.eup %3801  ;;  %v776_v22 = vmul.f32 %v3800_v5, %v772_v6  ;;  %3807 = vrcp.f32 %v5817_v3  ;;  %vm781_vm13 = vweird.f32 %v3800_v5  ;;  %v816_v56 = vand.u32 2147483648, %v5817_v3 }
 0x18b   :  { %v3804_v12 = vpop.eup %3803  ;;  %v791_v16 = vmul.f32 %v3802_v8, %v773_v13  ;;  %3809 = vrcp.f32 %v5819_v14  ;;  %vm796_vm14 = vweird.f32 %v3802_v8  ;;  %vm782_vm2 = vmor %vm780_vm0, %vm781_vm13  ;;  %vm939_vm5 = vweird.f32 %v5819_v14 }
 0x18c   :  { %v777_v20 = vsub.f32 1.0, %v776_v22  ;;  %v5823_v26 = vadd.f32 1.0, %v3804_v12  ;;  %3811 = vpow2.f32 %v3721_v18  ;;  %v3806_v35 = vpop.eup %3805  ;;  %vm797_vm3 = vmor %vm795_vm15, %vm796_vm14  ;;  %v943_v4 = vand.u32 2147483647, %v5819_v14  ;;  %v5975_v12 = vld [vmem:[#allocation7 + $0x100] sm:$0xff] }
 0x18d   :  { %v792_v28 = vsub.f32 1.0, %v791_v16  ;;  %v945_v6 = vand.u32 2147483648, %v5819_v14  ;;  %vm810_vm9 = vweird.f32 %v5817_v3  ;;  %v814_v18 = vand.u32 2147483647, %v5817_v3 }
 0x18e   :  { %v778_v34 = vmul.f32 %v3800_v5, %v777_v20  ;;  %3813 = vrcp.f32 %v5823_v26  ;;  %v960_v17 = vand.u32 2147483648, %v5823_v26  ;;  %v958_v19 = vand.u32 2147483647, %v5823_v26 }
 0x18f   :  { %v793_v36 = vmul.f32 %v3802_v8, %v792_v28  ;;  %3815 = vtanh.f32 %v921_v43  ;;  %vm954_vm11 = vweird.f32 %v5823_v26  ;;  %vm944_vm12 = vcmp.eq.f32.partialorder %v943_v4, 8.507059e+37  ;;  %v5927_v4 = vld [vmem:[#allocation7 + $0x190] sm:$0xff] }
 0x190   :  { %v5826_v9 = vpop.eup %3807  ;;  %v779_v37 = vadd.f32 %v3800_v5, %v778_v34  ;;  %v961_v16 = vor.u32 1.1754944e-38, %v960_v17  ;;  %v817_v20 = vor.u32 1.1754944e-38, %v816_v56  ;;  %vm959_vm15 = vcmp.eq.f32.partialorder %v958_v19, 8.507059e+37  ;;  %v5938_v17 = vld [vmem:[#allocation7 + $0x168] sm:$0xff]  ;;  %v5941_v19 = vld [vmem:[#allocation7 + $0x170] sm:$0xff] }
 0x191   :  { %v3810_v39 = vpop.eup %3809  ;;  %v806_v40 = vmul.f32 %v5826_v9, %v5817_v3  ;;  %v794_v42 = vadd.f32 %v3802_v8, %v793_v36  ;;  %vm811_vm7 = vweird.f32 %v5826_v9  ;;  %vm815_vm0 = vcmp.eq.f32.partialorder %v814_v18, 8.507059e+37  ;;  %v5963_v18 = vld [vmem:[#allocation7 + $0x120] sm:$0xff]  ;;  %v6029_v43 = vld [vmem:[#allocation7 + $0x90] sm:$0xff] }
 0x192   :  { %v3812_v44 = vpop.eup %3811  ;;  %v783_v47 = vsel %vm782_vm2, %v3800_v5, %v779_v37  ;;  %v935_v49 = vmul.f32 %v3810_v39, %v5819_v14  ;;  %vm940_vm6 = vweird.f32 %v3810_v39  ;;  %v946_v5 = vor.u32 1.1754944e-38, %v945_v6  ;;  %vm5859_vm13 = vmor %vm810_vm9, %vm811_vm7  ;;  %v5930_v6 = vld [vmem:[#allocation7 + $0x198] sm:$0xff]  ;;  %9601 = vst [vmem:[#allocation37_spill] sm:$0xff] %v6029_v43 }
 0x193   :  { %v807_v50 = vsub.f32 1.0, %v806_v40  ;;  %v788_v51 = vsel %vm785_vm1, %v787_v41, %v783_v47  ;;  %v798_v53 = vsel %vm797_vm3, %v3802_v8, %v794_v42  ;;  %v5835_v54 = vadd.f32 1.0, %v3812_v44  ;;  %vm941_vm10 = vmor %vm939_vm5, %vm940_vm6  ;;  %v5879_v41 = vld [vmem:[#allocation7 + $0x1e0] sm:$0xff]  ;;  %v5882_v42 = vld [vmem:[#allocation7 + $0x1e8] sm:$0xff] }
 0x194   :  { %v3814_v55 = vpop.eup %3813  ;;  %v803_v57 = vsel %vm800_vm4, %v802_v45, %v798_v53  ;;  %v822_v59 = vmul.f32 %v3806_v35, %v788_v51  ;;  %v936_v60 = vsub.f32 1.0, %v935_v49  ;;  %v5889_v44 = vld [vmem:[#allocation7 + $0x1f0] sm:$0xff]  ;;  %v5892_v45 = vld [vmem:[#allocation7 + $0x1f8] sm:$0xff]  ;;  %v5897_v47 = vld [vmem:[#allocation7 + $0x1c0] sm:$0xff] }
 0x195   :  { %v808_v61 = vmul.f32 %v5826_v9, %v807_v50  ;;  %v821_v63 = vmul.f32 %v803_v57, %v442_v46  ;;  %v950_v1 = vmul.f32 %v3814_v55, %v5823_v26  ;;  %3817 = vrcp.f32 %v5835_v54  ;;  %v3816_v8 = vpop.eup %3815  ;;  %v5900_v49 = vld [vmem:[#allocation7 + $0x1c8] sm:$0xff]  ;;  %v5903_v51 = vld [vmem:[#allocation7 + $0x1d0] sm:$0xff]  ;;  %v5906_v53 = vld [vmem:[#allocation7 + $0x1d8] sm:$0xff] }
 0x196   :  { %v937_v13 = vmul.f32 %v3810_v39, %v936_v60  ;;  %vm955_vm8 = vweird.f32 %v3814_v55  ;;  %vm969_vm2 = vweird.f32 %v5835_v54  ;;  %v973_v40 = vand.u32 2147483647, %v5835_v54  ;;  %v5918_v60 = vld [vmem:[#allocation7 + $0x1b8] sm:$0xff] }
 0x197   :  { %v5844_v10 = vadd.f32 %v822_v59, %v821_v63  ;;  %v951_v11 = vsub.f32 1.0, %v950_v1  ;;  %v809_v25 = vadd.f32 %v5826_v9, %v808_v61  ;;  %vm956_vm14 = vmor %vm954_vm11, %vm955_vm8  ;;  %v5915_v59 = vld [vmem:[#allocation7 + $0x1b0] sm:$0xff]  ;;  %v5921_v63 = vld [vmem:[#allocation7 + $0x180] sm:$0xff] }
 0x198   :  { %v938_v27 = vadd.f32 %v3810_v39, %v937_v13  ;;  %vm974_vm4 = vcmp.eq.f32.partialorder %v973_v40, 8.507059e+37  ;;  %v5924_v1 = vld [vmem:[#allocation7 + $0x188] sm:$0xff]  ;;  %v5935_v13 = vld [vmem:[#allocation7 + $0x160] sm:$0xff] }
 0x199   :  { %3819 = vtanh.f32 %v5844_v10  ;;  %v952_v23 = vmul.f32 %v3814_v55, %v951_v11  ;;  %v813_v3 = vsel %vm5859_vm13, %v5826_v9, %v809_v25  ;;  %v5944_v25 = vld [vmem:[#allocation7 + $0x178] sm:$0xff]  ;;  %v6026_v40 = vld [vmem:[#allocation7 + $0x88] sm:$0xff] }
 0x19a   :  { %v942_v22 = vsel %vm941_vm10, %v3810_v39, %v938_v27  ;;  %v818_v62 = vsel %vm815_vm0, %v817_v20, %v813_v3  ;;  %v975_v39 = vand.u32 2147483648, %v5835_v54  ;;  %v5954_v27 = vld [vmem:[#allocation7 + $0x148] sm:$0xff]  ;;  %v5987_v3 = vld [vmem:[#allocation7 + $0xe0] sm:$0xff]  ;;  %9600 = vst [vmem:[#allocation46_spill] sm:$0xff] %v6026_v40 }
 0x19b   :  { %v953_v29 = vadd.f32 %v3814_v55, %v952_v23  ;;  %v3818_v52 = vpop.eup %3817  ;;  %v947_v14 = vsel %vm944_vm12, %v946_v5, %v942_v22  ;;  %v5951_v23 = vld [vmem:[#allocation7 + $0x140] sm:$0xff]  ;;  %v5960_v5 = vld [vmem:[#allocation7 + $0x158] sm:$0xff]  ;;  %v5969_v22 = vld [vmem:[#allocation7 + $0x130] sm:$0xff] }
 0x19c   :  { %v965_v24 = vmul.f32 %v3818_v52, %v5835_v54  ;;  %v984_v28 = vmul.f32 %v3816_v8, %v947_v14  ;;  %vm970_vm1 = vweird.f32 %v3818_v52  ;;  %v976_v50 = vor.u32 1.1754944e-38, %v975_v39  ;;  %v5909_v54 = vld [vmem:[#allocation7 + $0x1a0] sm:$0xff]  ;;  %v5966_v8 = vld [vmem:[#allocation7 + $0x128] sm:$0xff]  ;;  %v5984_v14 = vld [vmem:[#allocation7 + $0x118] sm:$0xff] }
 0x19d   :  { %v957_v26 = vsel %vm956_vm14, %v3814_v55, %v953_v29  ;;  %vm5885_vm3 = vmor %vm969_vm2, %vm970_vm1  ;;  %v5912_v55 = vld [vmem:[#allocation7 + $0x1a8] sm:$0xff]  ;;  %v5972_v29 = vld [vmem:[#allocation7 + $0x138] sm:$0xff] }
 0x19e   :  { %v962_v30 = vsel %vm959_vm15, %v961_v16, %v957_v26  ;;  %v966_v32 = vsub.f32 1.0, %v965_v24  ;;  %v5981_v16 = vld [vmem:[#allocation7 + $0x110] sm:$0xff]  ;;  %v5990_v20 = vld [vmem:[#allocation7 + $0xe8] sm:$0xff]  ;;  %v5996_v26 = vld [vmem:[#allocation7 + $0xf8] sm:$0xff] }
 0x19f   :  { %v3820_v31 = vpop.eup %3819  ;;  %v983_v34 = vmul.f32 %v981_v7, %v962_v30  ;;  %v5957_v7 = vld [vmem:[#allocation7 + $0x150] sm:$0xff]  ;;  %9588 = vst [vmem:[#allocation36_spill] sm:$0xff] %v5990_v20  ;;  %v6002_v30 = vld [vmem:[#allocation7 + $0xc8] sm:$0xff]  ;;  %v6023_v39 = vld [vmem:[#allocation7 + $0x80] sm:$0xff] }
 0x1a0   :  { %v5867_v35 = vmul.f32 %v3820_v31, %v818_v62  ;;  %v967_v36 = vmul.f32 %v3818_v52, %v966_v32  ;;  %v5993_v24 = vld [vmem:[#allocation7 + $0xf0] sm:$0xff]  ;;  %9590 = vst [vmem:[#allocation39_spill] sm:$0xff] %v5996_v26  ;;  %v6008_v32 = vld [vmem:[#allocation7 + $0xd8] sm:$0xff]  ;;  %v6014_v62 = vld [vmem:[#allocation7 + $0xa8] sm:$0xff] }
 0x1a1   :  { %v5869_v37 = vadd.f32 %v984_v28, %v983_v34  ;;  %9589 = vst [vmem:[#allocation28_spill] sm:$0xff] %v5993_v24  ;;  %v5999_v28 = vld [vmem:[#allocation7 + $0xc0] sm:$0xff]  ;;  %v6005_v31 = vld [vmem:[#allocation7 + $0xd0] sm:$0xff] }
 0x1a2   :  { %9585 = vst [vmem:[#allocation24_spill] sm:$0xff] %v5867_v35  ;;  %1004 = vmatmul.f32.vlgmr.msra.gmra.mxu0 %v5867_v35  ;;  %1024 = vmatmul.f32.vlgmr.msra.gmra.mxu1 %v5867_v35  ;;  %v968_v9 = vadd.f32 %v3818_v52, %v967_v36  ;;  %v6011_v34 = vld [vmem:[#allocation7 + $0xa0] sm:$0xff]  ;;  %v6017_v36 = vld [vmem:[#allocation7 + $0xb0] sm:$0xff] }
 0x1a3   :  { %3821 = vtanh.f32 %v5869_v37  ;;  %1044 = vmatmul.f32.vlgmr.msrb.gmra.mxu2 %v5867_v35  ;;  %1064 = vmatmul.f32.vlgmr.msrb.gmra.mxu3 %v5867_v35  ;;  %9591 = vst [vmem:[#allocation25_spill] sm:$0xff] %v5999_v28  ;;  %v6047_v35 = vld [vmem:[#allocation7 + $0x40] sm:$0xff] }
 0x1a4   :  { %1218 = vmatpush.msra.mxu0 %v5879_v41  ;;  %1238 = vmatpush.msra.mxu1 %v5882_v42  ;;  %v972_v46 = vsel %vm5885_vm3, %v3818_v52, %v968_v9  ;;  %v5978_v52 = vld [vmem:[#allocation7 + $0x108] sm:$0xff]  ;;  %9592 = vst [vmem:[#allocation40_spill] sm:$0xff] %v6002_v30  ;;  %v6020_v9 = vld [vmem:[#allocation7 + $0xb8] sm:$0xff] }
 0x1a5   :  { %1258 = vmatpush.msrb.mxu2 %v5889_v44  ;;  %1278 = vmatpush.msrb.mxu3 %v5892_v45  ;;  %v977_v57 = vsel %vm974_vm4, %v976_v50, %v972_v46  ;;  %9593 = vst [vmem:[#allocation30_spill] sm:$0xff] %v6005_v31  ;;  %v6032_v46 = vld [vmem:[#allocation7 + $0x98] sm:$0xff]  ;;  %v6035_v50 = vld [vmem:[#allocation7 + $0x60] sm:$0xff] }
 0x1a6   :  { %1219 = vmatpush.msra.mxu0 %v5897_v47  ;;  %1239 = vmatpush.msra.mxu1 %v5900_v49  ;;  %9594 = vst [vmem:[#allocation42_spill] sm:$0xff] %v6008_v32 }
 0x1a7   :  { %1259 = vmatpush.msrb.mxu2 %v5903_v51  ;;  %1279 = vmatpush.msrb.mxu3 %v5906_v53  ;;  %9595 = vst [vmem:[#allocation27_spill] sm:$0xff] %v6011_v34 }
 0x1a8   :  { %1220 = vmatpush.msra.mxu0 %v5909_v54  ;;  %1240 = vmatpush.msra.mxu1 %v5912_v55  ;;  %9596 = vst [vmem:[#allocation43_spill] sm:$0xff] %v6014_v62 }
 0x1a9   :  { %v3822_v56 = vpop.eup %3821  ;;  %1260 = vmatpush.msrb.mxu2 %v5915_v59  ;;  %1280 = vmatpush.msrb.mxu3 %v5918_v60  ;;  %9597 = vst [vmem:[#allocation33_spill] sm:$0xff] %v6017_v36 }
 0x1aa   :  { %v987_v61 = vmul.f32 %v3822_v56, %v977_v57  ;;  %1221 = vmatpush.msra.mxu0 %v5921_v63  ;;  %1241 = vmatpush.msra.mxu1 %v5924_v1  ;;  %9598 = vst [vmem:[#allocation45_spill] sm:$0xff] %v6020_v9  ;;  %v6038_v56 = vld [vmem:[#allocation7 + $0x68] sm:$0xff]  ;;  %v6041_v57 = vld [vmem:[#allocation7 + $0x70] sm:$0xff] }
 0x1ab   :  { %1261 = vmatpush.msrb.mxu2 %v5927_v4  ;;  %1281 = vmatpush.msrb.mxu3 %v5930_v6  ;;  %9599 = vst [vmem:[#allocation29_spill] sm:$0xff] %v6023_v39 }
 0x1ac   :  { %v5933_v11 = vrot.slane %v987_v61, 1  ;;  %1222 = vmatpush.msra.mxu0 %v5935_v13  ;;  %1242 = vmatpush.msra.mxu1 %v5938_v17  ;;  %9602 = vst [vmem:[#allocation48_spill] sm:$0xff] %v6032_v46  ;;  %v6044_v61 = vld [vmem:[#allocation7 + $0x78] sm:$0xff] }
 0x1ad   :  { %1262 = vmatpush.msrb.mxu2 %v5941_v19  ;;  %1282 = vmatpush.msrb.mxu3 %v5944_v25  ;;  %9603 = vst [vmem:[#allocation31_spill] sm:$0xff] %v6035_v50 }
 0x1ae   :  { %1087 = vmatmul.f32.vlgmr.msrb.gmra.mxu0 %v5933_v11  ;;  %1107 = vmatmul.f32.vlgmr.msrb.gmra.mxu1 %v5933_v11  ;;  %9604 = vst [vmem:[#allocation49_spill] sm:$0xff] %v6038_v56 }
 0x1af   :  { %1127 = vmatmul.f32.vlgmr.msra.gmra.mxu2 %v5933_v11  ;;  %1147 = vmatmul.f32.vlgmr.msra.gmra.mxu3 %v5933_v11  ;;  %9605 = vst [vmem:[#allocation41_spill] sm:$0xff] %v6041_v57 }
 0x1b0   :  { %1223 = vmatpush.msra.mxu0 %v5951_v23  ;;  %1243 = vmatpush.msra.mxu1 %v5954_v27  ;;  %9606 = vst [vmem:[#allocation50_spill] sm:$0xff] %v6044_v61 }
 0x1b1   :  { %1263 = vmatpush.msrb.mxu2 %v5957_v7  ;;  %1283 = vmatpush.msrb.mxu3 %v5960_v5  ;;  %9607 = vst [vmem:[#allocation34_spill] sm:$0xff] %v6047_v35 }
 0x1b2   :  { %1224 = vmatpush.msra.mxu0 %v5963_v18  ;;  %1244 = vmatpush.msra.mxu1 %v5966_v8 }
 0x1b3   :  { %1264 = vmatpush.msrb.mxu2 %v5969_v22  ;;  %1284 = vmatpush.msrb.mxu3 %v5972_v29 }
 0x1b4   :  { %1225 = vmatpush.msra.mxu0 %v5975_v12  ;;  %1245 = vmatpush.msra.mxu1 %v5978_v52 }
 0x1b5   :  { %1265 = vmatpush.msrb.mxu2 %v5981_v16  ;;  %1285 = vmatpush.msrb.mxu3 %v5984_v14 }
 0x1b6   :  { %1226 = vmatpush.msra.mxu0 %v5987_v3  ;;  %1246 = vmatpush.msra.mxu1 %v5990_v20 }
 0x1b7   :  { %1266 = vmatpush.msrb.mxu2 %v5993_v24  ;;  %1286 = vmatpush.msrb.mxu3 %v5996_v26 }
 0x1b8   :  { %1227 = vmatpush.msra.mxu0 %v5999_v28  ;;  %1247 = vmatpush.msra.mxu1 %v6002_v30 }
 0x1b9   :  { %1267 = vmatpush.msrb.mxu2 %v6005_v31  ;;  %1287 = vmatpush.msrb.mxu3 %v6008_v32 }
 0x1ba   :  { %1228 = vmatpush.msra.mxu0 %v6011_v34  ;;  %1248 = vmatpush.msra.mxu1 %v6014_v62 }
 0x1bb   :  { %1268 = vmatpush.msrb.mxu2 %v6017_v36  ;;  %1288 = vmatpush.msrb.mxu3 %v6020_v9 }
 0x1bc   :  { %1229 = vmatpush.msra.mxu0 %v6023_v39  ;;  %1249 = vmatpush.msra.mxu1 %v6026_v40 }
 0x1bd   :  { %1269 = vmatpush.msrb.mxu2 %v6029_v43  ;;  %1289 = vmatpush.msrb.mxu3 %v6032_v46  ;;  %v6050_v46 = vld [vmem:[#allocation7 + $0x48] sm:$0xff] }
 0x1be   :  { %1230 = vmatpush.msra.mxu0 %v6035_v50  ;;  %1250 = vmatpush.msra.mxu1 %v6038_v56  ;;  %9608 = vst [vmem:[#allocation51_spill] sm:$0xff] %v6050_v46  ;;  %v6053_v50 = vld [vmem:[#allocation7 + $0x50] sm:$0xff]  ;;  %v6056_v56 = vld [vmem:[#allocation7 + $0x58] sm:$0xff] }
 0x1bf   :  { %1270 = vmatpush.msrb.mxu2 %v6041_v57  ;;  %1290 = vmatpush.msrb.mxu3 %v6044_v61  ;;  %9609 = vst [vmem:[#allocation44_spill] sm:$0xff] %v6053_v50  ;;  %v6059_v57 = vld [vmem:[#allocation7 + $0x20] sm:$0xff]  ;;  %v6062_v61 = vld [vmem:[#allocation7 + $0x28] sm:$0xff] }
 0x1c0   :  { %1231 = vmatpush.msra.mxu0 %v6047_v35  ;;  %1251 = vmatpush.msra.mxu1 %v6050_v46  ;;  %9610 = vst [vmem:[#allocation52_spill] sm:$0xff] %v6056_v56  ;;  %v6065_v35 = vld [vmem:[#allocation7 + $0x30] sm:$0xff]  ;;  %v6068_v46 = vld [vmem:[#allocation7 + $0x38] sm:$0xff] }
 0x1c1   :  { %1271 = vmatpush.msrb.mxu2 %v6053_v50  ;;  %1291 = vmatpush.msrb.mxu3 %v6056_v56  ;;  %9611 = vst [vmem:[#allocation38_spill] sm:$0xff] %v6059_v57  ;;  %v6071_v50 = vld [vmem:[#allocation7] sm:$0xff]  ;;  %v6074_v56 = vld [vmem:[#allocation7 + $0x8] sm:$0xff] }
 0x1c2   :  { %1232 = vmatpush.msra.mxu0 %v6059_v57  ;;  %9612 = vst [vmem:[#allocation53_spill] sm:$0xff] %v6062_v61  ;;  %1252 = vmatpush.msra.mxu1 %v6062_v61  ;;  %v6077_v57 = vld [vmem:[#allocation7 + $0x10] sm:$0xff]  ;;  %v6080_v61 = vld [vmem:[#allocation7 + $0x18] sm:$0xff] }
 0x1c3   :  { %9613 = vst [vmem:[#allocation47_spill] sm:$0xff] %v6065_v35  ;;  %1272 = vmatpush.msrb.mxu2 %v6065_v35  ;;  %1292 = vmatpush.msrb.mxu3 %v6068_v46 }
 0x1c4   :  { %9614 = vst [vmem:[#allocation54_spill] sm:$0xff] %v6068_v46  ;;  %1233 = vmatpush.msra.mxu0 %v6071_v50  ;;  %1253 = vmatpush.msra.mxu1 %v6074_v56  ;;  %v6099_v46 = vld [vmem:[#allocation10 + $0x1c0] sm:$0xff] }
 0x1c5   :  { %9615 = vst [vmem:[#allocation55_spill] sm:$0xff] %v6071_v50  ;;  %1273 = vmatpush.msrb.mxu2 %v6077_v57  ;;  %1293 = vmatpush.msrb.mxu3 %v6080_v61  ;;  %v6087_v50 = vld [vmem:[#allocation10 + $0x1e0] sm:$0xff] }
 0x1c6   :  { %9616 = vst [vmem:[#allocation56_spill] sm:$0xff] %v6074_v56  ;;  %1234 = vmatmul.f32.vlgmr.msra.gmra.mxu0 %v5933_v11  ;;  %1254 = vmatmul.f32.vlgmr.msra.gmra.mxu1 %v5933_v11  ;;  %v6090_v56 = vld [vmem:[#allocation10 + $0x1e8] sm:$0xff] }
 0x1c7   :  { %9617 = vst [vmem:[#allocation57_spill] sm:$0xff] %v6077_v57  ;;  %1274 = vmatmul.f32.vlgmr.msrb.gmra.mxu2 %v5933_v11  ;;  %1294 = vmatmul.f32.vlgmr.msrb.gmra.mxu3 %v5933_v11  ;;  %v6093_v57 = vld [vmem:[#allocation10 + $0x1f0] sm:$0xff]  ;;  %v6102_v11 = vld [vmem:[#allocation10 + $0x1c8] sm:$0xff] }
 0x1c8   :  { %9618 = vst [vmem:[#allocation58_spill] sm:$0xff] %v6080_v61  ;;  %1380 = vmatpush.msrb.mxu0 %v6087_v50  ;;  %1400 = vmatpush.msrb.mxu1 %v6090_v56  ;;  %v6096_v61 = vld [vmem:[#allocation10 + $0x1f8] sm:$0xff] }
 0x1c9   :  { %9619 = vst [vmem:[#allocation59_spill] sm:$0xff] %v6087_v50  ;;  %1420 = vmatpush.msra.mxu2 %v6093_v57  ;;  %1440 = vmatpush.msra.mxu3 %v6096_v61  ;;  %v6105_v50 = vld [vmem:[#allocation10 + $0x1d0] sm:$0xff] }
 0x1ca   :  { %9620 = vst [vmem:[#allocation60_spill] sm:$0xff] %v6090_v56  ;;  %1381 = vmatpush.msrb.mxu0 %v6099_v46  ;;  %1401 = vmatpush.msrb.mxu1 %v6102_v11  ;;  %v6108_v56 = vld [vmem:[#allocation10 + $0x1d8] sm:$0xff] }
 0x1cb   :  { %9621 = vst [vmem:[#allocation61_spill] sm:$0xff] %v6093_v57  ;;  %1421 = vmatpush.msra.mxu2 %v6105_v50  ;;  %1441 = vmatpush.msra.mxu3 %v6108_v56  ;;  %v6111_v57 = vld [vmem:[#allocation10 + $0x1a0] sm:$0xff] }
 0x1cc   :  { %9622 = vst [vmem:[#allocation62_spill] sm:$0xff] %v6096_v61  ;;  %1382 = vmatpush.msrb.mxu0 %v6111_v57  ;;  %v6114_v61 = vld [vmem:[#allocation10 + $0x1a8] sm:$0xff] }
 0x1cd   :  { %9623 = vst [vmem:[#allocation63_spill] sm:$0xff] %v6099_v46  ;;  %1402 = vmatpush.msrb.mxu1 %v6114_v61  ;;  %v6117_v46 = vld [vmem:[#allocation10 + $0x1b0] sm:$0xff] }
 0x1ce   :  { %9624 = vst [vmem:[#allocation64_spill] sm:$0xff] %v6102_v11  ;;  %1422 = vmatpush.msra.mxu2 %v6117_v46  ;;  %v6120_v11 = vld [vmem:[#allocation10 + $0x1b8] sm:$0xff] }
 0x1cf   :  { %9625 = vst [vmem:[#allocation65_spill] sm:$0xff] %v6105_v50  ;;  %1442 = vmatpush.msra.mxu3 %v6120_v11  ;;  %v6123_v50 = vld [vmem:[#allocation10 + $0x180] sm:$0xff] }
 0x1d0   :  { %9626 = vst [vmem:[#allocation66_spill] sm:$0xff] %v6108_v56  ;;  %1383 = vmatpush.msrb.mxu0 %v6123_v50  ;;  %v6126_v56 = vld [vmem:[#allocation10 + $0x188] sm:$0xff] }
 0x1d1   :  { %9627 = vst [vmem:[#allocation67_spill] sm:$0xff] %v6111_v57  ;;  %1403 = vmatpush.msrb.mxu1 %v6126_v56  ;;  %v6129_v57 = vld [vmem:[#allocation10 + $0x190] sm:$0xff] }
 0x1d2   :  { %9628 = vst [vmem:[#allocation68_spill] sm:$0xff] %v6114_v61  ;;  %1423 = vmatpush.msra.mxu2 %v6129_v57  ;;  %v6132_v61 = vld [vmem:[#allocation10 + $0x198] sm:$0xff] }
 0x1d3   :  { %9629 = vst [vmem:[#allocation69_spill] sm:$0xff] %v6117_v46  ;;  %1443 = vmatpush.msra.mxu3 %v6132_v61  ;;  %v6135_v46 = vld [vmem:[#allocation10 + $0x160] sm:$0xff] }
 0x1d4   :  { %9630 = vst [vmem:[#allocation70_spill] sm:$0xff] %v6120_v11  ;;  %1384 = vmatpush.msrb.mxu0 %v6135_v46  ;;  %v6138_v11 = vld [vmem:[#allocation10 + $0x168] sm:$0xff] }
 0x1d5   :  { %9631 = vst [vmem:[#allocation71_spill] sm:$0xff] %v6123_v50  ;;  %1404 = vmatpush.msrb.mxu1 %v6138_v11  ;;  %v6141_v50 = vld [vmem:[#allocation10 + $0x170] sm:$0xff] }
 0x1d6   :  { %9632 = vst [vmem:[#allocation72_spill] sm:$0xff] %v6126_v56  ;;  %1424 = vmatpush.msra.mxu2 %v6141_v50  ;;  %v6144_v56 = vld [vmem:[#allocation10 + $0x178] sm:$0xff] }
 0x1d7   :  { %9633 = vst [vmem:[#allocation73_spill] sm:$0xff] %v6129_v57  ;;  %1444 = vmatpush.msra.mxu3 %v6144_v56  ;;  %v6147_v57 = vld [vmem:[#allocation10 + $0x140] sm:$0xff] }
 0x1d8   :  { %9634 = vst [vmem:[#allocation74_spill] sm:$0xff] %v6132_v61  ;;  %1385 = vmatpush.msrb.mxu0 %v6147_v57  ;;  %v6150_v61 = vld [vmem:[#allocation10 + $0x148] sm:$0xff] }
 0x1d9   :  { %9635 = vst [vmem:[#allocation75_spill] sm:$0xff] %v6135_v46  ;;  %1405 = vmatpush.msrb.mxu1 %v6150_v61  ;;  %v6153_v46 = vld [vmem:[#allocation10 + $0x150] sm:$0xff] }
 0x1da   :  { %9636 = vst [vmem:[#allocation76_spill] sm:$0xff] %v6138_v11  ;;  %1425 = vmatpush.msra.mxu2 %v6153_v46  ;;  %v6156_v11 = vld [vmem:[#allocation10 + $0x158] sm:$0xff] }
 0x1db   :  { %9637 = vst [vmem:[#allocation77_spill] sm:$0xff] %v6141_v50  ;;  %1445 = vmatpush.msra.mxu3 %v6156_v11  ;;  %v6159_v50 = vld [vmem:[#allocation10 + $0x120] sm:$0xff] }
 0x1dc   :  { %9638 = vst [vmem:[#allocation78_spill] sm:$0xff] %v6144_v56  ;;  %1386 = vmatpush.msrb.mxu0 %v6159_v50  ;;  %v6162_v56 = vld [vmem:[#allocation10 + $0x128] sm:$0xff] }
 0x1dd   :  { %9639 = vst [vmem:[#allocation79_spill] sm:$0xff] %v6147_v57  ;;  %1406 = vmatpush.msrb.mxu1 %v6162_v56  ;;  %v6165_v57 = vld [vmem:[#allocation10 + $0x130] sm:$0xff] }
 0x1de   :  { %9640 = vst [vmem:[#allocation80_spill] sm:$0xff] %v6150_v61  ;;  %1426 = vmatpush.msra.mxu2 %v6165_v57  ;;  %v6168_v61 = vld [vmem:[#allocation10 + $0x138] sm:$0xff] }
 0x1df   :  { %9641 = vst [vmem:[#allocation81_spill] sm:$0xff] %v6153_v46  ;;  %1446 = vmatpush.msra.mxu3 %v6168_v61  ;;  %v6171_v46 = vld [vmem:[#allocation10 + $0x100] sm:$0xff] }
 0x1e0   :  { %9642 = vst [vmem:[#allocation82_spill] sm:$0xff] %v6156_v11  ;;  %1387 = vmatpush.msrb.mxu0 %v6171_v46  ;;  %v6174_v11 = vld [vmem:[#allocation10 + $0x108] sm:$0xff] }
 0x1e1   :  { %9643 = vst [vmem:[#allocation83_spill] sm:$0xff] %v6159_v50  ;;  %1407 = vmatpush.msrb.mxu1 %v6174_v11  ;;  %v6177_v50 = vld [vmem:[#allocation10 + $0x110] sm:$0xff] }
 0x1e2   :  { %9644 = vst [vmem:[#allocation84_spill] sm:$0xff] %v6162_v56  ;;  %1427 = vmatpush.msra.mxu2 %v6177_v50  ;;  %v6180_v56 = vld [vmem:[#allocation10 + $0x118] sm:$0xff] }
 0x1e3   :  { %9645 = vst [vmem:[#allocation85_spill] sm:$0xff] %v6165_v57  ;;  %1447 = vmatpush.msra.mxu3 %v6180_v56  ;;  %v6183_v57 = vld [vmem:[#allocation10 + $0xe0] sm:$0xff] }
 0x1e4   :  { %9646 = vst [vmem:[#allocation86_spill] sm:$0xff] %v6168_v61  ;;  %1388 = vmatpush.msrb.mxu0 %v6183_v57  ;;  %v6186_v61 = vld [vmem:[#allocation10 + $0xe8] sm:$0xff] }
 0x1e5   :  { %9647 = vst [vmem:[#allocation87_spill] sm:$0xff] %v6171_v46  ;;  %1408 = vmatpush.msrb.mxu1 %v6186_v61  ;;  %v6189_v46 = vld [vmem:[#allocation10 + $0xf0] sm:$0xff] }
 0x1e6   :  { %9648 = vst [vmem:[#allocation88_spill] sm:$0xff] %v6174_v11  ;;  %1428 = vmatpush.msra.mxu2 %v6189_v46  ;;  %v6192_v11 = vld [vmem:[#allocation10 + $0xf8] sm:$0xff] }
 0x1e7   :  { %9649 = vst [vmem:[#allocation89_spill] sm:$0xff] %v6177_v50  ;;  %1448 = vmatpush.msra.mxu3 %v6192_v11  ;;  %v6195_v50 = vld [vmem:[#allocation10 + $0xc0] sm:$0xff] }
 0x1e8   :  { %9650 = vst [vmem:[#allocation90_spill] sm:$0xff] %v6180_v56  ;;  %1389 = vmatpush.msrb.mxu0 %v6195_v50  ;;  %v6198_v56 = vld [vmem:[#allocation10 + $0xc8] sm:$0xff] }
 0x1e9   :  { %9651 = vst [vmem:[#allocation91_spill] sm:$0xff] %v6183_v57  ;;  %1409 = vmatpush.msrb.mxu1 %v6198_v56  ;;  %v6201_v57 = vld [vmem:[#allocation10 + $0xd0] sm:$0xff] }
 0x1ea   :  { %9652 = vst [vmem:[#allocation92_spill] sm:$0xff] %v6186_v61  ;;  %1429 = vmatpush.msra.mxu2 %v6201_v57  ;;  %v6204_v61 = vld [vmem:[#allocation10 + $0xd8] sm:$0xff] }
 0x1eb   :  { %9653 = vst [vmem:[#allocation93_spill] sm:$0xff] %v6189_v46  ;;  %1449 = vmatpush.msra.mxu3 %v6204_v61  ;;  %v6207_v46 = vld [vmem:[#allocation10 + $0xa0] sm:$0xff] }
 0x1ec   :  { %9654 = vst [vmem:[#allocation94_spill] sm:$0xff] %v6192_v11  ;;  %1390 = vmatpush.msrb.mxu0 %v6207_v46  ;;  %v6210_v11 = vld [vmem:[#allocation10 + $0xa8] sm:$0xff] }
 0x1ed   :  { %9655 = vst [vmem:[#allocation95_spill] sm:$0xff] %v6195_v50  ;;  %1410 = vmatpush.msrb.mxu1 %v6210_v11  ;;  %v6213_v50 = vld [vmem:[#allocation10 + $0xb0] sm:$0xff] }
 0x1ee   :  { %9656 = vst [vmem:[#allocation96_spill] sm:$0xff] %v6198_v56  ;;  %1430 = vmatpush.msra.mxu2 %v6213_v50  ;;  %v6216_v56 = vld [vmem:[#allocation10 + $0xb8] sm:$0xff] }
 0x1ef   :  { %9657 = vst [vmem:[#allocation97_spill] sm:$0xff] %v6201_v57  ;;  %1450 = vmatpush.msra.mxu3 %v6216_v56  ;;  %v6219_v57 = vld [vmem:[#allocation10 + $0x80] sm:$0xff] }
 0x1f0   :  { %9658 = vst [vmem:[#allocation98_spill] sm:$0xff] %v6204_v61  ;;  %1391 = vmatpush.msrb.mxu0 %v6219_v57  ;;  %v6222_v61 = vld [vmem:[#allocation10 + $0x88] sm:$0xff] }
 0x1f1   :  { %9659 = vst [vmem:[#allocation99_spill] sm:$0xff] %v6207_v46  ;;  %1411 = vmatpush.msrb.mxu1 %v6222_v61  ;;  %v6225_v46 = vld [vmem:[#allocation10 + $0x90] sm:$0xff] }
 0x1f2   :  { %9660 = vst [vmem:[#allocation100_spill] sm:$0xff] %v6210_v11  ;;  %1431 = vmatpush.msra.mxu2 %v6225_v46  ;;  %v6228_v11 = vld [vmem:[#allocation10 + $0x98] sm:$0xff] }
 0x1f3   :  { %9661 = vst [vmem:[#allocation101_spill] sm:$0xff] %v6213_v50  ;;  %1451 = vmatpush.msra.mxu3 %v6228_v11  ;;  %v6231_v50 = vld [vmem:[#allocation10 + $0x60] sm:$0xff] }
 0x1f4   :  { %9662 = vst [vmem:[#allocation102_spill] sm:$0xff] %v6216_v56  ;;  %1392 = vmatpush.msrb.mxu0 %v6231_v50  ;;  %v6234_v56 = vld [vmem:[#allocation10 + $0x68] sm:$0xff] }
 0x1f5   :  { %9663 = vst [vmem:[#allocation103_spill] sm:$0xff] %v6219_v57  ;;  %1412 = vmatpush.msrb.mxu1 %v6234_v56  ;;  %v6237_v57 = vld [vmem:[#allocation10 + $0x70] sm:$0xff] }
 0x1f6   :  { %9664 = vst [vmem:[#allocation104_spill] sm:$0xff] %v6222_v61  ;;  %1432 = vmatpush.msra.mxu2 %v6237_v57  ;;  %v6240_v61 = vld [vmem:[#allocation10 + $0x78] sm:$0xff] }
 0x1f7   :  { %9665 = vst [vmem:[#allocation105_spill] sm:$0xff] %v6225_v46  ;;  %1452 = vmatpush.msra.mxu3 %v6240_v61  ;;  %v6243_v46 = vld [vmem:[#allocation10 + $0x40] sm:$0xff] }
 0x1f8   :  { %9666 = vst [vmem:[#allocation106_spill] sm:$0xff] %v6228_v11  ;;  %1393 = vmatpush.msrb.mxu0 %v6243_v46  ;;  %v6246_v11 = vld [vmem:[#allocation10 + $0x48] sm:$0xff] }
 0x1f9   :  { %9667 = vst [vmem:[#allocation107_spill] sm:$0xff] %v6231_v50  ;;  %1413 = vmatpush.msrb.mxu1 %v6246_v11  ;;  %v6249_v50 = vld [vmem:[#allocation10 + $0x50] sm:$0xff] }
 0x1fa   :  { %9668 = vst [vmem:[#allocation108_spill] sm:$0xff] %v6234_v56  ;;  %1433 = vmatpush.msra.mxu2 %v6249_v50  ;;  %v6252_v56 = vld [vmem:[#allocation10 + $0x58] sm:$0xff] }
 0x1fb   :  { %9669 = vst [vmem:[#allocation109_spill] sm:$0xff] %v6237_v57  ;;  %1453 = vmatpush.msra.mxu3 %v6252_v56  ;;  %v6255_v57 = vld [vmem:[#allocation10 + $0x20] sm:$0xff] }
 0x1fc   :  { %9670 = vst [vmem:[#allocation110_spill] sm:$0xff] %v6240_v61  ;;  %1394 = vmatpush.msrb.mxu0 %v6255_v57  ;;  %v6258_v61 = vld [vmem:[#allocation10 + $0x28] sm:$0xff] }
 0x1fd   :  { %9671 = vst [vmem:[#allocation111_spill] sm:$0xff] %v6243_v46  ;;  %1414 = vmatpush.msrb.mxu1 %v6258_v61  ;;  %v6261_v46 = vld [vmem:[#allocation10 + $0x30] sm:$0xff] }
 0x1fe   :  { %9672 = vst [vmem:[#allocation112_spill] sm:$0xff] %v6246_v11  ;;  %1434 = vmatpush.msra.mxu2 %v6261_v46  ;;  %v6264_v11 = vld [vmem:[#allocation10 + $0x38] sm:$0xff] }
 0x1ff   :  { %9673 = vst [vmem:[#allocation113_spill] sm:$0xff] %v6249_v50  ;;  %1454 = vmatpush.msra.mxu3 %v6264_v11  ;;  %v6267_v50 = vld [vmem:[#allocation10] sm:$0xff] }
 0x200   :  { %9674 = vst [vmem:[#allocation114_spill] sm:$0xff] %v6252_v56  ;;  %1395 = vmatpush.msrb.mxu0 %v6267_v50  ;;  %v6270_v56 = vld [vmem:[#allocation10 + $0x8] sm:$0xff] }
 0x201   :  { %9675 = vst [vmem:[#allocation115_spill] sm:$0xff] %v6255_v57  ;;  %1415 = vmatpush.msrb.mxu1 %v6270_v56  ;;  %v6273_v57 = vld [vmem:[#allocation10 + $0x10] sm:$0xff] }
 0x202   :  { %9676 = vst [vmem:[#allocation116_spill] sm:$0xff] %v6258_v61  ;;  %1435 = vmatpush.msra.mxu2 %v6273_v57  ;;  %v6276_v61 = vld [vmem:[#allocation10 + $0x18] sm:$0xff] }
 0x203   :  { %9677 = vst [vmem:[#allocation117_spill] sm:$0xff] %v6261_v46  ;;  %1455 = vmatpush.msra.mxu3 %v6276_v61  ;;  %v6279_v46 = vld [vmem:[#allocation8 + $0x1e0] sm:$0xff] }
 0x204   :  { %9678 = vst [vmem:[#allocation118_spill] sm:$0xff] %v6264_v11  ;;  %1463 = vmatpush.msra.mxu0 %v6279_v46  ;;  %v6282_v11 = vld [vmem:[#allocation8 + $0x1e8] sm:$0xff] }
 0x205   :  { %9679 = vst [vmem:[#allocation119_spill] sm:$0xff] %v6267_v50  ;;  %1483 = vmatpush.msra.mxu1 %v6282_v11  ;;  %v6285_v50 = vld [vmem:[#allocation8 + $0x1f0] sm:$0xff] }
 0x206   :  { %9680 = vst [vmem:[#allocation120_spill] sm:$0xff] %v6270_v56  ;;  %1503 = vmatpush.msrb.mxu2 %v6285_v50  ;;  %v6288_v56 = vld [vmem:[#allocation8 + $0x1f8] sm:$0xff] }
 0x207   :  { %9681 = vst [vmem:[#allocation121_spill] sm:$0xff] %v6273_v57  ;;  %1523 = vmatpush.msrb.mxu3 %v6288_v56  ;;  %v6291_v57 = vld [vmem:[#allocation8 + $0x1c0] sm:$0xff] }
 0x208   :  { %9682 = vst [vmem:[#allocation122_spill] sm:$0xff] %v6276_v61  ;;  %1464 = vmatpush.msra.mxu0 %v6291_v57  ;;  %v6294_v61 = vld [vmem:[#allocation8 + $0x1c8] sm:$0xff] }
 0x209   :  { %9683 = vst [vmem:[#allocation123_spill] sm:$0xff] %v6279_v46  ;;  %1484 = vmatpush.msra.mxu1 %v6294_v61  ;;  %v6297_v46 = vld [vmem:[#allocation8 + $0x1d0] sm:$0xff] }
 0x20a   :  { %9684 = vst [vmem:[#allocation124_spill] sm:$0xff] %v6282_v11  ;;  %1504 = vmatpush.msrb.mxu2 %v6297_v46  ;;  %v6300_v11 = vld [vmem:[#allocation8 + $0x1d8] sm:$0xff] }
 0x20b   :  { %9685 = vst [vmem:[#allocation125_spill] sm:$0xff] %v6285_v50  ;;  %1524 = vmatpush.msrb.mxu3 %v6300_v11  ;;  %v6303_v50 = vld [vmem:[#allocation8 + $0x1a0] sm:$0xff] }
 0x20c   :  { %9686 = vst [vmem:[#allocation126_spill] sm:$0xff] %v6288_v56  ;;  %1465 = vmatpush.msra.mxu0 %v6303_v50  ;;  %v6306_v56 = vld [vmem:[#allocation8 + $0x1a8] sm:$0xff] }
 0x20d   :  { %9687 = vst [vmem:[#allocation127_spill] sm:$0xff] %v6291_v57  ;;  %1485 = vmatpush.msra.mxu1 %v6306_v56  ;;  %v6309_v57 = vld [vmem:[#allocation8 + $0x1b0] sm:$0xff] }
 0x20e   :  { %9688 = vst [vmem:[#allocation128_spill] sm:$0xff] %v6294_v61  ;;  %1505 = vmatpush.msrb.mxu2 %v6309_v57  ;;  %v6312_v61 = vld [vmem:[#allocation8 + $0x1b8] sm:$0xff] }
 0x20f   :  { %9689 = vst [vmem:[#allocation129_spill] sm:$0xff] %v6297_v46  ;;  %1525 = vmatpush.msrb.mxu3 %v6312_v61  ;;  %v6315_v46 = vld [vmem:[#allocation8 + $0x180] sm:$0xff] }
 0x210   :  { %9690 = vst [vmem:[#allocation130_spill] sm:$0xff] %v6300_v11  ;;  %1466 = vmatpush.msra.mxu0 %v6315_v46  ;;  %v6318_v11 = vld [vmem:[#allocation8 + $0x188] sm:$0xff] }
 0x211   :  { %9691 = vst [vmem:[#allocation131_spill] sm:$0xff] %v6303_v50  ;;  %1486 = vmatpush.msra.mxu1 %v6318_v11  ;;  %v6321_v50 = vld [vmem:[#allocation8 + $0x190] sm:$0xff] }
 0x212   :  { %9692 = vst [vmem:[#allocation132_spill] sm:$0xff] %v6306_v56  ;;  %1506 = vmatpush.msrb.mxu2 %v6321_v50  ;;  %v6324_v56 = vld [vmem:[#allocation8 + $0x198] sm:$0xff] }
 0x213   :  { %9693 = vst [vmem:[#allocation133_spill] sm:$0xff] %v6309_v57  ;;  %1526 = vmatpush.msrb.mxu3 %v6324_v56  ;;  %v6327_v57 = vld [vmem:[#allocation8 + $0x160] sm:$0xff] }
 0x214   :  { %9694 = vst [vmem:[#allocation134_spill] sm:$0xff] %v6312_v61  ;;  %1467 = vmatpush.msra.mxu0 %v6327_v57  ;;  %v6330_v61 = vld [vmem:[#allocation8 + $0x168] sm:$0xff] }
 0x215   :  { %9695 = vst [vmem:[#allocation135_spill] sm:$0xff] %v6315_v46  ;;  %1487 = vmatpush.msra.mxu1 %v6330_v61  ;;  %v6333_v46 = vld [vmem:[#allocation8 + $0x170] sm:$0xff] }
 0x216   :  { %9696 = vst [vmem:[#allocation136_spill] sm:$0xff] %v6318_v11  ;;  %1507 = vmatpush.msrb.mxu2 %v6333_v46  ;;  %v6336_v11 = vld [vmem:[#allocation8 + $0x178] sm:$0xff] }
 0x217   :  { %9697 = vst [vmem:[#allocation137_spill] sm:$0xff] %v6321_v50  ;;  %1527 = vmatpush.msrb.mxu3 %v6336_v11  ;;  %v6339_v50 = vld [vmem:[#allocation8 + $0x140] sm:$0xff] }
 0x218   :  { %9698 = vst [vmem:[#allocation138_spill] sm:$0xff] %v6324_v56  ;;  %1468 = vmatpush.msra.mxu0 %v6339_v50  ;;  %v6342_v56 = vld [vmem:[#allocation8 + $0x148] sm:$0xff] }
 0x219   :  { %9699 = vst [vmem:[#allocation139_spill] sm:$0xff] %v6327_v57  ;;  %1488 = vmatpush.msra.mxu1 %v6342_v56  ;;  %v6345_v57 = vld [vmem:[#allocation8 + $0x150] sm:$0xff] }
 0x21a   :  { %9700 = vst [vmem:[#allocation140_spill] sm:$0xff] %v6330_v61  ;;  %1508 = vmatpush.msrb.mxu2 %v6345_v57  ;;  %v6348_v61 = vld [vmem:[#allocation8 + $0x158] sm:$0xff] }
 0x21b   :  { %9701 = vst [vmem:[#allocation141_spill] sm:$0xff] %v6333_v46  ;;  %1528 = vmatpush.msrb.mxu3 %v6348_v61  ;;  %v6351_v46 = vld [vmem:[#allocation8 + $0x120] sm:$0xff] }
 0x21c   :  { %9702 = vst [vmem:[#allocation142_spill] sm:$0xff] %v6336_v11  ;;  %1469 = vmatpush.msra.mxu0 %v6351_v46  ;;  %v6354_v11 = vld [vmem:[#allocation8 + $0x128] sm:$0xff] }
 0x21d   :  { %9703 = vst [vmem:[#allocation143_spill] sm:$0xff] %v6339_v50  ;;  %1489 = vmatpush.msra.mxu1 %v6354_v11  ;;  %v6357_v50 = vld [vmem:[#allocation8 + $0x130] sm:$0xff] }
 0x21e   :  { %9704 = vst [vmem:[#allocation144_spill] sm:$0xff] %v6342_v56  ;;  %1509 = vmatpush.msrb.mxu2 %v6357_v50  ;;  %v6360_v56 = vld [vmem:[#allocation8 + $0x138] sm:$0xff] }
 0x21f   :  { %9705 = vst [vmem:[#allocation145_spill] sm:$0xff] %v6345_v57  ;;  %1529 = vmatpush.msrb.mxu3 %v6360_v56  ;;  %v6363_v57 = vld [vmem:[#allocation8 + $0x100] sm:$0xff]  ;;  %v1025_v35 = vpop.f32.mrf.mxu1 }
 0x220   :  { %9706 = vst [vmem:[#allocation146_spill] sm:$0xff] %v6348_v61  ;;  %1470 = vmatpush.msra.mxu0 %v6363_v57  ;;  %v6366_v61 = vld [vmem:[#allocation8 + $0x108] sm:$0xff] }
 0x221   :  { %9707 = vst [vmem:[#allocation147_spill] sm:$0xff] %v6351_v46  ;;  %1490 = vmatpush.msra.mxu1 %v6366_v61  ;;  %v6369_v46 = vld [vmem:[#allocation8 + $0x110] sm:$0xff] }
 0x222   :  { %9708 = vst [vmem:[#allocation148_spill] sm:$0xff] %v6354_v11  ;;  %1510 = vmatpush.msrb.mxu2 %v6369_v46  ;;  %v6372_v11 = vld [vmem:[#allocation8 + $0x118] sm:$0xff] }
 0x223   :  { %9709 = vst [vmem:[#allocation149_spill] sm:$0xff] %v6357_v50  ;;  %1530 = vmatpush.msrb.mxu3 %v6372_v11  ;;  %v6375_v50 = vld [vmem:[#allocation8 + $0xe0] sm:$0xff] }
 0x224   :  { %9710 = vst [vmem:[#allocation151_spill] sm:$0xff] %v6360_v56  ;;  %1471 = vmatpush.msra.mxu0 %v6375_v50  ;;  %v6378_v56 = vld [vmem:[#allocation8 + $0xe8] sm:$0xff] }
 0x225   :  { %9711 = vst [vmem:[#allocation152_spill] sm:$0xff] %v6363_v57  ;;  %1491 = vmatpush.msra.mxu1 %v6378_v56  ;;  %v6381_v57 = vld [vmem:[#allocation8 + $0xf0] sm:$0xff] }
 0x226   :  { %9712 = vst [vmem:[#allocation153_spill] sm:$0xff] %v6366_v61  ;;  %1511 = vmatpush.msrb.mxu2 %v6381_v57  ;;  %v6384_v61 = vld [vmem:[#allocation8 + $0xf8] sm:$0xff]  ;;  %v1045_v43 = vpop.f32.mrf.mxu2 }
 0x227   :  { %9713 = vst [vmem:[#allocation154_spill] sm:$0xff] %v6369_v46  ;;  %1531 = vmatpush.msrb.mxu3 %v6384_v61  ;;  %v6387_v46 = vld [vmem:[#allocation8 + $0xc0] sm:$0xff] }
 0x228   :  { %9714 = vst [vmem:[#allocation155_spill] sm:$0xff] %v6372_v11  ;;  %1472 = vmatpush.msra.mxu0 %v6387_v46  ;;  %v6390_v11 = vld [vmem:[#allocation8 + $0xc8] sm:$0xff] }
 0x229   :  { %9715 = vst [vmem:[#allocation156_spill] sm:$0xff] %v6375_v50  ;;  %1492 = vmatpush.msra.mxu1 %v6390_v11  ;;  %v6393_v50 = vld [vmem:[#allocation8 + $0xd0] sm:$0xff] }
 0x22a   :  { %9716 = vst [vmem:[#allocation157_spill] sm:$0xff] %v6378_v56  ;;  %1512 = vmatpush.msrb.mxu2 %v6393_v50  ;;  %v6396_v56 = vld [vmem:[#allocation8 + $0xd8] sm:$0xff] }
 0x22b   :  { %9717 = vst [vmem:[#allocation158_spill] sm:$0xff] %v6381_v57  ;;  %1532 = vmatpush.msrb.mxu3 %v6396_v56  ;;  %v6399_v57 = vld [vmem:[#allocation8 + $0xa0] sm:$0xff]  ;;  %v1108_v40 = vpop.f32.mrf.mxu1 }
 0x22c   :  { %9718 = vst [vmem:[#allocation159_spill] sm:$0xff] %v6384_v61  ;;  %1473 = vmatpush.msra.mxu0 %v6399_v57  ;;  %v6402_v61 = vld [vmem:[#allocation8 + $0xa8] sm:$0xff]  ;;  %v1109_v9 = vadd.f32 %v1108_v40, %v1025_v35 }
 0x22d   :  { %9719 = vst [vmem:[#allocation160_spill] sm:$0xff] %v6387_v46  ;;  %1493 = vmatpush.msra.mxu1 %v6402_v61  ;;  %v6405_v46 = vld [vmem:[#allocation8 + $0xb0] sm:$0xff] }
 0x22e   :  { %9720 = vst [vmem:[#allocation162_spill] sm:$0xff] %v6390_v11  ;;  %1513 = vmatpush.msrb.mxu2 %v6405_v46  ;;  %v6408_v11 = vld [vmem:[#allocation8 + $0xb8] sm:$0xff]  ;;  %v1152_v36 = vadd.f32 %v1109_v9, %v5804_v38 }
 0x22f   :  { %9721 = vst [vmem:[#allocation163_spill] sm:$0xff] %v6393_v50  ;;  %1533 = vmatpush.msrb.mxu3 %v6408_v11  ;;  %v6411_v50 = vld [vmem:[#allocation8 + $0x80] sm:$0xff] }
 0x230   :  { %9722 = vst [vmem:[#allocation164_spill] sm:$0xff] %v6396_v56  ;;  %1474 = vmatpush.msra.mxu0 %v6411_v50  ;;  %v6414_v56 = vld [vmem:[#allocation8 + $0x88] sm:$0xff]  ;;  %v3723_v34 = vmul.f32 -1.442695, %v1152_v36 }
 0x231   :  { %9723 = vst [vmem:[#allocation165_spill] sm:$0xff] %v6399_v57  ;;  %1494 = vmatpush.msra.mxu1 %v6414_v56  ;;  %v6417_v57 = vld [vmem:[#allocation8 + $0x90] sm:$0xff] }
 0x232   :  { %9724 = vst [vmem:[#allocation166_spill] sm:$0xff] %v6402_v61  ;;  %1514 = vmatpush.msrb.mxu2 %v6417_v57  ;;  %v6420_v61 = vld [vmem:[#allocation8 + $0x98] sm:$0xff] }
 0x233   :  { %9725 = vst [vmem:[#allocation167_spill] sm:$0xff] %v6405_v46  ;;  %1534 = vmatpush.msrb.mxu3 %v6420_v61  ;;  %v6423_v46 = vld [vmem:[#allocation8 + $0x60] sm:$0xff] }
 0x234   :  { %9726 = vst [vmem:[#allocation168_spill] sm:$0xff] %v6408_v11  ;;  %1475 = vmatpush.msra.mxu0 %v6423_v46  ;;  %v6426_v11 = vld [vmem:[#allocation8 + $0x68] sm:$0xff] }
 0x235   :  { %9727 = vst [vmem:[#allocation169_spill] sm:$0xff] %v6411_v50  ;;  %1495 = vmatpush.msra.mxu1 %v6426_v11  ;;  %v6429_v50 = vld [vmem:[#allocation8 + $0x70] sm:$0xff] }
 0x236   :  { %9728 = vst [vmem:[#allocation170_spill] sm:$0xff] %v6414_v56  ;;  %1515 = vmatpush.msrb.mxu2 %v6429_v50  ;;  %v6432_v56 = vld [vmem:[#allocation8 + $0x78] sm:$0xff] }
 0x237   :  { %9729 = vst [vmem:[#allocation171_spill] sm:$0xff] %v6417_v57  ;;  %1535 = vmatpush.msrb.mxu3 %v6432_v56  ;;  %v6435_v57 = vld [vmem:[#allocation8 + $0x40] sm:$0xff] }
 0x238   :  { %9730 = vst [vmem:[#allocation172_spill] sm:$0xff] %v6420_v61  ;;  %1476 = vmatpush.msra.mxu0 %v6435_v57  ;;  %v6438_v61 = vld [vmem:[#allocation8 + $0x48] sm:$0xff] }
 0x239   :  { %9731 = vst [vmem:[#allocation173_spill] sm:$0xff] %v6423_v46  ;;  %1496 = vmatpush.msra.mxu1 %v6438_v61  ;;  %v6441_v46 = vld [vmem:[#allocation8 + $0x50] sm:$0xff] }
 0x23a   :  { %9732 = vst [vmem:[#allocation174_spill] sm:$0xff] %v6426_v11  ;;  %1516 = vmatpush.msrb.mxu2 %v6441_v46  ;;  %v6444_v11 = vld [vmem:[#allocation8 + $0x58] sm:$0xff] }
 0x23b   :  { %9733 = vst [vmem:[#allocation175_spill] sm:$0xff] %v6429_v50  ;;  %1536 = vmatpush.msrb.mxu3 %v6444_v11  ;;  %v6447_v50 = vld [vmem:[#allocation8 + $0x20] sm:$0xff] }
 0x23c   :  { %9734 = vst [vmem:[#allocation176_spill] sm:$0xff] %v6432_v56  ;;  %1477 = vmatpush.msra.mxu0 %v6447_v50  ;;  %v6450_v56 = vld [vmem:[#allocation8 + $0x28] sm:$0xff] }
 0x23d   :  { %9735 = vst [vmem:[#allocation177_spill] sm:$0xff] %v6435_v57  ;;  %1497 = vmatpush.msra.mxu1 %v6450_v56  ;;  %v6453_v57 = vld [vmem:[#allocation8 + $0x30] sm:$0xff] }
 0x23e   :  { %9736 = vst [vmem:[#allocation178_spill] sm:$0xff] %v6438_v61  ;;  %1517 = vmatpush.msrb.mxu2 %v6453_v57  ;;  %v6456_v61 = vld [vmem:[#allocation8 + $0x38] sm:$0xff] }
 0x23f   :  { %9737 = vst [vmem:[#allocation179_spill] sm:$0xff] %v6441_v46  ;;  %1537 = vmatpush.msrb.mxu3 %v6456_v61  ;;  %v6459_v46 = vld [vmem:[#allocation8] sm:$0xff] }
 0x240   :  { %9738 = vst [vmem:[#allocation180_spill] sm:$0xff] %v6444_v11  ;;  %1478 = vmatpush.msra.mxu0 %v6459_v46  ;;  %v6462_v11 = vld [vmem:[#allocation8 + $0x8] sm:$0xff] }
 0x241   :  { %9739 = vst [vmem:[#allocation181_spill] sm:$0xff] %v6447_v50  ;;  %1498 = vmatpush.msra.mxu1 %v6462_v11  ;;  %v6465_v50 = vld [vmem:[#allocation8 + $0x10] sm:$0xff] }
 0x242   :  { %9740 = vst [vmem:[#allocation182_spill] sm:$0xff] %v6450_v56  ;;  %1518 = vmatpush.msrb.mxu2 %v6465_v50  ;;  %v6468_v56 = vld [vmem:[#allocation8 + $0x18] sm:$0xff] }
 0x243   :  { %9741 = vst [vmem:[#allocation183_spill] sm:$0xff] %v6453_v57  ;;  %1538 = vmatpush.msrb.mxu3 %v6468_v56  ;;  %v1005_v57 = vpop.f32.mrf.mxu0 }
 0x244   :  { %9742 = vst [vmem:[#allocation184_spill] sm:$0xff] %v6456_v61 }
 0x245   :  { %9743 = vst [vmem:[#allocation185_spill] sm:$0xff] %v6459_v46 }
 0x246   :  { %9744 = vst [vmem:[#allocation186_spill] sm:$0xff] %v6462_v11  ;;  %v1065_v11 = vpop.f32.mrf.mxu3 }
 0x247   :  { %9745 = vst [vmem:[#allocation187_spill] sm:$0xff] %v6465_v50  ;;  %v1128_v50 = vpop.f32.mrf.mxu2 }
 0x248   :  { %9746 = vst [vmem:[#allocation188_spill] sm:$0xff] %v6468_v56  ;;  %v1129_v32 = vadd.f32 %v1128_v50, %v1045_v43  ;;  %v1255_v50 = vpop.f32.mrf.mxu1 }
 0x24a   :  { %v1153_v56 = vadd.f32 %v1129_v32, %v5808_v48 }
 0x24b   :  { %v1088_v61 = vpop.f32.mrf.mxu0 }
 0x24c   :  { %v1089_v39 = vadd.f32 %v1088_v61, %v1005_v57  ;;  %v3724_v31 = vmul.f32 -1.442695, %v1153_v56  ;;  %v1303_v56 = vrot.slane %v1255_v50, 6 }
 0x24e   :  { %v1151_v46 = vadd.f32 %v1089_v39, %v5802_v15  ;;  %v1148_v28 = vpop.f32.mrf.mxu3 }
 0x24f   :  { %v1149_v39 = vadd.f32 %v1148_v28, %v1065_v11 }
 0x250   :  { %v3722_v62 = vmul.f32 -1.442695, %v1151_v46 }
 0x251   :  { %v1154_v40 = vadd.f32 %v1149_v39, %v5813_v0  ;;  %v1311_v0 = vadd.f32 %v1303_v56, %v5571_v2  ;;  %v1275_v56 = vpop.f32.mrf.mxu2 }
 0x252   :  { %3823 = vpow2.f32 %v3722_v62 }
 0x253   :  { %3825 = vpow2.f32 %v3723_v34  ;;  %v1235_v46 = vpop.f32.mrf.mxu0  ;;  %v3726_v15 = vmul.f32 -1.442695, %v1311_v0  ;;  %v1304_v0 = vrot.slane %v1275_v56, 6 }
 0x254   :  { %3827 = vpow2.f32 %v3724_v31 }
 0x258   :  { %v3824_v30 = vpop.eup %3823 }
 0x259   :  { %v3826_v26 = vpop.eup %3825  ;;  %v1164_v24 = vadd.f32 1.0, %v3824_v30 }
 0x25a   :  { %v1165_v35 = vadd.f32 1.0, %v3826_v26  ;;  %v3828_v9 = vpop.eup %3827  ;;  %v1302_v26 = vrot.slane %v1235_v46, 6 }
 0x25b   :  { %3829 = vrcp.f32 %v1164_v24  ;;  %v6475_v36 = vadd.f32 1.0, %v3828_v9  ;;  %v1176_v31 = vand.u32 2147483647, %v1164_v24  ;;  %v1178_v61 = vand.u32 2147483648, %v1164_v24 }
 0x25c   :  { %3831 = vrcp.f32 %v1165_v35  ;;  %v1193_v57 = vand.u32 2147483648, %v1165_v35  ;;  %v1191_v11 = vand.u32 2147483647, %v1165_v35  ;;  %v1310_v9 = vadd.f32 %v1302_v26, %v9581_v58 }
 0x25d   :  { %3833 = vrcp.f32 %v6475_v36  ;;  %vm1172_vm7 = vweird.f32 %v1164_v24  ;;  %vm1187_vm8 = vweird.f32 %v1165_v35  ;;  %vm1177_vm10 = vcmp.eq.f32.partialorder %v1176_v31, 8.507059e+37 }
 0x25e   :  { %3835 = vtanh.f32 %v1154_v40  ;;  %v1179_v50 = vor.u32 1.1754944e-38, %v1178_v61  ;;  %v1194_v20 = vor.u32 1.1754944e-38, %v1193_v57  ;;  %vm1192_vm12 = vcmp.eq.f32.partialorder %v1191_v11, 8.507059e+37 }
 0x25f   :  { %v1312_v31 = vadd.f32 %v1304_v0, %v5565_v21  ;;  %v1208_v11 = vand.u32 2147483648, %v6475_v36  ;;  %vm1202_vm14 = vweird.f32 %v6475_v36 }
 0x261   :  { %v3830_v62 = vpop.eup %3829  ;;  %v3727_v57 = vmul.f32 -1.442695, %v1312_v31 }
 0x262   :  { %v3832_v34 = vpop.eup %3831  ;;  %v1168_v43 = vmul.f32 %v3830_v62, %v1164_v24  ;;  %vm1173_vm5 = vweird.f32 %v3830_v62 }
 0x263   :  { %v1183_v32 = vmul.f32 %v3832_v34, %v1165_v35  ;;  %vm1188_vm6 = vweird.f32 %v3832_v34  ;;  %v3834_v40 = vpop.eup %3833  ;;  %vm1174_vm9 = vmor %vm1172_vm7, %vm1173_vm5 }
 0x264   :  { %v1169_v30 = vsub.f32 1.0, %v1168_v43  ;;  %v3725_v43 = vmul.f32 -1.442695, %v1310_v9  ;;  %v3836_v46 = vpop.eup %3835  ;;  %vm1189_vm11 = vmor %vm1187_vm8, %vm1188_vm6  ;;  %vm1203_vm13 = vweird.f32 %v3834_v40 }
 0x265   :  { %v1184_v28 = vsub.f32 1.0, %v1183_v32  ;;  %v1198_v32 = vmul.f32 %v3834_v40, %v6475_v36  ;;  %vm1204_vm15 = vmor %vm1202_vm14, %vm1203_vm13 }
 0x266   :  { %v1170_v39 = vmul.f32 %v3830_v62, %v1169_v30  ;;  %3837 = vpow2.f32 %v3725_v43  ;;  %v1209_v43 = vor.u32 1.1754944e-38, %v1208_v11 }
 0x267   :  { %v1185_v48 = vmul.f32 %v3832_v34, %v1184_v28  ;;  %v1199_v28 = vsub.f32 1.0, %v1198_v32  ;;  %3839 = vpow2.f32 %v3726_v15 }
 0x268   :  { %v1171_v38 = vadd.f32 %v3830_v62, %v1170_v39 }
 0x269   :  { %v1186_v30 = vadd.f32 %v3832_v34, %v1185_v48  ;;  %v1200_v9 = vmul.f32 %v3834_v40, %v1199_v28 }
 0x26a   :  { %v1175_v26 = vsel %vm1174_vm9, %v3830_v62, %v1171_v38 }
 0x26b   :  { %v1180_v24 = vsel %vm1177_vm10, %v1179_v50, %v1175_v26  ;;  %v1190_v2 = vsel %vm1189_vm11, %v3832_v34, %v1186_v30  ;;  %v1201_v38 = vadd.f32 %v3834_v40, %v1200_v9 }
 0x26c   :  { %v1195_v35 = vsel %vm1192_vm12, %v1194_v20, %v1190_v2  ;;  %v1214_v39 = vmul.f32 %v3836_v46, %v1180_v24  ;;  %v3838_v48 = vpop.eup %3837 }
 0x26d   :  { %v1213_v58 = vmul.f32 %v1195_v35, %v5844_v10  ;;  %v3840_v62 = vpop.eup %3839  ;;  %v6487_v15 = vadd.f32 1.0, %v3838_v48  ;;  %v1295_v10 = vpop.f32.mrf.mxu3  ;;  %v1205_v20 = vsel %vm1204_vm15, %v3834_v40, %v1201_v38  ;;  %v1373_v38 = vrot.slane %v5869_v37, 7 }
 0x26e   :  { %v6490_v2 = vadd.f32 1.0, %v3840_v62  ;;  %v1305_v34 = vrot.slane %v1295_v10, 6  ;;  %v9760_v10 = vld [vmem:[#allocation29_spill] sm:$0xff] }
 0x26f   :  { %v6483_v61 = vadd.f32 %v1214_v39, %v1213_v58  ;;  %v1206_v58 = vand.u32 2147483647, %v6475_v36  ;;  %v1337_v0 = vand.u32 2147483648, %v6487_v15  ;;  %v1335_v48 = vand.u32 2147483647, %v6487_v15 }
 0x270   :  { %v1313_v28 = vadd.f32 %v1305_v34, %v5618_v33  ;;  %v1352_v9 = vand.u32 2147483648, %v6490_v2  ;;  %vm1331_vm3 = vweird.f32 %v6487_v15  ;;  %vm1346_vm4 = vweird.f32 %v6490_v2  ;;  %v9763_v34 = vld [vmem:[#allocation48_spill] sm:$0xff] }
 0x271   :  { %3841 = vtanh.f32 %v6483_v61  ;;  %vm1207_vm0 = vcmp.eq.f32.partialorder %v1206_v58, 8.507059e+37  ;;  %vm1336_vm7 = vcmp.eq.f32.partialorder %v1335_v48, 8.507059e+37  ;;  %v9761_v58 = vld [vmem:[#allocation46_spill] sm:$0xff] }
 0x272   :  { %3843 = vpow2.f32 %v3727_v57  ;;  %v1210_v32 = vsel %vm1207_vm0, %v1209_v43, %v1205_v20  ;;  %v9762_v20 = vld [vmem:[#allocation37_spill] sm:$0xff]  ;;  %v9764_v43 = vld [vmem:[#allocation31_spill] sm:$0xff]  ;;  %v9779_v48 = vld [vmem:[#allocation58_spill] sm:$0xff] }
 0x273   :  { %3845 = vrcp.f32 %v6487_v15 }
 0x274   :  { %3847 = vrcp.f32 %v6490_v2 }
 0x277   :  { %v3842_v46 = vpop.eup %3841 }
 0x278   :  { %v3844_v50 = vpop.eup %3843  ;;  %v6495_v30 = vmul.f32 %v3842_v46, %v1210_v32  ;;  %v9765_v46 = vld [vmem:[#allocation49_spill] sm:$0xff] }
 0x279   :  { %v3846_v26 = vpop.eup %3845  ;;  %v6497_v56 = vadd.f32 1.0, %v3844_v50  ;;  %v9766_v32 = vld [vmem:[#allocation41_spill] sm:$0xff]  ;;  %v9767_v50 = vld [vmem:[#allocation50_spill] sm:$0xff] }
 0x27a   :  { %v3848_v36 = vpop.eup %3847  ;;  %v1327_v24 = vmul.f32 %v3846_v26, %v6487_v15  ;;  %1396 = vmatmul.f32.vlgmr.msrb.gmra.mxu0 %v6495_v30  ;;  %1416 = vmatmul.f32.vlgmr.msrb.gmra.mxu1 %v6495_v30  ;;  %vm1332_vm1 = vweird.f32 %v3846_v26 }
 0x27b   :  { %v1342_v40 = vmul.f32 %v3848_v36, %v6490_v2  ;;  %3849 = vrcp.f32 %v6497_v56  ;;  %1436 = vmatmul.f32.vlgmr.msra.gmra.mxu2 %v6495_v30  ;;  %1456 = vmatmul.f32.vlgmr.msra.gmra.mxu3 %v6495_v30  ;;  %vm1347_vm2 = vweird.f32 %v3848_v36  ;;  %vm1333_vm5 = vmor %vm1331_vm3, %vm1332_vm1  ;;  %vm1361_vm10 = vweird.f32 %v6497_v56 }
 0x27c   :  { %v1328_v35 = vsub.f32 1.0, %v1327_v24  ;;  %1610 = vmatpush.msrb.mxu0 %v5879_v41  ;;  %1630 = vmatpush.msrb.mxu1 %v5882_v42  ;;  %3851 = vtanh.f32 %v1313_v28  ;;  %v1350_v42 = vand.u32 2147483647, %v6490_v2  ;;  %vm6527_vm6 = vmor %vm1346_vm4, %vm1347_vm2  ;;  %v9770_v28 = vld [vmem:[#allocation44_spill] sm:$0xff]  ;;  %v9772_v24 = vld [vmem:[#allocation38_spill] sm:$0xff] }
 0x27d   :  { %v1343_v39 = vsub.f32 1.0, %v1342_v40  ;;  %1650 = vmatpush.msra.mxu2 %v5889_v44  ;;  %1670 = vmatpush.msra.mxu3 %v5892_v45  ;;  %v9773_v40 = vld [vmem:[#allocation53_spill] sm:$0xff] }
 0x27e   :  { %v1329_v31 = vmul.f32 %v3846_v26, %v1328_v35  ;;  %1611 = vmatpush.msrb.mxu0 %v5897_v47  ;;  %1631 = vmatpush.msrb.mxu1 %v5900_v49  ;;  %v1338_v47 = vor.u32 1.1754944e-38, %v1337_v0  ;;  %vm1351_vm8 = vcmp.eq.f32.partialorder %v1350_v42, 8.507059e+37  ;;  %v9774_v35 = vld [vmem:[#allocation47_spill] sm:$0xff]  ;;  %v9781_v42 = vld [vmem:[#allocation60_spill] sm:$0xff] }
 0x27f   :  { %v1344_v41 = vmul.f32 %v3848_v36, %v1343_v39  ;;  %1651 = vmatpush.msra.mxu2 %v5903_v51  ;;  %1671 = vmatpush.msra.mxu3 %v5906_v53  ;;  %v1353_v53 = vor.u32 1.1754944e-38, %v1352_v9  ;;  %v9775_v39 = vld [vmem:[#allocation54_spill] sm:$0xff]  ;;  %v9776_v0 = vld [vmem:[#allocation55_spill] sm:$0xff]  ;;  %v9777_v9 = vld [vmem:[#allocation56_spill] sm:$0xff] }
 0x280   :  { %v1330_v44 = vadd.f32 %v3846_v26, %v1329_v31  ;;  %1612 = vmatpush.msrb.mxu0 %v5909_v54  ;;  %1632 = vmatpush.msrb.mxu1 %v5912_v55  ;;  %v9778_v31 = vld [vmem:[#allocation57_spill] sm:$0xff] }
 0x281   :  { %v3850_v45 = vpop.eup %3849  ;;  %v1345_v49 = vadd.f32 %v3848_v36, %v1344_v41  ;;  %1652 = vmatpush.msra.mxu2 %v5915_v59  ;;  %1672 = vmatpush.msra.mxu3 %v5918_v60  ;;  %v9780_v41 = vld [vmem:[#allocation59_spill] sm:$0xff]  ;;  %v9786_v51 = vld [vmem:[#allocation65_spill] sm:$0xff] }
 0x282   :  { %v1357_v54 = vmul.f32 %v3850_v45, %v6497_v56  ;;  %v1334_v55 = vsel %vm1333_vm5, %v3846_v26, %v1330_v44  ;;  %1613 = vmatpush.msrb.mxu0 %v5921_v63  ;;  %1633 = vmatpush.msrb.mxu1 %v5924_v1  ;;  %v3852_v57 = vpop.eup %3851  ;;  %vm1362_vm9 = vweird.f32 %v3850_v45  ;;  %v9768_v26 = vld [vmem:[#allocation34_spill] sm:$0xff]  ;;  %v9782_v44 = vld [vmem:[#allocation61_spill] sm:$0xff] }
 0x283   :  { %v1339_v59 = vsel %vm1336_vm7, %v1338_v47, %v1334_v55  ;;  %v1349_v60 = vsel %vm6527_vm6, %v3848_v36, %v1345_v49  ;;  %1653 = vmatpush.msra.mxu2 %v5927_v4  ;;  %1673 = vmatpush.msra.mxu3 %v5930_v6  ;;  %v1367_v6 = vand.u32 2147483648, %v6497_v56  ;;  %vm1363_vm11 = vmor %vm1361_vm10, %vm1362_vm9  ;;  %v9771_v36 = vld [vmem:[#allocation52_spill] sm:$0xff]  ;;  %v9784_v47 = vld [vmem:[#allocation63_spill] sm:$0xff] }
 0x284   :  { %v1358_v62 = vsub.f32 1.0, %v1357_v54  ;;  %v1354_v11 = vsel %vm1351_vm8, %v1353_v53, %v1349_v60  ;;  %v1376_v15 = vmul.f32 %v3852_v57, %v1339_v59  ;;  %1614 = vmatpush.msrb.mxu0 %v5935_v13  ;;  %1634 = vmatpush.msrb.mxu1 %v5938_v17  ;;  %v1365_v13 = vand.u32 2147483647, %v6497_v56  ;;  %v9769_v56 = vld [vmem:[#allocation51_spill] sm:$0xff]  ;;  %v9785_v49 = vld [vmem:[#allocation64_spill] sm:$0xff]  ;;  %v9787_v53 = vld [vmem:[#allocation66_spill] sm:$0xff] }
 0x285   :  { %v1375_v63 = vmul.f32 %v1373_v38, %v1354_v11  ;;  %1654 = vmatpush.msra.mxu2 %v5941_v19  ;;  %1674 = vmatpush.msra.mxu3 %v5944_v25  ;;  %v9749_v19 = vld [vmem:[#allocation36_spill] sm:$0xff]  ;;  %v1368_v25 = vor.u32 1.1754944e-38, %v1367_v6  ;;  %v9788_v54 = vld [vmem:[#allocation67_spill] sm:$0xff]  ;;  %v9790_v57 = vld [vmem:[#allocation69_spill] sm:$0xff] }
 0x286   :  { %v1359_v37 = vmul.f32 %v3850_v45, %v1358_v62  ;;  %1615 = vmatpush.msrb.mxu0 %v5951_v23  ;;  %1635 = vmatpush.msrb.mxu1 %v5954_v27  ;;  %v9750_v23 = vld [vmem:[#allocation28_spill] sm:$0xff]  ;;  %v9751_v27 = vld [vmem:[#allocation39_spill] sm:$0xff]  ;;  %vm1366_vm12 = vcmp.eq.f32.partialorder %v1365_v13, 8.507059e+37  ;;  %v9791_v38 = vld [vmem:[#allocation70_spill] sm:$0xff] }
 0x287   :  { %v6545_v1 = vadd.f32 %v1376_v15, %v1375_v63  ;;  %1655 = vmatpush.msra.mxu2 %v5957_v7  ;;  %1675 = vmatpush.msra.mxu3 %v5960_v5  ;;  %v9752_v7 = vld [vmem:[#allocation25_spill] sm:$0xff]  ;;  %v9753_v5 = vld [vmem:[#allocation40_spill] sm:$0xff]  ;;  %v9792_v59 = vld [vmem:[#allocation71_spill] sm:$0xff] }
 0x288   :  { %v1360_v4 = vadd.f32 %v3850_v45, %v1359_v37  ;;  %1616 = vmatpush.msrb.mxu0 %v5963_v18  ;;  %1636 = vmatpush.msrb.mxu1 %v5966_v8  ;;  %v9789_v55 = vld [vmem:[#allocation68_spill] sm:$0xff]  ;;  %v9794_v62 = vld [vmem:[#allocation73_spill] sm:$0xff]  ;;  %v9795_v11 = vld [vmem:[#allocation74_spill] sm:$0xff] }
 0x289   :  { %3853 = vtanh.f32 %v6545_v1  ;;  %1656 = vmatpush.msra.mxu2 %v5969_v22  ;;  %1676 = vmatpush.msra.mxu3 %v5972_v29  ;;  %v9754_v22 = vld [vmem:[#allocation30_spill] sm:$0xff]  ;;  %v9793_v60 = vld [vmem:[#allocation72_spill] sm:$0xff]  ;;  %v9796_v15 = vld [vmem:[#allocation75_spill] sm:$0xff] }
 0x28a   :  { %1617 = vmatpush.msrb.mxu0 %v5975_v12  ;;  %1637 = vmatpush.msrb.mxu1 %v5978_v52  ;;  %v1364_v17 = vsel %vm1363_vm11, %v3850_v45, %v1360_v4  ;;  %v9755_v29 = vld [vmem:[#allocation42_spill] sm:$0xff]  ;;  %v9756_v52 = vld [vmem:[#allocation27_spill] sm:$0xff]  ;;  %v9797_v63 = vld [vmem:[#allocation76_spill] sm:$0xff] }
 0x28b   :  { %1657 = vmatpush.msra.mxu2 %v5981_v16  ;;  %1677 = vmatpush.msra.mxu3 %v5984_v14  ;;  %v1369_v8 = vsel %vm1366_vm12, %v1368_v25, %v1364_v17  ;;  %v9757_v16 = vld [vmem:[#allocation43_spill] sm:$0xff]  ;;  %v9758_v14 = vld [vmem:[#allocation33_spill] sm:$0xff]  ;;  %v9783_v45 = vld [vmem:[#allocation62_spill] sm:$0xff] }
 0x28c   :  { %1618 = vmatpush.msrb.mxu0 %v5987_v3  ;;  %1638 = vmatpush.msrb.mxu1 %v9749_v19  ;;  %v9759_v3 = vld [vmem:[#allocation45_spill] sm:$0xff]  ;;  %v9799_v4 = vld [vmem:[#allocation78_spill] sm:$0xff]  ;;  %v9800_v6 = vld [vmem:[#allocation79_spill] sm:$0xff] }
 0x28d   :  { %1658 = vmatpush.msra.mxu2 %v9750_v23  ;;  %1678 = vmatpush.msra.mxu3 %v9751_v27  ;;  %v9798_v37 = vld [vmem:[#allocation77_spill] sm:$0xff]  ;;  %v9801_v13 = vld [vmem:[#allocation80_spill] sm:$0xff]  ;;  %v9803_v19 = vld [vmem:[#allocation82_spill] sm:$0xff] }
 0x28e   :  { %1619 = vmatpush.msrb.mxu0 %v9752_v7  ;;  %1639 = vmatpush.msrb.mxu1 %v9753_v5  ;;  %v9802_v17 = vld [vmem:[#allocation81_spill] sm:$0xff]  ;;  %v9804_v25 = vld [vmem:[#allocation83_spill] sm:$0xff]  ;;  %v9805_v23 = vld [vmem:[#allocation84_spill] sm:$0xff] }
 0x28f   :  { %v3854_v18 = vpop.eup %3853  ;;  %1659 = vmatpush.msra.mxu2 %v9754_v22  ;;  %1679 = vmatpush.msra.mxu3 %v9755_v29  ;;  %v9806_v27 = vld [vmem:[#allocation85_spill] sm:$0xff]  ;;  %v9807_v7 = vld [vmem:[#allocation86_spill] sm:$0xff]  ;;  %v9808_v5 = vld [vmem:[#allocation87_spill] sm:$0xff] }
 0x290   :  { %v1379_v12 = vmul.f32 %v3854_v18, %v1369_v8  ;;  %1620 = vmatpush.msrb.mxu0 %v9756_v52  ;;  %1640 = vmatpush.msrb.mxu1 %v9757_v16  ;;  %v9809_v18 = vld [vmem:[#allocation88_spill] sm:$0xff]  ;;  %v9810_v8 = vld [vmem:[#allocation89_spill] sm:$0xff]  ;;  %v9811_v22 = vld [vmem:[#allocation90_spill] sm:$0xff] }
 0x291   :  { %1660 = vmatpush.msra.mxu2 %v9758_v14  ;;  %1680 = vmatpush.msra.mxu3 %v9759_v3  ;;  %v9812_v29 = vld [vmem:[#allocation91_spill] sm:$0xff]  ;;  %v9814_v52 = vld [vmem:[#allocation93_spill] sm:$0xff]  ;;  %v9815_v16 = vld [vmem:[#allocation94_spill] sm:$0xff] }
 0x292   :  { %v1461_v2 = vrot.slane %v1379_v12, 2  ;;  %1621 = vmatpush.msrb.mxu0 %v9760_v10  ;;  %1641 = vmatpush.msrb.mxu1 %v9761_v58  ;;  %v9813_v12 = vld [vmem:[#allocation92_spill] sm:$0xff]  ;;  %v9816_v14 = vld [vmem:[#allocation95_spill] sm:$0xff]  ;;  %v9819_v10 = vld [vmem:[#allocation98_spill] sm:$0xff] }
 0x293   :  { %1661 = vmatpush.msra.mxu2 %v9762_v20  ;;  %1681 = vmatpush.msra.mxu3 %v9763_v34  ;;  %v9817_v3 = vld [vmem:[#allocation96_spill] sm:$0xff]  ;;  %v9820_v58 = vld [vmem:[#allocation99_spill] sm:$0xff]  ;;  %v9822_v34 = vld [vmem:[#allocation101_spill] sm:$0xff] }
 0x294   :  { %1479 = vmatmul.f32.vlgmr.msra.gmra.mxu0 %v1461_v2  ;;  %1499 = vmatmul.f32.vlgmr.msra.gmra.mxu1 %v1461_v2  ;;  %v9821_v20 = vld [vmem:[#allocation100_spill] sm:$0xff] }
 0x295   :  { %1519 = vmatmul.f32.vlgmr.msrb.gmra.mxu2 %v1461_v2  ;;  %1539 = vmatmul.f32.vlgmr.msrb.gmra.mxu3 %v1461_v2 }
 0x296   :  { %1622 = vmatpush.msrb.mxu0 %v9764_v43  ;;  %1642 = vmatpush.msrb.mxu1 %v9765_v46  ;;  %v9823_v43 = vld [vmem:[#allocation102_spill] sm:$0xff]  ;;  %v9824_v46 = vld [vmem:[#allocation103_spill] sm:$0xff] }
 0x297   :  { %1662 = vmatpush.msra.mxu2 %v9766_v32  ;;  %1682 = vmatpush.msra.mxu3 %v9767_v50  ;;  %v9825_v32 = vld [vmem:[#allocation104_spill] sm:$0xff]  ;;  %v9826_v50 = vld [vmem:[#allocation105_spill] sm:$0xff] }
 0x298   :  { %1623 = vmatpush.msrb.mxu0 %v9768_v26  ;;  %1643 = vmatpush.msrb.mxu1 %v9769_v56  ;;  %v9827_v26 = vld [vmem:[#allocation106_spill] sm:$0xff]  ;;  %v9828_v56 = vld [vmem:[#allocation107_spill] sm:$0xff] }
 0x299   :  { %1663 = vmatpush.msra.mxu2 %v9770_v28  ;;  %1683 = vmatpush.msra.mxu3 %v9771_v36  ;;  %v9829_v28 = vld [vmem:[#allocation108_spill] sm:$0xff]  ;;  %v9830_v36 = vld [vmem:[#allocation109_spill] sm:$0xff] }
 0x29a   :  { %1624 = vmatpush.msrb.mxu0 %v9772_v24  ;;  %1644 = vmatpush.msrb.mxu1 %v9773_v40  ;;  %v9831_v24 = vld [vmem:[#allocation110_spill] sm:$0xff]  ;;  %v9832_v40 = vld [vmem:[#allocation111_spill] sm:$0xff] }
 0x29b   :  { %1664 = vmatpush.msra.mxu2 %v9774_v35  ;;  %1684 = vmatpush.msra.mxu3 %v9775_v39  ;;  %v9833_v35 = vld [vmem:[#allocation112_spill] sm:$0xff]  ;;  %v9834_v39 = vld [vmem:[#allocation113_spill] sm:$0xff] }
 0x29c   :  { %1625 = vmatpush.msrb.mxu0 %v9776_v0  ;;  %1645 = vmatpush.msrb.mxu1 %v9777_v9  ;;  %v9835_v0 = vld [vmem:[#allocation114_spill] sm:$0xff]  ;;  %v9836_v9 = vld [vmem:[#allocation115_spill] sm:$0xff] }
 0x29d   :  { %1665 = vmatpush.msra.mxu2 %v9778_v31  ;;  %1685 = vmatpush.msra.mxu3 %v9779_v48  ;;  %v9837_v31 = vld [vmem:[#allocation116_spill] sm:$0xff]  ;;  %v9838_v48 = vld [vmem:[#allocation117_spill] sm:$0xff] }
 0x29e   :  { %1626 = vmatmul.f32.vlgmr.msrb.gmra.mxu0 %v1461_v2  ;;  %1646 = vmatmul.f32.vlgmr.msrb.gmra.mxu1 %v1461_v2 }
 0x29f   :  { %1666 = vmatmul.f32.vlgmr.msra.gmra.mxu2 %v1461_v2  ;;  %1686 = vmatmul.f32.vlgmr.msra.gmra.mxu3 %v1461_v2  ;;  %v9818_v2 = vld [vmem:[#allocation97_spill] sm:$0xff] }
 0x2a0   :  { %1772 = vmatpush.msra.mxu0 %v9780_v41  ;;  %1792 = vmatpush.msra.mxu1 %v9781_v42  ;;  %v9839_v41 = vld [vmem:[#allocation118_spill] sm:$0xff]  ;;  %v9840_v42 = vld [vmem:[#allocation119_spill] sm:$0xff] }
 0x2a1   :  { %1812 = vmatpush.msrb.mxu2 %v9782_v44  ;;  %1832 = vmatpush.msrb.mxu3 %v9783_v45  ;;  %v9841_v44 = vld [vmem:[#allocation120_spill] sm:$0xff]  ;;  %v9842_v45 = vld [vmem:[#allocation121_spill] sm:$0xff] }
 0x2a2   :  { %1773 = vmatpush.msra.mxu0 %v9784_v47  ;;  %1793 = vmatpush.msra.mxu1 %v9785_v49  ;;  %v9843_v47 = vld [vmem:[#allocation122_spill] sm:$0xff]  ;;  %v9844_v49 = vld [vmem:[#allocation123_spill] sm:$0xff] }
 0x2a3   :  { %1813 = vmatpush.msrb.mxu2 %v9786_v51  ;;  %1833 = vmatpush.msrb.mxu3 %v9787_v53  ;;  %v9845_v51 = vld [vmem:[#allocation124_spill] sm:$0xff]  ;;  %v9846_v53 = vld [vmem:[#allocation125_spill] sm:$0xff] }
 0x2a4   :  { %1774 = vmatpush.msra.mxu0 %v9788_v54  ;;  %1794 = vmatpush.msra.mxu1 %v9789_v55  ;;  %v9847_v54 = vld [vmem:[#allocation126_spill] sm:$0xff]  ;;  %v9848_v55 = vld [vmem:[#allocation127_spill] sm:$0xff] }
 0x2a5   :  { %1814 = vmatpush.msrb.mxu2 %v9790_v57  ;;  %1834 = vmatpush.msrb.mxu3 %v9791_v38  ;;  %v9849_v57 = vld [vmem:[#allocation128_spill] sm:$0xff]  ;;  %v9850_v38 = vld [vmem:[#allocation129_spill] sm:$0xff] }
 0x2a6   :  { %1775 = vmatpush.msra.mxu0 %v9792_v59  ;;  %1795 = vmatpush.msra.mxu1 %v9793_v60  ;;  %v9851_v59 = vld [vmem:[#allocation130_spill] sm:$0xff]  ;;  %v9852_v60 = vld [vmem:[#allocation131_spill] sm:$0xff] }
 0x2a7   :  { %1815 = vmatpush.msrb.mxu2 %v9794_v62  ;;  %1835 = vmatpush.msrb.mxu3 %v9795_v11  ;;  %v9853_v62 = vld [vmem:[#allocation132_spill] sm:$0xff]  ;;  %v9854_v11 = vld [vmem:[#allocation133_spill] sm:$0xff] }
 0x2a8   :  { %1776 = vmatpush.msra.mxu0 %v9796_v15  ;;  %1796 = vmatpush.msra.mxu1 %v9797_v63  ;;  %v9855_v15 = vld [vmem:[#allocation134_spill] sm:$0xff]  ;;  %v9856_v63 = vld [vmem:[#allocation135_spill] sm:$0xff] }
 0x2a9   :  { %1816 = vmatpush.msrb.mxu2 %v9798_v37  ;;  %1836 = vmatpush.msrb.mxu3 %v9799_v4  ;;  %v9857_v37 = vld [vmem:[#allocation136_spill] sm:$0xff]  ;;  %v9858_v4 = vld [vmem:[#allocation137_spill] sm:$0xff] }
 0x2aa   :  { %1777 = vmatpush.msra.mxu0 %v9800_v6  ;;  %1797 = vmatpush.msra.mxu1 %v9801_v13  ;;  %v9859_v6 = vld [vmem:[#allocation138_spill] sm:$0xff]  ;;  %v9860_v13 = vld [vmem:[#allocation139_spill] sm:$0xff] }
 0x2ab   :  { %1817 = vmatpush.msrb.mxu2 %v9802_v17  ;;  %1837 = vmatpush.msrb.mxu3 %v9803_v19  ;;  %v9861_v17 = vld [vmem:[#allocation140_spill] sm:$0xff]  ;;  %v9862_v19 = vld [vmem:[#allocation141_spill] sm:$0xff] }
 0x2ac   :  { %1778 = vmatpush.msra.mxu0 %v9804_v25  ;;  %1798 = vmatpush.msra.mxu1 %v9805_v23  ;;  %v9863_v25 = vld [vmem:[#allocation142_spill] sm:$0xff]  ;;  %v9864_v23 = vld [vmem:[#allocation143_spill] sm:$0xff] }
 0x2ad   :  { %1818 = vmatpush.msrb.mxu2 %v9806_v27  ;;  %1838 = vmatpush.msrb.mxu3 %v9807_v7  ;;  %v9865_v27 = vld [vmem:[#allocation144_spill] sm:$0xff]  ;;  %v9866_v7 = vld [vmem:[#allocation145_spill] sm:$0xff] }
 0x2ae   :  { %1779 = vmatpush.msra.mxu0 %v9808_v5  ;;  %1799 = vmatpush.msra.mxu1 %v9809_v18  ;;  %v9867_v5 = vld [vmem:[#allocation146_spill] sm:$0xff]  ;;  %v9868_v18 = vld [vmem:[#allocation147_spill] sm:$0xff] }
 0x2af   :  { %1819 = vmatpush.msrb.mxu2 %v9810_v8  ;;  %1839 = vmatpush.msrb.mxu3 %v9811_v22  ;;  %v9869_v8 = vld [vmem:[#allocation148_spill] sm:$0xff]  ;;  %v9870_v22 = vld [vmem:[#allocation149_spill] sm:$0xff] }
 0x2b0   :  { %1780 = vmatpush.msra.mxu0 %v9812_v29  ;;  %1800 = vmatpush.msra.mxu1 %v9813_v12  ;;  %v9871_v29 = vld [vmem:[#allocation151_spill] sm:$0xff]  ;;  %v9872_v12 = vld [vmem:[#allocation152_spill] sm:$0xff] }
 0x2b1   :  { %1820 = vmatpush.msrb.mxu2 %v9814_v52  ;;  %1840 = vmatpush.msrb.mxu3 %v9815_v16  ;;  %v9873_v52 = vld [vmem:[#allocation153_spill] sm:$0xff]  ;;  %v9874_v16 = vld [vmem:[#allocation154_spill] sm:$0xff] }
 0x2b2   :  { %1781 = vmatpush.msra.mxu0 %v9816_v14  ;;  %1801 = vmatpush.msra.mxu1 %v9817_v3  ;;  %v9875_v14 = vld [vmem:[#allocation155_spill] sm:$0xff]  ;;  %v9876_v3 = vld [vmem:[#allocation156_spill] sm:$0xff] }
 0x2b3   :  { %1821 = vmatpush.msrb.mxu2 %v9818_v2  ;;  %1841 = vmatpush.msrb.mxu3 %v9819_v10  ;;  %v9877_v2 = vld [vmem:[#allocation157_spill] sm:$0xff]  ;;  %v9878_v10 = vld [vmem:[#allocation158_spill] sm:$0xff] }
 0x2b4   :  { %1782 = vmatpush.msra.mxu0 %v9820_v58  ;;  %1802 = vmatpush.msra.mxu1 %v9821_v20  ;;  %v9879_v58 = vld [vmem:[#allocation159_spill] sm:$0xff]  ;;  %v9880_v20 = vld [vmem:[#allocation160_spill] sm:$0xff] }
 0x2b5   :  { %1822 = vmatpush.msrb.mxu2 %v9822_v34  ;;  %1842 = vmatpush.msrb.mxu3 %v9823_v43  ;;  %v9881_v34 = vld [vmem:[#allocation162_spill] sm:$0xff]  ;;  %v9882_v43 = vld [vmem:[#allocation163_spill] sm:$0xff] }
 0x2b6   :  { %1783 = vmatpush.msra.mxu0 %v9824_v46  ;;  %1803 = vmatpush.msra.mxu1 %v9825_v32  ;;  %v9883_v46 = vld [vmem:[#allocation164_spill] sm:$0xff]  ;;  %v9884_v32 = vld [vmem:[#allocation165_spill] sm:$0xff] }
 0x2b7   :  { %1823 = vmatpush.msrb.mxu2 %v9826_v50  ;;  %1843 = vmatpush.msrb.mxu3 %v9827_v26  ;;  %v9885_v50 = vld [vmem:[#allocation166_spill] sm:$0xff]  ;;  %v9886_v26 = vld [vmem:[#allocation167_spill] sm:$0xff] }
 0x2b8   :  { %1784 = vmatpush.msra.mxu0 %v9828_v56  ;;  %1804 = vmatpush.msra.mxu1 %v9829_v28  ;;  %v9887_v56 = vld [vmem:[#allocation168_spill] sm:$0xff]  ;;  %v9888_v28 = vld [vmem:[#allocation169_spill] sm:$0xff] }
 0x2b9   :  { %1824 = vmatpush.msrb.mxu2 %v9830_v36  ;;  %1844 = vmatpush.msrb.mxu3 %v9831_v24  ;;  %v9889_v36 = vld [vmem:[#allocation170_spill] sm:$0xff]  ;;  %v9890_v24 = vld [vmem:[#allocation171_spill] sm:$0xff] }
 0x2ba   :  { %1785 = vmatpush.msra.mxu0 %v9832_v40  ;;  %1805 = vmatpush.msra.mxu1 %v9833_v35  ;;  %v9891_v40 = vld [vmem:[#allocation172_spill] sm:$0xff]  ;;  %v9892_v35 = vld [vmem:[#allocation173_spill] sm:$0xff] }
 0x2bb   :  { %1825 = vmatpush.msrb.mxu2 %v9834_v39  ;;  %1845 = vmatpush.msrb.mxu3 %v9835_v0  ;;  %v9893_v39 = vld [vmem:[#allocation174_spill] sm:$0xff]  ;;  %v9894_v0 = vld [vmem:[#allocation175_spill] sm:$0xff] }
 0x2bc   :  { %1786 = vmatpush.msra.mxu0 %v9836_v9  ;;  %1806 = vmatpush.msra.mxu1 %v9837_v31  ;;  %v9895_v9 = vld [vmem:[#allocation176_spill] sm:$0xff]  ;;  %v9896_v31 = vld [vmem:[#allocation177_spill] sm:$0xff] }
 0x2bd   :  { %1826 = vmatpush.msrb.mxu2 %v9838_v48  ;;  %1846 = vmatpush.msrb.mxu3 %v9839_v41  ;;  %v9897_v48 = vld [vmem:[#allocation178_spill] sm:$0xff]  ;;  %v9898_v41 = vld [vmem:[#allocation179_spill] sm:$0xff] }
 0x2be   :  { %1787 = vmatpush.msra.mxu0 %v9840_v42  ;;  %1807 = vmatpush.msra.mxu1 %v9841_v44  ;;  %v9899_v42 = vld [vmem:[#allocation180_spill] sm:$0xff]  ;;  %v9900_v44 = vld [vmem:[#allocation181_spill] sm:$0xff] }
 0x2bf   :  { %1827 = vmatpush.msrb.mxu2 %v9842_v45  ;;  %1847 = vmatpush.msrb.mxu3 %v9843_v47  ;;  %v9901_v45 = vld [vmem:[#allocation182_spill] sm:$0xff]  ;;  %v9902_v47 = vld [vmem:[#allocation183_spill] sm:$0xff] }
 0x2c0   :  { %1855 = vmatpush.msrb.mxu0 %v9844_v49  ;;  %1875 = vmatpush.msrb.mxu1 %v9845_v51  ;;  %v9903_v49 = vld [vmem:[#allocation184_spill] sm:$0xff]  ;;  %v9904_v51 = vld [vmem:[#allocation185_spill] sm:$0xff] }
 0x2c1   :  { %1895 = vmatpush.msra.mxu2 %v9846_v53  ;;  %1915 = vmatpush.msra.mxu3 %v9847_v54  ;;  %v9905_v53 = vld [vmem:[#allocation186_spill] sm:$0xff]  ;;  %v9906_v54 = vld [vmem:[#allocation187_spill] sm:$0xff] }
 0x2c2   :  { %1856 = vmatpush.msrb.mxu0 %v9848_v55  ;;  %1876 = vmatpush.msrb.mxu1 %v9849_v57  ;;  %v9907_v55 = vld [vmem:[#allocation188_spill] sm:$0xff] }
 0x2c3   :  { %1896 = vmatpush.msra.mxu2 %v9850_v38  ;;  %1916 = vmatpush.msra.mxu3 %v9851_v59 }
 0x2c4   :  { %1857 = vmatpush.msrb.mxu0 %v9852_v60  ;;  %1877 = vmatpush.msrb.mxu1 %v9853_v62 }
 0x2c5   :  { %1897 = vmatpush.msra.mxu2 %v9854_v11  ;;  %1917 = vmatpush.msra.mxu3 %v9855_v15 }
 0x2c6   :  { %1858 = vmatpush.msrb.mxu0 %v9856_v63  ;;  %1878 = vmatpush.msrb.mxu1 %v9857_v37  ;;  %v9908_v63 = vld [vmem:[#allocation23_spill] sm:$0xff] }
 0x2c7   :  { %1898 = vmatpush.msra.mxu2 %v9858_v4  ;;  %1918 = vmatpush.msra.mxu3 %v9859_v6  ;;  %v9909_v4 = vld [vmem:[#allocation32_spill] sm:$0xff] }
 0x2c8   :  { %1859 = vmatpush.msrb.mxu0 %v9860_v13  ;;  %1879 = vmatpush.msrb.mxu1 %v9861_v17 }
 0x2c9   :  { %1899 = vmatpush.msra.mxu2 %v9862_v19  ;;  %1919 = vmatpush.msra.mxu3 %v9863_v25 }
 0x2ca   :  { %1860 = vmatpush.msrb.mxu0 %v9864_v23  ;;  %1880 = vmatpush.msrb.mxu1 %v9865_v27  ;;  %v9910_v27 = vld [vmem:[#allocation26_spill] sm:$0xff] }
 0x2cb   :  { %1900 = vmatpush.msra.mxu2 %v9866_v7  ;;  %1920 = vmatpush.msra.mxu3 %v9867_v5 }
 0x2cc   :  { %1861 = vmatpush.msrb.mxu0 %v9868_v18  ;;  %1881 = vmatpush.msrb.mxu1 %v9869_v8 }
 0x2cd   :  { %1901 = vmatpush.msra.mxu2 %v9870_v22  ;;  %1921 = vmatpush.msra.mxu3 %v9871_v29 }
 0x2ce   :  { %1862 = vmatpush.msrb.mxu0 %v9872_v12  ;;  %1882 = vmatpush.msrb.mxu1 %v9873_v52  ;;  %v9911_v52 = vld [vmem:[#allocation150_spill] sm:$0xff] }
 0x2cf   :  { %1902 = vmatpush.msra.mxu2 %v9874_v16  ;;  %1922 = vmatpush.msra.mxu3 %v9875_v14  ;;  %v9912_v14 = vld [vmem:[#allocation161_spill] sm:$0xff] }
 0x2d0   :  { %1863 = vmatpush.msrb.mxu0 %v9876_v3  ;;  %1883 = vmatpush.msrb.mxu1 %v9877_v2 }
 0x2d1   :  { %1903 = vmatpush.msra.mxu2 %v9878_v10  ;;  %1923 = vmatpush.msra.mxu3 %v9879_v58 }
 0x2d2   :  { %1864 = vmatpush.msrb.mxu0 %v9880_v20  ;;  %1884 = vmatpush.msrb.mxu1 %v9881_v34 }
 0x2d3   :  { %1904 = vmatpush.msra.mxu2 %v9882_v43  ;;  %1924 = vmatpush.msra.mxu3 %v9883_v46 }
 0x2d4   :  { %1865 = vmatpush.msrb.mxu0 %v9884_v32  ;;  %1885 = vmatpush.msrb.mxu1 %v9885_v50 }
 0x2d5   :  { %1905 = vmatpush.msra.mxu2 %v9886_v26  ;;  %1925 = vmatpush.msra.mxu3 %v9887_v56 }
 0x2d6   :  { %1866 = vmatpush.msrb.mxu0 %v9888_v28  ;;  %1886 = vmatpush.msrb.mxu1 %v9889_v36  ;;  %v9913_v36 = vld [vmem:[#allocation35_spill] sm:$0xff] }
 0x2d7   :  { %1906 = vmatpush.msra.mxu2 %v9890_v24  ;;  %1926 = vmatpush.msra.mxu3 %v9891_v40 }
 0x2d8   :  { %1867 = vmatpush.msrb.mxu0 %v9892_v35  ;;  %1887 = vmatpush.msrb.mxu1 %v9893_v39 }
 0x2d9   :  { %1907 = vmatpush.msra.mxu2 %v9894_v0  ;;  %1927 = vmatpush.msra.mxu3 %v9895_v9 }
 0x2da   :  { %1868 = vmatpush.msrb.mxu0 %v9896_v31  ;;  %1888 = vmatpush.msrb.mxu1 %v9897_v48 }
 0x2db   :  { %1908 = vmatpush.msra.mxu2 %v9898_v41  ;;  %1928 = vmatpush.msra.mxu3 %v9899_v42 }
 0x2dc   :  { %1869 = vmatpush.msrb.mxu0 %v9900_v44  ;;  %1889 = vmatpush.msrb.mxu1 %v9901_v45 }
 0x2dd   :  { %1909 = vmatpush.msra.mxu2 %v9902_v47  ;;  %1929 = vmatpush.msra.mxu3 %v9903_v49 }
 0x2de   :  { %1870 = vmatpush.msrb.mxu0 %v9904_v51  ;;  %1890 = vmatpush.msrb.mxu1 %v9905_v53 }
 0x2df   :  { %1910 = vmatpush.msra.mxu2 %v9906_v54  ;;  %1930 = vmatpush.msra.mxu3 %v9907_v55 }
 0x2f7   :  { %v1397_v57 = vpop.f32.mrf.mxu0  ;;  %v1417_v38 = vpop.f32.mrf.mxu1 }
 0x2fe   :  { %v1437_v59 = vpop.f32.mrf.mxu2  ;;  %v1457_v19 = vpop.f32.mrf.mxu3 }
 0x311   :  { %v1480_v60 = vpop.f32.mrf.mxu0  ;;  %v1500_v62 = vpop.f32.mrf.mxu1 }
 0x312   :  { %v1481_v11 = vadd.f32 %v1480_v60, %v1397_v57  ;;  %v1501_v15 = vadd.f32 %v1500_v62, %v1417_v38 }
 0x314   :  { %v1543_v37 = vadd.f32 %v1481_v11, %v9908_v63  ;;  %v1544_v6 = vadd.f32 %v1501_v15, %v9909_v4 }
 0x316   :  { %v3728_v13 = vmul.f32 -1.442695, %v1543_v37  ;;  %v3729_v17 = vmul.f32 -1.442695, %v1544_v6 }
 0x318   :  { %3855 = vpow2.f32 %v3728_v13  ;;  %v1520_v25 = vpop.f32.mrf.mxu2  ;;  %v1540_v58 = vpop.f32.mrf.mxu3 }
 0x319   :  { %3857 = vpow2.f32 %v3729_v17  ;;  %v1521_v23 = vadd.f32 %v1520_v25, %v1437_v59  ;;  %v1541_v46 = vadd.f32 %v1540_v58, %v1457_v19 }
 0x31b   :  { %v1545_v7 = vadd.f32 %v1521_v23, %v9910_v27  ;;  %v1627_v5 = vpop.f32.mrf.mxu0  ;;  %v1647_v18 = vpop.f32.mrf.mxu1  ;;  %v1546_v24 = vadd.f32 %v1541_v46, %v9913_v36 }
 0x31c   :  { %v1694_v8 = vrot.slane %v1627_v5, 5  ;;  %v1695_v22 = vrot.slane %v1647_v18, 5 }
 0x31d   :  { %v3730_v29 = vmul.f32 -1.442695, %v1545_v7 }
 0x31e   :  { %v3856_v12 = vpop.eup %3855  ;;  %v1702_v16 = vadd.f32 %v1694_v8, %v9911_v52  ;;  %v1703_v3 = vadd.f32 %v1695_v22, %v9912_v14 }
 0x31f   :  { %v3858_v2 = vpop.eup %3857  ;;  %v1556_v10 = vadd.f32 1.0, %v3856_v12  ;;  %3859 = vpow2.f32 %v3730_v29 }
 0x320   :  { %v1557_v20 = vadd.f32 1.0, %v3858_v2  ;;  %v3731_v34 = vmul.f32 -1.442695, %v1702_v16  ;;  %v3732_v43 = vmul.f32 -1.442695, %v1703_v3  ;;  %v3585_v2 = vrot.slane %v6495_v30, 7 }
 0x321   :  { %3861 = vrcp.f32 %v1556_v10  ;;  %v1568_v42 = vand.u32 2147483647, %v1556_v10  ;;  %v1570_v51 = vand.u32 2147483648, %v1556_v10  ;;  %vm1564_vm0 = vweird.f32 %v1556_v10 }
 0x322   :  { %3863 = vrcp.f32 %v1557_v20  ;;  %v1667_v32 = vpop.f32.mrf.mxu2  ;;  %v1687_v45 = vpop.f32.mrf.mxu3  ;;  %v1585_v49 = vand.u32 2147483648, %v1557_v20  ;;  %v1583_v55 = vand.u32 2147483647, %v1557_v20  ;;  %vm1579_vm15 = vweird.f32 %v1557_v20 }
 0x323   :  { %3865 = vpow2.f32 %v3731_v34  ;;  %v1696_v50 = vrot.slane %v1667_v32, 5  ;;  %v1697_v38 = vrot.slane %v1687_v45, 5  ;;  %vm1569_vm2 = vcmp.eq.f32.partialorder %v1568_v42, 8.507059e+37 }
 0x324   :  { %3867 = vpow2.f32 %v3732_v43  ;;  %v1571_v15 = vor.u32 1.1754944e-38, %v1570_v51  ;;  %v1586_v13 = vor.u32 1.1754944e-38, %v1585_v49  ;;  %vm1584_vm4 = vcmp.eq.f32.partialorder %v1583_v55, 8.507059e+37 }
 0x325   :  { %v3860_v26 = vpop.eup %3859  ;;  %v1704_v56 = vadd.f32 %v1696_v50, %v5565_v21  ;;  %v1705_v5 = vadd.f32 %v1697_v38, %v5618_v33 }
 0x326   :  { %v6727_v28 = vadd.f32 1.0, %v3860_v26 }
 0x327   :  { %v3862_v40 = vpop.eup %3861  ;;  %v3733_v35 = vmul.f32 -1.442695, %v1704_v56 }
 0x328   :  { %v3864_v39 = vpop.eup %3863  ;;  %v1560_v0 = vmul.f32 %v3862_v40, %v1556_v10  ;;  %3869 = vrcp.f32 %v6727_v28  ;;  %vm1565_vm13 = vweird.f32 %v3862_v40  ;;  %v1765_v10 = vrot.slane %v6545_v1, 7 }
 0x329   :  { %v3866_v9 = vpop.eup %3865  ;;  %v1575_v31 = vmul.f32 %v3864_v39, %v1557_v20  ;;  %3871 = vpow2.f32 %v3733_v35  ;;  %vm1580_vm14 = vweird.f32 %v3864_v39  ;;  %vm1566_vm1 = vmor %vm1564_vm0, %vm1565_vm13  ;;  %vm1594_vm5 = vweird.f32 %v6727_v28 }
 0x32a   :  { %v3868_v48 = vpop.eup %3867  ;;  %v1561_v41 = vsub.f32 1.0, %v1560_v0  ;;  %3873 = vtanh.f32 %v1546_v24  ;;  %v6731_v44 = vadd.f32 1.0, %v3866_v9  ;;  %vm1581_vm3 = vmor %vm1579_vm15, %vm1580_vm14  ;;  %v1600_v58 = vand.u32 2147483648, %v6727_v28  ;;  %v6873_v0 = vld [vmem:[#allocation7 + $0x150] sm:$0xff] }
 0x32b   :  { %v1576_v47 = vsub.f32 1.0, %v1575_v31  ;;  %v6733_v53 = vadd.f32 1.0, %v3868_v48 }
 0x32c   :  { %v1562_v54 = vmul.f32 %v3862_v40, %v1561_v41  ;;  %3875 = vrcp.f32 %v6731_v44  ;;  %v1727_v46 = vand.u32 2147483647, %v6731_v44  ;;  %vm1723_vm9 = vweird.f32 %v6731_v44 }
 0x32d   :  { %v1577_v57 = vmul.f32 %v3864_v39, %v1576_v47  ;;  %3877 = vrcp.f32 %v6733_v53  ;;  %v1744_v30 = vand.u32 2147483648, %v6733_v53  ;;  %v1742_v24 = vand.u32 2147483647, %v6733_v53 }
 0x32e   :  { %v6737_v59 = vpop.eup %3869  ;;  %v1563_v60 = vadd.f32 %v3862_v40, %v1562_v54  ;;  %v1601_v9 = vor.u32 1.1754944e-38, %v1600_v58  ;;  %vm1738_vm11 = vweird.f32 %v6733_v53  ;;  %vm1728_vm14 = vcmp.eq.f32.partialorder %v1727_v46, 8.507059e+37  ;;  %v6834_v58 = vld [vmem:[#allocation7 + $0x1b8] sm:$0xff]  ;;  %v6837_v46 = vld [vmem:[#allocation7 + $0x180] sm:$0xff] }
 0x32f   :  { %v3872_v62 = vpop.eup %3871  ;;  %v1590_v11 = vmul.f32 %v6737_v59, %v6727_v28  ;;  %v1578_v37 = vadd.f32 %v3864_v39, %v1577_v57  ;;  %vm1595_vm6 = vweird.f32 %v6737_v59  ;;  %v1745_v45 = vor.u32 1.1754944e-38, %v1744_v30  ;;  %v6846_v30 = vld [vmem:[#allocation7 + $0x198] sm:$0xff] }
 0x330   :  { %v3874_v6 = vpop.eup %3873  ;;  %v1567_v17 = vsel %vm1566_vm1, %v3862_v40, %v1563_v60  ;;  %v6741_v19 = vadd.f32 1.0, %v3872_v62  ;;  %v1598_v40 = vand.u32 2147483647, %v6727_v28  ;;  %vm6770_vm10 = vmor %vm1594_vm5, %vm1595_vm6  ;;  %vm1743_vm15 = vcmp.eq.f32.partialorder %v1742_v24, 8.507059e+37  ;;  %v6857_v24 = vld [vmem:[#allocation7 + $0x170] sm:$0xff] }
 0x331   :  { %v1591_v25 = vsub.f32 1.0, %v1590_v11  ;;  %v1572_v23 = vsel %vm1569_vm2, %v1571_v15, %v1567_v17  ;;  %v1582_v7 = vsel %vm1581_vm3, %v3864_v39, %v1578_v37  ;;  %vm3573_vm1 = vcmask 1040384   ;;  %v9916_v15 = vld [vmem:[#allocation24_spill] sm:$0xff]  ;;  %v6790_v17 = vld [vmem:[#allocation7 + $0x1e8] sm:$0xff] }
 0x332   :  { %v3876_v18 = vpop.eup %3875  ;;  %v1587_v8 = vsel %vm1584_vm4, %v1586_v13, %v1582_v7  ;;  %v1606_v22 = vmul.f32 %v3874_v6, %v1572_v23  ;;  %3879 = vrcp.f32 %v6741_v19  ;;  %vm1599_vm0 = vcmp.eq.f32.partialorder %v1598_v40, 8.507059e+37  ;;  %v6787_v13 = vld [vmem:[#allocation7 + $0x1e0] sm:$0xff]  ;;  %v6798_v7 = vld [vmem:[#allocation7 + $0x1f0] sm:$0xff]  ;;  %v6860_v40 = vld [vmem:[#allocation7 + $0x178] sm:$0xff] }
 0x333   :  { %v3878_v29 = vpop.eup %3877  ;;  %v1592_v12 = vmul.f32 %v6737_v59, %v1591_v25  ;;  %v1605_v16 = vmul.f32 %v1587_v8, %v6483_v61  ;;  %v1719_v3 = vmul.f32 %v3876_v18, %v6731_v44  ;;  %3881 = vtanh.f32 %v1705_v5  ;;  %v6801_v5 = vld [vmem:[#allocation7 + $0x1f8] sm:$0xff]  ;;  %v6810_v8 = vld [vmem:[#allocation7 + $0x1c0] sm:$0xff] }
 0x334   :  { %v1734_v20 = vmul.f32 %v3878_v29, %v6733_v53  ;;  %v1729_v61 = vand.u32 2147483648, %v6731_v44  ;;  %vm1724_vm7 = vweird.f32 %v3876_v18  ;;  %vm1739_vm8 = vweird.f32 %v3878_v29 }
 0x335   :  { %v6753_v34 = vadd.f32 %v1606_v22, %v1605_v16  ;;  %v1720_v43 = vsub.f32 1.0, %v1719_v3  ;;  %v1593_v50 = vadd.f32 %v6737_v59, %v1592_v12  ;;  %vm1725_vm12 = vmor %vm1723_vm9, %vm1724_vm7  ;;  %vm3605_vm2 = vcmask 1041408   ;;  %v6813_v22 = vld [vmem:[#allocation7 + $0x1c8] sm:$0xff]  ;;  %v6822_v12 = vld [vmem:[#allocation7 + $0x1d8] sm:$0xff] }
 0x336   :  { %v1735_v32 = vsub.f32 1.0, %v1734_v20  ;;  %v1730_v31 = vor.u32 1.1754944e-38, %v1729_v61  ;;  %vm1740_vm13 = vmor %vm1738_vm11, %vm1739_vm8  ;;  %v3604_v37 = vsel %vm3573_vm1, %v9916_v15, %v3585_v2  ;;  %v1759_v6 = vand.u32 2147483648, %v6741_v19  ;;  %v6825_v3 = vld [vmem:[#allocation7 + $0x1a0] sm:$0xff]  ;;  %v6828_v2 = vld [vmem:[#allocation7 + $0x1a8] sm:$0xff] }
 0x337   :  { %3883 = vtanh.f32 %v6753_v34  ;;  %v1721_v1 = vmul.f32 %v3876_v18, %v1720_v43  ;;  %v1597_v41 = vsel %vm6770_vm10, %v6737_v59, %v1593_v50  ;;  %vm1753_vm4 = vweird.f32 %v6741_v19  ;;  %v6843_v50 = vld [vmem:[#allocation7 + $0x190] sm:$0xff] }
 0x338   :  { %v6761_v26 = vpop.eup %3879  ;;  %v1736_v56 = vmul.f32 %v3878_v29, %v1735_v32  ;;  %v1602_v57 = vsel %vm1599_vm0, %v1601_v9, %v1597_v41  ;;  %v1757_v23 = vand.u32 2147483647, %v6741_v19  ;;  %v1760_v16 = vor.u32 1.1754944e-38, %v1759_v6  ;;  %v6840_v32 = vld [vmem:[#allocation7 + $0x188] sm:$0xff]  ;;  %v6876_v9 = vld [vmem:[#allocation7 + $0x158] sm:$0xff]  ;;  %v6885_v41 = vld [vmem:[#allocation7 + $0x130] sm:$0xff] }
 0x339   :  { %v1749_v35 = vmul.f32 %v6761_v26, %v6741_v19  ;;  %v1722_v39 = vadd.f32 %v3876_v18, %v1721_v1  ;;  %v3882_v42 = vpop.eup %3881  ;;  %vm1754_vm3 = vweird.f32 %v6761_v26  ;;  %v6849_v1 = vld [vmem:[#allocation7 + $0x160] sm:$0xff]  ;;  %v6933_v15 = vld [vmem:[#allocation7 + $0xb0] sm:$0xff] }
 0x33a   :  { %v1737_v48 = vadd.f32 %v3878_v29, %v1736_v56  ;;  %vm6806_vm5 = vmor %vm1753_vm4, %vm1754_vm3  ;;  %vm1758_vm6 = vcmp.eq.f32.partialorder %v1757_v23, 8.507059e+37  ;;  %9930 = vst [vmem:[#allocation29_spill] sm:$0xff] %v6933_v15  ;;  %v6939_v6 = vld [vmem:[#allocation7 + $0x80] sm:$0xff]  ;;  %v6942_v23 = vld [vmem:[#allocation7 + $0x88] sm:$0xff]  ;;  %vm3607_vm4 = vcmask 1042432  }
 0x33b   :  { %v1750_v44 = vsub.f32 1.0, %v1749_v35  ;;  %v1726_v47 = vsel %vm1725_vm12, %v3876_v18, %v1722_v39  ;;  %v6863_v35 = vld [vmem:[#allocation7 + $0x140] sm:$0xff]  ;;  %v6866_v39 = vld [vmem:[#allocation7 + $0x148] sm:$0xff]  ;;  %9932 = vst [vmem:[#allocation37_spill] sm:$0xff] %v6939_v6  ;;  %v6945_v18 = vld [vmem:[#allocation7 + $0x90] sm:$0xff] }
 0x33c   :  { %v1731_v28 = vsel %vm1728_vm14, %v1730_v31, %v1726_v47  ;;  %v1741_v49 = vsel %vm1740_vm13, %v3878_v29, %v1737_v48  ;;  %v6819_v29 = vld [vmem:[#allocation7 + $0x1d0] sm:$0xff]  ;;  %v6879_v31 = vld [vmem:[#allocation7 + $0x120] sm:$0xff]  ;;  %v6882_v48 = vld [vmem:[#allocation7 + $0x128] sm:$0xff]  ;;  %9933 = vst [vmem:[#allocation48_spill] sm:$0xff] %v6942_v23 }
 0x33d   :  { %v3884_v51 = vpop.eup %3883  ;;  %v1751_v53 = vmul.f32 %v6761_v26, %v1750_v44  ;;  %v1746_v54 = vsel %vm1743_vm15, %v1745_v45, %v1741_v49  ;;  %v1768_v55 = vmul.f32 %v3882_v42, %v1731_v28  ;;  %v6888_v42 = vld [vmem:[#allocation7 + $0x138] sm:$0xff]  ;;  %v6891_v45 = vld [vmem:[#allocation7 + $0x100] sm:$0xff]  ;;  %v6894_v44 = vld [vmem:[#allocation7 + $0x108] sm:$0xff]  ;;  %9934 = vst [vmem:[#allocation31_spill] sm:$0xff] %v6945_v18 }
 0x33e   :  { %v1767_v38 = vmul.f32 %v1765_v10, %v1746_v54  ;;  %v1609_v60 = vmul.f32 %v3884_v51, %v1602_v57  ;;  %v6831_v10 = vld [vmem:[#allocation7 + $0x1b0] sm:$0xff]  ;;  %v6900_v28 = vld [vmem:[#allocation7 + $0x118] sm:$0xff]  ;;  %v6903_v49 = vld [vmem:[#allocation7 + $0xe0] sm:$0xff] }
 0x33f   :  { %v1752_v11 = vadd.f32 %v6761_v26, %v1751_v53  ;;  %v6897_v47 = vld [vmem:[#allocation7 + $0x110] sm:$0xff]  ;;  %9919 = vst [vmem:[#allocation36_spill] sm:$0xff] %v6900_v28  ;;  %v6906_v51 = vld [vmem:[#allocation7 + $0xe8] sm:$0xff]  ;;  %v6912_v54 = vld [vmem:[#allocation7 + $0xf8] sm:$0xff] }
 0x340   :  { %v6779_v59 = vadd.f32 %v1768_v55, %v1767_v38  ;;  %1788 = vmatmul.f32.vlgmr.msra.gmra.mxu0 %v1609_v60  ;;  %1808 = vmatmul.f32.vlgmr.msra.gmra.mxu1 %v1609_v60  ;;  %v3588_v62 = vrot.slane %v1609_v60, 6  ;;  %9920 = vst [vmem:[#allocation28_spill] sm:$0xff] %v6903_v49  ;;  %v6909_v53 = vld [vmem:[#allocation7 + $0xf0] sm:$0xff]  ;;  %v6915_v55 = vld [vmem:[#allocation7 + $0xc0] sm:$0xff]  ;;  %v6918_v57 = vld [vmem:[#allocation7 + $0xc8] sm:$0xff] }
 0x341   :  { %1828 = vmatmul.f32.vlgmr.msrb.gmra.mxu2 %v1609_v60  ;;  %1848 = vmatmul.f32.vlgmr.msrb.gmra.mxu3 %v1609_v60  ;;  %v1756_v19 = vsel %vm6806_vm5, %v6761_v26, %v1752_v11  ;;  %v6852_v26 = vld [vmem:[#allocation7 + $0x168] sm:$0xff]  ;;  %9921 = vst [vmem:[#allocation39_spill] sm:$0xff] %v6906_v51  ;;  %v6921_v38 = vld [vmem:[#allocation7 + $0xd0] sm:$0xff]  ;;  %v6924_v60 = vld [vmem:[#allocation7 + $0xd8] sm:$0xff] }
 0x342   :  { %3885 = vtanh.f32 %v6779_v59  ;;  %2002 = vmatpush.msra.mxu0 %v6787_v13  ;;  %2022 = vmatpush.msra.mxu1 %v6790_v17  ;;  %v6794_v25 = vsel %vm3605_vm2, %v3604_v37, %v3588_v62  ;;  %v1761_v43 = vsel %vm1758_vm6, %v1760_v16, %v1756_v19  ;;  %9922 = vst [vmem:[#allocation25_spill] sm:$0xff] %v6909_v53  ;;  %v6927_v62 = vld [vmem:[#allocation7 + $0xa0] sm:$0xff]  ;;  %v6930_v11 = vld [vmem:[#allocation7 + $0xa8] sm:$0xff]  ;;  %v6936_v37 = vld [vmem:[#allocation7 + $0xb8] sm:$0xff] }
 0x343   :  { %2042 = vmatpush.msrb.mxu2 %v6798_v7  ;;  %2062 = vmatpush.msrb.mxu3 %v6801_v5  ;;  %9923 = vst [vmem:[#allocation40_spill] sm:$0xff] %v6912_v54  ;;  %v6948_v19 = vld [vmem:[#allocation7 + $0x98] sm:$0xff]  ;;  %v6951_v16 = vld [vmem:[#allocation7 + $0x60] sm:$0xff] }
 0x344   :  { %2003 = vmatpush.msra.mxu0 %v6810_v8  ;;  %2023 = vmatpush.msra.mxu1 %v6813_v22  ;;  %9924 = vst [vmem:[#allocation30_spill] sm:$0xff] %v6915_v55 }
 0x345   :  { %2043 = vmatpush.msrb.mxu2 %v6819_v29  ;;  %2063 = vmatpush.msrb.mxu3 %v6822_v12  ;;  %9925 = vst [vmem:[#allocation42_spill] sm:$0xff] %v6918_v57 }
 0x346   :  { %2004 = vmatpush.msra.mxu0 %v6825_v3  ;;  %2024 = vmatpush.msra.mxu1 %v6828_v2  ;;  %9926 = vst [vmem:[#allocation27_spill] sm:$0xff] %v6921_v38 }
 0x347   :  { %2044 = vmatpush.msrb.mxu2 %v6831_v10  ;;  %2064 = vmatpush.msrb.mxu3 %v6834_v58  ;;  %9927 = vst [vmem:[#allocation43_spill] sm:$0xff] %v6924_v60 }
 0x348   :  { %v3886_v20 = vpop.eup %3885  ;;  %2005 = vmatpush.msra.mxu0 %v6837_v46  ;;  %2025 = vmatpush.msra.mxu1 %v6840_v32  ;;  %9928 = vst [vmem:[#allocation33_spill] sm:$0xff] %v6927_v62 }
 0x349   :  { %v1771_v61 = vmul.f32 %v3886_v20, %v1761_v43  ;;  %2045 = vmatpush.msrb.mxu2 %v6843_v50  ;;  %2065 = vmatpush.msrb.mxu3 %v6846_v30  ;;  %9929 = vst [vmem:[#allocation45_spill] sm:$0xff] %v6930_v11  ;;  %v6954_v20 = vld [vmem:[#allocation7 + $0x68] sm:$0xff]  ;;  %v6957_v43 = vld [vmem:[#allocation7 + $0x70] sm:$0xff] }
 0x34a   :  { %2006 = vmatpush.msra.mxu0 %v6849_v1  ;;  %2026 = vmatpush.msra.mxu1 %v6852_v26  ;;  %9931 = vst [vmem:[#allocation46_spill] sm:$0xff] %v6936_v37 }
 0x34b   :  { %v6855_v56 = vrot.slane %v1771_v61, 3  ;;  %2046 = vmatpush.msrb.mxu2 %v6857_v24  ;;  %2066 = vmatpush.msrb.mxu3 %v6860_v40  ;;  %9935 = vst [vmem:[#allocation49_spill] sm:$0xff] %v6948_v19  ;;  %v6960_v61 = vld [vmem:[#allocation7 + $0x78] sm:$0xff] }
 0x34c   :  { %2007 = vmatpush.msra.mxu0 %v6863_v35  ;;  %2027 = vmatpush.msra.mxu1 %v6866_v39  ;;  %9936 = vst [vmem:[#allocation41_spill] sm:$0xff] %v6951_v16 }
 0x34d   :  { %1871 = vmatmul.f32.vlgmr.msrb.gmra.mxu0 %v6855_v56  ;;  %1891 = vmatmul.f32.vlgmr.msrb.gmra.mxu1 %v6855_v56  ;;  %9937 = vst [vmem:[#allocation50_spill] sm:$0xff] %v6954_v20 }
 0x34e   :  { %1911 = vmatmul.f32.vlgmr.msra.gmra.mxu2 %v6855_v56  ;;  %1931 = vmatmul.f32.vlgmr.msra.gmra.mxu3 %v6855_v56  ;;  %9938 = vst [vmem:[#allocation34_spill] sm:$0xff] %v6957_v43 }
 0x34f   :  { %2047 = vmatpush.msrb.mxu2 %v6873_v0  ;;  %2067 = vmatpush.msrb.mxu3 %v6876_v9  ;;  %9939 = vst [vmem:[#allocation51_spill] sm:$0xff] %v6960_v61 }
 0x350   :  { %2008 = vmatpush.msra.mxu0 %v6879_v31  ;;  %2028 = vmatpush.msra.mxu1 %v6882_v48 }
 0x351   :  { %2048 = vmatpush.msrb.mxu2 %v6885_v41  ;;  %2068 = vmatpush.msrb.mxu3 %v6888_v42 }
 0x352   :  { %2009 = vmatpush.msra.mxu0 %v6891_v45  ;;  %2029 = vmatpush.msra.mxu1 %v6894_v44 }
 0x353   :  { %2049 = vmatpush.msrb.mxu2 %v6897_v47  ;;  %2069 = vmatpush.msrb.mxu3 %v6900_v28 }
 0x354   :  { %2010 = vmatpush.msra.mxu0 %v6903_v49  ;;  %2030 = vmatpush.msra.mxu1 %v6906_v51 }
 0x355   :  { %2050 = vmatpush.msrb.mxu2 %v6909_v53  ;;  %2070 = vmatpush.msrb.mxu3 %v6912_v54 }
 0x356   :  { %2011 = vmatpush.msra.mxu0 %v6915_v55  ;;  %2031 = vmatpush.msra.mxu1 %v6918_v57 }
 0x357   :  { %2051 = vmatpush.msrb.mxu2 %v6921_v38  ;;  %2071 = vmatpush.msrb.mxu3 %v6924_v60 }
 0x358   :  { %2012 = vmatpush.msra.mxu0 %v6927_v62  ;;  %2032 = vmatpush.msra.mxu1 %v6930_v11 }
 0x359   :  { %2052 = vmatpush.msrb.mxu2 %v6933_v15  ;;  %2072 = vmatpush.msrb.mxu3 %v6936_v37 }
 0x35a   :  { %2013 = vmatpush.msra.mxu0 %v6939_v6  ;;  %2033 = vmatpush.msra.mxu1 %v6942_v23 }
 0x35b   :  { %2053 = vmatpush.msrb.mxu2 %v6945_v18  ;;  %2073 = vmatpush.msrb.mxu3 %v6948_v19  ;;  %v6963_v18 = vld [vmem:[#allocation7 + $0x40] sm:$0xff]  ;;  %v6966_v19 = vld [vmem:[#allocation7 + $0x48] sm:$0xff] }
 0x35c   :  { %2014 = vmatpush.msra.mxu0 %v6951_v16  ;;  %2034 = vmatpush.msra.mxu1 %v6954_v20  ;;  %9940 = vst [vmem:[#allocation44_spill] sm:$0xff] %v6963_v18  ;;  %v6969_v16 = vld [vmem:[#allocation7 + $0x50] sm:$0xff]  ;;  %v6972_v20 = vld [vmem:[#allocation7 + $0x58] sm:$0xff] }
 0x35d   :  { %2054 = vmatpush.msrb.mxu2 %v6957_v43  ;;  %2074 = vmatpush.msrb.mxu3 %v6960_v61  ;;  %9941 = vst [vmem:[#allocation52_spill] sm:$0xff] %v6966_v19  ;;  %v6975_v43 = vld [vmem:[#allocation7 + $0x20] sm:$0xff]  ;;  %v6978_v61 = vld [vmem:[#allocation7 + $0x28] sm:$0xff] }
 0x35e   :  { %2015 = vmatpush.msra.mxu0 %v6963_v18  ;;  %2035 = vmatpush.msra.mxu1 %v6966_v19  ;;  %9942 = vst [vmem:[#allocation38_spill] sm:$0xff] %v6969_v16  ;;  %v6981_v18 = vld [vmem:[#allocation7 + $0x30] sm:$0xff]  ;;  %v6984_v19 = vld [vmem:[#allocation7 + $0x38] sm:$0xff] }
 0x35f   :  { %2055 = vmatpush.msrb.mxu2 %v6969_v16  ;;  %9943 = vst [vmem:[#allocation53_spill] sm:$0xff] %v6972_v20  ;;  %2075 = vmatpush.msrb.mxu3 %v6972_v20  ;;  %v6987_v16 = vld [vmem:[#allocation7] sm:$0xff]  ;;  %v6990_v20 = vld [vmem:[#allocation7 + $0x8] sm:$0xff] }
 0x360   :  { %9944 = vst [vmem:[#allocation47_spill] sm:$0xff] %v6975_v43  ;;  %2016 = vmatpush.msra.mxu0 %v6975_v43  ;;  %2036 = vmatpush.msra.mxu1 %v6978_v61  ;;  %v6993_v43 = vld [vmem:[#allocation7 + $0x10] sm:$0xff] }
 0x361   :  { %9945 = vst [vmem:[#allocation54_spill] sm:$0xff] %v6978_v61  ;;  %2056 = vmatpush.msrb.mxu2 %v6981_v18  ;;  %2076 = vmatpush.msrb.mxu3 %v6984_v19  ;;  %v6996_v61 = vld [vmem:[#allocation7 + $0x18] sm:$0xff] }
 0x362   :  { %9946 = vst [vmem:[#allocation55_spill] sm:$0xff] %v6981_v18  ;;  %2017 = vmatpush.msra.mxu0 %v6987_v16  ;;  %2037 = vmatpush.msra.mxu1 %v6990_v20 }
 0x363   :  { %9947 = vst [vmem:[#allocation56_spill] sm:$0xff] %v6984_v19  ;;  %2057 = vmatpush.msrb.mxu2 %v6993_v43  ;;  %2077 = vmatpush.msrb.mxu3 %v6996_v61  ;;  %v7015_v19 = vld [vmem:[#allocation10 + $0x1c0] sm:$0xff] }
 0x364   :  { %9948 = vst [vmem:[#allocation57_spill] sm:$0xff] %v6987_v16  ;;  %2018 = vmatmul.f32.vlgmr.msra.gmra.mxu0 %v6855_v56  ;;  %2038 = vmatmul.f32.vlgmr.msra.gmra.mxu1 %v6855_v56  ;;  %v7003_v16 = vld [vmem:[#allocation10 + $0x1e0] sm:$0xff] }
 0x365   :  { %9949 = vst [vmem:[#allocation58_spill] sm:$0xff] %v6990_v20  ;;  %2058 = vmatmul.f32.vlgmr.msrb.gmra.mxu2 %v6855_v56  ;;  %2078 = vmatmul.f32.vlgmr.msrb.gmra.mxu3 %v6855_v56  ;;  %v7006_v20 = vld [vmem:[#allocation10 + $0x1e8] sm:$0xff] }
 0x366   :  { %9950 = vst [vmem:[#allocation59_spill] sm:$0xff] %v6993_v43  ;;  %2164 = vmatpush.msrb.mxu0 %v7003_v16  ;;  %2184 = vmatpush.msrb.mxu1 %v7006_v20  ;;  %v7009_v43 = vld [vmem:[#allocation10 + $0x1f0] sm:$0xff]  ;;  %v7018_v56 = vld [vmem:[#allocation10 + $0x1c8] sm:$0xff] }
 0x367   :  { %9951 = vst [vmem:[#allocation60_spill] sm:$0xff] %v6996_v61  ;;  %2204 = vmatpush.msra.mxu2 %v7009_v43  ;;  %v7012_v61 = vld [vmem:[#allocation10 + $0x1f8] sm:$0xff] }
 0x368   :  { %9952 = vst [vmem:[#allocation61_spill] sm:$0xff] %v7003_v16  ;;  %2224 = vmatpush.msra.mxu3 %v7012_v61  ;;  %2165 = vmatpush.msrb.mxu0 %v7015_v19  ;;  %v7021_v16 = vld [vmem:[#allocation10 + $0x1d0] sm:$0xff] }
 0x369   :  { %9953 = vst [vmem:[#allocation62_spill] sm:$0xff] %v7006_v20  ;;  %2185 = vmatpush.msrb.mxu1 %v7018_v56  ;;  %2205 = vmatpush.msra.mxu2 %v7021_v16  ;;  %v7024_v20 = vld [vmem:[#allocation10 + $0x1d8] sm:$0xff] }
 0x36a   :  { %9954 = vst [vmem:[#allocation63_spill] sm:$0xff] %v7009_v43  ;;  %2225 = vmatpush.msra.mxu3 %v7024_v20  ;;  %v7027_v43 = vld [vmem:[#allocation10 + $0x1a0] sm:$0xff] }
 0x36b   :  { %9955 = vst [vmem:[#allocation64_spill] sm:$0xff] %v7012_v61  ;;  %2166 = vmatpush.msrb.mxu0 %v7027_v43  ;;  %v7030_v61 = vld [vmem:[#allocation10 + $0x1a8] sm:$0xff] }
 0x36c   :  { %9956 = vst [vmem:[#allocation65_spill] sm:$0xff] %v7015_v19  ;;  %2186 = vmatpush.msrb.mxu1 %v7030_v61  ;;  %v7033_v19 = vld [vmem:[#allocation10 + $0x1b0] sm:$0xff] }
 0x36d   :  { %9957 = vst [vmem:[#allocation66_spill] sm:$0xff] %v7018_v56  ;;  %2206 = vmatpush.msra.mxu2 %v7033_v19  ;;  %v7036_v56 = vld [vmem:[#allocation10 + $0x1b8] sm:$0xff] }
 0x36e   :  { %9958 = vst [vmem:[#allocation67_spill] sm:$0xff] %v7021_v16  ;;  %2226 = vmatpush.msra.mxu3 %v7036_v56  ;;  %v7039_v16 = vld [vmem:[#allocation10 + $0x180] sm:$0xff] }
 0x36f   :  { %9959 = vst [vmem:[#allocation68_spill] sm:$0xff] %v7024_v20  ;;  %2167 = vmatpush.msrb.mxu0 %v7039_v16  ;;  %v7042_v20 = vld [vmem:[#allocation10 + $0x188] sm:$0xff] }
 0x370   :  { %9960 = vst [vmem:[#allocation69_spill] sm:$0xff] %v7027_v43  ;;  %2187 = vmatpush.msrb.mxu1 %v7042_v20  ;;  %v7045_v43 = vld [vmem:[#allocation10 + $0x190] sm:$0xff] }
 0x371   :  { %9961 = vst [vmem:[#allocation70_spill] sm:$0xff] %v7030_v61  ;;  %2207 = vmatpush.msra.mxu2 %v7045_v43  ;;  %v7048_v61 = vld [vmem:[#allocation10 + $0x198] sm:$0xff] }
 0x372   :  { %9962 = vst [vmem:[#allocation71_spill] sm:$0xff] %v7033_v19  ;;  %2227 = vmatpush.msra.mxu3 %v7048_v61  ;;  %v7051_v19 = vld [vmem:[#allocation10 + $0x160] sm:$0xff] }
 0x373   :  { %9963 = vst [vmem:[#allocation72_spill] sm:$0xff] %v7036_v56  ;;  %2168 = vmatpush.msrb.mxu0 %v7051_v19  ;;  %v7054_v56 = vld [vmem:[#allocation10 + $0x168] sm:$0xff] }
 0x374   :  { %9964 = vst [vmem:[#allocation73_spill] sm:$0xff] %v7039_v16  ;;  %2188 = vmatpush.msrb.mxu1 %v7054_v56  ;;  %v7057_v16 = vld [vmem:[#allocation10 + $0x170] sm:$0xff] }
 0x375   :  { %9965 = vst [vmem:[#allocation74_spill] sm:$0xff] %v7042_v20  ;;  %2208 = vmatpush.msra.mxu2 %v7057_v16  ;;  %v7060_v20 = vld [vmem:[#allocation10 + $0x178] sm:$0xff] }
 0x376   :  { %9966 = vst [vmem:[#allocation75_spill] sm:$0xff] %v7045_v43  ;;  %2228 = vmatpush.msra.mxu3 %v7060_v20  ;;  %v7063_v43 = vld [vmem:[#allocation10 + $0x140] sm:$0xff] }
 0x377   :  { %9967 = vst [vmem:[#allocation76_spill] sm:$0xff] %v7048_v61  ;;  %2169 = vmatpush.msrb.mxu0 %v7063_v43  ;;  %v7066_v61 = vld [vmem:[#allocation10 + $0x148] sm:$0xff] }
 0x378   :  { %9968 = vst [vmem:[#allocation77_spill] sm:$0xff] %v7051_v19  ;;  %2189 = vmatpush.msrb.mxu1 %v7066_v61  ;;  %v7069_v19 = vld [vmem:[#allocation10 + $0x150] sm:$0xff] }
 0x379   :  { %9969 = vst [vmem:[#allocation78_spill] sm:$0xff] %v7054_v56  ;;  %2209 = vmatpush.msra.mxu2 %v7069_v19  ;;  %v7072_v56 = vld [vmem:[#allocation10 + $0x158] sm:$0xff] }
 0x37a   :  { %9970 = vst [vmem:[#allocation79_spill] sm:$0xff] %v7057_v16  ;;  %2229 = vmatpush.msra.mxu3 %v7072_v56  ;;  %v7075_v16 = vld [vmem:[#allocation10 + $0x120] sm:$0xff] }
 0x37b   :  { %9971 = vst [vmem:[#allocation80_spill] sm:$0xff] %v7060_v20  ;;  %2170 = vmatpush.msrb.mxu0 %v7075_v16  ;;  %v7078_v20 = vld [vmem:[#allocation10 + $0x128] sm:$0xff] }
 0x37c   :  { %9972 = vst [vmem:[#allocation81_spill] sm:$0xff] %v7063_v43  ;;  %2190 = vmatpush.msrb.mxu1 %v7078_v20  ;;  %v7081_v43 = vld [vmem:[#allocation10 + $0x130] sm:$0xff] }
 0x37d   :  { %9973 = vst [vmem:[#allocation82_spill] sm:$0xff] %v7066_v61  ;;  %2210 = vmatpush.msra.mxu2 %v7081_v43  ;;  %v7084_v61 = vld [vmem:[#allocation10 + $0x138] sm:$0xff] }
 0x37e   :  { %9974 = vst [vmem:[#allocation83_spill] sm:$0xff] %v7069_v19  ;;  %2230 = vmatpush.msra.mxu3 %v7084_v61  ;;  %v7087_v19 = vld [vmem:[#allocation10 + $0x100] sm:$0xff] }
 0x37f   :  { %9975 = vst [vmem:[#allocation84_spill] sm:$0xff] %v7072_v56  ;;  %2171 = vmatpush.msrb.mxu0 %v7087_v19  ;;  %v7090_v56 = vld [vmem:[#allocation10 + $0x108] sm:$0xff] }
 0x380   :  { %9976 = vst [vmem:[#allocation85_spill] sm:$0xff] %v7075_v16  ;;  %2191 = vmatpush.msrb.mxu1 %v7090_v56  ;;  %v7093_v16 = vld [vmem:[#allocation10 + $0x110] sm:$0xff] }
 0x381   :  { %9977 = vst [vmem:[#allocation86_spill] sm:$0xff] %v7078_v20  ;;  %2211 = vmatpush.msra.mxu2 %v7093_v16  ;;  %v7096_v20 = vld [vmem:[#allocation10 + $0x118] sm:$0xff] }
 0x382   :  { %9978 = vst [vmem:[#allocation87_spill] sm:$0xff] %v7081_v43  ;;  %2231 = vmatpush.msra.mxu3 %v7096_v20  ;;  %v7099_v43 = vld [vmem:[#allocation10 + $0xe0] sm:$0xff] }
 0x383   :  { %9979 = vst [vmem:[#allocation88_spill] sm:$0xff] %v7084_v61  ;;  %2172 = vmatpush.msrb.mxu0 %v7099_v43  ;;  %v7102_v61 = vld [vmem:[#allocation10 + $0xe8] sm:$0xff] }
 0x384   :  { %9980 = vst [vmem:[#allocation89_spill] sm:$0xff] %v7087_v19  ;;  %2192 = vmatpush.msrb.mxu1 %v7102_v61  ;;  %v7105_v19 = vld [vmem:[#allocation10 + $0xf0] sm:$0xff] }
 0x385   :  { %9981 = vst [vmem:[#allocation90_spill] sm:$0xff] %v7090_v56  ;;  %2212 = vmatpush.msra.mxu2 %v7105_v19  ;;  %v7108_v56 = vld [vmem:[#allocation10 + $0xf8] sm:$0xff] }
 0x386   :  { %9982 = vst [vmem:[#allocation91_spill] sm:$0xff] %v7093_v16  ;;  %2232 = vmatpush.msra.mxu3 %v7108_v56  ;;  %v7111_v16 = vld [vmem:[#allocation10 + $0xc0] sm:$0xff] }
 0x387   :  { %9983 = vst [vmem:[#allocation92_spill] sm:$0xff] %v7096_v20  ;;  %2173 = vmatpush.msrb.mxu0 %v7111_v16  ;;  %v7114_v20 = vld [vmem:[#allocation10 + $0xc8] sm:$0xff] }
 0x388   :  { %9984 = vst [vmem:[#allocation93_spill] sm:$0xff] %v7099_v43  ;;  %2193 = vmatpush.msrb.mxu1 %v7114_v20  ;;  %v7117_v43 = vld [vmem:[#allocation10 + $0xd0] sm:$0xff] }
 0x389   :  { %9985 = vst [vmem:[#allocation94_spill] sm:$0xff] %v7102_v61  ;;  %2213 = vmatpush.msra.mxu2 %v7117_v43  ;;  %v7120_v61 = vld [vmem:[#allocation10 + $0xd8] sm:$0xff] }
 0x38a   :  { %9986 = vst [vmem:[#allocation95_spill] sm:$0xff] %v7105_v19  ;;  %2233 = vmatpush.msra.mxu3 %v7120_v61  ;;  %v7123_v19 = vld [vmem:[#allocation10 + $0xa0] sm:$0xff] }
 0x38b   :  { %9987 = vst [vmem:[#allocation96_spill] sm:$0xff] %v7108_v56  ;;  %2174 = vmatpush.msrb.mxu0 %v7123_v19  ;;  %v7126_v56 = vld [vmem:[#allocation10 + $0xa8] sm:$0xff] }
 0x38c   :  { %9988 = vst [vmem:[#allocation97_spill] sm:$0xff] %v7111_v16  ;;  %2194 = vmatpush.msrb.mxu1 %v7126_v56  ;;  %v7129_v16 = vld [vmem:[#allocation10 + $0xb0] sm:$0xff] }
 0x38d   :  { %9989 = vst [vmem:[#allocation98_spill] sm:$0xff] %v7114_v20  ;;  %2214 = vmatpush.msra.mxu2 %v7129_v16  ;;  %v7132_v20 = vld [vmem:[#allocation10 + $0xb8] sm:$0xff] }
 0x38e   :  { %9990 = vst [vmem:[#allocation99_spill] sm:$0xff] %v7117_v43  ;;  %2234 = vmatpush.msra.mxu3 %v7132_v20  ;;  %v7135_v43 = vld [vmem:[#allocation10 + $0x80] sm:$0xff] }
 0x38f   :  { %9991 = vst [vmem:[#allocation100_spill] sm:$0xff] %v7120_v61  ;;  %2175 = vmatpush.msrb.mxu0 %v7135_v43  ;;  %v7138_v61 = vld [vmem:[#allocation10 + $0x88] sm:$0xff] }
 0x390   :  { %9992 = vst [vmem:[#allocation101_spill] sm:$0xff] %v7123_v19  ;;  %2195 = vmatpush.msrb.mxu1 %v7138_v61  ;;  %v7141_v19 = vld [vmem:[#allocation10 + $0x90] sm:$0xff] }
 0x391   :  { %9993 = vst [vmem:[#allocation102_spill] sm:$0xff] %v7126_v56  ;;  %2215 = vmatpush.msra.mxu2 %v7141_v19  ;;  %v7144_v56 = vld [vmem:[#allocation10 + $0x98] sm:$0xff] }
 0x392   :  { %9994 = vst [vmem:[#allocation103_spill] sm:$0xff] %v7129_v16  ;;  %2235 = vmatpush.msra.mxu3 %v7144_v56  ;;  %v7147_v16 = vld [vmem:[#allocation10 + $0x60] sm:$0xff] }
 0x393   :  { %9995 = vst [vmem:[#allocation104_spill] sm:$0xff] %v7132_v20  ;;  %2176 = vmatpush.msrb.mxu0 %v7147_v16  ;;  %v7150_v20 = vld [vmem:[#allocation10 + $0x68] sm:$0xff] }
 0x394   :  { %9996 = vst [vmem:[#allocation105_spill] sm:$0xff] %v7135_v43  ;;  %2196 = vmatpush.msrb.mxu1 %v7150_v20  ;;  %v7153_v43 = vld [vmem:[#allocation10 + $0x70] sm:$0xff] }
 0x395   :  { %9997 = vst [vmem:[#allocation106_spill] sm:$0xff] %v7138_v61  ;;  %2216 = vmatpush.msra.mxu2 %v7153_v43  ;;  %v7156_v61 = vld [vmem:[#allocation10 + $0x78] sm:$0xff] }
 0x396   :  { %9998 = vst [vmem:[#allocation107_spill] sm:$0xff] %v7141_v19  ;;  %2236 = vmatpush.msra.mxu3 %v7156_v61  ;;  %v7159_v19 = vld [vmem:[#allocation10 + $0x40] sm:$0xff] }
 0x397   :  { %9999 = vst [vmem:[#allocation108_spill] sm:$0xff] %v7144_v56  ;;  %2177 = vmatpush.msrb.mxu0 %v7159_v19  ;;  %v7162_v56 = vld [vmem:[#allocation10 + $0x48] sm:$0xff] }
 0x398   :  { %10000 = vst [vmem:[#allocation109_spill] sm:$0xff] %v7147_v16  ;;  %2197 = vmatpush.msrb.mxu1 %v7162_v56  ;;  %v7165_v16 = vld [vmem:[#allocation10 + $0x50] sm:$0xff] }
 0x399   :  { %10001 = vst [vmem:[#allocation110_spill] sm:$0xff] %v7150_v20  ;;  %2217 = vmatpush.msra.mxu2 %v7165_v16  ;;  %v7168_v20 = vld [vmem:[#allocation10 + $0x58] sm:$0xff] }
 0x39a   :  { %10002 = vst [vmem:[#allocation111_spill] sm:$0xff] %v7153_v43  ;;  %2237 = vmatpush.msra.mxu3 %v7168_v20  ;;  %v7171_v43 = vld [vmem:[#allocation10 + $0x20] sm:$0xff] }
 0x39b   :  { %10003 = vst [vmem:[#allocation112_spill] sm:$0xff] %v7156_v61  ;;  %2178 = vmatpush.msrb.mxu0 %v7171_v43  ;;  %v7174_v61 = vld [vmem:[#allocation10 + $0x28] sm:$0xff] }
 0x39c   :  { %10004 = vst [vmem:[#allocation113_spill] sm:$0xff] %v7159_v19  ;;  %2198 = vmatpush.msrb.mxu1 %v7174_v61  ;;  %v7177_v19 = vld [vmem:[#allocation10 + $0x30] sm:$0xff] }
 0x39d   :  { %10005 = vst [vmem:[#allocation114_spill] sm:$0xff] %v7162_v56  ;;  %2218 = vmatpush.msra.mxu2 %v7177_v19  ;;  %v7180_v56 = vld [vmem:[#allocation10 + $0x38] sm:$0xff] }
 0x39e   :  { %10006 = vst [vmem:[#allocation115_spill] sm:$0xff] %v7165_v16  ;;  %2238 = vmatpush.msra.mxu3 %v7180_v56  ;;  %v7183_v16 = vld [vmem:[#allocation10] sm:$0xff] }
 0x39f   :  { %10007 = vst [vmem:[#allocation116_spill] sm:$0xff] %v7168_v20  ;;  %2179 = vmatpush.msrb.mxu0 %v7183_v16  ;;  %v7186_v20 = vld [vmem:[#allocation10 + $0x8] sm:$0xff] }
 0x3a0   :  { %10008 = vst [vmem:[#allocation117_spill] sm:$0xff] %v7171_v43  ;;  %2199 = vmatpush.msrb.mxu1 %v7186_v20  ;;  %v7189_v43 = vld [vmem:[#allocation10 + $0x10] sm:$0xff] }
 0x3a1   :  { %10009 = vst [vmem:[#allocation118_spill] sm:$0xff] %v7174_v61  ;;  %2219 = vmatpush.msra.mxu2 %v7189_v43  ;;  %v7192_v61 = vld [vmem:[#allocation10 + $0x18] sm:$0xff] }
 0x3a2   :  { %10010 = vst [vmem:[#allocation119_spill] sm:$0xff] %v7177_v19  ;;  %2239 = vmatpush.msra.mxu3 %v7192_v61  ;;  %v7195_v19 = vld [vmem:[#allocation8 + $0x1e0] sm:$0xff] }
 0x3a3   :  { %10011 = vst [vmem:[#allocation120_spill] sm:$0xff] %v7180_v56  ;;  %2247 = vmatpush.msra.mxu0 %v7195_v19  ;;  %v7198_v56 = vld [vmem:[#allocation8 + $0x1e8] sm:$0xff] }
 0x3a4   :  { %10012 = vst [vmem:[#allocation121_spill] sm:$0xff] %v7183_v16  ;;  %2267 = vmatpush.msra.mxu1 %v7198_v56  ;;  %v7201_v16 = vld [vmem:[#allocation8 + $0x1f0] sm:$0xff] }
 0x3a5   :  { %10013 = vst [vmem:[#allocation122_spill] sm:$0xff] %v7186_v20  ;;  %2287 = vmatpush.msrb.mxu2 %v7201_v16  ;;  %v7204_v20 = vld [vmem:[#allocation8 + $0x1f8] sm:$0xff] }
 0x3a6   :  { %10014 = vst [vmem:[#allocation123_spill] sm:$0xff] %v7189_v43  ;;  %2307 = vmatpush.msrb.mxu3 %v7204_v20  ;;  %v7207_v43 = vld [vmem:[#allocation8 + $0x1c0] sm:$0xff] }
 0x3a7   :  { %10015 = vst [vmem:[#allocation124_spill] sm:$0xff] %v7192_v61  ;;  %2248 = vmatpush.msra.mxu0 %v7207_v43  ;;  %v7210_v61 = vld [vmem:[#allocation8 + $0x1c8] sm:$0xff] }
 0x3a8   :  { %10016 = vst [vmem:[#allocation125_spill] sm:$0xff] %v7195_v19  ;;  %2268 = vmatpush.msra.mxu1 %v7210_v61  ;;  %v7213_v19 = vld [vmem:[#allocation8 + $0x1d0] sm:$0xff] }
 0x3a9   :  { %10017 = vst [vmem:[#allocation126_spill] sm:$0xff] %v7198_v56  ;;  %2288 = vmatpush.msrb.mxu2 %v7213_v19  ;;  %v7216_v56 = vld [vmem:[#allocation8 + $0x1d8] sm:$0xff] }
 0x3aa   :  { %10018 = vst [vmem:[#allocation127_spill] sm:$0xff] %v7201_v16  ;;  %2308 = vmatpush.msrb.mxu3 %v7216_v56  ;;  %v7219_v16 = vld [vmem:[#allocation8 + $0x1a0] sm:$0xff] }
 0x3ab   :  { %10019 = vst [vmem:[#allocation128_spill] sm:$0xff] %v7204_v20  ;;  %2249 = vmatpush.msra.mxu0 %v7219_v16  ;;  %v7222_v20 = vld [vmem:[#allocation8 + $0x1a8] sm:$0xff] }
 0x3ac   :  { %10020 = vst [vmem:[#allocation129_spill] sm:$0xff] %v7207_v43  ;;  %2269 = vmatpush.msra.mxu1 %v7222_v20  ;;  %v7225_v43 = vld [vmem:[#allocation8 + $0x1b0] sm:$0xff] }
 0x3ad   :  { %10021 = vst [vmem:[#allocation130_spill] sm:$0xff] %v7210_v61  ;;  %2289 = vmatpush.msrb.mxu2 %v7225_v43  ;;  %v7228_v61 = vld [vmem:[#allocation8 + $0x1b8] sm:$0xff] }
 0x3ae   :  { %10022 = vst [vmem:[#allocation131_spill] sm:$0xff] %v7213_v19  ;;  %2309 = vmatpush.msrb.mxu3 %v7228_v61  ;;  %v7231_v19 = vld [vmem:[#allocation8 + $0x180] sm:$0xff] }
 0x3af   :  { %10023 = vst [vmem:[#allocation132_spill] sm:$0xff] %v7216_v56  ;;  %2250 = vmatpush.msra.mxu0 %v7231_v19  ;;  %v7234_v56 = vld [vmem:[#allocation8 + $0x188] sm:$0xff] }
 0x3b0   :  { %10024 = vst [vmem:[#allocation133_spill] sm:$0xff] %v7219_v16  ;;  %2270 = vmatpush.msra.mxu1 %v7234_v56  ;;  %v7237_v16 = vld [vmem:[#allocation8 + $0x190] sm:$0xff] }
 0x3b1   :  { %10025 = vst [vmem:[#allocation134_spill] sm:$0xff] %v7222_v20  ;;  %2290 = vmatpush.msrb.mxu2 %v7237_v16  ;;  %v7240_v20 = vld [vmem:[#allocation8 + $0x198] sm:$0xff] }
 0x3b2   :  { %10026 = vst [vmem:[#allocation135_spill] sm:$0xff] %v7225_v43  ;;  %2310 = vmatpush.msrb.mxu3 %v7240_v20  ;;  %v7243_v43 = vld [vmem:[#allocation8 + $0x160] sm:$0xff] }
 0x3b3   :  { %10027 = vst [vmem:[#allocation136_spill] sm:$0xff] %v7228_v61  ;;  %2251 = vmatpush.msra.mxu0 %v7243_v43  ;;  %v7246_v61 = vld [vmem:[#allocation8 + $0x168] sm:$0xff] }
 0x3b4   :  { %10028 = vst [vmem:[#allocation137_spill] sm:$0xff] %v7231_v19  ;;  %2271 = vmatpush.msra.mxu1 %v7246_v61  ;;  %v7249_v19 = vld [vmem:[#allocation8 + $0x170] sm:$0xff] }
 0x3b5   :  { %10029 = vst [vmem:[#allocation138_spill] sm:$0xff] %v7234_v56  ;;  %2291 = vmatpush.msrb.mxu2 %v7249_v19  ;;  %v7252_v56 = vld [vmem:[#allocation8 + $0x178] sm:$0xff] }
 0x3b6   :  { %10030 = vst [vmem:[#allocation139_spill] sm:$0xff] %v7237_v16  ;;  %2311 = vmatpush.msrb.mxu3 %v7252_v56  ;;  %v7255_v16 = vld [vmem:[#allocation8 + $0x140] sm:$0xff] }
 0x3b7   :  { %10031 = vst [vmem:[#allocation140_spill] sm:$0xff] %v7240_v20  ;;  %2252 = vmatpush.msra.mxu0 %v7255_v16  ;;  %v7258_v20 = vld [vmem:[#allocation8 + $0x148] sm:$0xff] }
 0x3b8   :  { %10032 = vst [vmem:[#allocation141_spill] sm:$0xff] %v7243_v43  ;;  %2272 = vmatpush.msra.mxu1 %v7258_v20  ;;  %v7261_v43 = vld [vmem:[#allocation8 + $0x150] sm:$0xff] }
 0x3b9   :  { %10033 = vst [vmem:[#allocation142_spill] sm:$0xff] %v7246_v61  ;;  %2292 = vmatpush.msrb.mxu2 %v7261_v43  ;;  %v7264_v61 = vld [vmem:[#allocation8 + $0x158] sm:$0xff] }
 0x3ba   :  { %10034 = vst [vmem:[#allocation143_spill] sm:$0xff] %v7249_v19  ;;  %2312 = vmatpush.msrb.mxu3 %v7264_v61  ;;  %v7267_v19 = vld [vmem:[#allocation8 + $0x120] sm:$0xff] }
 0x3bb   :  { %10035 = vst [vmem:[#allocation144_spill] sm:$0xff] %v7252_v56  ;;  %2253 = vmatpush.msra.mxu0 %v7267_v19  ;;  %v7270_v56 = vld [vmem:[#allocation8 + $0x128] sm:$0xff] }
 0x3bc   :  { %10036 = vst [vmem:[#allocation145_spill] sm:$0xff] %v7255_v16  ;;  %2273 = vmatpush.msra.mxu1 %v7270_v56  ;;  %v7273_v16 = vld [vmem:[#allocation8 + $0x130] sm:$0xff] }
 0x3bd   :  { %10037 = vst [vmem:[#allocation146_spill] sm:$0xff] %v7258_v20  ;;  %2293 = vmatpush.msrb.mxu2 %v7273_v16  ;;  %v7276_v20 = vld [vmem:[#allocation8 + $0x138] sm:$0xff]  ;;  %v1809_v18 = vpop.f32.mrf.mxu1 }
 0x3be   :  { %10038 = vst [vmem:[#allocation147_spill] sm:$0xff] %v7261_v43  ;;  %2313 = vmatpush.msrb.mxu3 %v7276_v20  ;;  %v7279_v43 = vld [vmem:[#allocation8 + $0x100] sm:$0xff] }
 0x3bf   :  { %10039 = vst [vmem:[#allocation148_spill] sm:$0xff] %v7264_v61  ;;  %2254 = vmatpush.msra.mxu0 %v7279_v43  ;;  %v7282_v61 = vld [vmem:[#allocation8 + $0x108] sm:$0xff] }
 0x3c0   :  { %10040 = vst [vmem:[#allocation149_spill] sm:$0xff] %v7267_v19  ;;  %2274 = vmatpush.msra.mxu1 %v7282_v61  ;;  %v7285_v19 = vld [vmem:[#allocation8 + $0x110] sm:$0xff] }
 0x3c1   :  { %10041 = vst [vmem:[#allocation151_spill] sm:$0xff] %v7270_v56  ;;  %2294 = vmatpush.msrb.mxu2 %v7285_v19  ;;  %v7288_v56 = vld [vmem:[#allocation8 + $0x118] sm:$0xff] }
 0x3c2   :  { %10042 = vst [vmem:[#allocation152_spill] sm:$0xff] %v7273_v16  ;;  %2314 = vmatpush.msrb.mxu3 %v7288_v56  ;;  %v7291_v16 = vld [vmem:[#allocation8 + $0xe0] sm:$0xff] }
 0x3c3   :  { %10043 = vst [vmem:[#allocation153_spill] sm:$0xff] %v7276_v20  ;;  %2255 = vmatpush.msra.mxu0 %v7291_v16  ;;  %v7294_v20 = vld [vmem:[#allocation8 + $0xe8] sm:$0xff] }
 0x3c4   :  { %10044 = vst [vmem:[#allocation154_spill] sm:$0xff] %v7279_v43  ;;  %2275 = vmatpush.msra.mxu1 %v7294_v20  ;;  %v7297_v43 = vld [vmem:[#allocation8 + $0xf0] sm:$0xff]  ;;  %v1829_v23 = vpop.f32.mrf.mxu2  ;;  %v1849_v60 = vpop.f32.mrf.mxu3 }
 0x3c5   :  { %10045 = vst [vmem:[#allocation155_spill] sm:$0xff] %v7282_v61  ;;  %2295 = vmatpush.msrb.mxu2 %v7297_v43  ;;  %v7300_v61 = vld [vmem:[#allocation8 + $0xf8] sm:$0xff] }
 0x3c6   :  { %10046 = vst [vmem:[#allocation156_spill] sm:$0xff] %v7285_v19  ;;  %2315 = vmatpush.msrb.mxu3 %v7300_v61  ;;  %v7303_v19 = vld [vmem:[#allocation8 + $0xc0] sm:$0xff] }
 0x3c7   :  { %10047 = vst [vmem:[#allocation157_spill] sm:$0xff] %v7288_v56  ;;  %2256 = vmatpush.msra.mxu0 %v7303_v19  ;;  %v7306_v56 = vld [vmem:[#allocation8 + $0xc8] sm:$0xff] }
 0x3c8   :  { %10048 = vst [vmem:[#allocation158_spill] sm:$0xff] %v7291_v16  ;;  %2276 = vmatpush.msra.mxu1 %v7306_v56  ;;  %v7309_v16 = vld [vmem:[#allocation8 + $0xd0] sm:$0xff] }
 0x3c9   :  { %10049 = vst [vmem:[#allocation159_spill] sm:$0xff] %v7294_v20  ;;  %2296 = vmatpush.msrb.mxu2 %v7309_v16  ;;  %v7312_v20 = vld [vmem:[#allocation8 + $0xd8] sm:$0xff] }
 0x3ca   :  { %10050 = vst [vmem:[#allocation160_spill] sm:$0xff] %v7297_v43  ;;  %2316 = vmatpush.msrb.mxu3 %v7312_v20  ;;  %v7315_v43 = vld [vmem:[#allocation8 + $0xa0] sm:$0xff]  ;;  %v1892_v6 = vpop.f32.mrf.mxu1 }
 0x3cb   :  { %10051 = vst [vmem:[#allocation162_spill] sm:$0xff] %v7300_v61  ;;  %2257 = vmatpush.msra.mxu0 %v7315_v43  ;;  %v7318_v61 = vld [vmem:[#allocation8 + $0xa8] sm:$0xff]  ;;  %v1893_v15 = vadd.f32 %v1892_v6, %v1809_v18 }
 0x3cc   :  { %10052 = vst [vmem:[#allocation163_spill] sm:$0xff] %v7303_v19  ;;  %2277 = vmatpush.msra.mxu1 %v7318_v61  ;;  %v7321_v19 = vld [vmem:[#allocation8 + $0xb0] sm:$0xff] }
 0x3cd   :  { %10053 = vst [vmem:[#allocation164_spill] sm:$0xff] %v7306_v56  ;;  %2297 = vmatpush.msrb.mxu2 %v7321_v19  ;;  %v7324_v56 = vld [vmem:[#allocation8 + $0xb8] sm:$0xff]  ;;  %v1936_v11 = vadd.f32 %v1893_v15, %v9909_v4 }
 0x3ce   :  { %10054 = vst [vmem:[#allocation165_spill] sm:$0xff] %v7309_v16  ;;  %2317 = vmatpush.msrb.mxu3 %v7324_v56  ;;  %v7327_v16 = vld [vmem:[#allocation8 + $0x80] sm:$0xff] }
 0x3cf   :  { %10055 = vst [vmem:[#allocation166_spill] sm:$0xff] %v7312_v20  ;;  %2258 = vmatpush.msra.mxu0 %v7327_v16  ;;  %v7330_v20 = vld [vmem:[#allocation8 + $0x88] sm:$0xff]  ;;  %v3735_v62 = vmul.f32 -1.442695, %v1936_v11 }
 0x3d0   :  { %10056 = vst [vmem:[#allocation167_spill] sm:$0xff] %v7315_v43  ;;  %2278 = vmatpush.msra.mxu1 %v7330_v20  ;;  %v7333_v43 = vld [vmem:[#allocation8 + $0x90] sm:$0xff] }
 0x3d1   :  { %10057 = vst [vmem:[#allocation168_spill] sm:$0xff] %v7318_v61  ;;  %2298 = vmatpush.msrb.mxu2 %v7333_v43  ;;  %v7336_v61 = vld [vmem:[#allocation8 + $0x98] sm:$0xff] }
 0x3d2   :  { %10058 = vst [vmem:[#allocation169_spill] sm:$0xff] %v7321_v19  ;;  %2318 = vmatpush.msrb.mxu3 %v7336_v61  ;;  %v7339_v19 = vld [vmem:[#allocation8 + $0x60] sm:$0xff] }
 0x3d3   :  { %10059 = vst [vmem:[#allocation170_spill] sm:$0xff] %v7324_v56  ;;  %2259 = vmatpush.msra.mxu0 %v7339_v19  ;;  %v7342_v56 = vld [vmem:[#allocation8 + $0x68] sm:$0xff] }
 0x3d4   :  { %10060 = vst [vmem:[#allocation171_spill] sm:$0xff] %v7327_v16  ;;  %2279 = vmatpush.msra.mxu1 %v7342_v56  ;;  %v7345_v16 = vld [vmem:[#allocation8 + $0x70] sm:$0xff] }
 0x3d5   :  { %10061 = vst [vmem:[#allocation172_spill] sm:$0xff] %v7330_v20  ;;  %2299 = vmatpush.msrb.mxu2 %v7345_v16  ;;  %v7348_v20 = vld [vmem:[#allocation8 + $0x78] sm:$0xff] }
 0x3d6   :  { %10062 = vst [vmem:[#allocation173_spill] sm:$0xff] %v7333_v43  ;;  %2319 = vmatpush.msrb.mxu3 %v7348_v20  ;;  %v7351_v43 = vld [vmem:[#allocation8 + $0x40] sm:$0xff] }
 0x3d7   :  { %10063 = vst [vmem:[#allocation174_spill] sm:$0xff] %v7336_v61  ;;  %2260 = vmatpush.msra.mxu0 %v7351_v43  ;;  %v7354_v61 = vld [vmem:[#allocation8 + $0x48] sm:$0xff] }
 0x3d8   :  { %10064 = vst [vmem:[#allocation175_spill] sm:$0xff] %v7339_v19  ;;  %2280 = vmatpush.msra.mxu1 %v7354_v61  ;;  %v7357_v19 = vld [vmem:[#allocation8 + $0x50] sm:$0xff] }
 0x3d9   :  { %10065 = vst [vmem:[#allocation176_spill] sm:$0xff] %v7342_v56  ;;  %2300 = vmatpush.msrb.mxu2 %v7357_v19  ;;  %v7360_v56 = vld [vmem:[#allocation8 + $0x58] sm:$0xff] }
 0x3da   :  { %10066 = vst [vmem:[#allocation177_spill] sm:$0xff] %v7345_v16  ;;  %2320 = vmatpush.msrb.mxu3 %v7360_v56  ;;  %v7363_v16 = vld [vmem:[#allocation8 + $0x20] sm:$0xff] }
 0x3db   :  { %10067 = vst [vmem:[#allocation178_spill] sm:$0xff] %v7348_v20  ;;  %2261 = vmatpush.msra.mxu0 %v7363_v16  ;;  %v7366_v20 = vld [vmem:[#allocation8 + $0x28] sm:$0xff] }
 0x3dc   :  { %10068 = vst [vmem:[#allocation179_spill] sm:$0xff] %v7351_v43  ;;  %2281 = vmatpush.msra.mxu1 %v7366_v20  ;;  %v7369_v43 = vld [vmem:[#allocation8 + $0x30] sm:$0xff] }
 0x3dd   :  { %10069 = vst [vmem:[#allocation180_spill] sm:$0xff] %v7354_v61  ;;  %2301 = vmatpush.msrb.mxu2 %v7369_v43  ;;  %v7372_v61 = vld [vmem:[#allocation8 + $0x38] sm:$0xff] }
 0x3de   :  { %10070 = vst [vmem:[#allocation181_spill] sm:$0xff] %v7357_v19  ;;  %2321 = vmatpush.msrb.mxu3 %v7372_v61  ;;  %v7375_v19 = vld [vmem:[#allocation8] sm:$0xff] }
 0x3df   :  { %10071 = vst [vmem:[#allocation182_spill] sm:$0xff] %v7360_v56  ;;  %2262 = vmatpush.msra.mxu0 %v7375_v19  ;;  %v7378_v56 = vld [vmem:[#allocation8 + $0x8] sm:$0xff] }
 0x3e0   :  { %10072 = vst [vmem:[#allocation183_spill] sm:$0xff] %v7363_v16  ;;  %2282 = vmatpush.msra.mxu1 %v7378_v56  ;;  %v7381_v16 = vld [vmem:[#allocation8 + $0x10] sm:$0xff] }
 0x3e1   :  { %10073 = vst [vmem:[#allocation184_spill] sm:$0xff] %v7366_v20  ;;  %2302 = vmatpush.msrb.mxu2 %v7381_v16  ;;  %v7384_v20 = vld [vmem:[#allocation8 + $0x18] sm:$0xff] }
 0x3e2   :  { %10074 = vst [vmem:[#allocation185_spill] sm:$0xff] %v7369_v43  ;;  %2322 = vmatpush.msrb.mxu3 %v7384_v20  ;;  %v1789_v43 = vpop.f32.mrf.mxu0 }
 0x3e3   :  { %10075 = vst [vmem:[#allocation186_spill] sm:$0xff] %v7372_v61 }
 0x3e4   :  { %10076 = vst [vmem:[#allocation187_spill] sm:$0xff] %v7375_v19 }
 0x3e5   :  { %10077 = vst [vmem:[#allocation188_spill] sm:$0xff] %v7378_v56 }
 0x3e6   :  { %10078 = vst [vmem:[#allocation24_spill] sm:$0xff] %v7381_v16  ;;  %v1912_v16 = vpop.f32.mrf.mxu2 }
 0x3e7   :  { %10079 = vst [vmem:[#allocation189_spill] sm:$0xff] %v7384_v20  ;;  %v1913_v38 = vadd.f32 %v1912_v16, %v1829_v23  ;;  %v2039_v16 = vpop.f32.mrf.mxu1 }
 0x3e9   :  { %v1937_v20 = vadd.f32 %v1913_v38, %v9910_v27 }
 0x3ea   :  { %v1872_v61 = vpop.f32.mrf.mxu0 }
 0x3eb   :  { %v1873_v37 = vadd.f32 %v1872_v61, %v1789_v43  ;;  %v3736_v57 = vmul.f32 -1.442695, %v1937_v20  ;;  %v1932_v43 = vpop.f32.mrf.mxu3 }
 0x3ed   :  { %v1935_v19 = vadd.f32 %v1873_v37, %v9908_v63  ;;  %v1933_v37 = vadd.f32 %v1932_v43, %v1849_v60 }
 0x3ef   :  { %v3734_v56 = vmul.f32 -1.442695, %v1935_v19  ;;  %v1938_v11 = vadd.f32 %v1933_v37, %v9913_v36 }
 0x3f1   :  { %3887 = vpow2.f32 %v3734_v56 }
 0x3f2   :  { %3889 = vpow2.f32 %v3735_v62  ;;  %v2019_v38 = vpop.f32.mrf.mxu0 }
 0x3f3   :  { %3891 = vpow2.f32 %v3736_v57 }
 0x3f7   :  { %v3888_v55 = vpop.eup %3887 }
 0x3f8   :  { %v3890_v54 = vpop.eup %3889  ;;  %v1948_v53 = vadd.f32 1.0, %v3888_v55  ;;  %v2086_v55 = vrot.slane %v2019_v38, 4 }
 0x3f9   :  { %v1949_v6 = vadd.f32 1.0, %v3890_v54  ;;  %v3892_v15 = vpop.eup %3891  ;;  %v2087_v54 = vrot.slane %v2039_v16, 4 }
 0x3fa   :  { %3893 = vrcp.f32 %v1948_v53  ;;  %v7390_v18 = vadd.f32 1.0, %v3892_v15  ;;  %v1960_v61 = vand.u32 2147483647, %v1948_v53  ;;  %vm1956_vm7 = vweird.f32 %v1948_v53 }
 0x3fb   :  { %3895 = vrcp.f32 %v1949_v6  ;;  %v1962_v60 = vand.u32 2147483648, %v1948_v53  ;;  %v2094_v43 = vadd.f32 %v2086_v55, %v9911_v52  ;;  %v1977_v15 = vand.u32 2147483648, %v1949_v6  ;;  %v2059_v55 = vpop.f32.mrf.mxu2 }
 0x3fc   :  { %3897 = vrcp.f32 %v7390_v18  ;;  %v2095_v36 = vadd.f32 %v2087_v54, %v9912_v14  ;;  %v1975_v4 = vand.u32 2147483647, %v1949_v6  ;;  %vm1971_vm10 = vweird.f32 %v1949_v6 }
 0x3fd   :  { %3899 = vtanh.f32 %v1938_v11  ;;  %v3737_v63 = vmul.f32 -1.442695, %v2094_v43  ;;  %vm1961_vm11 = vcmp.eq.f32.partialorder %v1960_v61, 8.507059e+37  ;;  %v1963_v16 = vor.u32 1.1754944e-38, %v1962_v60 }
 0x3fe   :  { %v3738_v11 = vmul.f32 -1.442695, %v2095_v36  ;;  %v1978_v54 = vor.u32 1.1754944e-38, %v1977_v15  ;;  %v2088_v43 = vrot.slane %v2059_v55, 4  ;;  %vm1976_vm14 = vcmp.eq.f32.partialorder %v1975_v4, 8.507059e+37 }
 0x3ff   :  { %3901 = vpow2.f32 %v3737_v63  ;;  %vm1986_vm0 = vweird.f32 %v7390_v18 }
 0x400   :  { %v3894_v19 = vpop.eup %3893  ;;  %3903 = vpow2.f32 %v3738_v11 }
 0x401   :  { %v3896_v62 = vpop.eup %3895  ;;  %v1952_v23 = vmul.f32 %v3894_v19, %v1948_v53  ;;  %vm1957_vm8 = vweird.f32 %v3894_v19  ;;  %v2096_v53 = vadd.f32 %v2088_v43, %v5565_v21 }
 0x402   :  { %v1967_v20 = vmul.f32 %v3896_v62, %v1949_v6  ;;  %vm1972_vm9 = vweird.f32 %v3896_v62  ;;  %v3898_v51 = vpop.eup %3897  ;;  %vm1958_vm12 = vmor %vm1956_vm7, %vm1957_vm8 }
 0x403   :  { %v1953_v57 = vsub.f32 1.0, %v1952_v23  ;;  %v1982_v38 = vmul.f32 %v3898_v51, %v7390_v18  ;;  %vm1973_vm13 = vmor %vm1971_vm10, %vm1972_vm9  ;;  %v3739_v63 = vmul.f32 -1.442695, %v2096_v53  ;;  %vm1987_vm15 = vweird.f32 %v3898_v51 }
 0x404   :  { %v1968_v56 = vsub.f32 1.0, %v1967_v20  ;;  %vm1988_vm2 = vmor %vm1986_vm0, %vm1987_vm15 }
 0x405   :  { %v1954_v37 = vmul.f32 %v3894_v19, %v1953_v57  ;;  %v3900_v57 = vpop.eup %3899  ;;  %v1983_v14 = vsub.f32 1.0, %v1982_v38  ;;  %3905 = vpow2.f32 %v3739_v63 }
 0x406   :  { %v1969_v27 = vmul.f32 %v3896_v62, %v1968_v56  ;;  %v3902_v60 = vpop.eup %3901 }
 0x407   :  { %v1955_v23 = vadd.f32 %v3894_v19, %v1954_v37  ;;  %v1984_v52 = vmul.f32 %v3898_v51, %v1983_v14  ;;  %v3904_v28 = vpop.eup %3903  ;;  %v7403_v15 = vadd.f32 1.0, %v3902_v60  ;;  %v1990_v14 = vand.u32 2147483647, %v7390_v18 }
 0x408   :  { %v1970_v20 = vadd.f32 %v3896_v62, %v1969_v27  ;;  %v7407_v4 = vadd.f32 1.0, %v3904_v28 }
 0x409   :  { %v1959_v56 = vsel %vm1958_vm12, %v3894_v19, %v1955_v23  ;;  %v1985_v19 = vadd.f32 %v3898_v51, %v1984_v52  ;;  %v2079_v23 = vpop.f32.mrf.mxu3  ;;  %vm1991_vm3 = vcmp.eq.f32.partialorder %v1990_v14, 8.507059e+37  ;;  %vm2115_vm7 = vweird.f32 %v7403_v15  ;;  %v10091_v14 = vld [vmem:[#allocation29_spill] sm:$0xff] }
 0x40a   :  { %v1964_v6 = vsel %vm1961_vm11, %v1963_v16, %v1959_v56  ;;  %v1974_v37 = vsel %vm1973_vm13, %v3896_v62, %v1970_v20  ;;  %v1992_v62 = vand.u32 2147483648, %v7390_v18  ;;  %v2136_v53 = vand.u32 2147483648, %v7407_v4 }
 0x40b   :  { %v1979_v36 = vsel %vm1976_vm14, %v1978_v54, %v1974_v37  ;;  %v1998_v61 = vmul.f32 %v3900_v57, %v1964_v6  ;;  %v1989_v11 = vsel %vm1988_vm2, %v3898_v51, %v1985_v19  ;;  %v3906_v38 = vpop.eup %3905  ;;  %v2134_v19 = vand.u32 2147483647, %v7407_v4 }
 0x40c   :  { %v1997_v27 = vmul.f32 %v1979_v36, %v6753_v34  ;;  %v2089_v34 = vrot.slane %v2079_v23, 4  ;;  %v1993_v52 = vor.u32 1.1754944e-38, %v1992_v62  ;;  %v7413_v20 = vadd.f32 1.0, %v3906_v38  ;;  %v10095_v38 = vld [vmem:[#allocation31_spill] sm:$0xff] }
 0x40d   :  { %v2119_v36 = vand.u32 2147483647, %v7403_v15  ;;  %vm2130_vm8 = vweird.f32 %v7407_v4  ;;  %vm2135_vm12 = vcmp.eq.f32.partialorder %v2134_v19, 8.507059e+37  ;;  %v10113_v19 = vld [vmem:[#allocation61_spill] sm:$0xff] }
 0x40e   :  { %v7401_v49 = vadd.f32 %v1998_v61, %v1997_v27  ;;  %v1994_v28 = vsel %vm1991_vm3, %v1993_v52, %v1989_v11  ;;  %v2097_v57 = vadd.f32 %v2089_v34, %v5618_v33  ;;  %v2121_v61 = vand.u32 2147483648, %v7403_v15  ;;  %v10092_v34 = vld [vmem:[#allocation46_spill] sm:$0xff]  ;;  %v10093_v11 = vld [vmem:[#allocation37_spill] sm:$0xff]  ;;  %v10094_v52 = vld [vmem:[#allocation48_spill] sm:$0xff] }
 0x40f   :  { %vm2120_vm11 = vcmp.eq.f32.partialorder %v2119_v36, 8.507059e+37  ;;  %vm2145_vm14 = vweird.f32 %v7413_v20  ;;  %v10108_v36 = vld [vmem:[#allocation56_spill] sm:$0xff] }
 0x410   :  { %3907 = vtanh.f32 %v7401_v49 }
 0x411   :  { %3909 = vrcp.f32 %v7403_v15 }
 0x412   :  { %3911 = vrcp.f32 %v7407_v4 }
 0x413   :  { %3913 = vrcp.f32 %v7413_v20 }
 0x414   :  { %3915 = vtanh.f32 %v2097_v57  ;;  %v10100_v57 = vld [vmem:[#allocation51_spill] sm:$0xff] }
 0x416   :  { %v3908_v16 = vpop.eup %3907 }
 0x417   :  { %v3910_v55 = vpop.eup %3909  ;;  %v2001_v54 = vmul.f32 %v3908_v16, %v1994_v28  ;;  %v10096_v16 = vld [vmem:[#allocation49_spill] sm:$0xff]  ;;  %v10098_v28 = vld [vmem:[#allocation50_spill] sm:$0xff] }
 0x418   :  { %v3912_v56 = vpop.eup %3911  ;;  %v2111_v43 = vmul.f32 %v3910_v55, %v7403_v15  ;;  %vm2116_vm5 = vweird.f32 %v3910_v55 }
 0x419   :  { %v2126_v18 = vmul.f32 %v3912_v56, %v7407_v4  ;;  %2180 = vmatmul.f32.vlgmr.msrb.gmra.mxu0 %v2001_v54  ;;  %2200 = vmatmul.f32.vlgmr.msrb.gmra.mxu1 %v2001_v54  ;;  %v3591_v6 = vrot.slane %v2001_v54, 5  ;;  %vm2131_vm6 = vweird.f32 %v3912_v56  ;;  %vm2117_vm9 = vmor %vm2115_vm7, %vm2116_vm5 }
 0x41a   :  { %v2112_v51 = vsub.f32 1.0, %v2111_v43  ;;  %2220 = vmatmul.f32.vlgmr.msra.gmra.mxu2 %v2001_v54  ;;  %2240 = vmatmul.f32.vlgmr.msra.gmra.mxu3 %v2001_v54  ;;  %vm2132_vm10 = vmor %vm2130_vm8, %vm2131_vm6  ;;  %v10101_v54 = vld [vmem:[#allocation44_spill] sm:$0xff]  ;;  %v10103_v43 = vld [vmem:[#allocation38_spill] sm:$0xff] }
 0x41b   :  { %v2127_v37 = vsub.f32 1.0, %v2126_v18  ;;  %2394 = vmatpush.msrb.mxu0 %v6787_v13  ;;  %2414 = vmatpush.msrb.mxu1 %v6790_v17  ;;  %v7428_v63 = vsel %vm3607_vm4, %v6794_v25, %v3591_v6  ;;  %v7433_v13 = vpop.eup %3913  ;;  %v10104_v18 = vld [vmem:[#allocation53_spill] sm:$0xff]  ;;  %v10106_v6 = vld [vmem:[#allocation54_spill] sm:$0xff] }
 0x41c   :  { %v2113_v27 = vmul.f32 %v3910_v55, %v2112_v51  ;;  %2434 = vmatpush.msra.mxu2 %v6798_v7  ;;  %2454 = vmatpush.msra.mxu3 %v6801_v5  ;;  %v2141_v25 = vmul.f32 %v7433_v13, %v7413_v20  ;;  %v2122_v7 = vor.u32 1.1754944e-38, %v2121_v61  ;;  %vm2146_vm13 = vweird.f32 %v7433_v13  ;;  %v10105_v51 = vld [vmem:[#allocation47_spill] sm:$0xff]  ;;  %v10109_v61 = vld [vmem:[#allocation57_spill] sm:$0xff] }
 0x41d   :  { %v2128_v60 = vmul.f32 %v3912_v56, %v2127_v37  ;;  %2395 = vmatpush.msrb.mxu0 %v6810_v8  ;;  %2415 = vmatpush.msrb.mxu1 %v6813_v22  ;;  %v2157_v8 = vrot.slane %v6779_v59, 7  ;;  %v2137_v22 = vor.u32 1.1754944e-38, %v2136_v53  ;;  %vm2147_vm15 = vmor %vm2145_vm14, %vm2146_vm13  ;;  %v10107_v37 = vld [vmem:[#allocation55_spill] sm:$0xff]  ;;  %v10110_v53 = vld [vmem:[#allocation58_spill] sm:$0xff] }
 0x41e   :  { %v2114_v17 = vadd.f32 %v3910_v55, %v2113_v27  ;;  %2435 = vmatpush.msra.mxu2 %v6819_v29  ;;  %2455 = vmatpush.msra.mxu3 %v6822_v12  ;;  %v3916_v12 = vpop.eup %3915  ;;  %v2142_v15 = vsub.f32 1.0, %v2141_v25  ;;  %v10111_v27 = vld [vmem:[#allocation59_spill] sm:$0xff]  ;;  %v10116_v25 = vld [vmem:[#allocation64_spill] sm:$0xff] }
 0x41f   :  { %v2129_v5 = vadd.f32 %v3912_v56, %v2128_v60  ;;  %2396 = vmatpush.msrb.mxu0 %v6825_v3  ;;  %2416 = vmatpush.msrb.mxu1 %v6828_v2  ;;  %v10112_v60 = vld [vmem:[#allocation60_spill] sm:$0xff] }
 0x420   :  { %v2118_v29 = vsel %vm2117_vm9, %v3910_v55, %v2114_v17  ;;  %2436 = vmatpush.msra.mxu2 %v6831_v10  ;;  %2456 = vmatpush.msra.mxu3 %v6834_v58  ;;  %v2143_v2 = vmul.f32 %v7433_v13, %v2142_v15  ;;  %v10099_v55 = vld [vmem:[#allocation34_spill] sm:$0xff]  ;;  %v10115_v17 = vld [vmem:[#allocation63_spill] sm:$0xff] }
 0x421   :  { %v2123_v62 = vsel %vm2120_vm11, %v2122_v7, %v2118_v29  ;;  %v2133_v4 = vsel %vm2132_vm10, %v3912_v56, %v2129_v5  ;;  %2397 = vmatpush.msrb.mxu0 %v6837_v46  ;;  %2417 = vmatpush.msrb.mxu1 %v6840_v32  ;;  %v2151_v32 = vand.u32 2147483648, %v7413_v20  ;;  %v10102_v56 = vld [vmem:[#allocation52_spill] sm:$0xff]  ;;  %v10117_v7 = vld [vmem:[#allocation65_spill] sm:$0xff]  ;;  %v10118_v5 = vld [vmem:[#allocation66_spill] sm:$0xff] }
 0x422   :  { %v2138_v3 = vsel %vm2135_vm12, %v2137_v22, %v2133_v4  ;;  %v2160_v59 = vmul.f32 %v3916_v12, %v2123_v62  ;;  %2437 = vmatpush.msra.mxu2 %v6843_v50  ;;  %2457 = vmatpush.msra.mxu3 %v6846_v30  ;;  %v2144_v46 = vadd.f32 %v7433_v13, %v2143_v2  ;;  %v2149_v50 = vand.u32 2147483647, %v7413_v20  ;;  %v10097_v20 = vld [vmem:[#allocation41_spill] sm:$0xff]  ;;  %v10120_v22 = vld [vmem:[#allocation68_spill] sm:$0xff]  ;;  %v10122_v12 = vld [vmem:[#allocation70_spill] sm:$0xff] }
 0x423   :  { %v2159_v10 = vmul.f32 %v2157_v8, %v2138_v3  ;;  %2398 = vmatpush.msrb.mxu0 %v6849_v1  ;;  %2418 = vmatpush.msrb.mxu1 %v6852_v26  ;;  %v10080_v1 = vld [vmem:[#allocation36_spill] sm:$0xff]  ;;  %v2152_v26 = vor.u32 1.1754944e-38, %v2151_v32  ;;  %v10119_v8 = vld [vmem:[#allocation67_spill] sm:$0xff]  ;;  %v10121_v29 = vld [vmem:[#allocation69_spill] sm:$0xff] }
 0x424   :  { %2438 = vmatpush.msra.mxu2 %v6857_v24  ;;  %2458 = vmatpush.msra.mxu3 %v6860_v40  ;;  %v2148_v30 = vsel %vm2147_vm15, %v7433_v13, %v2144_v46  ;;  %v10081_v24 = vld [vmem:[#allocation28_spill] sm:$0xff]  ;;  %v10082_v40 = vld [vmem:[#allocation39_spill] sm:$0xff]  ;;  %vm2150_vm0 = vcmp.eq.f32.partialorder %v2149_v50, 8.507059e+37  ;;  %v10114_v13 = vld [vmem:[#allocation62_spill] sm:$0xff] }
 0x425   :  { %v7457_v58 = vadd.f32 %v2160_v59, %v2159_v10  ;;  %2399 = vmatpush.msrb.mxu0 %v6863_v35  ;;  %2419 = vmatpush.msrb.mxu1 %v6866_v39  ;;  %v10083_v35 = vld [vmem:[#allocation25_spill] sm:$0xff]  ;;  %v10084_v39 = vld [vmem:[#allocation40_spill] sm:$0xff]  ;;  %v10123_v15 = vld [vmem:[#allocation71_spill] sm:$0xff] }
 0x426   :  { %2439 = vmatpush.msra.mxu2 %v6873_v0  ;;  %2459 = vmatpush.msra.mxu3 %v6876_v9  ;;  %v2153_v9 = vsel %vm2150_vm0, %v2152_v26, %v2148_v30  ;;  %v10124_v62 = vld [vmem:[#allocation72_spill] sm:$0xff]  ;;  %v10125_v4 = vld [vmem:[#allocation73_spill] sm:$0xff]  ;;  %v10126_v3 = vld [vmem:[#allocation74_spill] sm:$0xff] }
 0x427   :  { %3917 = vtanh.f32 %v7457_v58  ;;  %2400 = vmatpush.msrb.mxu0 %v6879_v31  ;;  %2420 = vmatpush.msrb.mxu1 %v6882_v48  ;;  %v10085_v31 = vld [vmem:[#allocation30_spill] sm:$0xff]  ;;  %v10127_v59 = vld [vmem:[#allocation75_spill] sm:$0xff]  ;;  %v10128_v2 = vld [vmem:[#allocation76_spill] sm:$0xff] }
 0x428   :  { %2440 = vmatpush.msra.mxu2 %v6885_v41  ;;  %2460 = vmatpush.msra.mxu3 %v6888_v42  ;;  %v10086_v48 = vld [vmem:[#allocation42_spill] sm:$0xff]  ;;  %v10087_v42 = vld [vmem:[#allocation27_spill] sm:$0xff]  ;;  %v10129_v10 = vld [vmem:[#allocation77_spill] sm:$0xff] }
 0x429   :  { %2401 = vmatpush.msrb.mxu0 %v6891_v45  ;;  %2421 = vmatpush.msrb.mxu1 %v6894_v44  ;;  %v10088_v45 = vld [vmem:[#allocation43_spill] sm:$0xff]  ;;  %v10089_v44 = vld [vmem:[#allocation33_spill] sm:$0xff]  ;;  %v10130_v46 = vld [vmem:[#allocation78_spill] sm:$0xff] }
 0x42a   :  { %2441 = vmatpush.msra.mxu2 %v6897_v47  ;;  %2461 = vmatpush.msra.mxu3 %v10080_v1  ;;  %v10090_v47 = vld [vmem:[#allocation45_spill] sm:$0xff]  ;;  %v10131_v32 = vld [vmem:[#allocation79_spill] sm:$0xff]  ;;  %v10132_v50 = vld [vmem:[#allocation80_spill] sm:$0xff] }
 0x42b   :  { %2402 = vmatpush.msrb.mxu0 %v10081_v24  ;;  %2422 = vmatpush.msrb.mxu1 %v10082_v40  ;;  %v10133_v30 = vld [vmem:[#allocation81_spill] sm:$0xff]  ;;  %v10134_v1 = vld [vmem:[#allocation82_spill] sm:$0xff]  ;;  %v10135_v26 = vld [vmem:[#allocation83_spill] sm:$0xff] }
 0x42c   :  { %2442 = vmatpush.msra.mxu2 %v10083_v35  ;;  %2462 = vmatpush.msra.mxu3 %v10084_v39  ;;  %v10136_v24 = vld [vmem:[#allocation84_spill] sm:$0xff]  ;;  %v10137_v40 = vld [vmem:[#allocation85_spill] sm:$0xff]  ;;  %v10138_v35 = vld [vmem:[#allocation86_spill] sm:$0xff] }
 0x42d   :  { %v3918_v0 = vpop.eup %3917  ;;  %2403 = vmatpush.msrb.mxu0 %v10085_v31  ;;  %2423 = vmatpush.msrb.mxu1 %v10086_v48  ;;  %v10139_v39 = vld [vmem:[#allocation87_spill] sm:$0xff]  ;;  %v10142_v31 = vld [vmem:[#allocation90_spill] sm:$0xff] }
 0x42e   :  { %v2163_v41 = vmul.f32 %v3918_v0, %v2153_v9  ;;  %2443 = vmatpush.msra.mxu2 %v10087_v42  ;;  %2463 = vmatpush.msra.mxu3 %v10088_v45  ;;  %v10140_v0 = vld [vmem:[#allocation88_spill] sm:$0xff]  ;;  %v10141_v9 = vld [vmem:[#allocation89_spill] sm:$0xff]  ;;  %v10143_v48 = vld [vmem:[#allocation91_spill] sm:$0xff] }
 0x42f   :  { %2404 = vmatpush.msrb.mxu0 %v10089_v44  ;;  %2424 = vmatpush.msrb.mxu1 %v10090_v47  ;;  %v10145_v42 = vld [vmem:[#allocation93_spill] sm:$0xff]  ;;  %v10146_v45 = vld [vmem:[#allocation94_spill] sm:$0xff]  ;;  %v10147_v44 = vld [vmem:[#allocation95_spill] sm:$0xff] }
 0x430   :  { %v2245_v23 = vrot.slane %v2163_v41, 4  ;;  %2444 = vmatpush.msra.mxu2 %v10091_v14  ;;  %2464 = vmatpush.msra.mxu3 %v10092_v34  ;;  %v10144_v41 = vld [vmem:[#allocation92_spill] sm:$0xff]  ;;  %v10150_v14 = vld [vmem:[#allocation98_spill] sm:$0xff]  ;;  %v10151_v34 = vld [vmem:[#allocation99_spill] sm:$0xff] }
 0x431   :  { %2405 = vmatpush.msrb.mxu0 %v10093_v11  ;;  %2425 = vmatpush.msrb.mxu1 %v10094_v52  ;;  %v10148_v47 = vld [vmem:[#allocation96_spill] sm:$0xff]  ;;  %v10153_v52 = vld [vmem:[#allocation101_spill] sm:$0xff] }
 0x432   :  { %2445 = vmatpush.msra.mxu2 %v10095_v38  ;;  %2465 = vmatpush.msra.mxu3 %v10096_v16  ;;  %v10152_v11 = vld [vmem:[#allocation100_spill] sm:$0xff]  ;;  %v10154_v38 = vld [vmem:[#allocation102_spill] sm:$0xff]  ;;  %v10155_v16 = vld [vmem:[#allocation103_spill] sm:$0xff] }
 0x433   :  { %2263 = vmatmul.f32.vlgmr.msra.gmra.mxu0 %v2245_v23  ;;  %2283 = vmatmul.f32.vlgmr.msra.gmra.mxu1 %v2245_v23 }
 0x434   :  { %2303 = vmatmul.f32.vlgmr.msrb.gmra.mxu2 %v2245_v23  ;;  %2323 = vmatmul.f32.vlgmr.msrb.gmra.mxu3 %v2245_v23 }
 0x435   :  { %2406 = vmatpush.msrb.mxu0 %v10097_v20  ;;  %2426 = vmatpush.msrb.mxu1 %v10098_v28  ;;  %v10156_v20 = vld [vmem:[#allocation104_spill] sm:$0xff]  ;;  %v10157_v28 = vld [vmem:[#allocation105_spill] sm:$0xff] }
 0x436   :  { %2446 = vmatpush.msra.mxu2 %v10099_v55  ;;  %2466 = vmatpush.msra.mxu3 %v10100_v57  ;;  %v10158_v55 = vld [vmem:[#allocation106_spill] sm:$0xff]  ;;  %v10159_v57 = vld [vmem:[#allocation107_spill] sm:$0xff] }
 0x437   :  { %2407 = vmatpush.msrb.mxu0 %v10101_v54  ;;  %2427 = vmatpush.msrb.mxu1 %v10102_v56  ;;  %v10160_v54 = vld [vmem:[#allocation108_spill] sm:$0xff]  ;;  %v10161_v56 = vld [vmem:[#allocation109_spill] sm:$0xff] }
 0x438   :  { %2447 = vmatpush.msra.mxu2 %v10103_v43  ;;  %2467 = vmatpush.msra.mxu3 %v10104_v18  ;;  %v10162_v43 = vld [vmem:[#allocation110_spill] sm:$0xff]  ;;  %v10163_v18 = vld [vmem:[#allocation111_spill] sm:$0xff] }
 0x439   :  { %2408 = vmatpush.msrb.mxu0 %v10105_v51  ;;  %2428 = vmatpush.msrb.mxu1 %v10106_v6  ;;  %v10164_v51 = vld [vmem:[#allocation112_spill] sm:$0xff]  ;;  %v10165_v6 = vld [vmem:[#allocation113_spill] sm:$0xff] }
 0x43a   :  { %2448 = vmatpush.msra.mxu2 %v10107_v37  ;;  %2468 = vmatpush.msra.mxu3 %v10108_v36  ;;  %v10166_v37 = vld [vmem:[#allocation114_spill] sm:$0xff]  ;;  %v10167_v36 = vld [vmem:[#allocation115_spill] sm:$0xff] }
 0x43b   :  { %2409 = vmatpush.msrb.mxu0 %v10109_v61  ;;  %2429 = vmatpush.msrb.mxu1 %v10110_v53  ;;  %v10168_v61 = vld [vmem:[#allocation116_spill] sm:$0xff]  ;;  %v10169_v53 = vld [vmem:[#allocation117_spill] sm:$0xff] }
 0x43c   :  { %2449 = vmatpush.msra.mxu2 %v10111_v27  ;;  %2469 = vmatpush.msra.mxu3 %v10112_v60  ;;  %v10170_v27 = vld [vmem:[#allocation118_spill] sm:$0xff]  ;;  %v10171_v60 = vld [vmem:[#allocation119_spill] sm:$0xff] }
 0x43d   :  { %2410 = vmatmul.f32.vlgmr.msrb.gmra.mxu0 %v2245_v23  ;;  %2430 = vmatmul.f32.vlgmr.msrb.gmra.mxu1 %v2245_v23 }
 0x43e   :  { %2450 = vmatmul.f32.vlgmr.msra.gmra.mxu2 %v2245_v23  ;;  %2470 = vmatmul.f32.vlgmr.msra.gmra.mxu3 %v2245_v23  ;;  %v10149_v23 = vld [vmem:[#allocation97_spill] sm:$0xff] }
 0x43f   :  { %2556 = vmatpush.msra.mxu0 %v10113_v19  ;;  %2576 = vmatpush.msra.mxu1 %v10114_v13  ;;  %v10172_v19 = vld [vmem:[#allocation120_spill] sm:$0xff]  ;;  %v10173_v13 = vld [vmem:[#allocation121_spill] sm:$0xff] }
 0x440   :  { %2596 = vmatpush.msrb.mxu2 %v10115_v17  ;;  %2616 = vmatpush.msrb.mxu3 %v10116_v25  ;;  %v10174_v17 = vld [vmem:[#allocation122_spill] sm:$0xff]  ;;  %v10175_v25 = vld [vmem:[#allocation123_spill] sm:$0xff] }
 0x441   :  { %2557 = vmatpush.msra.mxu0 %v10117_v7  ;;  %2577 = vmatpush.msra.mxu1 %v10118_v5  ;;  %v10176_v7 = vld [vmem:[#allocation124_spill] sm:$0xff]  ;;  %v10177_v5 = vld [vmem:[#allocation125_spill] sm:$0xff] }
 0x442   :  { %2597 = vmatpush.msrb.mxu2 %v10119_v8  ;;  %2617 = vmatpush.msrb.mxu3 %v10120_v22  ;;  %v10178_v8 = vld [vmem:[#allocation126_spill] sm:$0xff]  ;;  %v10179_v22 = vld [vmem:[#allocation127_spill] sm:$0xff] }
 0x443   :  { %2558 = vmatpush.msra.mxu0 %v10121_v29  ;;  %2578 = vmatpush.msra.mxu1 %v10122_v12  ;;  %v10180_v29 = vld [vmem:[#allocation128_spill] sm:$0xff]  ;;  %v10181_v12 = vld [vmem:[#allocation129_spill] sm:$0xff] }
 0x444   :  { %2598 = vmatpush.msrb.mxu2 %v10123_v15  ;;  %2618 = vmatpush.msrb.mxu3 %v10124_v62  ;;  %v10182_v15 = vld [vmem:[#allocation130_spill] sm:$0xff]  ;;  %v10183_v62 = vld [vmem:[#allocation131_spill] sm:$0xff] }
 0x445   :  { %2559 = vmatpush.msra.mxu0 %v10125_v4  ;;  %2579 = vmatpush.msra.mxu1 %v10126_v3  ;;  %v10184_v4 = vld [vmem:[#allocation132_spill] sm:$0xff]  ;;  %v10185_v3 = vld [vmem:[#allocation133_spill] sm:$0xff] }
 0x446   :  { %2599 = vmatpush.msrb.mxu2 %v10127_v59  ;;  %2619 = vmatpush.msrb.mxu3 %v10128_v2  ;;  %v10186_v59 = vld [vmem:[#allocation134_spill] sm:$0xff]  ;;  %v10187_v2 = vld [vmem:[#allocation135_spill] sm:$0xff] }
 0x447   :  { %2560 = vmatpush.msra.mxu0 %v10129_v10  ;;  %2580 = vmatpush.msra.mxu1 %v10130_v46  ;;  %v10188_v10 = vld [vmem:[#allocation136_spill] sm:$0xff]  ;;  %v10189_v46 = vld [vmem:[#allocation137_spill] sm:$0xff] }
 0x448   :  { %2600 = vmatpush.msrb.mxu2 %v10131_v32  ;;  %2620 = vmatpush.msrb.mxu3 %v10132_v50  ;;  %v10190_v32 = vld [vmem:[#allocation138_spill] sm:$0xff]  ;;  %v10191_v50 = vld [vmem:[#allocation139_spill] sm:$0xff] }
 0x449   :  { %2561 = vmatpush.msra.mxu0 %v10133_v30  ;;  %2581 = vmatpush.msra.mxu1 %v10134_v1  ;;  %v10192_v30 = vld [vmem:[#allocation140_spill] sm:$0xff]  ;;  %v10193_v1 = vld [vmem:[#allocation141_spill] sm:$0xff] }
 0x44a   :  { %2601 = vmatpush.msrb.mxu2 %v10135_v26  ;;  %2621 = vmatpush.msrb.mxu3 %v10136_v24  ;;  %v10194_v26 = vld [vmem:[#allocation142_spill] sm:$0xff]  ;;  %v10195_v24 = vld [vmem:[#allocation143_spill] sm:$0xff] }
 0x44b   :  { %2562 = vmatpush.msra.mxu0 %v10137_v40  ;;  %2582 = vmatpush.msra.mxu1 %v10138_v35  ;;  %v10196_v40 = vld [vmem:[#allocation144_spill] sm:$0xff]  ;;  %v10197_v35 = vld [vmem:[#allocation145_spill] sm:$0xff] }
 0x44c   :  { %2602 = vmatpush.msrb.mxu2 %v10139_v39  ;;  %2622 = vmatpush.msrb.mxu3 %v10140_v0  ;;  %v10198_v39 = vld [vmem:[#allocation146_spill] sm:$0xff]  ;;  %v10199_v0 = vld [vmem:[#allocation147_spill] sm:$0xff] }
 0x44d   :  { %2563 = vmatpush.msra.mxu0 %v10141_v9  ;;  %2583 = vmatpush.msra.mxu1 %v10142_v31  ;;  %v10200_v9 = vld [vmem:[#allocation148_spill] sm:$0xff]  ;;  %v10201_v31 = vld [vmem:[#allocation149_spill] sm:$0xff] }
 0x44e   :  { %2603 = vmatpush.msrb.mxu2 %v10143_v48  ;;  %2623 = vmatpush.msrb.mxu3 %v10144_v41  ;;  %v10202_v48 = vld [vmem:[#allocation151_spill] sm:$0xff]  ;;  %v10203_v41 = vld [vmem:[#allocation152_spill] sm:$0xff] }
 0x44f   :  { %2564 = vmatpush.msra.mxu0 %v10145_v42  ;;  %2584 = vmatpush.msra.mxu1 %v10146_v45  ;;  %v10204_v42 = vld [vmem:[#allocation153_spill] sm:$0xff]  ;;  %v10205_v45 = vld [vmem:[#allocation154_spill] sm:$0xff] }
 0x450   :  { %2604 = vmatpush.msrb.mxu2 %v10147_v44  ;;  %2624 = vmatpush.msrb.mxu3 %v10148_v47  ;;  %v10206_v44 = vld [vmem:[#allocation155_spill] sm:$0xff]  ;;  %v10207_v47 = vld [vmem:[#allocation156_spill] sm:$0xff] }
 0x451   :  { %2565 = vmatpush.msra.mxu0 %v10149_v23  ;;  %2585 = vmatpush.msra.mxu1 %v10150_v14  ;;  %v10208_v23 = vld [vmem:[#allocation157_spill] sm:$0xff]  ;;  %v10209_v14 = vld [vmem:[#allocation158_spill] sm:$0xff] }
 0x452   :  { %2605 = vmatpush.msrb.mxu2 %v10151_v34  ;;  %2625 = vmatpush.msrb.mxu3 %v10152_v11  ;;  %v10210_v34 = vld [vmem:[#allocation159_spill] sm:$0xff]  ;;  %v10211_v11 = vld [vmem:[#allocation160_spill] sm:$0xff] }
 0x453   :  { %2566 = vmatpush.msra.mxu0 %v10153_v52  ;;  %2586 = vmatpush.msra.mxu1 %v10154_v38  ;;  %v10212_v52 = vld [vmem:[#allocation162_spill] sm:$0xff]  ;;  %v10213_v38 = vld [vmem:[#allocation163_spill] sm:$0xff] }
 0x454   :  { %2606 = vmatpush.msrb.mxu2 %v10155_v16  ;;  %2626 = vmatpush.msrb.mxu3 %v10156_v20  ;;  %v10214_v16 = vld [vmem:[#allocation164_spill] sm:$0xff]  ;;  %v10215_v20 = vld [vmem:[#allocation165_spill] sm:$0xff] }
 0x455   :  { %2567 = vmatpush.msra.mxu0 %v10157_v28  ;;  %2587 = vmatpush.msra.mxu1 %v10158_v55  ;;  %v10216_v28 = vld [vmem:[#allocation166_spill] sm:$0xff]  ;;  %v10217_v55 = vld [vmem:[#allocation167_spill] sm:$0xff] }
 0x456   :  { %2607 = vmatpush.msrb.mxu2 %v10159_v57  ;;  %2627 = vmatpush.msrb.mxu3 %v10160_v54  ;;  %v10218_v57 = vld [vmem:[#allocation168_spill] sm:$0xff]  ;;  %v10219_v54 = vld [vmem:[#allocation169_spill] sm:$0xff] }
 0x457   :  { %2568 = vmatpush.msra.mxu0 %v10161_v56  ;;  %2588 = vmatpush.msra.mxu1 %v10162_v43  ;;  %v10220_v56 = vld [vmem:[#allocation170_spill] sm:$0xff]  ;;  %v10221_v43 = vld [vmem:[#allocation171_spill] sm:$0xff] }
 0x458   :  { %2608 = vmatpush.msrb.mxu2 %v10163_v18  ;;  %2628 = vmatpush.msrb.mxu3 %v10164_v51  ;;  %v10222_v18 = vld [vmem:[#allocation172_spill] sm:$0xff]  ;;  %v10223_v51 = vld [vmem:[#allocation173_spill] sm:$0xff] }
 0x459   :  { %2569 = vmatpush.msra.mxu0 %v10165_v6  ;;  %2589 = vmatpush.msra.mxu1 %v10166_v37  ;;  %v10224_v6 = vld [vmem:[#allocation174_spill] sm:$0xff]  ;;  %v10225_v37 = vld [vmem:[#allocation175_spill] sm:$0xff] }
 0x45a   :  { %2609 = vmatpush.msrb.mxu2 %v10167_v36  ;;  %2629 = vmatpush.msrb.mxu3 %v10168_v61  ;;  %v10226_v36 = vld [vmem:[#allocation176_spill] sm:$0xff]  ;;  %v10227_v61 = vld [vmem:[#allocation177_spill] sm:$0xff] }
 0x45b   :  { %2570 = vmatpush.msra.mxu0 %v10169_v53  ;;  %2590 = vmatpush.msra.mxu1 %v10170_v27  ;;  %v10228_v53 = vld [vmem:[#allocation178_spill] sm:$0xff]  ;;  %v10229_v27 = vld [vmem:[#allocation179_spill] sm:$0xff] }
 0x45c   :  { %2610 = vmatpush.msrb.mxu2 %v10171_v60  ;;  %2630 = vmatpush.msrb.mxu3 %v10172_v19  ;;  %v10230_v60 = vld [vmem:[#allocation180_spill] sm:$0xff]  ;;  %v10231_v19 = vld [vmem:[#allocation181_spill] sm:$0xff] }
 0x45d   :  { %2571 = vmatpush.msra.mxu0 %v10173_v13  ;;  %2591 = vmatpush.msra.mxu1 %v10174_v17  ;;  %v10232_v13 = vld [vmem:[#allocation182_spill] sm:$0xff]  ;;  %v10233_v17 = vld [vmem:[#allocation183_spill] sm:$0xff] }
 0x45e   :  { %2611 = vmatpush.msrb.mxu2 %v10175_v25  ;;  %2631 = vmatpush.msrb.mxu3 %v10176_v7  ;;  %v10234_v25 = vld [vmem:[#allocation184_spill] sm:$0xff]  ;;  %v10235_v7 = vld [vmem:[#allocation185_spill] sm:$0xff] }
 0x45f   :  { %2639 = vmatpush.msrb.mxu0 %v10177_v5  ;;  %2659 = vmatpush.msrb.mxu1 %v10178_v8  ;;  %v10236_v5 = vld [vmem:[#allocation186_spill] sm:$0xff]  ;;  %v10237_v8 = vld [vmem:[#allocation187_spill] sm:$0xff] }
 0x460   :  { %2679 = vmatpush.msra.mxu2 %v10179_v22  ;;  %2699 = vmatpush.msra.mxu3 %v10180_v29  ;;  %v10238_v22 = vld [vmem:[#allocation188_spill] sm:$0xff] }
 0x461   :  { %2640 = vmatpush.msrb.mxu0 %v10181_v12  ;;  %2660 = vmatpush.msrb.mxu1 %v10182_v15  ;;  %v10239_v29 = vld [vmem:[#allocation24_spill] sm:$0xff]  ;;  %v10240_v12 = vld [vmem:[#allocation189_spill] sm:$0xff] }
 0x462   :  { %2680 = vmatpush.msra.mxu2 %v10183_v62  ;;  %2700 = vmatpush.msra.mxu3 %v10184_v4 }
 0x463   :  { %2641 = vmatpush.msrb.mxu0 %v10185_v3  ;;  %2661 = vmatpush.msrb.mxu1 %v10186_v59 }
 0x464   :  { %2681 = vmatpush.msra.mxu2 %v10187_v2  ;;  %2701 = vmatpush.msra.mxu3 %v10188_v10 }
 0x465   :  { %2642 = vmatpush.msrb.mxu0 %v10189_v46  ;;  %2662 = vmatpush.msrb.mxu1 %v10190_v32  ;;  %v10241_v46 = vld [vmem:[#allocation23_spill] sm:$0xff] }
 0x466   :  { %2682 = vmatpush.msra.mxu2 %v10191_v50  ;;  %2702 = vmatpush.msra.mxu3 %v10192_v30  ;;  %v10242_v50 = vld [vmem:[#allocation32_spill] sm:$0xff] }
 0x467   :  { %2643 = vmatpush.msrb.mxu0 %v10193_v1  ;;  %2663 = vmatpush.msrb.mxu1 %v10194_v26 }
 0x468   :  { %2683 = vmatpush.msra.mxu2 %v10195_v24  ;;  %2703 = vmatpush.msra.mxu3 %v10196_v40 }
 0x469   :  { %2644 = vmatpush.msrb.mxu0 %v10197_v35  ;;  %2664 = vmatpush.msrb.mxu1 %v10198_v39  ;;  %v10243_v39 = vld [vmem:[#allocation26_spill] sm:$0xff] }
 0x46a   :  { %2684 = vmatpush.msra.mxu2 %v10199_v0  ;;  %2704 = vmatpush.msra.mxu3 %v10200_v9 }
 0x46b   :  { %2645 = vmatpush.msrb.mxu0 %v10201_v31  ;;  %2665 = vmatpush.msrb.mxu1 %v10202_v48 }
 0x46c   :  { %2685 = vmatpush.msra.mxu2 %v10203_v41  ;;  %2705 = vmatpush.msra.mxu3 %v10204_v42 }
 0x46d   :  { %2646 = vmatpush.msrb.mxu0 %v10205_v45  ;;  %2666 = vmatpush.msrb.mxu1 %v10206_v44  ;;  %v10244_v44 = vld [vmem:[#allocation150_spill] sm:$0xff] }
 0x46e   :  { %2686 = vmatpush.msra.mxu2 %v10207_v47  ;;  %2706 = vmatpush.msra.mxu3 %v10208_v23  ;;  %v10245_v23 = vld [vmem:[#allocation161_spill] sm:$0xff] }
 0x46f   :  { %2647 = vmatpush.msrb.mxu0 %v10209_v14  ;;  %2667 = vmatpush.msrb.mxu1 %v10210_v34 }
 0x470   :  { %2687 = vmatpush.msra.mxu2 %v10211_v11  ;;  %2707 = vmatpush.msra.mxu3 %v10212_v52 }
 0x471   :  { %2648 = vmatpush.msrb.mxu0 %v10213_v38  ;;  %2668 = vmatpush.msrb.mxu1 %v10214_v16 }
 0x472   :  { %2688 = vmatpush.msra.mxu2 %v10215_v20  ;;  %2708 = vmatpush.msra.mxu3 %v10216_v28 }
 0x473   :  { %2649 = vmatpush.msrb.mxu0 %v10217_v55  ;;  %2669 = vmatpush.msrb.mxu1 %v10218_v57 }
 0x474   :  { %2689 = vmatpush.msra.mxu2 %v10219_v54  ;;  %2709 = vmatpush.msra.mxu3 %v10220_v56 }
 0x475   :  { %2650 = vmatpush.msrb.mxu0 %v10221_v43  ;;  %2670 = vmatpush.msrb.mxu1 %v10222_v18  ;;  %v10246_v18 = vld [vmem:[#allocation35_spill] sm:$0xff] }
 0x476   :  { %2690 = vmatpush.msra.mxu2 %v10223_v51  ;;  %2710 = vmatpush.msra.mxu3 %v10224_v6 }
 0x477   :  { %2651 = vmatpush.msrb.mxu0 %v10225_v37  ;;  %2671 = vmatpush.msrb.mxu1 %v10226_v36 }
 0x478   :  { %2691 = vmatpush.msra.mxu2 %v10227_v61  ;;  %2711 = vmatpush.msra.mxu3 %v10228_v53 }
 0x479   :  { %2652 = vmatpush.msrb.mxu0 %v10229_v27  ;;  %2672 = vmatpush.msrb.mxu1 %v10230_v60 }
 0x47a   :  { %2692 = vmatpush.msra.mxu2 %v10231_v19  ;;  %2712 = vmatpush.msra.mxu3 %v10232_v13 }
 0x47b   :  { %2653 = vmatpush.msrb.mxu0 %v10233_v17  ;;  %2673 = vmatpush.msrb.mxu1 %v10234_v25 }
 0x47c   :  { %2693 = vmatpush.msra.mxu2 %v10235_v7  ;;  %2713 = vmatpush.msra.mxu3 %v10236_v5 }
 0x47d   :  { %2654 = vmatpush.msrb.mxu0 %v10237_v8  ;;  %2674 = vmatpush.msrb.mxu1 %v10238_v22 }
 0x47e   :  { %2694 = vmatpush.msra.mxu2 %v10239_v29  ;;  %2714 = vmatpush.msra.mxu3 %v10240_v12 }
 0x496   :  { %v2181_v15 = vpop.f32.mrf.mxu0  ;;  %v2201_v62 = vpop.f32.mrf.mxu1 }
 0x49d   :  { %v2221_v4 = vpop.f32.mrf.mxu2  ;;  %v2241_v24 = vpop.f32.mrf.mxu3 }
 0x4b0   :  { %v2264_v3 = vpop.f32.mrf.mxu0  ;;  %v2284_v59 = vpop.f32.mrf.mxu1 }
 0x4b1   :  { %v2265_v2 = vadd.f32 %v2264_v3, %v2181_v15  ;;  %v2285_v10 = vadd.f32 %v2284_v59, %v2201_v62 }
 0x4b3   :  { %v2327_v32 = vadd.f32 %v2265_v2, %v10241_v46  ;;  %v2328_v30 = vadd.f32 %v2285_v10, %v10242_v50 }
 0x4b5   :  { %v3740_v1 = vmul.f32 -1.442695, %v2327_v32  ;;  %v3741_v26 = vmul.f32 -1.442695, %v2328_v30 }
 0x4b7   :  { %3919 = vpow2.f32 %v3740_v1  ;;  %v2304_v40 = vpop.f32.mrf.mxu2  ;;  %v2324_v52 = vpop.f32.mrf.mxu3 }
 0x4b8   :  { %3921 = vpow2.f32 %v3741_v26  ;;  %v2305_v35 = vadd.f32 %v2304_v40, %v2221_v4  ;;  %v2325_v28 = vadd.f32 %v2324_v52, %v2241_v24 }
 0x4ba   :  { %v2329_v0 = vadd.f32 %v2305_v35, %v10243_v39  ;;  %v2411_v9 = vpop.f32.mrf.mxu0  ;;  %v2431_v31 = vpop.f32.mrf.mxu1  ;;  %v2330_v51 = vadd.f32 %v2325_v28, %v10246_v18 }
 0x4bb   :  { %v2478_v48 = vrot.slane %v2411_v9, 3  ;;  %v2479_v41 = vrot.slane %v2431_v31, 3 }
 0x4bc   :  { %v3742_v42 = vmul.f32 -1.442695, %v2329_v0 }
 0x4bd   :  { %v3920_v45 = vpop.eup %3919  ;;  %v2486_v47 = vadd.f32 %v2478_v48, %v10244_v44  ;;  %v2487_v14 = vadd.f32 %v2479_v41, %v10245_v23 }
 0x4be   :  { %v3922_v34 = vpop.eup %3921  ;;  %v2340_v11 = vadd.f32 1.0, %v3920_v45  ;;  %3923 = vpow2.f32 %v3742_v42 }
 0x4bf   :  { %v2341_v38 = vadd.f32 1.0, %v3922_v34  ;;  %v3743_v16 = vmul.f32 -1.442695, %v2486_v47  ;;  %v3744_v20 = vmul.f32 -1.442695, %v2487_v14  ;;  %v2549_v34 = vrot.slane %v7457_v58, 7 }
 0x4c0   :  { %3925 = vrcp.f32 %v2340_v11  ;;  %v2352_v13 = vand.u32 2147483647, %v2340_v11  ;;  %v2354_v8 = vand.u32 2147483648, %v2340_v11  ;;  %vm2348_vm5 = vweird.f32 %v2340_v11 }
 0x4c1   :  { %3927 = vrcp.f32 %v2341_v38  ;;  %v2451_v55 = vpop.f32.mrf.mxu2  ;;  %v2471_v25 = vpop.f32.mrf.mxu3  ;;  %v2369_v5 = vand.u32 2147483648, %v2341_v38  ;;  %v2367_v12 = vand.u32 2147483647, %v2341_v38  ;;  %vm2363_vm4 = vweird.f32 %v2341_v38 }
 0x4c2   :  { %3929 = vpow2.f32 %v3743_v16  ;;  %v2480_v57 = vrot.slane %v2451_v55, 3  ;;  %v2481_v62 = vrot.slane %v2471_v25, 3  ;;  %vm2353_vm7 = vcmp.eq.f32.partialorder %v2352_v13, 8.507059e+37 }
 0x4c3   :  { %3931 = vpow2.f32 %v3744_v20  ;;  %v2355_v10 = vor.u32 1.1754944e-38, %v2354_v8  ;;  %v2370_v1 = vor.u32 1.1754944e-38, %v2369_v5  ;;  %vm2368_vm9 = vcmp.eq.f32.partialorder %v2367_v12, 8.507059e+37 }
 0x4c4   :  { %v3924_v54 = vpop.eup %3923  ;;  %v2488_v56 = vadd.f32 %v2480_v57, %v5565_v21  ;;  %v2489_v9 = vadd.f32 %v2481_v62, %v5618_v33 }
 0x4c5   :  { %v7644_v43 = vadd.f32 1.0, %v3924_v54 }
 0x4c6   :  { %v3926_v6 = vpop.eup %3925  ;;  %v3745_v37 = vmul.f32 -1.442695, %v2488_v56 }
 0x4c7   :  { %v3928_v36 = vpop.eup %3927  ;;  %v2344_v61 = vmul.f32 %v3926_v6, %v2340_v11  ;;  %3933 = vrcp.f32 %v7644_v43  ;;  %vm2349_vm2 = vweird.f32 %v3926_v6  ;;  %vm2378_vm10 = vweird.f32 %v7644_v43 }
 0x4c8   :  { %v3930_v53 = vpop.eup %3929  ;;  %v2359_v27 = vmul.f32 %v3928_v36, %v2341_v38  ;;  %3935 = vpow2.f32 %v3745_v37  ;;  %vm2364_vm3 = vweird.f32 %v3928_v36  ;;  %vm2350_vm6 = vmor %vm2348_vm5, %vm2349_vm2  ;;  %v2384_v11 = vand.u32 2147483648, %v7644_v43 }
 0x4c9   :  { %v3932_v60 = vpop.eup %3931  ;;  %v2345_v19 = vsub.f32 1.0, %v2344_v61  ;;  %3937 = vtanh.f32 %v2330_v51  ;;  %v7648_v17 = vadd.f32 1.0, %v3930_v53  ;;  %vm2365_vm8 = vmor %vm2363_vm4, %vm2364_vm3  ;;  %v7793_v61 = vld [vmem:[#allocation7 + $0x120] sm:$0xff] }
 0x4ca   :  { %v2360_v7 = vsub.f32 1.0, %v2359_v27  ;;  %v7650_v22 = vadd.f32 1.0, %v3932_v60  ;;  %v2385_v53 = vor.u32 1.1754944e-38, %v2384_v11 }
 0x4cb   :  { %v2346_v29 = vmul.f32 %v3926_v6, %v2345_v19  ;;  %3939 = vrcp.f32 %v7648_v17  ;;  %v2511_v20 = vand.u32 2147483647, %v7648_v17  ;;  %v2513_v55 = vand.u32 2147483648, %v7648_v17 }
 0x4cc   :  { %v2361_v15 = vmul.f32 %v3928_v36, %v2360_v7  ;;  %3941 = vrcp.f32 %v7650_v22  ;;  %v2528_v58 = vand.u32 2147483648, %v7650_v22  ;;  %v2526_v51 = vand.u32 2147483647, %v7650_v22 }
 0x4cd   :  { %v7654_v4 = vpop.eup %3933  ;;  %v2347_v3 = vadd.f32 %v3926_v6, %v2346_v29  ;;  %vm2507_vm14 = vweird.f32 %v7648_v17  ;;  %vm2522_vm0 = vweird.f32 %v7650_v22  ;;  %v2514_v27 = vor.u32 1.1754944e-38, %v2513_v55  ;;  %v7760_v55 = vld [vmem:[#allocation7 + $0x198] sm:$0xff] }
 0x4ce   :  { %v3936_v59 = vpop.eup %3935  ;;  %v2374_v2 = vmul.f32 %v7654_v4, %v7644_v43  ;;  %v2362_v32 = vadd.f32 %v3928_v36, %v2361_v15  ;;  %vm2379_vm11 = vweird.f32 %v7654_v4  ;;  %v2529_v25 = vor.u32 1.1754944e-38, %v2528_v58  ;;  %v7766_v58 = vld [vmem:[#allocation7 + $0x168] sm:$0xff] }
 0x4cf   :  { %v3938_v30 = vpop.eup %3937  ;;  %v2351_v26 = vsel %vm2350_vm6, %v3926_v6, %v2347_v3  ;;  %v7658_v24 = vadd.f32 1.0, %v3936_v59  ;;  %v2382_v6 = vand.u32 2147483647, %v7644_v43  ;;  %vm7686_vm15 = vmor %vm2378_vm10, %vm2379_vm11  ;;  %vm2512_vm4 = vcmp.eq.f32.partialorder %v2511_v20, 8.507059e+37 }
 0x4d0   :  { %v2375_v40 = vsub.f32 1.0, %v2374_v2  ;;  %v2356_v35 = vsel %vm2353_vm7, %v2355_v10, %v2351_v26  ;;  %v2366_v0 = vsel %vm2365_vm8, %v3928_v36, %v2362_v32  ;;  %vm2527_vm5 = vcmp.eq.f32.partialorder %v2526_v51, 8.507059e+37  ;;  %v7701_v32 = vld [vmem:[#allocation7 + $0x1e0] sm:$0xff] }
 0x4d1   :  { %v3940_v31 = vpop.eup %3939  ;;  %v2371_v48 = vsel %vm2368_vm9, %v2370_v1, %v2366_v0  ;;  %v2390_v41 = vmul.f32 %v3938_v30, %v2356_v35  ;;  %3943 = vrcp.f32 %v7658_v24  ;;  %vm2383_vm6 = vcmp.eq.f32.partialorder %v2382_v6, 8.507059e+37  ;;  %v7704_v30 = vld [vmem:[#allocation7 + $0x1e8] sm:$0xff]  ;;  %v7715_v35 = vld [vmem:[#allocation7 + $0x1f8] sm:$0xff]  ;;  %v7777_v51 = vld [vmem:[#allocation7 + $0x140] sm:$0xff] }
 0x4d2   :  { %v3942_v42 = vpop.eup %3941  ;;  %v2376_v45 = vmul.f32 %v7654_v4, %v2375_v40  ;;  %v2389_v47 = vmul.f32 %v2371_v48, %v7401_v49  ;;  %v2503_v14 = vmul.f32 %v3940_v31, %v7648_v17  ;;  %3945 = vtanh.f32 %v2489_v9  ;;  %v7712_v40 = vld [vmem:[#allocation7 + $0x1f0] sm:$0xff]  ;;  %v7727_v9 = vld [vmem:[#allocation7 + $0x1c8] sm:$0xff]  ;;  %v7736_v48 = vld [vmem:[#allocation7 + $0x1d8] sm:$0xff] }
 0x4d3   :  { %v2518_v52 = vmul.f32 %v3942_v42, %v7650_v22  ;;  %vm2508_vm12 = vweird.f32 %v3940_v31  ;;  %vm2523_vm13 = vweird.f32 %v3942_v42  ;;  %vm3609_vm7 = vcmask 1043456   ;;  %v7780_v6 = vld [vmem:[#allocation7 + $0x148] sm:$0xff]  ;;  %v7859_v0 = vld [vmem:[#allocation7 + $0x90] sm:$0xff] }
 0x4d4   :  { %v7669_v38 = vadd.f32 %v2390_v41, %v2389_v47  ;;  %v2504_v16 = vsub.f32 1.0, %v2503_v14  ;;  %v2377_v49 = vadd.f32 %v7654_v4, %v2376_v45  ;;  %vm2509_vm2 = vmor %vm2507_vm14, %vm2508_vm12  ;;  %v2543_v10 = vand.u32 2147483648, %v7658_v24  ;;  %v7742_v45 = vld [vmem:[#allocation7 + $0x1a8] sm:$0xff]  ;;  %v7745_v47 = vld [vmem:[#allocation7 + $0x1b0] sm:$0xff]  ;;  %10266 = vst [vmem:[#allocation31_spill] sm:$0xff] %v7859_v0 }
 0x4d5   :  { %v2519_v28 = vsub.f32 1.0, %v2518_v52  ;;  %vm2524_vm3 = vmor %vm2522_vm0, %vm2523_vm13  ;;  %vm2537_vm9 = vweird.f32 %v7658_v24  ;;  %v2541_v26 = vand.u32 2147483647, %v7658_v24  ;;  %v7748_v14 = vld [vmem:[#allocation7 + $0x1b8] sm:$0xff]  ;;  %v7751_v52 = vld [vmem:[#allocation7 + $0x180] sm:$0xff] }
 0x4d6   :  { %3947 = vtanh.f32 %v7669_v38  ;;  %v2505_v57 = vmul.f32 %v3940_v31, %v2504_v16  ;;  %v2381_v19 = vsel %vm7686_vm15, %v7654_v4, %v2377_v49  ;;  %v2544_v41 = vor.u32 1.1754944e-38, %v2543_v10  ;;  %v7754_v16 = vld [vmem:[#allocation7 + $0x188] sm:$0xff]  ;;  %v7763_v49 = vld [vmem:[#allocation7 + $0x160] sm:$0xff] }
 0x4d7   :  { %v7677_v54 = vpop.eup %3943  ;;  %v2520_v56 = vmul.f32 %v3942_v42, %v2519_v28  ;;  %v2386_v15 = vsel %vm2383_vm6, %v2385_v53, %v2381_v19  ;;  %vm2542_vm11 = vcmp.eq.f32.partialorder %v2541_v26, 8.507059e+37  ;;  %v7757_v28 = vld [vmem:[#allocation7 + $0x190] sm:$0xff]  ;;  %v7796_v53 = vld [vmem:[#allocation7 + $0x128] sm:$0xff]  ;;  %v7805_v19 = vld [vmem:[#allocation7 + $0x100] sm:$0xff] }
 0x4d8   :  { %v2533_v37 = vmul.f32 %v7677_v54, %v7658_v24  ;;  %v2506_v36 = vadd.f32 %v3940_v31, %v2505_v57  ;;  %v3946_v13 = vpop.eup %3945  ;;  %vm2538_vm8 = vweird.f32 %v7677_v54  ;;  %v7853_v10 = vld [vmem:[#allocation7 + $0x80] sm:$0xff]  ;;  %v7856_v26 = vld [vmem:[#allocation7 + $0x88] sm:$0xff] }
 0x4d9   :  { %v2521_v60 = vadd.f32 %v3942_v42, %v2520_v56  ;;  %vm7720_vm10 = vmor %vm2537_vm9, %vm2538_vm8  ;;  %v7774_v56 = vld [vmem:[#allocation7 + $0x178] sm:$0xff]  ;;  %10264 = vst [vmem:[#allocation37_spill] sm:$0xff] %v7853_v10  ;;  %vm3611_vm9 = vcmask 1044480  }
 0x4da   :  { %v2534_v17 = vsub.f32 1.0, %v2533_v37  ;;  %v2510_v7 = vsel %vm2509_vm2, %v3940_v31, %v2506_v36  ;;  %v7733_v31 = vld [vmem:[#allocation7 + $0x1d0] sm:$0xff]  ;;  %v7790_v36 = vld [vmem:[#allocation7 + $0x158] sm:$0xff]  ;;  %10265 = vst [vmem:[#allocation48_spill] sm:$0xff] %v7856_v26 }
 0x4db   :  { %v2515_v43 = vsel %vm2512_vm4, %v2514_v27, %v2510_v7  ;;  %v2525_v5 = vsel %vm2524_vm3, %v3942_v42, %v2521_v60  ;;  %v7739_v42 = vld [vmem:[#allocation7 + $0x1a0] sm:$0xff]  ;;  %v7787_v37 = vld [vmem:[#allocation7 + $0x150] sm:$0xff]  ;;  %v7802_v60 = vld [vmem:[#allocation7 + $0x138] sm:$0xff] }
 0x4dc   :  { %v3948_v8 = vpop.eup %3947  ;;  %v2535_v22 = vmul.f32 %v7677_v54, %v2534_v17  ;;  %v2530_v29 = vsel %vm2527_vm5, %v2529_v25, %v2525_v5  ;;  %v2552_v12 = vmul.f32 %v3946_v13, %v2515_v43  ;;  %v7799_v27 = vld [vmem:[#allocation7 + $0x130] sm:$0xff]  ;;  %v7808_v13 = vld [vmem:[#allocation7 + $0x108] sm:$0xff]  ;;  %v7814_v17 = vld [vmem:[#allocation7 + $0x118] sm:$0xff] }
 0x4dd   :  { %v2551_v62 = vmul.f32 %v2549_v34, %v2530_v29  ;;  %v2393_v3 = vmul.f32 %v3948_v8, %v2386_v15  ;;  %v7811_v25 = vld [vmem:[#allocation7 + $0x110] sm:$0xff]  ;;  %10251 = vst [vmem:[#allocation36_spill] sm:$0xff] %v7814_v17  ;;  %v7817_v7 = vld [vmem:[#allocation7 + $0xe0] sm:$0xff]  ;;  %v7820_v43 = vld [vmem:[#allocation7 + $0xe8] sm:$0xff] }
 0x4de   :  { %v2536_v2 = vadd.f32 %v7677_v54, %v2535_v22  ;;  %10252 = vst [vmem:[#allocation28_spill] sm:$0xff] %v7817_v7  ;;  %v7823_v5 = vld [vmem:[#allocation7 + $0xf0] sm:$0xff]  ;;  %v7826_v8 = vld [vmem:[#allocation7 + $0xf8] sm:$0xff]  ;;  %v7829_v22 = vld [vmem:[#allocation7 + $0xc0] sm:$0xff] }
 0x4df   :  { %v7695_v4 = vadd.f32 %v2552_v12, %v2551_v62  ;;  %2572 = vmatmul.f32.vlgmr.msra.gmra.mxu0 %v2393_v3  ;;  %2592 = vmatmul.f32.vlgmr.msra.gmra.mxu1 %v2393_v3  ;;  %v3594_v59 = vrot.slane %v2393_v3, 4  ;;  %10253 = vst [vmem:[#allocation39_spill] sm:$0xff] %v7820_v43  ;;  %v7832_v29 = vld [vmem:[#allocation7 + $0xc8] sm:$0xff]  ;;  %v7835_v12 = vld [vmem:[#allocation7 + $0xd0] sm:$0xff]  ;;  %v7838_v15 = vld [vmem:[#allocation7 + $0xd8] sm:$0xff] }
 0x4e0   :  { %2612 = vmatmul.f32.vlgmr.msrb.gmra.mxu2 %v2393_v3  ;;  %2632 = vmatmul.f32.vlgmr.msrb.gmra.mxu3 %v2393_v3  ;;  %v2540_v24 = vsel %vm7720_vm10, %v7677_v54, %v2536_v2  ;;  %v7771_v54 = vld [vmem:[#allocation7 + $0x170] sm:$0xff]  ;;  %10254 = vst [vmem:[#allocation25_spill] sm:$0xff] %v7823_v5  ;;  %v7841_v62 = vld [vmem:[#allocation7 + $0xa0] sm:$0xff]  ;;  %v7844_v3 = vld [vmem:[#allocation7 + $0xa8] sm:$0xff] }
 0x4e1   :  { %3949 = vtanh.f32 %v7695_v4  ;;  %2786 = vmatpush.msra.mxu0 %v7701_v32  ;;  %2806 = vmatpush.msra.mxu1 %v7704_v30  ;;  %v7708_v1 = vsel %vm3609_vm7, %v7428_v63, %v3594_v59  ;;  %v7724_v63 = vld [vmem:[#allocation7 + $0x1c0] sm:$0xff]  ;;  %v2545_v11 = vsel %vm2542_vm11, %v2544_v41, %v2540_v24  ;;  %10255 = vst [vmem:[#allocation40_spill] sm:$0xff] %v7826_v8  ;;  %v7847_v59 = vld [vmem:[#allocation7 + $0xb0] sm:$0xff]  ;;  %v7850_v2 = vld [vmem:[#allocation7 + $0xb8] sm:$0xff] }
 0x4e2   :  { %2826 = vmatpush.msrb.mxu2 %v7712_v40  ;;  %2846 = vmatpush.msrb.mxu3 %v7715_v35  ;;  %10256 = vst [vmem:[#allocation30_spill] sm:$0xff] %v7829_v22  ;;  %v7862_v24 = vld [vmem:[#allocation7 + $0x98] sm:$0xff]  ;;  %v7865_v41 = vld [vmem:[#allocation7 + $0x60] sm:$0xff] }
 0x4e3   :  { %2787 = vmatpush.msra.mxu0 %v7724_v63  ;;  %2807 = vmatpush.msra.mxu1 %v7727_v9  ;;  %10257 = vst [vmem:[#allocation42_spill] sm:$0xff] %v7832_v29 }
 0x4e4   :  { %2827 = vmatpush.msrb.mxu2 %v7733_v31  ;;  %2847 = vmatpush.msrb.mxu3 %v7736_v48  ;;  %10258 = vst [vmem:[#allocation27_spill] sm:$0xff] %v7835_v12 }
 0x4e5   :  { %2788 = vmatpush.msra.mxu0 %v7739_v42  ;;  %2808 = vmatpush.msra.mxu1 %v7742_v45  ;;  %10259 = vst [vmem:[#allocation43_spill] sm:$0xff] %v7838_v15 }
 0x4e6   :  { %2828 = vmatpush.msrb.mxu2 %v7745_v47  ;;  %2848 = vmatpush.msrb.mxu3 %v7748_v14  ;;  %10260 = vst [vmem:[#allocation33_spill] sm:$0xff] %v7841_v62 }
 0x4e7   :  { %v3950_v34 = vpop.eup %3949  ;;  %2789 = vmatpush.msra.mxu0 %v7751_v52  ;;  %2809 = vmatpush.msra.mxu1 %v7754_v16  ;;  %10261 = vst [vmem:[#allocation45_spill] sm:$0xff] %v7844_v3 }
 0x4e8   :  { %v2555_v20 = vmul.f32 %v3950_v34, %v2545_v11  ;;  %2829 = vmatpush.msrb.mxu2 %v7757_v28  ;;  %2849 = vmatpush.msrb.mxu3 %v7760_v55  ;;  %10262 = vst [vmem:[#allocation29_spill] sm:$0xff] %v7847_v59  ;;  %v7868_v34 = vld [vmem:[#allocation7 + $0x68] sm:$0xff]  ;;  %v7871_v11 = vld [vmem:[#allocation7 + $0x70] sm:$0xff] }
 0x4e9   :  { %2790 = vmatpush.msra.mxu0 %v7763_v49  ;;  %2810 = vmatpush.msra.mxu1 %v7766_v58  ;;  %10263 = vst [vmem:[#allocation46_spill] sm:$0xff] %v7850_v2 }
 0x4ea   :  { %v7769_v57 = vrot.slane %v2555_v20, 5  ;;  %2830 = vmatpush.msrb.mxu2 %v7771_v54  ;;  %2850 = vmatpush.msrb.mxu3 %v7774_v56  ;;  %10267 = vst [vmem:[#allocation49_spill] sm:$0xff] %v7862_v24  ;;  %v7874_v20 = vld [vmem:[#allocation7 + $0x78] sm:$0xff] }
 0x4eb   :  { %2791 = vmatpush.msra.mxu0 %v7777_v51  ;;  %2811 = vmatpush.msra.mxu1 %v7780_v6  ;;  %10268 = vst [vmem:[#allocation41_spill] sm:$0xff] %v7865_v41 }
 0x4ec   :  { %2655 = vmatmul.f32.vlgmr.msrb.gmra.mxu0 %v7769_v57  ;;  %2675 = vmatmul.f32.vlgmr.msrb.gmra.mxu1 %v7769_v57  ;;  %10269 = vst [vmem:[#allocation50_spill] sm:$0xff] %v7868_v34 }
 0x4ed   :  { %2695 = vmatmul.f32.vlgmr.msra.gmra.mxu2 %v7769_v57  ;;  %2715 = vmatmul.f32.vlgmr.msra.gmra.mxu3 %v7769_v57  ;;  %10270 = vst [vmem:[#allocation34_spill] sm:$0xff] %v7871_v11 }
 0x4ee   :  { %2831 = vmatpush.msrb.mxu2 %v7787_v37  ;;  %2851 = vmatpush.msrb.mxu3 %v7790_v36  ;;  %10271 = vst [vmem:[#allocation51_spill] sm:$0xff] %v7874_v20 }
 0x4ef   :  { %2792 = vmatpush.msra.mxu0 %v7793_v61  ;;  %2812 = vmatpush.msra.mxu1 %v7796_v53 }
 0x4f0   :  { %2832 = vmatpush.msrb.mxu2 %v7799_v27  ;;  %2852 = vmatpush.msrb.mxu3 %v7802_v60 }
 0x4f1   :  { %2793 = vmatpush.msra.mxu0 %v7805_v19  ;;  %2813 = vmatpush.msra.mxu1 %v7808_v13 }
 0x4f2   :  { %2833 = vmatpush.msrb.mxu2 %v7811_v25  ;;  %2853 = vmatpush.msrb.mxu3 %v7814_v17 }
 0x4f3   :  { %2794 = vmatpush.msra.mxu0 %v7817_v7  ;;  %2814 = vmatpush.msra.mxu1 %v7820_v43 }
 0x4f4   :  { %2834 = vmatpush.msrb.mxu2 %v7823_v5  ;;  %2854 = vmatpush.msrb.mxu3 %v7826_v8 }
 0x4f5   :  { %2795 = vmatpush.msra.mxu0 %v7829_v22  ;;  %2815 = vmatpush.msra.mxu1 %v7832_v29 }
 0x4f6   :  { %2835 = vmatpush.msrb.mxu2 %v7835_v12  ;;  %2855 = vmatpush.msrb.mxu3 %v7838_v15 }
 0x4f7   :  { %2796 = vmatpush.msra.mxu0 %v7841_v62  ;;  %2816 = vmatpush.msra.mxu1 %v7844_v3 }
 0x4f8   :  { %2836 = vmatpush.msrb.mxu2 %v7847_v59  ;;  %2856 = vmatpush.msrb.mxu3 %v7850_v2 }
 0x4f9   :  { %2797 = vmatpush.msra.mxu0 %v7853_v10  ;;  %2817 = vmatpush.msra.mxu1 %v7856_v26 }
 0x4fa   :  { %2837 = vmatpush.msrb.mxu2 %v7859_v0  ;;  %2857 = vmatpush.msrb.mxu3 %v7862_v24  ;;  %v7877_v0 = vld [vmem:[#allocation7 + $0x40] sm:$0xff]  ;;  %v7880_v24 = vld [vmem:[#allocation7 + $0x48] sm:$0xff] }
 0x4fb   :  { %2798 = vmatpush.msra.mxu0 %v7865_v41  ;;  %2818 = vmatpush.msra.mxu1 %v7868_v34  ;;  %10272 = vst [vmem:[#allocation44_spill] sm:$0xff] %v7877_v0  ;;  %v7883_v41 = vld [vmem:[#allocation7 + $0x50] sm:$0xff]  ;;  %v7886_v34 = vld [vmem:[#allocation7 + $0x58] sm:$0xff] }
 0x4fc   :  { %2838 = vmatpush.msrb.mxu2 %v7871_v11  ;;  %2858 = vmatpush.msrb.mxu3 %v7874_v20  ;;  %10273 = vst [vmem:[#allocation52_spill] sm:$0xff] %v7880_v24  ;;  %v7889_v11 = vld [vmem:[#allocation7 + $0x20] sm:$0xff]  ;;  %v7892_v20 = vld [vmem:[#allocation7 + $0x28] sm:$0xff] }
 0x4fd   :  { %2799 = vmatpush.msra.mxu0 %v7877_v0  ;;  %2819 = vmatpush.msra.mxu1 %v7880_v24  ;;  %10274 = vst [vmem:[#allocation38_spill] sm:$0xff] %v7883_v41  ;;  %v7895_v0 = vld [vmem:[#allocation7 + $0x30] sm:$0xff]  ;;  %v7898_v24 = vld [vmem:[#allocation7 + $0x38] sm:$0xff] }
 0x4fe   :  { %2839 = vmatpush.msrb.mxu2 %v7883_v41  ;;  %10275 = vst [vmem:[#allocation53_spill] sm:$0xff] %v7886_v34  ;;  %2859 = vmatpush.msrb.mxu3 %v7886_v34  ;;  %v7901_v41 = vld [vmem:[#allocation7] sm:$0xff]  ;;  %v7904_v34 = vld [vmem:[#allocation7 + $0x8] sm:$0xff] }
 0x4ff   :  { %10276 = vst [vmem:[#allocation47_spill] sm:$0xff] %v7889_v11  ;;  %2800 = vmatpush.msra.mxu0 %v7889_v11  ;;  %2820 = vmatpush.msra.mxu1 %v7892_v20  ;;  %v7907_v11 = vld [vmem:[#allocation7 + $0x10] sm:$0xff] }
 0x500   :  { %10277 = vst [vmem:[#allocation54_spill] sm:$0xff] %v7892_v20  ;;  %2840 = vmatpush.msrb.mxu2 %v7895_v0  ;;  %2860 = vmatpush.msrb.mxu3 %v7898_v24  ;;  %v7910_v20 = vld [vmem:[#allocation7 + $0x18] sm:$0xff] }
 0x501   :  { %10278 = vst [vmem:[#allocation55_spill] sm:$0xff] %v7895_v0  ;;  %2801 = vmatpush.msra.mxu0 %v7901_v41  ;;  %2821 = vmatpush.msra.mxu1 %v7904_v34 }
 0x502   :  { %10279 = vst [vmem:[#allocation56_spill] sm:$0xff] %v7898_v24  ;;  %2841 = vmatpush.msrb.mxu2 %v7907_v11  ;;  %2861 = vmatpush.msrb.mxu3 %v7910_v20  ;;  %v7929_v24 = vld [vmem:[#allocation10 + $0x1c0] sm:$0xff] }
 0x503   :  { %10280 = vst [vmem:[#allocation57_spill] sm:$0xff] %v7901_v41  ;;  %2802 = vmatmul.f32.vlgmr.msra.gmra.mxu0 %v7769_v57  ;;  %2822 = vmatmul.f32.vlgmr.msra.gmra.mxu1 %v7769_v57  ;;  %v7917_v41 = vld [vmem:[#allocation10 + $0x1e0] sm:$0xff] }
 0x504   :  { %10281 = vst [vmem:[#allocation58_spill] sm:$0xff] %v7904_v34  ;;  %2842 = vmatmul.f32.vlgmr.msrb.gmra.mxu2 %v7769_v57  ;;  %2862 = vmatmul.f32.vlgmr.msrb.gmra.mxu3 %v7769_v57  ;;  %v7920_v34 = vld [vmem:[#allocation10 + $0x1e8] sm:$0xff] }
 0x505   :  { %10282 = vst [vmem:[#allocation59_spill] sm:$0xff] %v7907_v11  ;;  %2948 = vmatpush.msrb.mxu0 %v7917_v41  ;;  %2968 = vmatpush.msrb.mxu1 %v7920_v34  ;;  %v7923_v11 = vld [vmem:[#allocation10 + $0x1f0] sm:$0xff]  ;;  %v7932_v57 = vld [vmem:[#allocation10 + $0x1c8] sm:$0xff] }
 0x506   :  { %10283 = vst [vmem:[#allocation60_spill] sm:$0xff] %v7910_v20  ;;  %2988 = vmatpush.msra.mxu2 %v7923_v11  ;;  %v7926_v20 = vld [vmem:[#allocation10 + $0x1f8] sm:$0xff] }
 0x507   :  { %10284 = vst [vmem:[#allocation61_spill] sm:$0xff] %v7917_v41  ;;  %3008 = vmatpush.msra.mxu3 %v7926_v20  ;;  %2949 = vmatpush.msrb.mxu0 %v7929_v24  ;;  %v7935_v41 = vld [vmem:[#allocation10 + $0x1d0] sm:$0xff] }
 0x508   :  { %10285 = vst [vmem:[#allocation62_spill] sm:$0xff] %v7920_v34  ;;  %2969 = vmatpush.msrb.mxu1 %v7932_v57  ;;  %2989 = vmatpush.msra.mxu2 %v7935_v41  ;;  %v7938_v34 = vld [vmem:[#allocation10 + $0x1d8] sm:$0xff] }
 0x509   :  { %10286 = vst [vmem:[#allocation63_spill] sm:$0xff] %v7923_v11  ;;  %3009 = vmatpush.msra.mxu3 %v7938_v34  ;;  %v7941_v11 = vld [vmem:[#allocation10 + $0x1a0] sm:$0xff] }
 0x50a   :  { %10287 = vst [vmem:[#allocation64_spill] sm:$0xff] %v7926_v20  ;;  %2950 = vmatpush.msrb.mxu0 %v7941_v11  ;;  %v7944_v20 = vld [vmem:[#allocation10 + $0x1a8] sm:$0xff] }
 0x50b   :  { %10288 = vst [vmem:[#allocation65_spill] sm:$0xff] %v7929_v24  ;;  %2970 = vmatpush.msrb.mxu1 %v7944_v20  ;;  %v7947_v24 = vld [vmem:[#allocation10 + $0x1b0] sm:$0xff] }
 0x50c   :  { %10289 = vst [vmem:[#allocation66_spill] sm:$0xff] %v7932_v57  ;;  %2990 = vmatpush.msra.mxu2 %v7947_v24  ;;  %v7950_v57 = vld [vmem:[#allocation10 + $0x1b8] sm:$0xff] }
 0x50d   :  { %10290 = vst [vmem:[#allocation67_spill] sm:$0xff] %v7935_v41  ;;  %3010 = vmatpush.msra.mxu3 %v7950_v57  ;;  %v7953_v41 = vld [vmem:[#allocation10 + $0x180] sm:$0xff] }
 0x50e   :  { %10291 = vst [vmem:[#allocation68_spill] sm:$0xff] %v7938_v34  ;;  %2951 = vmatpush.msrb.mxu0 %v7953_v41  ;;  %v7956_v34 = vld [vmem:[#allocation10 + $0x188] sm:$0xff] }
 0x50f   :  { %10292 = vst [vmem:[#allocation69_spill] sm:$0xff] %v7941_v11  ;;  %2971 = vmatpush.msrb.mxu1 %v7956_v34  ;;  %v7959_v11 = vld [vmem:[#allocation10 + $0x190] sm:$0xff] }
 0x510   :  { %10293 = vst [vmem:[#allocation70_spill] sm:$0xff] %v7944_v20  ;;  %2991 = vmatpush.msra.mxu2 %v7959_v11  ;;  %v7962_v20 = vld [vmem:[#allocation10 + $0x198] sm:$0xff] }
 0x511   :  { %10294 = vst [vmem:[#allocation71_spill] sm:$0xff] %v7947_v24  ;;  %3011 = vmatpush.msra.mxu3 %v7962_v20  ;;  %v7965_v24 = vld [vmem:[#allocation10 + $0x160] sm:$0xff] }
 0x512   :  { %10295 = vst [vmem:[#allocation72_spill] sm:$0xff] %v7950_v57  ;;  %2952 = vmatpush.msrb.mxu0 %v7965_v24  ;;  %v7968_v57 = vld [vmem:[#allocation10 + $0x168] sm:$0xff] }
 0x513   :  { %10296 = vst [vmem:[#allocation73_spill] sm:$0xff] %v7953_v41  ;;  %2972 = vmatpush.msrb.mxu1 %v7968_v57  ;;  %v7971_v41 = vld [vmem:[#allocation10 + $0x170] sm:$0xff] }
 0x514   :  { %10297 = vst [vmem:[#allocation74_spill] sm:$0xff] %v7956_v34  ;;  %2992 = vmatpush.msra.mxu2 %v7971_v41  ;;  %v7974_v34 = vld [vmem:[#allocation10 + $0x178] sm:$0xff] }
 0x515   :  { %10298 = vst [vmem:[#allocation75_spill] sm:$0xff] %v7959_v11  ;;  %3012 = vmatpush.msra.mxu3 %v7974_v34  ;;  %v7977_v11 = vld [vmem:[#allocation10 + $0x140] sm:$0xff] }
 0x516   :  { %10299 = vst [vmem:[#allocation76_spill] sm:$0xff] %v7962_v20  ;;  %2953 = vmatpush.msrb.mxu0 %v7977_v11  ;;  %v7980_v20 = vld [vmem:[#allocation10 + $0x148] sm:$0xff] }
 0x517   :  { %10300 = vst [vmem:[#allocation77_spill] sm:$0xff] %v7965_v24  ;;  %2973 = vmatpush.msrb.mxu1 %v7980_v20  ;;  %v7983_v24 = vld [vmem:[#allocation10 + $0x150] sm:$0xff] }
 0x518   :  { %10301 = vst [vmem:[#allocation78_spill] sm:$0xff] %v7968_v57  ;;  %2993 = vmatpush.msra.mxu2 %v7983_v24  ;;  %v7986_v57 = vld [vmem:[#allocation10 + $0x158] sm:$0xff] }
 0x519   :  { %10302 = vst [vmem:[#allocation79_spill] sm:$0xff] %v7971_v41  ;;  %3013 = vmatpush.msra.mxu3 %v7986_v57  ;;  %v7989_v41 = vld [vmem:[#allocation10 + $0x120] sm:$0xff] }
 0x51a   :  { %10303 = vst [vmem:[#allocation80_spill] sm:$0xff] %v7974_v34  ;;  %2954 = vmatpush.msrb.mxu0 %v7989_v41  ;;  %v7992_v34 = vld [vmem:[#allocation10 + $0x128] sm:$0xff] }
 0x51b   :  { %10304 = vst [vmem:[#allocation81_spill] sm:$0xff] %v7977_v11  ;;  %2974 = vmatpush.msrb.mxu1 %v7992_v34  ;;  %v7995_v11 = vld [vmem:[#allocation10 + $0x130] sm:$0xff] }
 0x51c   :  { %10305 = vst [vmem:[#allocation82_spill] sm:$0xff] %v7980_v20  ;;  %2994 = vmatpush.msra.mxu2 %v7995_v11  ;;  %v7998_v20 = vld [vmem:[#allocation10 + $0x138] sm:$0xff] }
 0x51d   :  { %10306 = vst [vmem:[#allocation83_spill] sm:$0xff] %v7983_v24  ;;  %3014 = vmatpush.msra.mxu3 %v7998_v20  ;;  %v8001_v24 = vld [vmem:[#allocation10 + $0x100] sm:$0xff] }
 0x51e   :  { %10307 = vst [vmem:[#allocation84_spill] sm:$0xff] %v7986_v57  ;;  %2955 = vmatpush.msrb.mxu0 %v8001_v24  ;;  %v8004_v57 = vld [vmem:[#allocation10 + $0x108] sm:$0xff] }
 0x51f   :  { %10308 = vst [vmem:[#allocation85_spill] sm:$0xff] %v7989_v41  ;;  %2975 = vmatpush.msrb.mxu1 %v8004_v57  ;;  %v8007_v41 = vld [vmem:[#allocation10 + $0x110] sm:$0xff] }
 0x520   :  { %10309 = vst [vmem:[#allocation86_spill] sm:$0xff] %v7992_v34  ;;  %2995 = vmatpush.msra.mxu2 %v8007_v41  ;;  %v8010_v34 = vld [vmem:[#allocation10 + $0x118] sm:$0xff] }
 0x521   :  { %10310 = vst [vmem:[#allocation87_spill] sm:$0xff] %v7995_v11  ;;  %3015 = vmatpush.msra.mxu3 %v8010_v34  ;;  %v8013_v11 = vld [vmem:[#allocation10 + $0xe0] sm:$0xff] }
 0x522   :  { %10311 = vst [vmem:[#allocation88_spill] sm:$0xff] %v7998_v20  ;;  %2956 = vmatpush.msrb.mxu0 %v8013_v11  ;;  %v8016_v20 = vld [vmem:[#allocation10 + $0xe8] sm:$0xff] }
 0x523   :  { %10312 = vst [vmem:[#allocation89_spill] sm:$0xff] %v8001_v24  ;;  %2976 = vmatpush.msrb.mxu1 %v8016_v20  ;;  %v8019_v24 = vld [vmem:[#allocation10 + $0xf0] sm:$0xff] }
 0x524   :  { %10313 = vst [vmem:[#allocation90_spill] sm:$0xff] %v8004_v57  ;;  %2996 = vmatpush.msra.mxu2 %v8019_v24  ;;  %v8022_v57 = vld [vmem:[#allocation10 + $0xf8] sm:$0xff] }
 0x525   :  { %10314 = vst [vmem:[#allocation91_spill] sm:$0xff] %v8007_v41  ;;  %3016 = vmatpush.msra.mxu3 %v8022_v57  ;;  %v8025_v41 = vld [vmem:[#allocation10 + $0xc0] sm:$0xff] }
 0x526   :  { %10315 = vst [vmem:[#allocation92_spill] sm:$0xff] %v8010_v34  ;;  %2957 = vmatpush.msrb.mxu0 %v8025_v41  ;;  %v8028_v34 = vld [vmem:[#allocation10 + $0xc8] sm:$0xff] }
 0x527   :  { %10316 = vst [vmem:[#allocation93_spill] sm:$0xff] %v8013_v11  ;;  %2977 = vmatpush.msrb.mxu1 %v8028_v34  ;;  %v8031_v11 = vld [vmem:[#allocation10 + $0xd0] sm:$0xff] }
 0x528   :  { %10317 = vst [vmem:[#allocation94_spill] sm:$0xff] %v8016_v20  ;;  %2997 = vmatpush.msra.mxu2 %v8031_v11  ;;  %v8034_v20 = vld [vmem:[#allocation10 + $0xd8] sm:$0xff] }
 0x529   :  { %10318 = vst [vmem:[#allocation95_spill] sm:$0xff] %v8019_v24  ;;  %3017 = vmatpush.msra.mxu3 %v8034_v20  ;;  %v8037_v24 = vld [vmem:[#allocation10 + $0xa0] sm:$0xff] }
 0x52a   :  { %10319 = vst [vmem:[#allocation96_spill] sm:$0xff] %v8022_v57  ;;  %2958 = vmatpush.msrb.mxu0 %v8037_v24  ;;  %v8040_v57 = vld [vmem:[#allocation10 + $0xa8] sm:$0xff] }
 0x52b   :  { %10320 = vst [vmem:[#allocation97_spill] sm:$0xff] %v8025_v41  ;;  %2978 = vmatpush.msrb.mxu1 %v8040_v57  ;;  %v8043_v41 = vld [vmem:[#allocation10 + $0xb0] sm:$0xff] }
 0x52c   :  { %10321 = vst [vmem:[#allocation98_spill] sm:$0xff] %v8028_v34  ;;  %2998 = vmatpush.msra.mxu2 %v8043_v41  ;;  %v8046_v34 = vld [vmem:[#allocation10 + $0xb8] sm:$0xff] }
 0x52d   :  { %10322 = vst [vmem:[#allocation99_spill] sm:$0xff] %v8031_v11  ;;  %3018 = vmatpush.msra.mxu3 %v8046_v34  ;;  %v8049_v11 = vld [vmem:[#allocation10 + $0x80] sm:$0xff] }
 0x52e   :  { %10323 = vst [vmem:[#allocation100_spill] sm:$0xff] %v8034_v20  ;;  %2959 = vmatpush.msrb.mxu0 %v8049_v11  ;;  %v8052_v20 = vld [vmem:[#allocation10 + $0x88] sm:$0xff] }
 0x52f   :  { %10324 = vst [vmem:[#allocation101_spill] sm:$0xff] %v8037_v24  ;;  %2979 = vmatpush.msrb.mxu1 %v8052_v20  ;;  %v8055_v24 = vld [vmem:[#allocation10 + $0x90] sm:$0xff] }
 0x530   :  { %10325 = vst [vmem:[#allocation102_spill] sm:$0xff] %v8040_v57  ;;  %2999 = vmatpush.msra.mxu2 %v8055_v24  ;;  %v8058_v57 = vld [vmem:[#allocation10 + $0x98] sm:$0xff] }
 0x531   :  { %10326 = vst [vmem:[#allocation103_spill] sm:$0xff] %v8043_v41  ;;  %3019 = vmatpush.msra.mxu3 %v8058_v57  ;;  %v8061_v41 = vld [vmem:[#allocation10 + $0x60] sm:$0xff] }
 0x532   :  { %10327 = vst [vmem:[#allocation104_spill] sm:$0xff] %v8046_v34  ;;  %2960 = vmatpush.msrb.mxu0 %v8061_v41  ;;  %v8064_v34 = vld [vmem:[#allocation10 + $0x68] sm:$0xff] }
 0x533   :  { %10328 = vst [vmem:[#allocation105_spill] sm:$0xff] %v8049_v11  ;;  %2980 = vmatpush.msrb.mxu1 %v8064_v34  ;;  %v8067_v11 = vld [vmem:[#allocation10 + $0x70] sm:$0xff] }
 0x534   :  { %10329 = vst [vmem:[#allocation106_spill] sm:$0xff] %v8052_v20  ;;  %3000 = vmatpush.msra.mxu2 %v8067_v11  ;;  %v8070_v20 = vld [vmem:[#allocation10 + $0x78] sm:$0xff] }
 0x535   :  { %10330 = vst [vmem:[#allocation107_spill] sm:$0xff] %v8055_v24  ;;  %3020 = vmatpush.msra.mxu3 %v8070_v20  ;;  %v8073_v24 = vld [vmem:[#allocation10 + $0x40] sm:$0xff] }
 0x536   :  { %10331 = vst [vmem:[#allocation108_spill] sm:$0xff] %v8058_v57  ;;  %2961 = vmatpush.msrb.mxu0 %v8073_v24  ;;  %v8076_v57 = vld [vmem:[#allocation10 + $0x48] sm:$0xff] }
 0x537   :  { %10332 = vst [vmem:[#allocation109_spill] sm:$0xff] %v8061_v41  ;;  %2981 = vmatpush.msrb.mxu1 %v8076_v57  ;;  %v8079_v41 = vld [vmem:[#allocation10 + $0x50] sm:$0xff] }
 0x538   :  { %10333 = vst [vmem:[#allocation110_spill] sm:$0xff] %v8064_v34  ;;  %3001 = vmatpush.msra.mxu2 %v8079_v41  ;;  %v8082_v34 = vld [vmem:[#allocation10 + $0x58] sm:$0xff] }
 0x539   :  { %10334 = vst [vmem:[#allocation111_spill] sm:$0xff] %v8067_v11  ;;  %3021 = vmatpush.msra.mxu3 %v8082_v34  ;;  %v8085_v11 = vld [vmem:[#allocation10 + $0x20] sm:$0xff] }
 0x53a   :  { %10335 = vst [vmem:[#allocation112_spill] sm:$0xff] %v8070_v20  ;;  %2962 = vmatpush.msrb.mxu0 %v8085_v11  ;;  %v8088_v20 = vld [vmem:[#allocation10 + $0x28] sm:$0xff] }
 0x53b   :  { %10336 = vst [vmem:[#allocation113_spill] sm:$0xff] %v8073_v24  ;;  %2982 = vmatpush.msrb.mxu1 %v8088_v20  ;;  %v8091_v24 = vld [vmem:[#allocation10 + $0x30] sm:$0xff] }
 0x53c   :  { %10337 = vst [vmem:[#allocation114_spill] sm:$0xff] %v8076_v57  ;;  %3002 = vmatpush.msra.mxu2 %v8091_v24  ;;  %v8094_v57 = vld [vmem:[#allocation10 + $0x38] sm:$0xff] }
 0x53d   :  { %10338 = vst [vmem:[#allocation115_spill] sm:$0xff] %v8079_v41  ;;  %3022 = vmatpush.msra.mxu3 %v8094_v57  ;;  %v8097_v41 = vld [vmem:[#allocation10] sm:$0xff] }
 0x53e   :  { %10339 = vst [vmem:[#allocation116_spill] sm:$0xff] %v8082_v34  ;;  %2963 = vmatpush.msrb.mxu0 %v8097_v41  ;;  %v8100_v34 = vld [vmem:[#allocation10 + $0x8] sm:$0xff] }
 0x53f   :  { %10340 = vst [vmem:[#allocation117_spill] sm:$0xff] %v8085_v11  ;;  %2983 = vmatpush.msrb.mxu1 %v8100_v34  ;;  %v8103_v11 = vld [vmem:[#allocation10 + $0x10] sm:$0xff] }
 0x540   :  { %10341 = vst [vmem:[#allocation118_spill] sm:$0xff] %v8088_v20  ;;  %3003 = vmatpush.msra.mxu2 %v8103_v11  ;;  %v8106_v20 = vld [vmem:[#allocation10 + $0x18] sm:$0xff] }
 0x541   :  { %10342 = vst [vmem:[#allocation119_spill] sm:$0xff] %v8091_v24  ;;  %3023 = vmatpush.msra.mxu3 %v8106_v20  ;;  %v8109_v24 = vld [vmem:[#allocation8 + $0x1e0] sm:$0xff] }
 0x542   :  { %10343 = vst [vmem:[#allocation120_spill] sm:$0xff] %v8094_v57  ;;  %3031 = vmatpush.msra.mxu0 %v8109_v24  ;;  %v8112_v57 = vld [vmem:[#allocation8 + $0x1e8] sm:$0xff] }
 0x543   :  { %10344 = vst [vmem:[#allocation121_spill] sm:$0xff] %v8097_v41  ;;  %3051 = vmatpush.msra.mxu1 %v8112_v57  ;;  %v8115_v41 = vld [vmem:[#allocation8 + $0x1f0] sm:$0xff] }
 0x544   :  { %10345 = vst [vmem:[#allocation122_spill] sm:$0xff] %v8100_v34  ;;  %3071 = vmatpush.msrb.mxu2 %v8115_v41  ;;  %v8118_v34 = vld [vmem:[#allocation8 + $0x1f8] sm:$0xff] }
 0x545   :  { %10346 = vst [vmem:[#allocation123_spill] sm:$0xff] %v8103_v11  ;;  %3091 = vmatpush.msrb.mxu3 %v8118_v34  ;;  %v8121_v11 = vld [vmem:[#allocation8 + $0x1c0] sm:$0xff] }
 0x546   :  { %10347 = vst [vmem:[#allocation124_spill] sm:$0xff] %v8106_v20  ;;  %3032 = vmatpush.msra.mxu0 %v8121_v11  ;;  %v8124_v20 = vld [vmem:[#allocation8 + $0x1c8] sm:$0xff] }
 0x547   :  { %10348 = vst [vmem:[#allocation125_spill] sm:$0xff] %v8109_v24  ;;  %3052 = vmatpush.msra.mxu1 %v8124_v20  ;;  %v8127_v24 = vld [vmem:[#allocation8 + $0x1d0] sm:$0xff] }
 0x548   :  { %10349 = vst [vmem:[#allocation126_spill] sm:$0xff] %v8112_v57  ;;  %3072 = vmatpush.msrb.mxu2 %v8127_v24  ;;  %v8130_v57 = vld [vmem:[#allocation8 + $0x1d8] sm:$0xff] }
 0x549   :  { %10350 = vst [vmem:[#allocation127_spill] sm:$0xff] %v8115_v41  ;;  %3092 = vmatpush.msrb.mxu3 %v8130_v57  ;;  %v8133_v41 = vld [vmem:[#allocation8 + $0x1a0] sm:$0xff] }
 0x54a   :  { %10351 = vst [vmem:[#allocation128_spill] sm:$0xff] %v8118_v34  ;;  %3033 = vmatpush.msra.mxu0 %v8133_v41  ;;  %v8136_v34 = vld [vmem:[#allocation8 + $0x1a8] sm:$0xff] }
 0x54b   :  { %10352 = vst [vmem:[#allocation129_spill] sm:$0xff] %v8121_v11  ;;  %3053 = vmatpush.msra.mxu1 %v8136_v34  ;;  %v8139_v11 = vld [vmem:[#allocation8 + $0x1b0] sm:$0xff] }
 0x54c   :  { %10353 = vst [vmem:[#allocation130_spill] sm:$0xff] %v8124_v20  ;;  %3073 = vmatpush.msrb.mxu2 %v8139_v11  ;;  %v8142_v20 = vld [vmem:[#allocation8 + $0x1b8] sm:$0xff] }
 0x54d   :  { %10354 = vst [vmem:[#allocation131_spill] sm:$0xff] %v8127_v24  ;;  %3093 = vmatpush.msrb.mxu3 %v8142_v20  ;;  %v8145_v24 = vld [vmem:[#allocation8 + $0x180] sm:$0xff] }
 0x54e   :  { %10355 = vst [vmem:[#allocation132_spill] sm:$0xff] %v8130_v57  ;;  %3034 = vmatpush.msra.mxu0 %v8145_v24  ;;  %v8148_v57 = vld [vmem:[#allocation8 + $0x188] sm:$0xff] }
 0x54f   :  { %10356 = vst [vmem:[#allocation133_spill] sm:$0xff] %v8133_v41  ;;  %3054 = vmatpush.msra.mxu1 %v8148_v57  ;;  %v8151_v41 = vld [vmem:[#allocation8 + $0x190] sm:$0xff] }
 0x550   :  { %10357 = vst [vmem:[#allocation134_spill] sm:$0xff] %v8136_v34  ;;  %3074 = vmatpush.msrb.mxu2 %v8151_v41  ;;  %v8154_v34 = vld [vmem:[#allocation8 + $0x198] sm:$0xff] }
 0x551   :  { %10358 = vst [vmem:[#allocation135_spill] sm:$0xff] %v8139_v11  ;;  %3094 = vmatpush.msrb.mxu3 %v8154_v34  ;;  %v8157_v11 = vld [vmem:[#allocation8 + $0x160] sm:$0xff] }
 0x552   :  { %10359 = vst [vmem:[#allocation136_spill] sm:$0xff] %v8142_v20  ;;  %3035 = vmatpush.msra.mxu0 %v8157_v11  ;;  %v8160_v20 = vld [vmem:[#allocation8 + $0x168] sm:$0xff] }
 0x553   :  { %10360 = vst [vmem:[#allocation137_spill] sm:$0xff] %v8145_v24  ;;  %3055 = vmatpush.msra.mxu1 %v8160_v20  ;;  %v8163_v24 = vld [vmem:[#allocation8 + $0x170] sm:$0xff] }
 0x554   :  { %10361 = vst [vmem:[#allocation138_spill] sm:$0xff] %v8148_v57  ;;  %3075 = vmatpush.msrb.mxu2 %v8163_v24  ;;  %v8166_v57 = vld [vmem:[#allocation8 + $0x178] sm:$0xff] }
 0x555   :  { %10362 = vst [vmem:[#allocation139_spill] sm:$0xff] %v8151_v41  ;;  %3095 = vmatpush.msrb.mxu3 %v8166_v57  ;;  %v8169_v41 = vld [vmem:[#allocation8 + $0x140] sm:$0xff] }
 0x556   :  { %10363 = vst [vmem:[#allocation140_spill] sm:$0xff] %v8154_v34  ;;  %3036 = vmatpush.msra.mxu0 %v8169_v41  ;;  %v8172_v34 = vld [vmem:[#allocation8 + $0x148] sm:$0xff] }
 0x557   :  { %10364 = vst [vmem:[#allocation141_spill] sm:$0xff] %v8157_v11  ;;  %3056 = vmatpush.msra.mxu1 %v8172_v34  ;;  %v8175_v11 = vld [vmem:[#allocation8 + $0x150] sm:$0xff] }
 0x558   :  { %10365 = vst [vmem:[#allocation142_spill] sm:$0xff] %v8160_v20  ;;  %3076 = vmatpush.msrb.mxu2 %v8175_v11  ;;  %v8178_v20 = vld [vmem:[#allocation8 + $0x158] sm:$0xff] }
 0x559   :  { %10366 = vst [vmem:[#allocation143_spill] sm:$0xff] %v8163_v24  ;;  %3096 = vmatpush.msrb.mxu3 %v8178_v20  ;;  %v8181_v24 = vld [vmem:[#allocation8 + $0x120] sm:$0xff] }
 0x55a   :  { %10367 = vst [vmem:[#allocation144_spill] sm:$0xff] %v8166_v57  ;;  %3037 = vmatpush.msra.mxu0 %v8181_v24  ;;  %v8184_v57 = vld [vmem:[#allocation8 + $0x128] sm:$0xff] }
 0x55b   :  { %10368 = vst [vmem:[#allocation145_spill] sm:$0xff] %v8169_v41  ;;  %3057 = vmatpush.msra.mxu1 %v8184_v57  ;;  %v8187_v41 = vld [vmem:[#allocation8 + $0x130] sm:$0xff] }
 0x55c   :  { %10369 = vst [vmem:[#allocation146_spill] sm:$0xff] %v8172_v34  ;;  %3077 = vmatpush.msrb.mxu2 %v8187_v41  ;;  %v8190_v34 = vld [vmem:[#allocation8 + $0x138] sm:$0xff]  ;;  %v2593_v0 = vpop.f32.mrf.mxu1 }
 0x55d   :  { %10370 = vst [vmem:[#allocation147_spill] sm:$0xff] %v8175_v11  ;;  %3097 = vmatpush.msrb.mxu3 %v8190_v34  ;;  %v8193_v11 = vld [vmem:[#allocation8 + $0x100] sm:$0xff] }
 0x55e   :  { %10371 = vst [vmem:[#allocation148_spill] sm:$0xff] %v8178_v20  ;;  %3038 = vmatpush.msra.mxu0 %v8193_v11  ;;  %v8196_v20 = vld [vmem:[#allocation8 + $0x108] sm:$0xff] }
 0x55f   :  { %10372 = vst [vmem:[#allocation149_spill] sm:$0xff] %v8181_v24  ;;  %3058 = vmatpush.msra.mxu1 %v8196_v20  ;;  %v8199_v24 = vld [vmem:[#allocation8 + $0x110] sm:$0xff] }
 0x560   :  { %10373 = vst [vmem:[#allocation151_spill] sm:$0xff] %v8184_v57  ;;  %3078 = vmatpush.msrb.mxu2 %v8199_v24  ;;  %v8202_v57 = vld [vmem:[#allocation8 + $0x118] sm:$0xff] }
 0x561   :  { %10374 = vst [vmem:[#allocation152_spill] sm:$0xff] %v8187_v41  ;;  %3098 = vmatpush.msrb.mxu3 %v8202_v57  ;;  %v8205_v41 = vld [vmem:[#allocation8 + $0xe0] sm:$0xff] }
 0x562   :  { %10375 = vst [vmem:[#allocation153_spill] sm:$0xff] %v8190_v34  ;;  %3039 = vmatpush.msra.mxu0 %v8205_v41  ;;  %v8208_v34 = vld [vmem:[#allocation8 + $0xe8] sm:$0xff] }
 0x563   :  { %10376 = vst [vmem:[#allocation154_spill] sm:$0xff] %v8193_v11  ;;  %3059 = vmatpush.msra.mxu1 %v8208_v34  ;;  %v8211_v11 = vld [vmem:[#allocation8 + $0xf0] sm:$0xff]  ;;  %v2613_v26 = vpop.f32.mrf.mxu2  ;;  %v2633_v15 = vpop.f32.mrf.mxu3 }
 0x564   :  { %10377 = vst [vmem:[#allocation155_spill] sm:$0xff] %v8196_v20  ;;  %3079 = vmatpush.msrb.mxu2 %v8211_v11  ;;  %v8214_v20 = vld [vmem:[#allocation8 + $0xf8] sm:$0xff] }
 0x565   :  { %10378 = vst [vmem:[#allocation156_spill] sm:$0xff] %v8199_v24  ;;  %3099 = vmatpush.msrb.mxu3 %v8214_v20  ;;  %v8217_v24 = vld [vmem:[#allocation8 + $0xc0] sm:$0xff] }
 0x566   :  { %10379 = vst [vmem:[#allocation157_spill] sm:$0xff] %v8202_v57  ;;  %3040 = vmatpush.msra.mxu0 %v8217_v24  ;;  %v8220_v57 = vld [vmem:[#allocation8 + $0xc8] sm:$0xff] }
 0x567   :  { %10380 = vst [vmem:[#allocation158_spill] sm:$0xff] %v8205_v41  ;;  %3060 = vmatpush.msra.mxu1 %v8220_v57  ;;  %v8223_v41 = vld [vmem:[#allocation8 + $0xd0] sm:$0xff] }
 0x568   :  { %10381 = vst [vmem:[#allocation159_spill] sm:$0xff] %v8208_v34  ;;  %3080 = vmatpush.msrb.mxu2 %v8223_v41  ;;  %v8226_v34 = vld [vmem:[#allocation8 + $0xd8] sm:$0xff] }
 0x569   :  { %10382 = vst [vmem:[#allocation160_spill] sm:$0xff] %v8211_v11  ;;  %3100 = vmatpush.msrb.mxu3 %v8226_v34  ;;  %v8229_v11 = vld [vmem:[#allocation8 + $0xa0] sm:$0xff]  ;;  %v2676_v10 = vpop.f32.mrf.mxu1 }
 0x56a   :  { %10383 = vst [vmem:[#allocation162_spill] sm:$0xff] %v8214_v20  ;;  %3041 = vmatpush.msra.mxu0 %v8229_v11  ;;  %v8232_v20 = vld [vmem:[#allocation8 + $0xa8] sm:$0xff]  ;;  %v2677_v59 = vadd.f32 %v2676_v10, %v2593_v0 }
 0x56b   :  { %10384 = vst [vmem:[#allocation163_spill] sm:$0xff] %v8217_v24  ;;  %3061 = vmatpush.msra.mxu1 %v8232_v20  ;;  %v8235_v24 = vld [vmem:[#allocation8 + $0xb0] sm:$0xff] }
 0x56c   :  { %10385 = vst [vmem:[#allocation164_spill] sm:$0xff] %v8220_v57  ;;  %3081 = vmatpush.msrb.mxu2 %v8235_v24  ;;  %v8238_v57 = vld [vmem:[#allocation8 + $0xb8] sm:$0xff]  ;;  %v2720_v3 = vadd.f32 %v2677_v59, %v10242_v50 }
 0x56d   :  { %10386 = vst [vmem:[#allocation165_spill] sm:$0xff] %v8223_v41  ;;  %3101 = vmatpush.msrb.mxu3 %v8238_v57  ;;  %v8241_v41 = vld [vmem:[#allocation8 + $0x80] sm:$0xff] }
 0x56e   :  { %10387 = vst [vmem:[#allocation166_spill] sm:$0xff] %v8226_v34  ;;  %3042 = vmatpush.msra.mxu0 %v8241_v41  ;;  %v8244_v34 = vld [vmem:[#allocation8 + $0x88] sm:$0xff]  ;;  %v3747_v62 = vmul.f32 -1.442695, %v2720_v3 }
 0x56f   :  { %10388 = vst [vmem:[#allocation167_spill] sm:$0xff] %v8229_v11  ;;  %3062 = vmatpush.msra.mxu1 %v8244_v34  ;;  %v8247_v11 = vld [vmem:[#allocation8 + $0x90] sm:$0xff] }
 0x570   :  { %10389 = vst [vmem:[#allocation168_spill] sm:$0xff] %v8232_v20  ;;  %3082 = vmatpush.msrb.mxu2 %v8247_v11  ;;  %v8250_v20 = vld [vmem:[#allocation8 + $0x98] sm:$0xff] }
 0x571   :  { %10390 = vst [vmem:[#allocation169_spill] sm:$0xff] %v8235_v24  ;;  %3102 = vmatpush.msrb.mxu3 %v8250_v20  ;;  %v8253_v24 = vld [vmem:[#allocation8 + $0x60] sm:$0xff] }
 0x572   :  { %10391 = vst [vmem:[#allocation170_spill] sm:$0xff] %v8238_v57  ;;  %3043 = vmatpush.msra.mxu0 %v8253_v24  ;;  %v8256_v57 = vld [vmem:[#allocation8 + $0x68] sm:$0xff] }
 0x573   :  { %10392 = vst [vmem:[#allocation171_spill] sm:$0xff] %v8241_v41  ;;  %3063 = vmatpush.msra.mxu1 %v8256_v57  ;;  %v8259_v41 = vld [vmem:[#allocation8 + $0x70] sm:$0xff] }
 0x574   :  { %10393 = vst [vmem:[#allocation172_spill] sm:$0xff] %v8244_v34  ;;  %3083 = vmatpush.msrb.mxu2 %v8259_v41  ;;  %v8262_v34 = vld [vmem:[#allocation8 + $0x78] sm:$0xff] }
 0x575   :  { %10394 = vst [vmem:[#allocation173_spill] sm:$0xff] %v8247_v11  ;;  %3103 = vmatpush.msrb.mxu3 %v8262_v34  ;;  %v8265_v11 = vld [vmem:[#allocation8 + $0x40] sm:$0xff] }
 0x576   :  { %10395 = vst [vmem:[#allocation174_spill] sm:$0xff] %v8250_v20  ;;  %3044 = vmatpush.msra.mxu0 %v8265_v11  ;;  %v8268_v20 = vld [vmem:[#allocation8 + $0x48] sm:$0xff] }
 0x577   :  { %10396 = vst [vmem:[#allocation175_spill] sm:$0xff] %v8253_v24  ;;  %3064 = vmatpush.msra.mxu1 %v8268_v20  ;;  %v8271_v24 = vld [vmem:[#allocation8 + $0x50] sm:$0xff] }
 0x578   :  { %10397 = vst [vmem:[#allocation176_spill] sm:$0xff] %v8256_v57  ;;  %3084 = vmatpush.msrb.mxu2 %v8271_v24  ;;  %v8274_v57 = vld [vmem:[#allocation8 + $0x58] sm:$0xff] }
 0x579   :  { %10398 = vst [vmem:[#allocation177_spill] sm:$0xff] %v8259_v41  ;;  %3104 = vmatpush.msrb.mxu3 %v8274_v57  ;;  %v8277_v41 = vld [vmem:[#allocation8 + $0x20] sm:$0xff] }
 0x57a   :  { %10399 = vst [vmem:[#allocation178_spill] sm:$0xff] %v8262_v34  ;;  %3045 = vmatpush.msra.mxu0 %v8277_v41  ;;  %v8280_v34 = vld [vmem:[#allocation8 + $0x28] sm:$0xff] }
 0x57b   :  { %10400 = vst [vmem:[#allocation179_spill] sm:$0xff] %v8265_v11  ;;  %3065 = vmatpush.msra.mxu1 %v8280_v34  ;;  %v8283_v11 = vld [vmem:[#allocation8 + $0x30] sm:$0xff] }
 0x57c   :  { %10401 = vst [vmem:[#allocation180_spill] sm:$0xff] %v8268_v20  ;;  %3085 = vmatpush.msrb.mxu2 %v8283_v11  ;;  %v8286_v20 = vld [vmem:[#allocation8 + $0x38] sm:$0xff] }
 0x57d   :  { %10402 = vst [vmem:[#allocation181_spill] sm:$0xff] %v8271_v24  ;;  %3105 = vmatpush.msrb.mxu3 %v8286_v20  ;;  %v8289_v24 = vld [vmem:[#allocation8] sm:$0xff] }
 0x57e   :  { %10403 = vst [vmem:[#allocation182_spill] sm:$0xff] %v8274_v57  ;;  %3046 = vmatpush.msra.mxu0 %v8289_v24  ;;  %v8292_v57 = vld [vmem:[#allocation8 + $0x8] sm:$0xff] }
 0x57f   :  { %10404 = vst [vmem:[#allocation183_spill] sm:$0xff] %v8277_v41  ;;  %3066 = vmatpush.msra.mxu1 %v8292_v57  ;;  %v8295_v41 = vld [vmem:[#allocation8 + $0x10] sm:$0xff] }
 0x580   :  { %10405 = vst [vmem:[#allocation184_spill] sm:$0xff] %v8280_v34  ;;  %3086 = vmatpush.msrb.mxu2 %v8295_v41  ;;  %v8298_v34 = vld [vmem:[#allocation8 + $0x18] sm:$0xff] }
 0x581   :  { %10406 = vst [vmem:[#allocation185_spill] sm:$0xff] %v8283_v11  ;;  %3106 = vmatpush.msrb.mxu3 %v8298_v34  ;;  %v2573_v11 = vpop.f32.mrf.mxu0 }
 0x582   :  { %10407 = vst [vmem:[#allocation186_spill] sm:$0xff] %v8286_v20 }
 0x583   :  { %10408 = vst [vmem:[#allocation187_spill] sm:$0xff] %v8289_v24 }
 0x584   :  { %10409 = vst [vmem:[#allocation188_spill] sm:$0xff] %v8292_v57 }
 0x585   :  { %10410 = vst [vmem:[#allocation24_spill] sm:$0xff] %v8295_v41  ;;  %v2696_v41 = vpop.f32.mrf.mxu2 }
 0x586   :  { %10411 = vst [vmem:[#allocation189_spill] sm:$0xff] %v8298_v34  ;;  %v2697_v12 = vadd.f32 %v2696_v41, %v2613_v26  ;;  %v2823_v41 = vpop.f32.mrf.mxu1 }
 0x588   :  { %v2721_v34 = vadd.f32 %v2697_v12, %v10243_v39 }
 0x589   :  { %v2656_v20 = vpop.f32.mrf.mxu0 }
 0x58a   :  { %v2657_v2 = vadd.f32 %v2656_v20, %v2573_v11  ;;  %v3748_v29 = vmul.f32 -1.442695, %v2721_v34  ;;  %v2716_v11 = vpop.f32.mrf.mxu3 }
 0x58c   :  { %v2719_v24 = vadd.f32 %v2657_v2, %v10241_v46  ;;  %v2717_v2 = vadd.f32 %v2716_v11, %v2633_v15 }
 0x58e   :  { %v3746_v57 = vmul.f32 -1.442695, %v2719_v24  ;;  %v2722_v3 = vadd.f32 %v2717_v2, %v10246_v18 }
 0x590   :  { %3951 = vpow2.f32 %v3746_v57 }
 0x591   :  { %3953 = vpow2.f32 %v3747_v62  ;;  %v2803_v12 = vpop.f32.mrf.mxu0 }
 0x592   :  { %3955 = vpow2.f32 %v3748_v29 }
 0x596   :  { %v3952_v22 = vpop.eup %3951 }
 0x597   :  { %v3954_v8 = vpop.eup %3953  ;;  %v2732_v5 = vadd.f32 1.0, %v3952_v22  ;;  %v2870_v22 = vrot.slane %v2803_v12, 2 }
 0x598   :  { %v2733_v10 = vadd.f32 1.0, %v3954_v8  ;;  %v3956_v59 = vpop.eup %3955  ;;  %v2871_v8 = vrot.slane %v2823_v41, 2 }
 0x599   :  { %3957 = vrcp.f32 %v2732_v5  ;;  %v8304_v0 = vadd.f32 1.0, %v3956_v59  ;;  %v2744_v20 = vand.u32 2147483647, %v2732_v5  ;;  %vm2740_vm12 = vweird.f32 %v2732_v5 }
 0x59a   :  { %3959 = vrcp.f32 %v2733_v10  ;;  %v2746_v15 = vand.u32 2147483648, %v2732_v5  ;;  %v2878_v11 = vadd.f32 %v2870_v22, %v10244_v44  ;;  %v2761_v59 = vand.u32 2147483648, %v2733_v10  ;;  %v2843_v22 = vpop.f32.mrf.mxu2 }
 0x59b   :  { %3961 = vrcp.f32 %v8304_v0  ;;  %v2879_v18 = vadd.f32 %v2871_v8, %v10245_v23  ;;  %v2759_v50 = vand.u32 2147483647, %v2733_v10  ;;  %vm2755_vm15 = vweird.f32 %v2733_v10 }
 0x59c   :  { %3963 = vtanh.f32 %v2722_v3  ;;  %v3749_v46 = vmul.f32 -1.442695, %v2878_v11  ;;  %vm2745_vm0 = vcmp.eq.f32.partialorder %v2744_v20, 8.507059e+37  ;;  %v2747_v41 = vor.u32 1.1754944e-38, %v2746_v15 }
 0x59d   :  { %v3750_v3 = vmul.f32 -1.442695, %v2879_v18  ;;  %v2762_v8 = vor.u32 1.1754944e-38, %v2761_v59  ;;  %v2872_v11 = vrot.slane %v2843_v22, 2  ;;  %vm2760_vm4 = vcmp.eq.f32.partialorder %v2759_v50, 8.507059e+37 }
 0x59e   :  { %3965 = vpow2.f32 %v3749_v46  ;;  %vm2770_vm6 = vweird.f32 %v8304_v0 }
 0x59f   :  { %v3958_v24 = vpop.eup %3957  ;;  %3967 = vpow2.f32 %v3750_v3 }
 0x5a0   :  { %v3960_v62 = vpop.eup %3959  ;;  %v2736_v26 = vmul.f32 %v3958_v24, %v2732_v5  ;;  %vm2741_vm13 = vweird.f32 %v3958_v24  ;;  %v2880_v5 = vadd.f32 %v2872_v11, %v5565_v21 }
 0x5a1   :  { %v2751_v34 = vmul.f32 %v3960_v62, %v2733_v10  ;;  %vm2756_vm14 = vweird.f32 %v3960_v62  ;;  %v3962_v43 = vpop.eup %3961  ;;  %vm2742_vm2 = vmor %vm2740_vm12, %vm2741_vm13 }
 0x5a2   :  { %v2737_v29 = vsub.f32 1.0, %v2736_v26  ;;  %v2766_v12 = vmul.f32 %v3962_v43, %v8304_v0  ;;  %vm2757_vm3 = vmor %vm2755_vm15, %vm2756_vm14  ;;  %v3751_v46 = vmul.f32 -1.442695, %v2880_v5  ;;  %vm2771_vm5 = vweird.f32 %v3962_v43 }
 0x5a3   :  { %v2752_v57 = vsub.f32 1.0, %v2751_v34  ;;  %vm2772_vm7 = vmor %vm2770_vm6, %vm2771_vm5 }
 0x5a4   :  { %v2738_v2 = vmul.f32 %v3958_v24, %v2737_v29  ;;  %v3964_v29 = vpop.eup %3963  ;;  %v2767_v23 = vsub.f32 1.0, %v2766_v12  ;;  %3969 = vpow2.f32 %v3751_v46 }
 0x5a5   :  { %v2753_v39 = vmul.f32 %v3960_v62, %v2752_v57  ;;  %v3966_v15 = vpop.eup %3965 }
 0x5a6   :  { %v2739_v26 = vadd.f32 %v3958_v24, %v2738_v2  ;;  %v2768_v44 = vmul.f32 %v3962_v43, %v2767_v23  ;;  %v3968_v17 = vpop.eup %3967  ;;  %v8317_v59 = vadd.f32 1.0, %v3966_v15  ;;  %v2774_v23 = vand.u32 2147483647, %v8304_v0 }
 0x5a7   :  { %v2754_v34 = vadd.f32 %v3960_v62, %v2753_v39  ;;  %v8321_v50 = vadd.f32 1.0, %v3968_v17 }
 0x5a8   :  { %v2743_v57 = vsel %vm2742_vm2, %v3958_v24, %v2739_v26  ;;  %v2769_v24 = vadd.f32 %v3962_v43, %v2768_v44  ;;  %v2863_v26 = vpop.f32.mrf.mxu3  ;;  %vm2775_vm8 = vcmp.eq.f32.partialorder %v2774_v23, 8.507059e+37  ;;  %vm2899_vm12 = vweird.f32 %v8317_v59  ;;  %v10423_v23 = vld [vmem:[#allocation29_spill] sm:$0xff] }
 0x5a9   :  { %v2748_v10 = vsel %vm2745_vm0, %v2747_v41, %v2743_v57  ;;  %v2758_v2 = vsel %vm2757_vm3, %v3960_v62, %v2754_v34  ;;  %v2776_v62 = vand.u32 2147483648, %v8304_v0  ;;  %v2920_v5 = vand.u32 2147483648, %v8321_v50 }
 0x5aa   :  { %v2763_v18 = vsel %vm2760_vm4, %v2762_v8, %v2758_v2  ;;  %v2782_v20 = vmul.f32 %v3964_v29, %v2748_v10  ;;  %v2773_v3 = vsel %vm2772_vm7, %v3962_v43, %v2769_v24  ;;  %v3970_v12 = vpop.eup %3969  ;;  %v2918_v24 = vand.u32 2147483647, %v8321_v50 }
 0x5ab   :  { %v2781_v39 = vmul.f32 %v2763_v18, %v7669_v38  ;;  %v2873_v38 = vrot.slane %v2863_v26, 2  ;;  %v2777_v44 = vor.u32 1.1754944e-38, %v2776_v62  ;;  %v8327_v34 = vadd.f32 1.0, %v3970_v12  ;;  %v10427_v12 = vld [vmem:[#allocation31_spill] sm:$0xff] }
 0x5ac   :  { %v2903_v18 = vand.u32 2147483647, %v8317_v59  ;;  %vm2914_vm13 = vweird.f32 %v8321_v50  ;;  %vm2919_vm2 = vcmp.eq.f32.partialorder %v2918_v24, 8.507059e+37  ;;  %v10445_v24 = vld [vmem:[#allocation61_spill] sm:$0xff] }
 0x5ad   :  { %v8315_v7 = vadd.f32 %v2782_v20, %v2781_v39  ;;  %v2778_v17 = vsel %vm2775_vm8, %v2777_v44, %v2773_v3  ;;  %v2881_v29 = vadd.f32 %v2873_v38, %v5618_v33  ;;  %v2905_v20 = vand.u32 2147483648, %v8317_v59  ;;  %v10424_v38 = vld [vmem:[#allocation46_spill] sm:$0xff]  ;;  %v10425_v3 = vld [vmem:[#allocation37_spill] sm:$0xff]  ;;  %v10426_v44 = vld [vmem:[#allocation48_spill] sm:$0xff] }
 0x5ae   :  { %vm2904_vm0 = vcmp.eq.f32.partialorder %v2903_v18, 8.507059e+37  ;;  %vm2929_vm4 = vweird.f32 %v8327_v34  ;;  %v10440_v18 = vld [vmem:[#allocation56_spill] sm:$0xff] }
 0x5af   :  { %3971 = vtanh.f32 %v8315_v7 }
 0x5b0   :  { %3973 = vrcp.f32 %v8317_v59 }
 0x5b1   :  { %3975 = vrcp.f32 %v8321_v50 }
 0x5b2   :  { %3977 = vrcp.f32 %v8327_v34 }
 0x5b3   :  { %3979 = vtanh.f32 %v2881_v29  ;;  %v10432_v29 = vld [vmem:[#allocation51_spill] sm:$0xff] }
 0x5b5   :  { %v3972_v41 = vpop.eup %3971 }
 0x5b6   :  { %v3974_v22 = vpop.eup %3973  ;;  %v2785_v8 = vmul.f32 %v3972_v41, %v2778_v17  ;;  %v10428_v41 = vld [vmem:[#allocation49_spill] sm:$0xff]  ;;  %v10430_v17 = vld [vmem:[#allocation50_spill] sm:$0xff] }
 0x5b7   :  { %v3976_v57 = vpop.eup %3975  ;;  %v2895_v11 = vmul.f32 %v3974_v22, %v8317_v59  ;;  %vm2900_vm10 = vweird.f32 %v3974_v22 }
 0x5b8   :  { %v2910_v0 = vmul.f32 %v3976_v57, %v8321_v50  ;;  %2964 = vmatmul.f32.vlgmr.msrb.gmra.mxu0 %v2785_v8  ;;  %2984 = vmatmul.f32.vlgmr.msrb.gmra.mxu1 %v2785_v8  ;;  %v3597_v10 = vrot.slane %v2785_v8, 3  ;;  %vm2915_vm11 = vweird.f32 %v3976_v57  ;;  %vm2901_vm14 = vmor %vm2899_vm12, %vm2900_vm10 }
 0x5b9   :  { %v2896_v43 = vsub.f32 1.0, %v2895_v11  ;;  %3004 = vmatmul.f32.vlgmr.msra.gmra.mxu2 %v2785_v8  ;;  %3024 = vmatmul.f32.vlgmr.msra.gmra.mxu3 %v2785_v8  ;;  %vm2916_vm15 = vmor %vm2914_vm13, %vm2915_vm11  ;;  %v10433_v8 = vld [vmem:[#allocation44_spill] sm:$0xff]  ;;  %v10435_v11 = vld [vmem:[#allocation38_spill] sm:$0xff] }
 0x5ba   :  { %v2911_v2 = vsub.f32 1.0, %v2910_v0  ;;  %3178 = vmatpush.msrb.mxu0 %v7701_v32  ;;  %3198 = vmatpush.msrb.mxu1 %v7704_v30  ;;  %v8342_v46 = vsel %vm3611_vm9, %v7708_v1, %v3597_v10  ;;  %v8347_v32 = vpop.eup %3977  ;;  %v10436_v0 = vld [vmem:[#allocation53_spill] sm:$0xff]  ;;  %v10438_v10 = vld [vmem:[#allocation54_spill] sm:$0xff] }
 0x5bb   :  { %v2897_v39 = vmul.f32 %v3974_v22, %v2896_v43  ;;  %3218 = vmatpush.msra.mxu2 %v7712_v40  ;;  %3238 = vmatpush.msra.mxu3 %v7715_v35  ;;  %v2925_v1 = vmul.f32 %v8347_v32, %v8327_v34  ;;  %v2906_v40 = vor.u32 1.1754944e-38, %v2905_v20  ;;  %vm2930_vm3 = vweird.f32 %v8347_v32  ;;  %v10437_v43 = vld [vmem:[#allocation47_spill] sm:$0xff]  ;;  %v10441_v20 = vld [vmem:[#allocation57_spill] sm:$0xff] }
 0x5bc   :  { %v2912_v15 = vmul.f32 %v3976_v57, %v2911_v2  ;;  %3179 = vmatpush.msrb.mxu0 %v7724_v63  ;;  %3199 = vmatpush.msrb.mxu1 %v7727_v9  ;;  %v2941_v63 = vrot.slane %v7695_v4, 7  ;;  %v2921_v9 = vor.u32 1.1754944e-38, %v2920_v5  ;;  %vm2931_vm5 = vmor %vm2929_vm4, %vm2930_vm3  ;;  %v10439_v2 = vld [vmem:[#allocation55_spill] sm:$0xff]  ;;  %v10442_v5 = vld [vmem:[#allocation58_spill] sm:$0xff] }
 0x5bd   :  { %v2898_v30 = vadd.f32 %v3974_v22, %v2897_v39  ;;  %3219 = vmatpush.msra.mxu2 %v7733_v31  ;;  %3239 = vmatpush.msra.mxu3 %v7736_v48  ;;  %v3980_v48 = vpop.eup %3979  ;;  %v2926_v59 = vsub.f32 1.0, %v2925_v1  ;;  %v10443_v39 = vld [vmem:[#allocation59_spill] sm:$0xff]  ;;  %v10448_v1 = vld [vmem:[#allocation64_spill] sm:$0xff] }
 0x5be   :  { %v2913_v35 = vadd.f32 %v3976_v57, %v2912_v15  ;;  %3180 = vmatpush.msrb.mxu0 %v7739_v42  ;;  %3200 = vmatpush.msrb.mxu1 %v7742_v45  ;;  %v10444_v15 = vld [vmem:[#allocation60_spill] sm:$0xff] }
 0x5bf   :  { %v2902_v31 = vsel %vm2901_vm14, %v3974_v22, %v2898_v30  ;;  %3220 = vmatpush.msra.mxu2 %v7745_v47  ;;  %3240 = vmatpush.msra.mxu3 %v7748_v14  ;;  %v2927_v45 = vmul.f32 %v8347_v32, %v2926_v59  ;;  %v10431_v22 = vld [vmem:[#allocation34_spill] sm:$0xff]  ;;  %v10447_v30 = vld [vmem:[#allocation63_spill] sm:$0xff] }
 0x5c0   :  { %v2907_v62 = vsel %vm2904_vm0, %v2906_v40, %v2902_v31  ;;  %v2917_v50 = vsel %vm2916_vm15, %v3976_v57, %v2913_v35  ;;  %3181 = vmatpush.msrb.mxu0 %v7751_v52  ;;  %3201 = vmatpush.msrb.mxu1 %v7754_v16  ;;  %v2935_v16 = vand.u32 2147483648, %v8327_v34  ;;  %v10434_v57 = vld [vmem:[#allocation52_spill] sm:$0xff]  ;;  %v10449_v40 = vld [vmem:[#allocation65_spill] sm:$0xff]  ;;  %v10450_v35 = vld [vmem:[#allocation66_spill] sm:$0xff] }
 0x5c1   :  { %v2922_v42 = vsel %vm2919_vm2, %v2921_v9, %v2917_v50  ;;  %v2944_v4 = vmul.f32 %v3980_v48, %v2907_v62  ;;  %3221 = vmatpush.msra.mxu2 %v7757_v28  ;;  %3241 = vmatpush.msra.mxu3 %v7760_v55  ;;  %v2928_v52 = vadd.f32 %v8347_v32, %v2927_v45  ;;  %v2933_v28 = vand.u32 2147483647, %v8327_v34  ;;  %v10429_v34 = vld [vmem:[#allocation41_spill] sm:$0xff]  ;;  %v10452_v9 = vld [vmem:[#allocation68_spill] sm:$0xff]  ;;  %v10454_v48 = vld [vmem:[#allocation70_spill] sm:$0xff] }
 0x5c2   :  { %v2943_v47 = vmul.f32 %v2941_v63, %v2922_v42  ;;  %3182 = vmatpush.msrb.mxu0 %v7763_v49  ;;  %3202 = vmatpush.msrb.mxu1 %v7766_v58  ;;  %v10412_v49 = vld [vmem:[#allocation36_spill] sm:$0xff]  ;;  %v2936_v58 = vor.u32 1.1754944e-38, %v2935_v16  ;;  %v10451_v63 = vld [vmem:[#allocation67_spill] sm:$0xff]  ;;  %v10453_v31 = vld [vmem:[#allocation69_spill] sm:$0xff] }
 0x5c3   :  { %3222 = vmatpush.msra.mxu2 %v7771_v54  ;;  %3242 = vmatpush.msra.mxu3 %v7774_v56  ;;  %v2932_v55 = vsel %vm2931_vm5, %v8347_v32, %v2928_v52  ;;  %v10413_v54 = vld [vmem:[#allocation28_spill] sm:$0xff]  ;;  %v10414_v56 = vld [vmem:[#allocation39_spill] sm:$0xff]  ;;  %vm2934_vm6 = vcmp.eq.f32.partialorder %v2933_v28, 8.507059e+37  ;;  %v10446_v32 = vld [vmem:[#allocation62_spill] sm:$0xff] }
 0x5c4   :  { %v8371_v14 = vadd.f32 %v2944_v4, %v2943_v47  ;;  %3183 = vmatpush.msrb.mxu0 %v7777_v51  ;;  %3203 = vmatpush.msrb.mxu1 %v7780_v6  ;;  %v10415_v51 = vld [vmem:[#allocation25_spill] sm:$0xff]  ;;  %v10416_v6 = vld [vmem:[#allocation40_spill] sm:$0xff]  ;;  %v10455_v59 = vld [vmem:[#allocation71_spill] sm:$0xff] }
 0x5c5   :  { %3223 = vmatpush.msra.mxu2 %v7787_v37  ;;  %3243 = vmatpush.msra.mxu3 %v7790_v36  ;;  %v2937_v36 = vsel %vm2934_vm6, %v2936_v58, %v2932_v55  ;;  %v10456_v62 = vld [vmem:[#allocation72_spill] sm:$0xff]  ;;  %v10457_v50 = vld [vmem:[#allocation73_spill] sm:$0xff]  ;;  %v10458_v42 = vld [vmem:[#allocation74_spill] sm:$0xff] }
 0x5c6   :  { %3981 = vtanh.f32 %v8371_v14  ;;  %3184 = vmatpush.msrb.mxu0 %v7793_v61  ;;  %3204 = vmatpush.msrb.mxu1 %v7796_v53  ;;  %v10417_v61 = vld [vmem:[#allocation30_spill] sm:$0xff]  ;;  %v10459_v4 = vld [vmem:[#allocation75_spill] sm:$0xff]  ;;  %v10460_v45 = vld [vmem:[#allocation76_spill] sm:$0xff] }
 0x5c7   :  { %3224 = vmatpush.msra.mxu2 %v7799_v27  ;;  %3244 = vmatpush.msra.mxu3 %v7802_v60  ;;  %v10418_v53 = vld [vmem:[#allocation42_spill] sm:$0xff]  ;;  %v10419_v60 = vld [vmem:[#allocation27_spill] sm:$0xff]  ;;  %v10461_v47 = vld [vmem:[#allocation77_spill] sm:$0xff] }
 0x5c8   :  { %3185 = vmatpush.msrb.mxu0 %v7805_v19  ;;  %3205 = vmatpush.msrb.mxu1 %v7808_v13  ;;  %v10420_v19 = vld [vmem:[#allocation43_spill] sm:$0xff]  ;;  %v10421_v13 = vld [vmem:[#allocation33_spill] sm:$0xff]  ;;  %v10462_v52 = vld [vmem:[#allocation78_spill] sm:$0xff] }
 0x5c9   :  { %3225 = vmatpush.msra.mxu2 %v7811_v25  ;;  %3245 = vmatpush.msra.mxu3 %v10412_v49  ;;  %v10422_v25 = vld [vmem:[#allocation45_spill] sm:$0xff]  ;;  %v10463_v16 = vld [vmem:[#allocation79_spill] sm:$0xff]  ;;  %v10464_v28 = vld [vmem:[#allocation80_spill] sm:$0xff] }
 0x5ca   :  { %3186 = vmatpush.msrb.mxu0 %v10413_v54  ;;  %3206 = vmatpush.msrb.mxu1 %v10414_v56  ;;  %v10465_v55 = vld [vmem:[#allocation81_spill] sm:$0xff]  ;;  %v10466_v49 = vld [vmem:[#allocation82_spill] sm:$0xff]  ;;  %v10467_v58 = vld [vmem:[#allocation83_spill] sm:$0xff] }
 0x5cb   :  { %3226 = vmatpush.msra.mxu2 %v10415_v51  ;;  %3246 = vmatpush.msra.mxu3 %v10416_v6  ;;  %v10468_v54 = vld [vmem:[#allocation84_spill] sm:$0xff]  ;;  %v10469_v56 = vld [vmem:[#allocation85_spill] sm:$0xff]  ;;  %v10470_v51 = vld [vmem:[#allocation86_spill] sm:$0xff] }
 0x5cc   :  { %v3982_v37 = vpop.eup %3981  ;;  %3187 = vmatpush.msrb.mxu0 %v10417_v61  ;;  %3207 = vmatpush.msrb.mxu1 %v10418_v53  ;;  %v10471_v6 = vld [vmem:[#allocation87_spill] sm:$0xff]  ;;  %v10474_v61 = vld [vmem:[#allocation90_spill] sm:$0xff] }
 0x5cd   :  { %v2947_v27 = vmul.f32 %v3982_v37, %v2937_v36  ;;  %3227 = vmatpush.msra.mxu2 %v10419_v60  ;;  %3247 = vmatpush.msra.mxu3 %v10420_v19  ;;  %v10472_v37 = vld [vmem:[#allocation88_spill] sm:$0xff]  ;;  %v10473_v36 = vld [vmem:[#allocation89_spill] sm:$0xff]  ;;  %v10475_v53 = vld [vmem:[#allocation91_spill] sm:$0xff] }
 0x5ce   :  { %3188 = vmatpush.msrb.mxu0 %v10421_v13  ;;  %3208 = vmatpush.msrb.mxu1 %v10422_v25  ;;  %v10477_v60 = vld [vmem:[#allocation93_spill] sm:$0xff]  ;;  %v10478_v19 = vld [vmem:[#allocation94_spill] sm:$0xff]  ;;  %v10479_v13 = vld [vmem:[#allocation95_spill] sm:$0xff] }
 0x5cf   :  { %v3029_v26 = vrot.slane %v2947_v27, 6  ;;  %3228 = vmatpush.msra.mxu2 %v10423_v23  ;;  %3248 = vmatpush.msra.mxu3 %v10424_v38  ;;  %v10476_v27 = vld [vmem:[#allocation92_spill] sm:$0xff]  ;;  %v10482_v23 = vld [vmem:[#allocation98_spill] sm:$0xff]  ;;  %v10483_v38 = vld [vmem:[#allocation99_spill] sm:$0xff] }
 0x5d0   :  { %3189 = vmatpush.msrb.mxu0 %v10425_v3  ;;  %3209 = vmatpush.msrb.mxu1 %v10426_v44  ;;  %v10480_v25 = vld [vmem:[#allocation96_spill] sm:$0xff]  ;;  %v10485_v44 = vld [vmem:[#allocation101_spill] sm:$0xff] }
 0x5d1   :  { %3229 = vmatpush.msra.mxu2 %v10427_v12  ;;  %3249 = vmatpush.msra.mxu3 %v10428_v41  ;;  %v10484_v3 = vld [vmem:[#allocation100_spill] sm:$0xff]  ;;  %v10486_v12 = vld [vmem:[#allocation102_spill] sm:$0xff]  ;;  %v10487_v41 = vld [vmem:[#allocation103_spill] sm:$0xff] }
 0x5d2   :  { %3047 = vmatmul.f32.vlgmr.msra.gmra.mxu0 %v3029_v26  ;;  %3067 = vmatmul.f32.vlgmr.msra.gmra.mxu1 %v3029_v26 }
 0x5d3   :  { %3087 = vmatmul.f32.vlgmr.msrb.gmra.mxu2 %v3029_v26  ;;  %3107 = vmatmul.f32.vlgmr.msrb.gmra.mxu3 %v3029_v26 }
 0x5d4   :  { %3190 = vmatpush.msrb.mxu0 %v10429_v34  ;;  %3210 = vmatpush.msrb.mxu1 %v10430_v17  ;;  %v10488_v34 = vld [vmem:[#allocation104_spill] sm:$0xff]  ;;  %v10489_v17 = vld [vmem:[#allocation105_spill] sm:$0xff] }
 0x5d5   :  { %3230 = vmatpush.msra.mxu2 %v10431_v22  ;;  %3250 = vmatpush.msra.mxu3 %v10432_v29  ;;  %v10490_v22 = vld [vmem:[#allocation106_spill] sm:$0xff]  ;;  %v10491_v29 = vld [vmem:[#allocation107_spill] sm:$0xff] }
 0x5d6   :  { %3191 = vmatpush.msrb.mxu0 %v10433_v8  ;;  %3211 = vmatpush.msrb.mxu1 %v10434_v57  ;;  %v10492_v8 = vld [vmem:[#allocation108_spill] sm:$0xff]  ;;  %v10493_v57 = vld [vmem:[#allocation109_spill] sm:$0xff] }
 0x5d7   :  { %3231 = vmatpush.msra.mxu2 %v10435_v11  ;;  %3251 = vmatpush.msra.mxu3 %v10436_v0  ;;  %v10494_v11 = vld [vmem:[#allocation110_spill] sm:$0xff]  ;;  %v10495_v0 = vld [vmem:[#allocation111_spill] sm:$0xff] }
 0x5d8   :  { %3192 = vmatpush.msrb.mxu0 %v10437_v43  ;;  %3212 = vmatpush.msrb.mxu1 %v10438_v10  ;;  %v10496_v43 = vld [vmem:[#allocation112_spill] sm:$0xff]  ;;  %v10497_v10 = vld [vmem:[#allocation113_spill] sm:$0xff] }
 0x5d9   :  { %3232 = vmatpush.msra.mxu2 %v10439_v2  ;;  %3252 = vmatpush.msra.mxu3 %v10440_v18  ;;  %v10498_v2 = vld [vmem:[#allocation114_spill] sm:$0xff]  ;;  %v10499_v18 = vld [vmem:[#allocation115_spill] sm:$0xff] }
 0x5da   :  { %3193 = vmatpush.msrb.mxu0 %v10441_v20  ;;  %3213 = vmatpush.msrb.mxu1 %v10442_v5  ;;  %v10500_v20 = vld [vmem:[#allocation116_spill] sm:$0xff]  ;;  %v10501_v5 = vld [vmem:[#allocation117_spill] sm:$0xff] }
 0x5db   :  { %3233 = vmatpush.msra.mxu2 %v10443_v39  ;;  %3253 = vmatpush.msra.mxu3 %v10444_v15  ;;  %v10502_v39 = vld [vmem:[#allocation118_spill] sm:$0xff]  ;;  %v10503_v15 = vld [vmem:[#allocation119_spill] sm:$0xff] }
 0x5dc   :  { %3194 = vmatmul.f32.vlgmr.msrb.gmra.mxu0 %v3029_v26  ;;  %3214 = vmatmul.f32.vlgmr.msrb.gmra.mxu1 %v3029_v26 }
 0x5dd   :  { %3234 = vmatmul.f32.vlgmr.msra.gmra.mxu2 %v3029_v26  ;;  %3254 = vmatmul.f32.vlgmr.msra.gmra.mxu3 %v3029_v26  ;;  %v10481_v26 = vld [vmem:[#allocation97_spill] sm:$0xff] }
 0x5de   :  { %3340 = vmatpush.msra.mxu0 %v10445_v24  ;;  %3360 = vmatpush.msra.mxu1 %v10446_v32  ;;  %v10504_v24 = vld [vmem:[#allocation120_spill] sm:$0xff]  ;;  %v10505_v32 = vld [vmem:[#allocation121_spill] sm:$0xff] }
 0x5df   :  { %3380 = vmatpush.msrb.mxu2 %v10447_v30  ;;  %3400 = vmatpush.msrb.mxu3 %v10448_v1  ;;  %v10506_v30 = vld [vmem:[#allocation122_spill] sm:$0xff]  ;;  %v10507_v1 = vld [vmem:[#allocation123_spill] sm:$0xff] }
 0x5e0   :  { %3341 = vmatpush.msra.mxu0 %v10449_v40  ;;  %3361 = vmatpush.msra.mxu1 %v10450_v35  ;;  %v10508_v40 = vld [vmem:[#allocation124_spill] sm:$0xff]  ;;  %v10509_v35 = vld [vmem:[#allocation125_spill] sm:$0xff] }
 0x5e1   :  { %3381 = vmatpush.msrb.mxu2 %v10451_v63  ;;  %3401 = vmatpush.msrb.mxu3 %v10452_v9  ;;  %v10510_v63 = vld [vmem:[#allocation126_spill] sm:$0xff]  ;;  %v10511_v9 = vld [vmem:[#allocation127_spill] sm:$0xff] }
 0x5e2   :  { %3342 = vmatpush.msra.mxu0 %v10453_v31  ;;  %3362 = vmatpush.msra.mxu1 %v10454_v48  ;;  %v10512_v31 = vld [vmem:[#allocation128_spill] sm:$0xff]  ;;  %v10513_v48 = vld [vmem:[#allocation129_spill] sm:$0xff] }
 0x5e3   :  { %3382 = vmatpush.msrb.mxu2 %v10455_v59  ;;  %3402 = vmatpush.msrb.mxu3 %v10456_v62  ;;  %v10514_v59 = vld [vmem:[#allocation130_spill] sm:$0xff]  ;;  %v10515_v62 = vld [vmem:[#allocation131_spill] sm:$0xff] }
 0x5e4   :  { %3343 = vmatpush.msra.mxu0 %v10457_v50  ;;  %3363 = vmatpush.msra.mxu1 %v10458_v42  ;;  %v10516_v50 = vld [vmem:[#allocation132_spill] sm:$0xff]  ;;  %v10517_v42 = vld [vmem:[#allocation133_spill] sm:$0xff] }
 0x5e5   :  { %3383 = vmatpush.msrb.mxu2 %v10459_v4  ;;  %3403 = vmatpush.msrb.mxu3 %v10460_v45  ;;  %v10518_v4 = vld [vmem:[#allocation134_spill] sm:$0xff]  ;;  %v10519_v45 = vld [vmem:[#allocation135_spill] sm:$0xff] }
 0x5e6   :  { %3344 = vmatpush.msra.mxu0 %v10461_v47  ;;  %3364 = vmatpush.msra.mxu1 %v10462_v52  ;;  %v10520_v47 = vld [vmem:[#allocation136_spill] sm:$0xff]  ;;  %v10521_v52 = vld [vmem:[#allocation137_spill] sm:$0xff] }
 0x5e7   :  { %3384 = vmatpush.msrb.mxu2 %v10463_v16  ;;  %3404 = vmatpush.msrb.mxu3 %v10464_v28  ;;  %v10522_v16 = vld [vmem:[#allocation138_spill] sm:$0xff]  ;;  %v10523_v28 = vld [vmem:[#allocation139_spill] sm:$0xff] }
 0x5e8   :  { %3345 = vmatpush.msra.mxu0 %v10465_v55  ;;  %3365 = vmatpush.msra.mxu1 %v10466_v49  ;;  %v10524_v55 = vld [vmem:[#allocation140_spill] sm:$0xff]  ;;  %v10525_v49 = vld [vmem:[#allocation141_spill] sm:$0xff] }
 0x5e9   :  { %3385 = vmatpush.msrb.mxu2 %v10467_v58  ;;  %3405 = vmatpush.msrb.mxu3 %v10468_v54  ;;  %v10526_v58 = vld [vmem:[#allocation142_spill] sm:$0xff]  ;;  %v10527_v54 = vld [vmem:[#allocation143_spill] sm:$0xff] }
 0x5ea   :  { %3346 = vmatpush.msra.mxu0 %v10469_v56  ;;  %3366 = vmatpush.msra.mxu1 %v10470_v51  ;;  %v10528_v56 = vld [vmem:[#allocation144_spill] sm:$0xff]  ;;  %v10529_v51 = vld [vmem:[#allocation145_spill] sm:$0xff] }
 0x5eb   :  { %3386 = vmatpush.msrb.mxu2 %v10471_v6  ;;  %3406 = vmatpush.msrb.mxu3 %v10472_v37  ;;  %v10530_v6 = vld [vmem:[#allocation146_spill] sm:$0xff]  ;;  %v10531_v37 = vld [vmem:[#allocation147_spill] sm:$0xff] }
 0x5ec   :  { %3347 = vmatpush.msra.mxu0 %v10473_v36  ;;  %3367 = vmatpush.msra.mxu1 %v10474_v61  ;;  %v10532_v36 = vld [vmem:[#allocation148_spill] sm:$0xff]  ;;  %v10533_v61 = vld [vmem:[#allocation149_spill] sm:$0xff] }
 0x5ed   :  { %3387 = vmatpush.msrb.mxu2 %v10475_v53  ;;  %3407 = vmatpush.msrb.mxu3 %v10476_v27  ;;  %v10534_v53 = vld [vmem:[#allocation151_spill] sm:$0xff]  ;;  %v10535_v27 = vld [vmem:[#allocation152_spill] sm:$0xff] }
 0x5ee   :  { %3348 = vmatpush.msra.mxu0 %v10477_v60  ;;  %3368 = vmatpush.msra.mxu1 %v10478_v19  ;;  %v10536_v60 = vld [vmem:[#allocation153_spill] sm:$0xff]  ;;  %v10537_v19 = vld [vmem:[#allocation154_spill] sm:$0xff] }
 0x5ef   :  { %3388 = vmatpush.msrb.mxu2 %v10479_v13  ;;  %3408 = vmatpush.msrb.mxu3 %v10480_v25  ;;  %v10538_v13 = vld [vmem:[#allocation155_spill] sm:$0xff]  ;;  %v10539_v25 = vld [vmem:[#allocation156_spill] sm:$0xff] }
 0x5f0   :  { %3349 = vmatpush.msra.mxu0 %v10481_v26  ;;  %3369 = vmatpush.msra.mxu1 %v10482_v23  ;;  %v10540_v26 = vld [vmem:[#allocation157_spill] sm:$0xff]  ;;  %v10541_v23 = vld [vmem:[#allocation158_spill] sm:$0xff] }
 0x5f1   :  { %3389 = vmatpush.msrb.mxu2 %v10483_v38  ;;  %3409 = vmatpush.msrb.mxu3 %v10484_v3  ;;  %v10542_v38 = vld [vmem:[#allocation159_spill] sm:$0xff]  ;;  %v10543_v3 = vld [vmem:[#allocation160_spill] sm:$0xff] }
 0x5f2   :  { %3350 = vmatpush.msra.mxu0 %v10485_v44  ;;  %3370 = vmatpush.msra.mxu1 %v10486_v12  ;;  %v10544_v44 = vld [vmem:[#allocation162_spill] sm:$0xff]  ;;  %v10545_v12 = vld [vmem:[#allocation163_spill] sm:$0xff] }
 0x5f3   :  { %3390 = vmatpush.msrb.mxu2 %v10487_v41  ;;  %3410 = vmatpush.msrb.mxu3 %v10488_v34  ;;  %v10546_v41 = vld [vmem:[#allocation164_spill] sm:$0xff]  ;;  %v10547_v34 = vld [vmem:[#allocation165_spill] sm:$0xff] }
 0x5f4   :  { %3351 = vmatpush.msra.mxu0 %v10489_v17  ;;  %3371 = vmatpush.msra.mxu1 %v10490_v22  ;;  %v10548_v17 = vld [vmem:[#allocation166_spill] sm:$0xff]  ;;  %v10549_v22 = vld [vmem:[#allocation167_spill] sm:$0xff] }
 0x5f5   :  { %3391 = vmatpush.msrb.mxu2 %v10491_v29  ;;  %3411 = vmatpush.msrb.mxu3 %v10492_v8  ;;  %v10550_v29 = vld [vmem:[#allocation168_spill] sm:$0xff]  ;;  %v10551_v8 = vld [vmem:[#allocation169_spill] sm:$0xff] }
 0x5f6   :  { %3352 = vmatpush.msra.mxu0 %v10493_v57  ;;  %3372 = vmatpush.msra.mxu1 %v10494_v11  ;;  %v10552_v57 = vld [vmem:[#allocation170_spill] sm:$0xff]  ;;  %v10553_v11 = vld [vmem:[#allocation171_spill] sm:$0xff] }
 0x5f7   :  { %3392 = vmatpush.msrb.mxu2 %v10495_v0  ;;  %3412 = vmatpush.msrb.mxu3 %v10496_v43  ;;  %v10554_v0 = vld [vmem:[#allocation172_spill] sm:$0xff]  ;;  %v10555_v43 = vld [vmem:[#allocation173_spill] sm:$0xff] }
 0x5f8   :  { %3353 = vmatpush.msra.mxu0 %v10497_v10  ;;  %3373 = vmatpush.msra.mxu1 %v10498_v2  ;;  %v10556_v10 = vld [vmem:[#allocation174_spill] sm:$0xff]  ;;  %v10557_v2 = vld [vmem:[#allocation175_spill] sm:$0xff] }
 0x5f9   :  { %3393 = vmatpush.msrb.mxu2 %v10499_v18  ;;  %3413 = vmatpush.msrb.mxu3 %v10500_v20  ;;  %v10558_v18 = vld [vmem:[#allocation176_spill] sm:$0xff]  ;;  %v10559_v20 = vld [vmem:[#allocation177_spill] sm:$0xff] }
 0x5fa   :  { %3354 = vmatpush.msra.mxu0 %v10501_v5  ;;  %3374 = vmatpush.msra.mxu1 %v10502_v39  ;;  %v10560_v5 = vld [vmem:[#allocation178_spill] sm:$0xff]  ;;  %v10561_v39 = vld [vmem:[#allocation179_spill] sm:$0xff] }
 0x5fb   :  { %3394 = vmatpush.msrb.mxu2 %v10503_v15  ;;  %3414 = vmatpush.msrb.mxu3 %v10504_v24  ;;  %v10562_v15 = vld [vmem:[#allocation180_spill] sm:$0xff]  ;;  %v10563_v24 = vld [vmem:[#allocation181_spill] sm:$0xff] }
 0x5fc   :  { %3355 = vmatpush.msra.mxu0 %v10505_v32  ;;  %3375 = vmatpush.msra.mxu1 %v10506_v30  ;;  %v10564_v32 = vld [vmem:[#allocation182_spill] sm:$0xff]  ;;  %v10565_v30 = vld [vmem:[#allocation183_spill] sm:$0xff] }
 0x5fd   :  { %3395 = vmatpush.msrb.mxu2 %v10507_v1  ;;  %3415 = vmatpush.msrb.mxu3 %v10508_v40  ;;  %v10566_v1 = vld [vmem:[#allocation184_spill] sm:$0xff]  ;;  %v10567_v40 = vld [vmem:[#allocation185_spill] sm:$0xff] }
 0x5fe   :  { %3423 = vmatpush.msrb.mxu0 %v10509_v35  ;;  %3443 = vmatpush.msrb.mxu1 %v10510_v63  ;;  %v10568_v35 = vld [vmem:[#allocation186_spill] sm:$0xff]  ;;  %v10569_v63 = vld [vmem:[#allocation187_spill] sm:$0xff] }
 0x5ff   :  { %3463 = vmatpush.msra.mxu2 %v10511_v9  ;;  %3483 = vmatpush.msra.mxu3 %v10512_v31  ;;  %v10570_v9 = vld [vmem:[#allocation188_spill] sm:$0xff] }
 0x600   :  { %3424 = vmatpush.msrb.mxu0 %v10513_v48  ;;  %3444 = vmatpush.msrb.mxu1 %v10514_v59  ;;  %v10571_v31 = vld [vmem:[#allocation24_spill] sm:$0xff]  ;;  %v10572_v48 = vld [vmem:[#allocation189_spill] sm:$0xff] }
 0x601   :  { %3464 = vmatpush.msra.mxu2 %v10515_v62  ;;  %3484 = vmatpush.msra.mxu3 %v10516_v50 }
 0x602   :  { %3425 = vmatpush.msrb.mxu0 %v10517_v42  ;;  %3445 = vmatpush.msrb.mxu1 %v10518_v4 }
 0x603   :  { %3465 = vmatpush.msra.mxu2 %v10519_v45  ;;  %3485 = vmatpush.msra.mxu3 %v10520_v47 }
 0x604   :  { %3426 = vmatpush.msrb.mxu0 %v10521_v52  ;;  %3446 = vmatpush.msrb.mxu1 %v10522_v16  ;;  %v10573_v52 = vld [vmem:[#allocation23_spill] sm:$0xff] }
 0x605   :  { %3466 = vmatpush.msra.mxu2 %v10523_v28  ;;  %3486 = vmatpush.msra.mxu3 %v10524_v55  ;;  %v10574_v28 = vld [vmem:[#allocation32_spill] sm:$0xff] }
 0x606   :  { %3427 = vmatpush.msrb.mxu0 %v10525_v49  ;;  %3447 = vmatpush.msrb.mxu1 %v10526_v58 }
 0x607   :  { %3467 = vmatpush.msra.mxu2 %v10527_v54  ;;  %3487 = vmatpush.msra.mxu3 %v10528_v56 }
 0x608   :  { %3428 = vmatpush.msrb.mxu0 %v10529_v51  ;;  %3448 = vmatpush.msrb.mxu1 %v10530_v6  ;;  %v10575_v6 = vld [vmem:[#allocation26_spill] sm:$0xff] }
 0x609   :  { %3468 = vmatpush.msra.mxu2 %v10531_v37  ;;  %3488 = vmatpush.msra.mxu3 %v10532_v36 }
 0x60a   :  { %3429 = vmatpush.msrb.mxu0 %v10533_v61  ;;  %3449 = vmatpush.msrb.mxu1 %v10534_v53 }
 0x60b   :  { %3469 = vmatpush.msra.mxu2 %v10535_v27  ;;  %3489 = vmatpush.msra.mxu3 %v10536_v60 }
 0x60c   :  { %3430 = vmatpush.msrb.mxu0 %v10537_v19  ;;  %3450 = vmatpush.msrb.mxu1 %v10538_v13  ;;  %v10576_v13 = vld [vmem:[#allocation150_spill] sm:$0xff] }
 0x60d   :  { %3470 = vmatpush.msra.mxu2 %v10539_v25  ;;  %3490 = vmatpush.msra.mxu3 %v10540_v26  ;;  %v10577_v26 = vld [vmem:[#allocation161_spill] sm:$0xff] }
 0x60e   :  { %3431 = vmatpush.msrb.mxu0 %v10541_v23  ;;  %3451 = vmatpush.msrb.mxu1 %v10542_v38 }
 0x60f   :  { %3471 = vmatpush.msra.mxu2 %v10543_v3  ;;  %3491 = vmatpush.msra.mxu3 %v10544_v44 }
 0x610   :  { %3432 = vmatpush.msrb.mxu0 %v10545_v12  ;;  %3452 = vmatpush.msrb.mxu1 %v10546_v41 }
 0x611   :  { %3472 = vmatpush.msra.mxu2 %v10547_v34  ;;  %3492 = vmatpush.msra.mxu3 %v10548_v17 }
 0x612   :  { %3433 = vmatpush.msrb.mxu0 %v10549_v22  ;;  %3453 = vmatpush.msrb.mxu1 %v10550_v29 }
 0x613   :  { %3473 = vmatpush.msra.mxu2 %v10551_v8  ;;  %3493 = vmatpush.msra.mxu3 %v10552_v57 }
 0x614   :  { %3434 = vmatpush.msrb.mxu0 %v10553_v11  ;;  %3454 = vmatpush.msrb.mxu1 %v10554_v0  ;;  %v10578_v0 = vld [vmem:[#allocation35_spill] sm:$0xff] }
 0x615   :  { %3474 = vmatpush.msra.mxu2 %v10555_v43  ;;  %3494 = vmatpush.msra.mxu3 %v10556_v10 }
 0x616   :  { %3435 = vmatpush.msrb.mxu0 %v10557_v2  ;;  %3455 = vmatpush.msrb.mxu1 %v10558_v18 }
 0x617   :  { %3475 = vmatpush.msra.mxu2 %v10559_v20  ;;  %3495 = vmatpush.msra.mxu3 %v10560_v5 }
 0x618   :  { %3436 = vmatpush.msrb.mxu0 %v10561_v39  ;;  %3456 = vmatpush.msrb.mxu1 %v10562_v15 }
 0x619   :  { %3476 = vmatpush.msra.mxu2 %v10563_v24  ;;  %3496 = vmatpush.msra.mxu3 %v10564_v32 }
 0x61a   :  { %3437 = vmatpush.msrb.mxu0 %v10565_v30  ;;  %3457 = vmatpush.msrb.mxu1 %v10566_v1 }
 0x61b   :  { %3477 = vmatpush.msra.mxu2 %v10567_v40  ;;  %3497 = vmatpush.msra.mxu3 %v10568_v35 }
 0x61c   :  { %3438 = vmatpush.msrb.mxu0 %v10569_v63  ;;  %3458 = vmatpush.msrb.mxu1 %v10570_v9 }
 0x61d   :  { %3478 = vmatpush.msra.mxu2 %v10571_v31  ;;  %3498 = vmatpush.msra.mxu3 %v10572_v48 }
 0x635   :  { %v2965_v59 = vpop.f32.mrf.mxu0  ;;  %v2985_v62 = vpop.f32.mrf.mxu1 }
 0x63c   :  { %v3005_v50 = vpop.f32.mrf.mxu2  ;;  %v3025_v54 = vpop.f32.mrf.mxu3 }
 0x64f   :  { %v3048_v42 = vpop.f32.mrf.mxu0  ;;  %v3068_v4 = vpop.f32.mrf.mxu1 }
 0x650   :  { %v3049_v45 = vadd.f32 %v3048_v42, %v2965_v59  ;;  %v3069_v47 = vadd.f32 %v3068_v4, %v2985_v62 }
 0x652   :  { %v3111_v16 = vadd.f32 %v3049_v45, %v10573_v52  ;;  %v3112_v55 = vadd.f32 %v3069_v47, %v10574_v28 }
 0x654   :  { %v3752_v49 = vmul.f32 -1.442695, %v3111_v16  ;;  %v3753_v58 = vmul.f32 -1.442695, %v3112_v55 }
 0x656   :  { %3983 = vpow2.f32 %v3752_v49  ;;  %v3088_v56 = vpop.f32.mrf.mxu2  ;;  %v3108_v44 = vpop.f32.mrf.mxu3 }
 0x657   :  { %3985 = vpow2.f32 %v3753_v58  ;;  %v3089_v51 = vadd.f32 %v3088_v56, %v3005_v50  ;;  %v3109_v17 = vadd.f32 %v3108_v44, %v3025_v54 }
 0x659   :  { %v3113_v37 = vadd.f32 %v3089_v51, %v10575_v6  ;;  %v3195_v36 = vpop.f32.mrf.mxu0  ;;  %v3215_v61 = vpop.f32.mrf.mxu1  ;;  %v3114_v43 = vadd.f32 %v3109_v17, %v10578_v0 }
 0x65a   :  { %v3262_v53 = vrot.slane %v3195_v36, 1  ;;  %v3263_v27 = vrot.slane %v3215_v61, 1 }
 0x65b   :  { %v3754_v60 = vmul.f32 -1.442695, %v3113_v37 }
 0x65c   :  { %v3984_v19 = vpop.eup %3983  ;;  %v3270_v25 = vadd.f32 %v3262_v53, %v10576_v13  ;;  %v3271_v23 = vadd.f32 %v3263_v27, %v10577_v26 }
 0x65d   :  { %v3986_v38 = vpop.eup %3985  ;;  %v3124_v3 = vadd.f32 1.0, %v3984_v19  ;;  %3987 = vpow2.f32 %v3754_v60 }
 0x65e   :  { %v3125_v12 = vadd.f32 1.0, %v3986_v38  ;;  %v3755_v41 = vmul.f32 -1.442695, %v3270_v25  ;;  %v3756_v34 = vmul.f32 -1.442695, %v3271_v23  ;;  %v3333_v25 = vrot.slane %v8371_v14, 7 }
 0x65f   :  { %3989 = vrcp.f32 %v3124_v3  ;;  %v3136_v32 = vand.u32 2147483647, %v3124_v3  ;;  %v3138_v35 = vand.u32 2147483648, %v3124_v3  ;;  %vm3132_vm10 = vweird.f32 %v3124_v3 }
 0x660   :  { %3991 = vrcp.f32 %v3125_v12  ;;  %v3235_v22 = vpop.f32.mrf.mxu2  ;;  %v3153_v40 = vand.u32 2147483648, %v3125_v12  ;;  %v3151_v31 = vand.u32 2147483647, %v3125_v12  ;;  %vm3147_vm9 = vweird.f32 %v3125_v12 }
 0x661   :  { %3993 = vpow2.f32 %v3755_v41  ;;  %v3264_v29 = vrot.slane %v3235_v22, 1  ;;  %vm3137_vm12 = vcmp.eq.f32.partialorder %v3136_v32, 8.507059e+37  ;;  %v3139_v45 = vor.u32 1.1754944e-38, %v3138_v35 }
 0x662   :  { %3995 = vpow2.f32 %v3756_v34  ;;  %v3154_v55 = vor.u32 1.1754944e-38, %v3153_v40  ;;  %vm3152_vm14 = vcmp.eq.f32.partialorder %v3151_v31, 8.507059e+37 }
 0x663   :  { %v3988_v8 = vpop.eup %3987  ;;  %v3272_v57 = vadd.f32 %v3264_v29, %v5565_v21  ;;  %v3255_v21 = vpop.f32.mrf.mxu3 }
 0x664   :  { %v8558_v11 = vadd.f32 1.0, %v3988_v8  ;;  %v3265_v59 = vrot.slane %v3255_v21, 1 }
 0x665   :  { %v3990_v10 = vpop.eup %3989  ;;  %v3757_v2 = vmul.f32 -1.442695, %v3272_v57 }
 0x666   :  { %v3992_v18 = vpop.eup %3991  ;;  %v3128_v20 = vmul.f32 %v3990_v10, %v3124_v3  ;;  %3997 = vrcp.f32 %v8558_v11  ;;  %vm3133_vm7 = vweird.f32 %v3990_v10  ;;  %v3273_v37 = vadd.f32 %v3265_v59, %v5618_v33 }
 0x667   :  { %v3994_v5 = vpop.eup %3993  ;;  %v3143_v39 = vmul.f32 %v3992_v18, %v3125_v12  ;;  %3999 = vpow2.f32 %v3757_v2  ;;  %vm3148_vm8 = vweird.f32 %v3992_v18  ;;  %vm3134_vm11 = vmor %vm3132_vm10, %vm3133_vm7  ;;  %vm3162_vm15 = vweird.f32 %v8558_v11 }
 0x668   :  { %v3996_v15 = vpop.eup %3995  ;;  %v3129_v24 = vsub.f32 1.0, %v3128_v20  ;;  %4001 = vtanh.f32 %v3114_v43  ;;  %v8562_v30 = vadd.f32 1.0, %v3994_v5  ;;  %vm3149_vm13 = vmor %vm3147_vm9, %vm3148_vm8  ;;  %v3168_v26 = vand.u32 2147483648, %v8558_v11 }
 0x669   :  { %v3144_v1 = vsub.f32 1.0, %v3143_v39  ;;  %v8564_v63 = vadd.f32 1.0, %v3996_v15  ;;  %v3166_v29 = vand.u32 2147483647, %v8558_v11 }
 0x66a   :  { %v3130_v9 = vmul.f32 %v3990_v10, %v3129_v24  ;;  %4003 = vrcp.f32 %v8562_v30  ;;  %v3295_v3 = vand.u32 2147483647, %v8562_v30  ;;  %v3297_v12 = vand.u32 2147483648, %v8562_v30 }
 0x66b   :  { %v3145_v48 = vmul.f32 %v3992_v18, %v3144_v1  ;;  %4005 = vrcp.f32 %v8564_v63  ;;  %v3312_v14 = vand.u32 2147483648, %v8564_v63  ;;  %v3310_v22 = vand.u32 2147483647, %v8564_v63 }
 0x66c   :  { %v8568_v62 = vpop.eup %3997  ;;  %v3131_v50 = vadd.f32 %v3990_v10, %v3130_v9  ;;  %vm3291_vm4 = vweird.f32 %v8562_v30  ;;  %vm3306_vm6 = vweird.f32 %v8564_v63  ;;  %v3298_v2 = vor.u32 1.1754944e-38, %v3297_v12  ;;  %v3624_v12 = vld [vmem:[#allocation11 + $0x38] sm:$0xff] }
 0x66d   :  { %v4000_v42 = vpop.eup %3999  ;;  %v3158_v4 = vmul.f32 %v8568_v62, %v8558_v11  ;;  %v3146_v47 = vadd.f32 %v3992_v18, %v3145_v48  ;;  %vm3163_vm0 = vweird.f32 %v8568_v62  ;;  %v3313_v39 = vor.u32 1.1754944e-38, %v3312_v14 }
 0x66e   :  { %v4002_v16 = vpop.eup %4001  ;;  %v3135_v49 = vsel %vm3134_vm11, %v3990_v10, %v3131_v50  ;;  %v8572_v58 = vadd.f32 1.0, %v4000_v42  ;;  %vm8597_vm5 = vmor %vm3162_vm15, %vm3163_vm0  ;;  %v3169_v10 = vor.u32 1.1754944e-38, %v3168_v26  ;;  %vm3296_vm9 = vcmp.eq.f32.partialorder %v3295_v3, 8.507059e+37 }
 0x66f   :  { %v3159_v54 = vsub.f32 1.0, %v3158_v4  ;;  %v3140_v56 = vsel %vm3137_vm12, %v3139_v45, %v3135_v49  ;;  %v3150_v51 = vsel %vm3149_vm13, %v3992_v18, %v3146_v47  ;;  %vm3311_vm10 = vcmp.eq.f32.partialorder %v3310_v22, 8.507059e+37  ;;  %v3621_v22 = vld [vmem:[#allocation11 + $0x20] sm:$0xff] }
 0x670   :  { %v4004_v36 = vpop.eup %4003  ;;  %v3155_v61 = vsel %vm3152_vm14, %v3154_v55, %v3150_v51  ;;  %v3174_v53 = vmul.f32 %v4002_v16, %v3140_v56  ;;  %4007 = vrcp.f32 %v8572_v58  ;;  %vm3167_vm11 = vcmp.eq.f32.partialorder %v3166_v29, 8.507059e+37  ;;  %v3630_v51 = vld [vmem:[#allocation11 + $0x68] sm:$0xff] }
 0x671   :  { %v4006_v27 = vpop.eup %4005  ;;  %v3160_v60 = vmul.f32 %v8568_v62, %v3159_v54  ;;  %v3173_v19 = vmul.f32 %v3155_v61, %v8315_v7  ;;  %v3287_v13 = vmul.f32 %v4004_v36, %v8562_v30  ;;  %4009 = vtanh.f32 %v3273_v37  ;;  %v3629_v37 = vld [vmem:[#allocation11 + $0x60] sm:$0xff] }
 0x672   :  { %v3302_v33 = vmul.f32 %v4006_v27, %v8564_v63  ;;  %vm3292_vm2 = vweird.f32 %v4004_v36  ;;  %vm3307_vm3 = vweird.f32 %v4006_v27  ;;  %vm3613_vm12 = vcmask 1045504  }
 0x673   :  { %v8583_v23 = vadd.f32 %v3174_v53, %v3173_v19  ;;  %v3288_v38 = vsub.f32 1.0, %v3287_v13  ;;  %v3161_v7 = vadd.f32 %v8568_v62, %v3160_v60  ;;  %vm3293_vm7 = vmor %vm3291_vm4, %vm3292_vm2  ;;  %vm3321_vm14 = vweird.f32 %v8572_v58  ;;  %v3627_v53 = vld [vmem:[#allocation11 + $0x50] sm:$0xff] }
 0x674   :  { %v3303_v44 = vsub.f32 1.0, %v3302_v33  ;;  %vm3308_vm8 = vmor %vm3306_vm6, %vm3307_vm3  ;;  %v3325_v42 = vand.u32 2147483647, %v8572_v58 }
 0x675   :  { %4011 = vtanh.f32 %v8583_v23  ;;  %v3289_v41 = vmul.f32 %v4004_v36, %v3288_v38  ;;  %v3165_v20 = vsel %vm8597_vm5, %v8568_v62, %v3161_v7  ;;  %v3327_v62 = vand.u32 2147483648, %v8572_v58  ;;  %v3625_v38 = vld [vmem:[#allocation11 + $0x40] sm:$0xff]  ;;  %v3623_v7 = vld [vmem:[#allocation11 + $0x30] sm:$0xff] }
 0x676   :  { %v4008_v34 = vpop.eup %4007  ;;  %v3304_v17 = vmul.f32 %v4006_v27, %v3303_v44  ;;  %v3170_v35 = vsel %vm3167_vm11, %v3169_v10, %v3165_v20  ;;  %vm3326_vm0 = vcmp.eq.f32.partialorder %v3325_v42, 8.507059e+37  ;;  %v3618_v20 = vld [vmem:[#allocation11 + $0x8] sm:$0xff] }
 0x677   :  { %v3317_v8 = vmul.f32 %v4008_v34, %v8572_v58  ;;  %v3290_v57 = vadd.f32 %v4004_v36, %v3289_v41  ;;  %v4010_v5 = vpop.eup %4009  ;;  %vm3322_vm13 = vweird.f32 %v4008_v34  ;;  %v3328_v45 = vor.u32 1.1754944e-38, %v3327_v62  ;;  %v3631_v58 = vld [vmem:[#allocation11 + $0x70] sm:$0xff] }
 0x678   :  { %v3305_v18 = vadd.f32 %v4006_v27, %v3304_v17  ;;  %vm3323_vm15 = vmor %vm3321_vm14, %vm3322_vm13  ;;  %vm3615_vm14 = vcmask 1046528  }
 0x679   :  { %v3318_v15 = vsub.f32 1.0, %v3317_v8  ;;  %v3294_v24 = vsel %vm3293_vm7, %v4004_v36, %v3290_v57  ;;  %v3628_v36 = vld [vmem:[#allocation11 + $0x58] sm:$0xff]  ;;  %v3619_v57 = vld [vmem:[#allocation11 + $0x10] sm:$0xff] }
 0x67a   :  { %v3299_v11 = vsel %vm3296_vm9, %v3298_v2, %v3294_v24  ;;  %v3309_v32 = vsel %vm3308_vm8, %v4006_v27, %v3305_v18 }
 0x67b   :  { %v4012_v30 = vpop.eup %4011  ;;  %v3319_v21 = vmul.f32 %v4008_v34, %v3318_v15  ;;  %v3314_v1 = vsel %vm3311_vm10, %v3313_v39, %v3309_v32  ;;  %v3336_v40 = vmul.f32 %v4010_v5, %v3299_v11  ;;  %v3617_v5 = vld [vmem:[#allocation11] sm:$0xff] }
 0x67c   :  { %v3335_v63 = vmul.f32 %v3333_v25, %v3314_v1  ;;  %v3177_v9 = vmul.f32 %v4012_v30, %v3170_v35  ;;  %v3626_v25 = vld [vmem:[#allocation11 + $0x48] sm:$0xff] }
 0x67d   :  { %v3320_v59 = vadd.f32 %v4008_v34, %v3319_v21 }
 0x67e   :  { %v8605_v31 = vadd.f32 %v3336_v40, %v3335_v63  ;;  %3356 = vmatmul.f32.vlgmr.msra.gmra.mxu0 %v3177_v9  ;;  %3376 = vmatmul.f32.vlgmr.msra.gmra.mxu1 %v3177_v9  ;;  %v3600_v48 = vrot.slane %v3177_v9, 2 }
 0x67f   :  { %3396 = vmatmul.f32.vlgmr.msrb.gmra.mxu2 %v3177_v9  ;;  %3416 = vmatmul.f32.vlgmr.msrb.gmra.mxu3 %v3177_v9  ;;  %v3324_v4 = vsel %vm3323_vm15, %v4008_v34, %v3320_v59  ;;  %v3622_v34 = vld [vmem:[#allocation11 + $0x28] sm:$0xff] }
 0x680   :  { %4013 = vtanh.f32 %v8605_v31  ;;  %v8610_v50 = vsel %vm3613_vm12, %v8342_v46, %v3600_v48  ;;  %v3329_v16 = vsel %vm3326_vm0, %v3328_v45, %v3324_v4  ;;  %v3632_v46 = vld [vmem:[#allocation11 + $0x78] sm:$0xff] }
 0x681   :  { %3637 = vmatpush.msra.mxu0 %v3632_v46 }
 0x683   :  { %3638 = vmatpush.msra.mxu0 %v3631_v58 }
 0x685   :  { %3639 = vmatpush.msra.mxu0 %v3630_v51 }
 0x686   :  { %v4014_v47 = vpop.eup %4013 }
 0x687   :  { %v3339_v55 = vmul.f32 %v4014_v47, %v3329_v16  ;;  %3640 = vmatpush.msra.mxu0 %v3629_v37 }
 0x689   :  { %v8614_v49 = vrot.slane %v3339_v55, 7  ;;  %3641 = vmatpush.msra.mxu0 %v3628_v36 }
 0x68b   :  { %3439 = vmatmul.f32.vlgmr.msrb.gmra.mxu0 %v8614_v49  ;;  %3459 = vmatmul.f32.vlgmr.msrb.gmra.mxu1 %v8614_v49 }
 0x68c   :  { %3479 = vmatmul.f32.vlgmr.msra.gmra.mxu2 %v8614_v49  ;;  %3499 = vmatmul.f32.vlgmr.msra.gmra.mxu3 %v8614_v49 }
 0x68d   :  { %3642 = vmatpush.msra.mxu0 %v3627_v53 }
 0x68f   :  { %3643 = vmatpush.msra.mxu0 %v3626_v25 }
 0x691   :  { %3644 = vmatpush.msra.mxu0 %v3625_v38 }
 0x693   :  { %3645 = vmatpush.msra.mxu0 %v3624_v12 }
 0x695   :  { %3646 = vmatpush.msra.mxu0 %v3623_v7 }
 0x697   :  { %3647 = vmatpush.msra.mxu0 %v3622_v34 }
 0x699   :  { %3648 = vmatpush.msra.mxu0 %v3621_v22 }
 0x6fb   :  { %v3357_v54 = vpop.f32.mrf.mxu0  ;;  %v3377_v56 = vpop.f32.mrf.mxu1 }
 0x702   :  { %v3397_v61 = vpop.f32.mrf.mxu2  ;;  %v3417_v14 = vpop.f32.mrf.mxu3 }
 0x708   :  { %v3440_v27 = vpop.f32.mrf.mxu0  ;;  %v3460_v60 = vpop.f32.mrf.mxu1 }
 0x709   :  { %v3441_v19 = vadd.f32 %v3440_v27, %v3357_v54  ;;  %v3461_v13 = vadd.f32 %v3460_v60, %v3377_v56 }
 0x70b   :  { %v3503_v26 = vadd.f32 %v3441_v19, %v10573_v52  ;;  %v3504_v33 = vadd.f32 %v3461_v13, %v10574_v28  ;;  %v3620_v52 = vld [vmem:[#allocation11 + $0x18] sm:$0xff]  ;;  %v3577_v19 = vrot.slane %v8605_v31, 7 }
 0x70c   :  { %3649 = vmatpush.msra.mxu0 %v3620_v52 }
 0x70d   :  { %v3758_v3 = vmul.f32 -1.442695, %v3503_v26  ;;  %v3759_v44 = vmul.f32 -1.442695, %v3504_v33 }
 0x70e   :  { %3650 = vmatpush.msra.mxu0 %v3619_v57 }
 0x70f   :  { %4015 = vpow2.f32 %v3758_v3  ;;  %v3480_v41 = vpop.f32.mrf.mxu2  ;;  %v3500_v18 = vpop.f32.mrf.mxu3 }
 0x710   :  { %4017 = vpow2.f32 %v3759_v44  ;;  %v3481_v17 = vadd.f32 %v3480_v41, %v3397_v61  ;;  %v3501_v39 = vadd.f32 %v3500_v18, %v3417_v14  ;;  %3651 = vmatpush.msra.mxu0 %v3618_v20 }
 0x712   :  { %v3505_v29 = vadd.f32 %v3481_v17, %v10575_v6  ;;  %3652 = vmatpush.msra.mxu0 %v3617_v5  ;;  %v3506_v11 = vadd.f32 %v3501_v39, %v10578_v0 }
 0x714   :  { %v3760_v28 = vmul.f32 -1.442695, %v3505_v29 }
 0x715   :  { %v4016_v8 = vpop.eup %4015 }
 0x716   :  { %v4018_v43 = vpop.eup %4017  ;;  %v3516_v10 = vadd.f32 1.0, %v4016_v8  ;;  %4019 = vpow2.f32 %v3760_v28 }
 0x717   :  { %v3517_v2 = vadd.f32 1.0, %v4018_v43 }
 0x718   :  { %4021 = vrcp.f32 %v3516_v10  ;;  %v3530_v35 = vand.u32 2147483648, %v3516_v10  ;;  %v3528_v48 = vand.u32 2147483647, %v3516_v10  ;;  %vm3524_vm4 = vweird.f32 %v3516_v10 }
 0x719   :  { %4023 = vrcp.f32 %v3517_v2  ;;  %v3545_v63 = vand.u32 2147483648, %v3517_v2  ;;  %v3543_v62 = vand.u32 2147483647, %v3517_v2  ;;  %vm3539_vm5 = vweird.f32 %v3517_v2 }
 0x71a   :  { %v3531_v45 = vor.u32 1.1754944e-38, %v3530_v35  ;;  %vm3529_vm8 = vcmp.eq.f32.partialorder %v3528_v48, 8.507059e+37 }
 0x71b   :  { %v3546_v16 = vor.u32 1.1754944e-38, %v3545_v63  ;;  %vm3544_vm9 = vcmp.eq.f32.partialorder %v3543_v62, 8.507059e+37 }
 0x71c   :  { %v4020_v6 = vpop.eup %4019 }
 0x71d   :  { %v3518_v15 = vadd.f32 1.0, %v4020_v6 }
 0x71e   :  { %v4022_v24 = vpop.eup %4021 }
 0x71f   :  { %v4024_v32 = vpop.eup %4023  ;;  %v3520_v30 = vmul.f32 %v4022_v24, %v3516_v10  ;;  %4025 = vrcp.f32 %v3518_v15  ;;  %vm3525_vm2 = vweird.f32 %v4022_v24  ;;  %v3560_v60 = vand.u32 2147483648, %v3518_v15 }
 0x720   :  { %v3535_v21 = vmul.f32 %v4024_v32, %v3517_v2  ;;  %4027 = vtanh.f32 %v3506_v11  ;;  %vm3540_vm3 = vweird.f32 %v4024_v32  ;;  %vm3526_vm6 = vmor %vm3524_vm4, %vm3525_vm2  ;;  %vm3554_vm11 = vweird.f32 %v3518_v15 }
 0x721   :  { %v3521_v1 = vsub.f32 1.0, %v3520_v30  ;;  %vm3541_vm7 = vmor %vm3539_vm5, %vm3540_vm3  ;;  %v3558_v25 = vand.u32 2147483647, %v3518_v15  ;;  %v3561_v38 = vor.u32 1.1754944e-38, %v3560_v60 }
 0x722   :  { %v3536_v40 = vsub.f32 1.0, %v3535_v21 }
 0x723   :  { %v3522_v9 = vmul.f32 %v4022_v24, %v3521_v1  ;;  %vm3559_vm13 = vcmp.eq.f32.partialorder %v3558_v25, 8.507059e+37 }
 0x724   :  { %v3537_v59 = vmul.f32 %v4024_v32, %v3536_v40 }
 0x725   :  { %v4026_v42 = vpop.eup %4025  ;;  %v3523_v4 = vadd.f32 %v4022_v24, %v3522_v9 }
 0x726   :  { %v3550_v0 = vmul.f32 %v4026_v42, %v3518_v15  ;;  %v3538_v47 = vadd.f32 %v4024_v32, %v3537_v59  ;;  %v4028_v46 = vpop.eup %4027  ;;  %vm3555_vm10 = vweird.f32 %v4026_v42 }
 0x727   :  { %v3527_v55 = vsel %vm3526_vm6, %v4022_v24, %v3523_v4  ;;  %vm3556_vm12 = vmor %vm3554_vm11, %vm3555_vm10 }
 0x728   :  { %v3551_v58 = vsub.f32 1.0, %v3550_v0  ;;  %v3532_v54 = vsel %vm3529_vm8, %v3531_v45, %v3527_v55  ;;  %v3542_v56 = vsel %vm3541_vm7, %v4024_v32, %v3538_v47 }
 0x729   :  { %v3547_v51 = vsel %vm3544_vm9, %v3546_v16, %v3542_v56  ;;  %v3566_v37 = vmul.f32 %v4028_v46, %v3532_v54 }
 0x72a   :  { %v3552_v36 = vmul.f32 %v4026_v42, %v3551_v58  ;;  %v3565_v61 = vmul.f32 %v3547_v51, %v8583_v23 }
 0x72c   :  { %v3567_v53 = vadd.f32 %v3566_v37, %v3565_v61  ;;  %v3553_v27 = vadd.f32 %v4026_v42, %v3552_v36 }
 0x72e   :  { %4029 = vtanh.f32 %v3567_v53  ;;  %v3580_v13 = vrot.slane %v3567_v53, 7  ;;  %v3557_v33 = vsel %vm3556_vm12, %v4026_v42, %v3553_v27 }
 0x72f   :  { %v3562_v44 = vsel %vm3559_vm13, %v3561_v38, %v3557_v33 }
 0x730   :  { %v3582_v26 = vsel %vm3573_vm1, %v3577_v19, %v3580_v13 }
 0x731   :  { %3583 = vst [vmem:[#allocation16] sm:$0x3] %v3582_v26 }
 0x734   :  { %v4030_v3 = vpop.eup %4029 }
 0x735   :  { %v3569_v23 = vmul.f32 %v4030_v3, %v3562_v44 }
 0x737   :  { %v3602_v12 = vrot.slane %v3569_v23, 1  ;;  %v3571_v7 = vrot.slane %v3569_v23, 7 }
 0x739   :  { %v3616_v14 = vsel %vm3615_vm14, %v8610_v50, %v3602_v12  ;;  %v3574_v31 = vsel %vm3573_vm1, %v8614_v49, %v3571_v7  ;;  %v3774_v50 = vld [vmem:[%s8652_s10] ss:$0 sm:$0xff] }
 0x73a   :  { %3653 = vmatmul.f32.vlgmr.msra.gmra.mxu0 %v3616_v14  ;;  %3575 = vst [vmem:[#allocation14] sm:$0x3] %v3574_v31 }
 0x73b   :  { %3679 = dma.vmem_to_hbm [thread:$0]  %s3675_s29, 32, %s3677_s27, [#allocation15]  }
 0x73c   :  { %3690 = dma.vmem_to_hbm [thread:$0]  %s3686_s15, 32, %s3688_s14, [#allocation15]  }
 0x7b7   :  { %v3654_v49 = vpop.f32.mrf.mxu0 }
 0x7b8   :  { %v3655_v41 = vadd.f32 %v3774_v50, %v3654_v49 }
 0x7ba   :  { %3657 = vst [vmem:[#allocation13] sm:$0xff] %v3655_v41 }
 0x7bb   :  { %3668 = dma.vmem_to_hbm [thread:$0]  %s3664_s12, 128, %s3666_s9, [#allocation4]  }
 0x7bc   :  { %4831 = dma.done.wait [#allocation4], 128  }
 0x7bd   :  { %4832 = vsyncadd [#allocation4], 4294967168 }
 0x7be   :  { %4833 = dma.done.wait [#allocation15], 64  }
 0x7bf   :  { %4834 = vsyncadd [#allocation15], 4294967232 }
 0x7c0   :  { %3703 = vsyncpa [#allocation3], 1 }
 0x7c1   :  { %3704 = vsyncpa [#allocation6], 1 }
 0x7c2   :  { %3705 = vsyncpa [#allocation9], 1 }
 0x7c3   :  { %3706 = vsyncpa [#allocation12], 1 }
 0x7c4   :  { %3707 = vsyncpa [#allocation4], 1 }
 0x7c5   :  { %3708 = vsyncpa [#allocation15], 1 }

</bundles_post_ra>
